<compile_context>
chip_gen: v5e
topology: v5e:2x2
jax: 0.10.0
libtpu: 0.0.40
codegen_flags: <defaults>
</compile_context>

<pallas_src>
import functools

import jax
import jax.numpy as jnp
from jax import lax
from jax.experimental import pallas as pl
from jax.experimental.pallas import tpu as pltpu


_LN_EPS = 1e-5                      # torch.nn.LayerNorm default eps
_NEG_INF = -1e30
_VMEM_LIMIT = 64 * 1024 * 1024      # budget also fits v7x's 64 MiB physical VMEM


def _pick_tile_m(m, target=512):
    """Largest row tile <= target dividing m (prefers >=2 grid steps)."""
    for t in (target, 256, 128, 64, 32, 16, 8):
        if t < m and m % t == 0:
            return t
    return m


def _layernorm_f32(x, gamma, beta):
    mu = jnp.mean(x, axis=-1, keepdims=True)
    xc = x - mu
    var = jnp.mean(xc * xc, axis=-1, keepdims=True)
    return xc * lax.rsqrt(var + _LN_EPS) * gamma + beta


def _erf_approx(x):
    # Abramowitz & Stegun 7.1.26, |err| < 1.5e-7 -> matches exact nn.GELU()
    # to f32 precision.  exp() rides the EUP slot; kernel is MXU/memory bound.
    a1, a2, a3, a4, a5 = 0.254829592, -0.284496736, 1.421413741, -1.453152027, 1.061405429
    p = 0.3275911
    s = jnp.where(x >= 0.0, 1.0, -1.0)
    ax = jnp.abs(x)
    t = 1.0 / (1.0 + p * ax)
    poly = ((((a5 * t + a4) * t + a3) * t + a2) * t + a1) * t
    return s * (1.0 - poly * jnp.exp(-ax * ax))


def _gelu(x):
    return 0.5 * x * (1.0 + _erf_approx(x * 0.7071067811865476))


# ------------------------- fused LN + QKV projection -------------------------


def _ln_qkv_kernel(x_ref, g_ref, bln_ref, wq_ref, wk_ref, wv_ref,
                   bq_ref, bk_ref, bv_ref, q_ref, k_ref, v_ref):
    x = x_ref[...].astype(jnp.float32)
    h = _layernorm_f32(x, g_ref[...], bln_ref[...]).astype(jnp.bfloat16)
    q = jnp.dot(h, wq_ref[...], preferred_element_type=jnp.float32) + bq_ref[...]
    k = jnp.dot(h, wk_ref[...], preferred_element_type=jnp.float32) + bk_ref[...]
    v = jnp.dot(h, wv_ref[...], preferred_element_type=jnp.float32) + bv_ref[...]
    q_ref[...] = q.astype(q_ref.dtype)
    k_ref[...] = k.astype(k_ref.dtype)
    v_ref[...] = v.astype(v_ref.dtype)


def ln_qkv(x2d, g, b, wq, wk, wv, bq, bk, bv):
    M, C = x2d.shape
    tm = _pick_tile_m(M)
    row = lambda i: (i, 0)
    full = lambda i: (0, 0)
    return pl.pallas_call(
        _ln_qkv_kernel,
        out_shape=tuple(jax.ShapeDtypeStruct((M, C), jnp.bfloat16) for _ in range(3)),
        grid=(M // tm,),
        in_specs=[
            pl.BlockSpec((tm, C), row),
            pl.BlockSpec((1, C), full), pl.BlockSpec((1, C), full),
            pl.BlockSpec((C, C), full), pl.BlockSpec((C, C), full), pl.BlockSpec((C, C), full),
            pl.BlockSpec((1, C), full), pl.BlockSpec((1, C), full), pl.BlockSpec((1, C), full),
        ],
        out_specs=tuple(pl.BlockSpec((tm, C), row) for _ in range(3)),
        compiler_params=pltpu.CompilerParams(
            dimension_semantics=("parallel",), vmem_limit_bytes=_VMEM_LIMIT),
    )(x2d, g.reshape(1, C), b.reshape(1, C), wq, wk, wv,
      bq.reshape(1, C), bk.reshape(1, C), bv.reshape(1, C))


# ---------------- icosahedral neighborhood attention (in-kernel gather) ------


def _ico_attn_kernel(which_ref, mask_ref, q_ref, k_ref, v_ref, o_ref,
                     m_sc, l_sc, acc_sc, *, num_heads, head_dim, qk_scale, n_nbr):
    n = pl.program_id(1)
    kk = pl.program_id(2)

    @pl.when(kk == 0)
    def _():
        m_sc[...] = jnp.full(m_sc.shape, -jnp.inf, jnp.float32)
        l_sc[...] = jnp.zeros(l_sc.shape, jnp.float32)
        acc_sc[...] = jnp.zeros(acc_sc.shape, jnp.float32)

    # mask bias computed in-kernel from the (Nvert*K,) int32 mask in SMEM.
    valid = mask_ref[n * n_nbr + kk]
    bias = jnp.where(valid > 0, 0.0, _NEG_INF).astype(jnp.float32)

    q = q_ref[0, 0]        # (D, C) bf16 -- query vertex, all vertical levels
    k = k_ref[0, 0]        # (D, C) bf16 -- gathered neighbor vertex (via index_map)
    v = v_ref[0, 0]        # (D, C) bf16

    for h in range(num_heads):
        lo, hi = h * head_dim, (h + 1) * head_dim
        q_h = q[:, lo:hi]
        k_h = k[:, lo:hi]
        v_h = v[:, lo:hi]
        # scores of D query levels vs this neighbor's D levels: (D, D), f32 acc.
        s = lax.dot_general(q_h, k_h, (((1,), (1,)), ((), ())),
                            preferred_element_type=jnp.float32)
        s = s * qk_scale + bias            # matches reference `q /= self.scale`
        m_prev = m_sc[h]
        m_new = jnp.maximum(m_prev, jnp.max(s, axis=-1, keepdims=True))
        alpha = jnp.exp(m_prev - m_new)
        p = jnp.exp(s - m_new)
        l_sc[h] = alpha * l_sc[h] + jnp.sum(p, axis=-1, keepdims=True)
        acc_sc[h] = alpha * acc_sc[h] + jnp.dot(
            p.astype(jnp.bfloat16), v_h, preferred_element_type=jnp.float32)
        m_sc[h] = m_new

    @pl.when(kk == pl.num_programs(2) - 1)
    def _():
        outs = []
        for h in range(num_heads):
            inv = pl.reciprocal(l_sc[h], approx=True)
            outs.append(acc_sc[h] * inv)
        # heads re-fused along channels -> one lane-dense (D, C) store.
        o_ref[0, 0] = jnp.concatenate(outs, axis=-1).astype(o_ref.dtype)


def ico_attention(q, k, v, which_flat, mask_flat, num_heads):
    B, N, D, C = q.shape
    hd = C // num_heads
    n_nbr = which_flat.shape[0] // N
    kern = functools.partial(_ico_attn_kernel, num_heads=num_heads, head_dim=hd,
                             qk_scale=float(hd) ** 0.5, n_nbr=n_nbr)

    def q_map(b, n, kk, which, mask):
        return (b, n, 0, 0)

    def kv_map(b, n, kk, which, mask):
        return (b, which[n * n_nbr + kk], 0, 0)   # data-dependent neighbor gather

    return pl.pallas_call(
        kern,
        out_shape=jax.ShapeDtypeStruct((B, N, D, C), jnp.bfloat16),
        grid_spec=pltpu.PrefetchScalarGridSpec(
            num_scalar_prefetch=2,
            grid=(B, N, n_nbr),
            in_specs=[
                pl.BlockSpec((1, 1, D, C), q_map),
                pl.BlockSpec((1, 1, D, C), kv_map),
                pl.BlockSpec((1, 1, D, C), kv_map),
            ],
            out_specs=pl.BlockSpec((1, 1, D, C), q_map),
            scratch_shapes=[
                pltpu.VMEM((num_heads, D, 1), jnp.float32),    # running max
                pltpu.VMEM((num_heads, D, 1), jnp.float32),    # running sum
                pltpu.VMEM((num_heads, D, hd), jnp.float32),   # output accumulator
            ],
        ),
        compiler_params=pltpu.CompilerParams(
            dimension_semantics=("parallel", "parallel", "arbitrary")),
    )(which_flat, mask_flat, q, k, v)


# ------------------- fused output projection + residual ----------------------


def _proj_res_kernel(y_ref, s_ref, w_ref, b_ref, o_ref):
    t = jnp.dot(y_ref[...], w_ref[...], preferred_element_type=jnp.float32) + b_ref[...]
    o_ref[...] = (s_ref[...] + t).astype(o_ref.dtype)


def proj_residual(y2d, shortcut2d, w, b):
    M, C = shortcut2d.shape
    tm = _pick_tile_m(M)
    row = lambda i: (i, 0)
    full = lambda i: (0, 0)
    return pl.pallas_call(
        _proj_res_kernel,
        out_shape=jax.ShapeDtypeStruct((M, C), shortcut2d.dtype),
        grid=(M // tm,),
        in_specs=[pl.BlockSpec((tm, C), row), pl.BlockSpec((tm, C), row),
                  pl.BlockSpec((C, C), full), pl.BlockSpec((1, C), full)],
        out_specs=pl.BlockSpec((tm, C), row),
        compiler_params=pltpu.CompilerParams(
            dimension_semantics=("parallel",), vmem_limit_bytes=_VMEM_LIMIT),
    )(y2d, shortcut2d, w, b.reshape(1, C))


# ---------------- fused LN + fc1 + GELU + fc2 + residual ---------------------


def _ln_mlp_res_kernel(x_ref, g_ref, bln_ref, w1_ref, b1_ref, w2_ref, b2_ref, o_ref):
    x = x_ref[...].astype(jnp.float32)
    h = _layernorm_f32(x, g_ref[...], bln_ref[...]).astype(jnp.bfloat16)
    h1 = jnp.dot(h, w1_ref[...], preferred_element_type=jnp.float32) + b1_ref[...]
    h1 = _gelu(h1).astype(jnp.bfloat16)          # hidden stays on-chip
    h2 = jnp.dot(h1, w2_ref[...], preferred_element_type=jnp.float32) + b2_ref[...]
    o_ref[...] = (x + h2).astype(o_ref.dtype)


def ln_mlp_residual(x2d, g, b, w1, b1, w2, b2):
    M, C = x2d.shape
    Hf = w1.shape[1]
    tm = _pick_tile_m(M)
    row = lambda i: (i, 0)
    full = lambda i: (0, 0)
    return pl.pallas_call(
        _ln_mlp_res_kernel,
        out_shape=jax.ShapeDtypeStruct((M, C), x2d.dtype),
        grid=(M // tm,),
        in_specs=[pl.BlockSpec((tm, C), row),
                  pl.BlockSpec((1, C), full), pl.BlockSpec((1, C), full),
                  pl.BlockSpec((C, Hf), full), pl.BlockSpec((1, Hf), full),
                  pl.BlockSpec((Hf, C), full), pl.BlockSpec((1, C), full)],
        out_specs=pl.BlockSpec((tm, C), row),
        compiler_params=pltpu.CompilerParams(
            dimension_semantics=("parallel",), vmem_limit_bytes=_VMEM_LIMIT),
    )(x2d, g.reshape(1, C), b.reshape(1, C), w1, b1.reshape(1, Hf), w2, b2.reshape(1, C))


# ----------------------------- model glue ------------------------------------


def ico_block_forward(x, p, which_flat, mask_flat, num_heads):
    B, N, D, C = x.shape
    M = B * N * D
    x2 = x.reshape(M, C)

    # attention branch
    q, k, v = ln_qkv(x2, p["g1"], p["b1"], p["w_q"], p["w_k"], p["w_v"],
                     p["b_q"], p["b_k"], p["b_v"])
    q = q.reshape(B, N, D, C)
    k = k.reshape(B, N, D, C)
    v = v.reshape(B, N, D, C)
    y = ico_attention(q, k, v, which_flat, mask_flat, num_heads)     # (B,N,D,C) bf16
    x2 = proj_residual(y.reshape(M, C), x2, p["w_proj"], p["b_proj"])

    # MLP branch (one fused HBM pass)
    x2 = ln_mlp_residual(x2, p["g2"], p["b2"], p["w_fc1"], p["b_fc1"],
                         p["w_fc2"], p["b_fc2"])
    return x2.reshape(B, N, D, C)


def ico_slide3d_forward(x, params, which, mask, num_heads):
    # call_checkpointed ('matepoint') is memory-only; forward math unchanged.
    N, K = which.shape
    which_flat = which.reshape(N * K).astype(jnp.int32)     # 1-D -> compact in SMEM
    mask_flat = mask.astype(jnp.int32).reshape(N * K)
    for p in params:
        x = ico_block_forward(x, p, which_flat, mask_flat, num_heads)
    return x


def init_ico_slide3d_params(key, dim, depth, mlp_ratio=4.0):
    hidden = int(dim * mlp_ratio)
    params = []
    for d in range(depth):
        ks = jax.random.split(jax.random.fold_in(key, d), 4)
        w_qkv = 0.02 * jax.random.normal(ks[0], (dim, 3 * dim), jnp.float32)
        b_qkv = jnp.zeros((3 * dim,), jnp.float32)
        params.append(dict(
            g1=jnp.ones((dim,), jnp.float32),
            b1=jnp.zeros((dim,), jnp.float32),
            # qkv weight split into its q/k/v column blocks (numerically the same
            # as the single (dim, 3*dim) matmul) and stored bf16 for the MXU.
            w_q=w_qkv[:, 0 * dim:1 * dim].astype(jnp.bfloat16),
            w_k=w_qkv[:, 1 * dim:2 * dim].astype(jnp.bfloat16),
            w_v=w_qkv[:, 2 * dim:3 * dim].astype(jnp.bfloat16),
            b_q=b_qkv[0 * dim:1 * dim],
            b_k=b_qkv[1 * dim:2 * dim],
            b_v=b_qkv[2 * dim:3 * dim],
            w_proj=(0.02 * jax.random.normal(ks[1], (dim, dim), jnp.float32)).astype(jnp.bfloat16),
            b_proj=jnp.zeros((dim,), jnp.float32),
            g2=jnp.ones((dim,), jnp.float32),
            b2=jnp.zeros((dim,), jnp.float32),
            w_fc1=(0.02 * jax.random.normal(ks[2], (dim, hidden), jnp.float32)).astype(jnp.bfloat16),
            b_fc1=jnp.zeros((hidden,), jnp.float32),
            w_fc2=(0.02 * jax.random.normal(ks[3], (hidden, dim), jnp.float32)).astype(jnp.bfloat16),
            b_fc2=jnp.zeros((dim,), jnp.float32),
        ))
    return params


if __name__ == "__main__":
    # small, module-consistent shapes
    B, Nvert, D, dim = 2, 16, 4, 64
    num_heads, depth, K = 2, 2, 8

    key = jax.random.PRNGKey(0)
    kx, kp = jax.random.split(key)

    x = jax.random.normal(kx, (B, Nvert, D, dim), jnp.float32)
    params = init_ico_slide3d_params(kp, dim, depth)

    # synthetic deterministic hlmesh neighborhood (see TODO(synk) above)
    which = ((jnp.arange(Nvert)[:, None] + jnp.arange(K)[None, :]) % Nvert).astype(jnp.int32)
    mask = jnp.ones((Nvert, K), dtype=bool).at[1::2, -1].set(False)

    fwd = jax.jit(functools.partial(ico_slide3d_forward, num_heads=num_heads))
    out = fwd(x, params, which, mask)
    out = jax.block_until_ready(out)
    assert out.shape == (B, Nvert, D, dim)
    assert bool(jnp.all(jnp.isfinite(out)))
    print("KERNEL_OK")
</pallas_src>

<mosaic_0001>
module attributes {stable_mosaic.version = 11 : i64} {
  func.func @_ln_qkv_kernel(%arg0: i32, %arg1: memref<64x64xf32, #tpu.memory_space<vmem>>, %arg2: memref<1x64xf32, #tpu.memory_space<vmem>>, %arg3: memref<1x64xf32, #tpu.memory_space<vmem>>, %arg4: memref<64x64xbf16, #tpu.memory_space<vmem>>, %arg5: memref<64x64xbf16, #tpu.memory_space<vmem>>, %arg6: memref<64x64xbf16, #tpu.memory_space<vmem>>, %arg7: memref<1x64xf32, #tpu.memory_space<vmem>>, %arg8: memref<1x64xf32, #tpu.memory_space<vmem>>, %arg9: memref<1x64xf32, #tpu.memory_space<vmem>>, %arg10: memref<64x64xbf16, #tpu.memory_space<vmem>>, %arg11: memref<64x64xbf16, #tpu.memory_space<vmem>>, %arg12: memref<64x64xbf16, #tpu.memory_space<vmem>>) attributes {dimension_semantics = [#tpu.dimension_semantics<parallel>], iteration_bounds = array<i64: 2>, scalar_prefetch = 0 : i64, scratch_operands = 0 : i64, tpu.core_type = #tpu.core_type<tc>, window_params = [{transform_indices = @transform_0, window_bounds = array<i64: 64, 64>}, {pipeline_mode = #tpu.pipeline_mode<synchronous>, transform_indices = @transform_1, window_bounds = array<i64: 1, 64>}, {pipeline_mode = #tpu.pipeline_mode<synchronous>, transform_indices = @transform_2, window_bounds = array<i64: 1, 64>}, {pipeline_mode = #tpu.pipeline_mode<synchronous>, transform_indices = @transform_3, window_bounds = array<i64: 64, 64>}, {pipeline_mode = #tpu.pipeline_mode<synchronous>, transform_indices = @transform_4, window_bounds = array<i64: 64, 64>}, {pipeline_mode = #tpu.pipeline_mode<synchronous>, transform_indices = @transform_5, window_bounds = array<i64: 64, 64>}, {pipeline_mode = #tpu.pipeline_mode<synchronous>, transform_indices = @transform_6, window_bounds = array<i64: 1, 64>}, {pipeline_mode = #tpu.pipeline_mode<synchronous>, transform_indices = @transform_7, window_bounds = array<i64: 1, 64>}, {pipeline_mode = #tpu.pipeline_mode<synchronous>, transform_indices = @transform_8, window_bounds = array<i64: 1, 64>}, {transform_indices = @transform_9, window_bounds = array<i64: 64, 64>}, {transform_indices = @transform_10, window_bounds = array<i64: 64, 64>}, {transform_indices = @transform_11, window_bounds = array<i64: 64, 64>}]} {
    %c0 = arith.constant 0 : index
    %c0_0 = arith.constant 0 : index
    %0 = vector.load %arg1[%c0, %c0_0] : memref<64x64xf32, #tpu.memory_space<vmem>>, vector<64x64xf32>
    %c0_1 = arith.constant 0 : index
    %c0_2 = arith.constant 0 : index
    %1 = vector.load %arg2[%c0_1, %c0_2] : memref<1x64xf32, #tpu.memory_space<vmem>>, vector<1x64xf32>
    %c0_3 = arith.constant 0 : index
    %c0_4 = arith.constant 0 : index
    %2 = vector.load %arg3[%c0_3, %c0_4] : memref<1x64xf32, #tpu.memory_space<vmem>>, vector<1x64xf32>
    %cst = arith.constant dense<0.000000e+00> : vector<64xf32>
    %3 = vector.multi_reduction <add>, %0, %cst [1] : vector<64x64xf32> to vector<64xf32>
    %4 = vector.shape_cast %3 : vector<64xf32> to vector<64x1xf32>
    %cst_5 = arith.constant 6.400000e+01 : f32
    %5 = vector.broadcast %cst_5 : f32 to vector<64x1xf32>
    %6 = arith.divf %4, %5 : vector<64x1xf32>
    %7 = vector.broadcast %6 : vector<64x1xf32> to vector<64x64xf32>
    %8 = arith.subf %0, %7 : vector<64x64xf32>
    %9 = arith.mulf %8, %8 : vector<64x64xf32>
    %cst_6 = arith.constant dense<0.000000e+00> : vector<64xf32>
    %10 = vector.multi_reduction <add>, %9, %cst_6 [1] : vector<64x64xf32> to vector<64xf32>
    %11 = vector.shape_cast %10 : vector<64xf32> to vector<64x1xf32>
    %cst_7 = arith.constant 6.400000e+01 : f32
    %12 = vector.broadcast %cst_7 : f32 to vector<64x1xf32>
    %13 = arith.divf %11, %12 : vector<64x1xf32>
    %cst_8 = arith.constant 9.99999974E-6 : f32
    %14 = vector.broadcast %cst_8 : f32 to vector<64x1xf32>
    %15 = arith.addf %13, %14 : vector<64x1xf32>
    %16 = math.rsqrt %15 : vector<64x1xf32>
    %17 = vector.broadcast %16 : vector<64x1xf32> to vector<64x64xf32>
    %18 = arith.mulf %8, %17 : vector<64x64xf32>
    %19 = vector.broadcast %1 : vector<1x64xf32> to vector<64x64xf32>
    %20 = arith.mulf %18, %19 : vector<64x64xf32>
    %21 = vector.broadcast %2 : vector<1x64xf32> to vector<64x64xf32>
    %22 = arith.addf %20, %21 : vector<64x64xf32>
    %23 = arith.truncf %22 : vector<64x64xf32> to vector<64x64xbf16>
    %c0_9 = arith.constant 0 : index
    %c0_10 = arith.constant 0 : index
    %24 = vector.load %arg4[%c0_9, %c0_10] : memref<64x64xbf16, #tpu.memory_space<vmem>>, vector<64x64xbf16>
    %cst_11 = arith.constant dense<0.000000e+00> : vector<64x64xf32>
    %25 = tpu.matmul %23, %24, %cst_11 {dimension_numbers = #tpu.dot_dimension_numbers<[1], [0], [0], [1], [0, 0, 1, 1], [], []>} : vector<64x64xbf16>, vector<64x64xbf16>, vector<64x64xf32> -> vector<64x64xf32>
    %c0_12 = arith.constant 0 : index
    %c0_13 = arith.constant 0 : index
    %26 = vector.load %arg7[%c0_12, %c0_13] : memref<1x64xf32, #tpu.memory_space<vmem>>, vector<1x64xf32>
    %27 = vector.broadcast %26 : vector<1x64xf32> to vector<64x64xf32>
    %28 = arith.addf %25, %27 : vector<64x64xf32>
    %c0_14 = arith.constant 0 : index
    %c0_15 = arith.constant 0 : index
    %29 = vector.load %arg5[%c0_14, %c0_15] : memref<64x64xbf16, #tpu.memory_space<vmem>>, vector<64x64xbf16>
    %cst_16 = arith.constant dense<0.000000e+00> : vector<64x64xf32>
    %30 = tpu.matmul %23, %29, %cst_16 {dimension_numbers = #tpu.dot_dimension_numbers<[1], [0], [0], [1], [0, 0, 1, 1], [], []>} : vector<64x64xbf16>, vector<64x64xbf16>, vector<64x64xf32> -> vector<64x64xf32>
    %c0_17 = arith.constant 0 : index
    %c0_18 = arith.constant 0 : index
    %31 = vector.load %arg8[%c0_17, %c0_18] : memref<1x64xf32, #tpu.memory_space<vmem>>, vector<1x64xf32>
    %32 = vector.broadcast %31 : vector<1x64xf32> to vector<64x64xf32>
    %33 = arith.addf %30, %32 : vector<64x64xf32>
    %c0_19 = arith.constant 0 : index
    %c0_20 = arith.constant 0 : index
    %34 = vector.load %arg6[%c0_19, %c0_20] : memref<64x64xbf16, #tpu.memory_space<vmem>>, vector<64x64xbf16>
    %cst_21 = arith.constant dense<0.000000e+00> : vector<64x64xf32>
    %35 = tpu.matmul %23, %34, %cst_21 {dimension_numbers = #tpu.dot_dimension_numbers<[1], [0], [0], [1], [0, 0, 1, 1], [], []>} : vector<64x64xbf16>, vector<64x64xbf16>, vector<64x64xf32> -> vector<64x64xf32>
    %c0_22 = arith.constant 0 : index
    %c0_23 = arith.constant 0 : index
    %36 = vector.load %arg9[%c0_22, %c0_23] : memref<1x64xf32, #tpu.memory_space<vmem>>, vector<1x64xf32>
    %37 = vector.broadcast %36 : vector<1x64xf32> to vector<64x64xf32>
    %38 = arith.addf %35, %37 : vector<64x64xf32>
    %39 = arith.truncf %28 : vector<64x64xf32> to vector<64x64xbf16>
    %c0_24 = arith.constant 0 : index
    %c0_25 = arith.constant 0 : index
    %40 = vector.load %arg10[%c0_24, %c0_25] : memref<64x64xbf16, #tpu.memory_space<vmem>>, vector<64x64xbf16>
    tpu.vector_store %arg10[%c0_24, %c0_25], %39 {strides = array<i32>} : memref<64x64xbf16, #tpu.memory_space<vmem>>, vector<64x64xbf16>,
    %41 = arith.truncf %33 : vector<64x64xf32> to vector<64x64xbf16>
    %c0_26 = arith.constant 0 : index
    %c0_27 = arith.constant 0 : index
    %42 = vector.load %arg11[%c0_26, %c0_27] : memref<64x64xbf16, #tpu.memory_space<vmem>>, vector<64x64xbf16>
    tpu.vector_store %arg11[%c0_26, %c0_27], %41 {strides = array<i32>} : memref<64x64xbf16, #tpu.memory_space<vmem>>, vector<64x64xbf16>,
    %43 = arith.truncf %38 : vector<64x64xf32> to vector<64x64xbf16>
    %c0_28 = arith.constant 0 : index
    %c0_29 = arith.constant 0 : index
    %44 = vector.load %arg12[%c0_28, %c0_29] : memref<64x64xbf16, #tpu.memory_space<vmem>>, vector<64x64xbf16>
    tpu.vector_store %arg12[%c0_28, %c0_29], %43 {strides = array<i32>} : memref<64x64xbf16, #tpu.memory_space<vmem>>, vector<64x64xbf16>,
    return
  }
  func.func @transform_0(%arg0: i32) -> (i32, i32) {
    %c0_i32 = arith.constant 0 : i32
    %c0_i32_0 = arith.constant 0 : i32
    return %arg0, %c0_i32 : i32, i32
  }
  func.func @transform_1(%arg0: i32) -> (i32, i32) {
    %c0_i32 = arith.constant 0 : i32
    %c0_i32_0 = arith.constant 0 : i32
    %c0_i32_1 = arith.constant 0 : i32
    return %c0_i32, %c0_i32_0 : i32, i32
  }
  func.func @transform_2(%arg0: i32) -> (i32, i32) {
    %c0_i32 = arith.constant 0 : i32
    %c0_i32_0 = arith.constant 0 : i32
    %c0_i32_1 = arith.constant 0 : i32
    return %c0_i32, %c0_i32_0 : i32, i32
  }
  func.func @transform_3(%arg0: i32) -> (i32, i32) {
    %c0_i32 = arith.constant 0 : i32
    %c0_i32_0 = arith.constant 0 : i32
    %c0_i32_1 = arith.constant 0 : i32
    return %c0_i32, %c0_i32_0 : i32, i32
  }
  func.func @transform_4(%arg0: i32) -> (i32, i32) {
    %c0_i32 = arith.constant 0 : i32
    %c0_i32_0 = arith.constant 0 : i32
    %c0_i32_1 = arith.constant 0 : i32
    return %c0_i32, %c0_i32_0 : i32, i32
  }
  func.func @transform_5(%arg0: i32) -> (i32, i32) {
    %c0_i32 = arith.constant 0 : i32
    %c0_i32_0 = arith.constant 0 : i32
    %c0_i32_1 = arith.constant 0 : i32
    return %c0_i32, %c0_i32_0 : i32, i32
  }
  func.func @transform_6(%arg0: i32) -> (i32, i32) {
    %c0_i32 = arith.constant 0 : i32
    %c0_i32_0 = arith.constant 0 : i32
    %c0_i32_1 = arith.constant 0 : i32
    return %c0_i32, %c0_i32_0 : i32, i32
  }
  func.func @transform_7(%arg0: i32) -> (i32, i32) {
    %c0_i32 = arith.constant 0 : i32
    %c0_i32_0 = arith.constant 0 : i32
    %c0_i32_1 = arith.constant 0 : i32
    return %c0_i32, %c0_i32_0 : i32, i32
  }
  func.func @transform_8(%arg0: i32) -> (i32, i32) {
    %c0_i32 = arith.constant 0 : i32
    %c0_i32_0 = arith.constant 0 : i32
    %c0_i32_1 = arith.constant 0 : i32
    return %c0_i32, %c0_i32_0 : i32, i32
  }
  func.func @transform_9(%arg0: i32) -> (i32, i32) {
    %c0_i32 = arith.constant 0 : i32
    %c0_i32_0 = arith.constant 0 : i32
    return %arg0, %c0_i32 : i32, i32
  }
  func.func @transform_10(%arg0: i32) -> (i32, i32) {
    %c0_i32 = arith.constant 0 : i32
    %c0_i32_0 = arith.constant 0 : i32
    return %arg0, %c0_i32 : i32, i32
  }
  func.func @transform_11(%arg0: i32) -> (i32, i32) {
    %c0_i32 = arith.constant 0 : i32
    %c0_i32_0 = arith.constant 0 : i32
    return %arg0, %c0_i32 : i32, i32
  }
}

module attributes {stable_mosaic.version = 11 : i64} {
  func.func @_proj_res_kernel(%arg0: i32, %arg1: memref<64x64xbf16, #tpu.memory_space<vmem>>, %arg2: memref<64x64xf32, #tpu.memory_space<vmem>>, %arg3: memref<64x64xbf16, #tpu.memory_space<vmem>>, %arg4: memref<1x64xf32, #tpu.memory_space<vmem>>, %arg5: memref<64x64xf32, #tpu.memory_space<vmem>>) attributes {dimension_semantics = [#tpu.dimension_semantics<parallel>], iteration_bounds = array<i64: 2>, scalar_prefetch = 0 : i64, scratch_operands = 0 : i64, tpu.core_type = #tpu.core_type<tc>, window_params = [{transform_indices = @transform_0, window_bounds = array<i64: 64, 64>}, {transform_indices = @transform_1, window_bounds = array<i64: 64, 64>}, {pipeline_mode = #tpu.pipeline_mode<synchronous>, transform_indices = @transform_2, window_bounds = array<i64: 64, 64>}, {pipeline_mode = #tpu.pipeline_mode<synchronous>, transform_indices = @transform_3, window_bounds = array<i64: 1, 64>}, {transform_indices = @transform_4, window_bounds = array<i64: 64, 64>}]} {
    %c0 = arith.constant 0 : index
    %c0_0 = arith.constant 0 : index
    %0 = vector.load %arg1[%c0, %c0_0] : memref<64x64xbf16, #tpu.memory_space<vmem>>, vector<64x64xbf16>
    %c0_1 = arith.constant 0 : index
    %c0_2 = arith.constant 0 : index
    %1 = vector.load %arg3[%c0_1, %c0_2] : memref<64x64xbf16, #tpu.memory_space<vmem>>, vector<64x64xbf16>
    %cst = arith.constant dense<0.000000e+00> : vector<64x64xf32>
    %2 = tpu.matmul %0, %1, %cst {dimension_numbers = #tpu.dot_dimension_numbers<[1], [0], [0], [1], [0, 0, 1, 1], [], []>} : vector<64x64xbf16>, vector<64x64xbf16>, vector<64x64xf32> -> vector<64x64xf32>
    %c0_3 = arith.constant 0 : index
    %c0_4 = arith.constant 0 : index
    %3 = vector.load %arg4[%c0_3, %c0_4] : memref<1x64xf32, #tpu.memory_space<vmem>>, vector<1x64xf32>
    %4 = vector.broadcast %3 : vector<1x64xf32> to vector<64x64xf32>
    %5 = arith.addf %2, %4 : vector<64x64xf32>
    %c0_5 = arith.constant 0 : index
    %c0_6 = arith.constant 0 : index
    %6 = vector.load %arg2[%c0_5, %c0_6] : memref<64x64xf32, #tpu.memory_space<vmem>>, vector<64x64xf32>
    %7 = arith.addf %6, %5 : vector<64x64xf32>
    %c0_7 = arith.constant 0 : index
    %c0_8 = arith.constant 0 : index
    %8 = vector.load %arg5[%c0_7, %c0_8] : memref<64x64xf32, #tpu.memory_space<vmem>>, vector<64x64xf32>
    tpu.vector_store %arg5[%c0_7, %c0_8], %7 {strides = array<i32>} : memref<64x64xf32, #tpu.memory_space<vmem>>, vector<64x64xf32>,
    return
  }
  func.func @transform_0(%arg0: i32) -> (i32, i32) {
    %c0_i32 = arith.constant 0 : i32
    %c0_i32_0 = arith.constant 0 : i32
    return %arg0, %c0_i32 : i32, i32
  }
  func.func @transform_1(%arg0: i32) -> (i32, i32) {
    %c0_i32 = arith.constant 0 : i32
    %c0_i32_0 = arith.constant 0 : i32
    return %arg0, %c0_i32 : i32, i32
  }
  func.func @transform_2(%arg0: i32) -> (i32, i32) {
    %c0_i32 = arith.constant 0 : i32
    %c0_i32_0 = arith.constant 0 : i32
    %c0_i32_1 = arith.constant 0 : i32
    return %c0_i32, %c0_i32_0 : i32, i32
  }
  func.func @transform_3(%arg0: i32) -> (i32, i32) {
    %c0_i32 = arith.constant 0 : i32
    %c0_i32_0 = arith.constant 0 : i32
    %c0_i32_1 = arith.constant 0 : i32
    return %c0_i32, %c0_i32_0 : i32, i32
  }
  func.func @transform_4(%arg0: i32) -> (i32, i32) {
    %c0_i32 = arith.constant 0 : i32
    %c0_i32_0 = arith.constant 0 : i32
    return %arg0, %c0_i32 : i32, i32
  }
}

module attributes {stable_mosaic.version = 11 : i64} {
  func.func @_ico_attn_kernel(%arg0: i32, %arg1: i32, %arg2: i32, %arg3: memref<128xi32, #tpu.memory_space<smem>>, %arg4: memref<128xi32, #tpu.memory_space<smem>>, %arg5: memref<1x1x4x64xbf16, #tpu.memory_space<vmem>>, %arg6: memref<1x1x4x64xbf16, #tpu.memory_space<vmem>>, %arg7: memref<1x1x4x64xbf16, #tpu.memory_space<vmem>>, %arg8: memref<1x1x4x64xbf16, #tpu.memory_space<vmem>>, %arg9: memref<2x4x1xf32, #tpu.memory_space<vmem>>, %arg10: memref<2x4x1xf32, #tpu.memory_space<vmem>>, %arg11: memref<2x4x32xf32, #tpu.memory_space<vmem>>) attributes {dimension_semantics = [#tpu.dimension_semantics<parallel>, #tpu.dimension_semantics<parallel>, #tpu.dimension_semantics<arbitrary>], iteration_bounds = array<i64: 2, 16, 8>, scalar_prefetch = 2 : i64, scratch_operands = 3 : i64, tpu.core_type = #tpu.core_type<tc>, window_params = [{transform_indices = @transform_0, window_bounds = array<i64: 1, 1, 4, 64>}, {transform_indices = @transform_1, window_bounds = array<i64: 1, 1, 4, 64>}, {transform_indices = @transform_2, window_bounds = array<i64: 1, 1, 4, 64>}, {transform_indices = @transform_3, window_bounds = array<i64: 1, 1, 4, 64>}]} {
    %c0_i32 = arith.constant 0 : i32
    %0 = arith.cmpi eq, %arg2, %c0_i32 : i32
    %1 = arith.extui %0 : i1 to i32
    %c0_i32_0 = arith.constant 0 : i32
    %2 = arith.cmpi ne, %1, %c0_i32_0 : i32
    scf.if %2 {
      %cst_60 = arith.constant 0xFF800000 : f32
      %98 = vector.broadcast %cst_60 : f32 to vector<2x4x1xf32>
      %c0_61 = arith.constant 0 : index
      %c0_62 = arith.constant 0 : index
      %c0_63 = arith.constant 0 : index
      %99 = vector.load %arg9[%c0_61, %c0_62, %c0_63] : memref<2x4x1xf32, #tpu.memory_space<vmem>>, vector<2x4x1xf32>
      tpu.vector_store %arg9[%c0_61, %c0_62, %c0_63], %98 {strides = array<i32>} : memref<2x4x1xf32, #tpu.memory_space<vmem>>, vector<2x4x1xf32>,
      %cst_64 = arith.constant 0.000000e+00 : f32
      %100 = vector.broadcast %cst_64 : f32 to vector<2x4x1xf32>
      %c0_65 = arith.constant 0 : index
      %c0_66 = arith.constant 0 : index
      %c0_67 = arith.constant 0 : index
      %101 = vector.load %arg10[%c0_65, %c0_66, %c0_67] : memref<2x4x1xf32, #tpu.memory_space<vmem>>, vector<2x4x1xf32>
      tpu.vector_store %arg10[%c0_65, %c0_66, %c0_67], %100 {strides = array<i32>} : memref<2x4x1xf32, #tpu.memory_space<vmem>>, vector<2x4x1xf32>,
      %cst_68 = arith.constant 0.000000e+00 : f32
      %102 = vector.broadcast %cst_68 : f32 to vector<2x4x32xf32>
      %c0_69 = arith.constant 0 : index
      %c0_70 = arith.constant 0 : index
      %c0_71 = arith.constant 0 : index
      %103 = vector.load %arg11[%c0_69, %c0_70, %c0_71] : memref<2x4x32xf32, #tpu.memory_space<vmem>>, vector<2x4x32xf32>
      tpu.vector_store %arg11[%c0_69, %c0_70, %c0_71], %102 {strides = array<i32>} : memref<2x4x32xf32, #tpu.memory_space<vmem>>, vector<2x4x32xf32>,
    } else {
    }
    %c8_i32 = arith.constant 8 : i32
    %3 = arith.muli %arg1, %c8_i32 : i32
    %4 = arith.addi %3, %arg2 : i32
    %5 = arith.index_cast %4 : i32 to index
    %6 = memref.load %arg4[%5] : memref<128xi32, #tpu.memory_space<smem>>
    %c0_i32_1 = arith.constant 0 : i32
    %7 = arith.cmpi sgt, %6, %c0_i32_1 : i32
    %cst = arith.constant 0.000000e+00 : f32
    %cst_2 = arith.constant -1.000000e+30 : f32
    %8 = arith.select %7, %cst, %cst_2 : f32
    %c0 = arith.constant 0 : index
    %c0_3 = arith.constant 0 : index
    %c0_4 = arith.constant 0 : index
    %c0_5 = arith.constant 0 : index
    %9 = vector.load %arg5[%c0, %c0_3, %c0_4, %c0_5] : memref<1x1x4x64xbf16, #tpu.memory_space<vmem>>, vector<1x1x4x64xbf16>
    %10 = vector.shape_cast %9 : vector<1x1x4x64xbf16> to vector<4x64xbf16>
    %c0_6 = arith.constant 0 : index
    %c0_7 = arith.constant 0 : index
    %c0_8 = arith.constant 0 : index
    %c0_9 = arith.constant 0 : index
    %11 = vector.load %arg6[%c0_6, %c0_7, %c0_8, %c0_9] : memref<1x1x4x64xbf16, #tpu.memory_space<vmem>>, vector<1x1x4x64xbf16>
    %12 = vector.shape_cast %11 : vector<1x1x4x64xbf16> to vector<4x64xbf16>
    %c0_10 = arith.constant 0 : index
    %c0_11 = arith.constant 0 : index
    %c0_12 = arith.constant 0 : index
    %c0_13 = arith.constant 0 : index
    %13 = vector.load %arg7[%c0_10, %c0_11, %c0_12, %c0_13] : memref<1x1x4x64xbf16, #tpu.memory_space<vmem>>, vector<1x1x4x64xbf16>
    %14 = vector.shape_cast %13 : vector<1x1x4x64xbf16> to vector<4x64xbf16>
    %15 = vector.extract_strided_slice %10 {offsets = [0, 0], sizes = [4, 32], strides = [1, 1]} : vector<4x64xbf16> to vector<4x32xbf16>
    %16 = vector.extract_strided_slice %12 {offsets = [0, 0], sizes = [4, 32], strides = [1, 1]} : vector<4x64xbf16> to vector<4x32xbf16>
    %17 = vector.extract_strided_slice %14 {offsets = [0, 0], sizes = [4, 32], strides = [1, 1]} : vector<4x64xbf16> to vector<4x32xbf16>
    %cst_14 = arith.constant dense<0.000000e+00> : vector<4x4xf32>
    %18 = tpu.matmul %15, %16, %cst_14 {dimension_numbers = #tpu.dot_dimension_numbers<[1], [1], [0], [0], [0, 0, 1, 0], [], []>} : vector<4x32xbf16>, vector<4x32xbf16>, vector<4x4xf32> -> vector<4x4xf32>
    %cst_15 = arith.constant 5.65685415 : f32
    %19 = vector.broadcast %cst_15 : f32 to vector<4x4xf32>
    %20 = arith.mulf %18, %19 : vector<4x4xf32>
    %21 = vector.broadcast %8 : f32 to vector<4x4xf32>
    %22 = arith.addf %20, %21 : vector<4x4xf32>
    %c0_16 = arith.constant 0 : index
    %c0_17 = arith.constant 0 : index
    %c0_18 = arith.constant 0 : index
    %23 = vector.load %arg9[%c0_16, %c0_17, %c0_18] : memref<2x4x1xf32, #tpu.memory_space<vmem>>, vector<1x4x1xf32>
    %24 = vector.shape_cast %23 : vector<1x4x1xf32> to vector<4x1xf32>
    %cst_19 = arith.constant dense<0xFF800000> : vector<4xf32>
    %25 = vector.multi_reduction <maximumf>, %22, %cst_19 [1] : vector<4x4xf32> to vector<4xf32>
    %26 = vector.shape_cast %25 : vector<4xf32> to vector<4x1xf32>
    %27 = arith.maximumf %24, %26 : vector<4x1xf32>
    %28 = arith.subf %24, %27 : vector<4x1xf32>
    %29 = math.exp %28 : vector<4x1xf32>
    %30 = vector.broadcast %27 : vector<4x1xf32> to vector<4x4xf32>
    %31 = arith.subf %22, %30 : vector<4x4xf32>
    %32 = math.exp %31 : vector<4x4xf32>
    %c0_20 = arith.constant 0 : index
    %c0_21 = arith.constant 0 : index
    %c0_22 = arith.constant 0 : index
    %33 = vector.load %arg10[%c0_20, %c0_21, %c0_22] : memref<2x4x1xf32, #tpu.memory_space<vmem>>, vector<1x4x1xf32>
    %34 = vector.shape_cast %33 : vector<1x4x1xf32> to vector<4x1xf32>
    %35 = arith.mulf %29, %34 : vector<4x1xf32>
    %cst_23 = arith.constant dense<0.000000e+00> : vector<4xf32>
    %36 = vector.multi_reduction <add>, %32, %cst_23 [1] : vector<4x4xf32> to vector<4xf32>
    %37 = vector.shape_cast %36 : vector<4xf32> to vector<4x1xf32>
    %38 = arith.addf %35, %37 : vector<4x1xf32>
    %c0_24 = arith.constant 0 : index
    %c0_25 = arith.constant 0 : index
    %c0_26 = arith.constant 0 : index
    %39 = vector.load %arg10[%c0_24, %c0_25, %c0_26] : memref<2x4x1xf32, #tpu.memory_space<vmem>>, vector<1x4x1xf32>
    %40 = vector.shape_cast %39 : vector<1x4x1xf32> to vector<4x1xf32>
    %41 = vector.shape_cast %38 : vector<4x1xf32> to vector<1x4x1xf32>
    tpu.vector_store %arg10[%c0_24, %c0_25, %c0_26], %41 {strides = array<i32>} : memref<2x4x1xf32, #tpu.memory_space<vmem>>, vector<1x4x1xf32>,
    %c0_27 = arith.constant 0 : index
    %c0_28 = arith.constant 0 : index
    %c0_29 = arith.constant 0 : index
    %42 = vector.load %arg11[%c0_27, %c0_28, %c0_29] : memref<2x4x32xf32, #tpu.memory_space<vmem>>, vector<1x4x32xf32>
    %43 = vector.shape_cast %42 : vector<1x4x32xf32> to vector<4x32xf32>
    %44 = vector.broadcast %29 : vector<4x1xf32> to vector<4x32xf32>
    %45 = arith.mulf %44, %43 : vector<4x32xf32>
    %46 = arith.truncf %32 : vector<4x4xf32> to vector<4x4xbf16>
    %cst_30 = arith.constant dense<0.000000e+00> : vector<4x32xf32>
    %47 = tpu.matmul %46, %17, %cst_30 {dimension_numbers = #tpu.dot_dimension_numbers<[1], [0], [0], [1], [0, 0, 1, 1], [], []>} : vector<4x4xbf16>, vector<4x32xbf16>, vector<4x32xf32> -> vector<4x32xf32>
    %48 = arith.addf %45, %47 : vector<4x32xf32>
    %c0_31 = arith.constant 0 : index
    %c0_32 = arith.constant 0 : index
    %c0_33 = arith.constant 0 : index
    %49 = vector.load %arg11[%c0_31, %c0_32, %c0_33] : memref<2x4x32xf32, #tpu.memory_space<vmem>>, vector<1x4x32xf32>
    %50 = vector.shape_cast %49 : vector<1x4x32xf32> to vector<4x32xf32>
    %51 = vector.shape_cast %48 : vector<4x32xf32> to vector<1x4x32xf32>
    tpu.vector_store %arg11[%c0_31, %c0_32, %c0_33], %51 {strides = array<i32>} : memref<2x4x32xf32, #tpu.memory_space<vmem>>, vector<1x4x32xf32>,
    %c0_34 = arith.constant 0 : index
    %c0_35 = arith.constant 0 : index
    %c0_36 = arith.constant 0 : index
    %52 = vector.load %arg9[%c0_34, %c0_35, %c0_36] : memref<2x4x1xf32, #tpu.memory_space<vmem>>, vector<1x4x1xf32>
    %53 = vector.shape_cast %52 : vector<1x4x1xf32> to vector<4x1xf32>
    %54 = vector.shape_cast %27 : vector<4x1xf32> to vector<1x4x1xf32>
    tpu.vector_store %arg9[%c0_34, %c0_35, %c0_36], %54 {strides = array<i32>} : memref<2x4x1xf32, #tpu.memory_space<vmem>>, vector<1x4x1xf32>,
    %55 = vector.extract_strided_slice %10 {offsets = [0, 32], sizes = [4, 32], strides = [1, 1]} : vector<4x64xbf16> to vector<4x32xbf16>
    %56 = vector.extract_strided_slice %12 {offsets = [0, 32], sizes = [4, 32], strides = [1, 1]} : vector<4x64xbf16> to vector<4x32xbf16>
    %57 = vector.extract_strided_slice %14 {offsets = [0, 32], sizes = [4, 32], strides = [1, 1]} : vector<4x64xbf16> to vector<4x32xbf16>
    %cst_37 = arith.constant dense<0.000000e+00> : vector<4x4xf32>
    %58 = tpu.matmul %55, %56, %cst_37 {dimension_numbers = #tpu.dot_dimension_numbers<[1], [1], [0], [0], [0, 0, 1, 0], [], []>} : vector<4x32xbf16>, vector<4x32xbf16>, vector<4x4xf32> -> vector<4x4xf32>
    %cst_38 = arith.constant 5.65685415 : f32
    %59 = vector.broadcast %cst_38 : f32 to vector<4x4xf32>
    %60 = arith.mulf %58, %59 : vector<4x4xf32>
    %61 = vector.broadcast %8 : f32 to vector<4x4xf32>
    %62 = arith.addf %60, %61 : vector<4x4xf32>
    %c1 = arith.constant 1 : index
    %c0_39 = arith.constant 0 : index
    %c0_40 = arith.constant 0 : index
    %63 = vector.load %arg9[%c1, %c0_39, %c0_40] : memref<2x4x1xf32, #tpu.memory_space<vmem>>, vector<1x4x1xf32>
    %64 = vector.shape_cast %63 : vector<1x4x1xf32> to vector<4x1xf32>
    %cst_41 = arith.constant dense<0xFF800000> : vector<4xf32>
    %65 = vector.multi_reduction <maximumf>, %62, %cst_41 [1] : vector<4x4xf32> to vector<4xf32>
    %66 = vector.shape_cast %65 : vector<4xf32> to vector<4x1xf32>
    %67 = arith.maximumf %64, %66 : vector<4x1xf32>
    %68 = arith.subf %64, %67 : vector<4x1xf32>
    %69 = math.exp %68 : vector<4x1xf32>
    %70 = vector.broadcast %67 : vector<4x1xf32> to vector<4x4xf32>
    %71 = arith.subf %62, %70 : vector<4x4xf32>
    %72 = math.exp %71 : vector<4x4xf32>
    %c1_42 = arith.constant 1 : index
    %c0_43 = arith.constant 0 : index
    %c0_44 = arith.constant 0 : index
    %73 = vector.load %arg10[%c1_42, %c0_43, %c0_44] : memref<2x4x1xf32, #tpu.memory_space<vmem>>, vector<1x4x1xf32>
    %74 = vector.shape_cast %73 : vector<1x4x1xf32> to vector<4x1xf32>
    %75 = arith.mulf %69, %74 : vector<4x1xf32>
    %cst_45 = arith.constant dense<0.000000e+00> : vector<4xf32>
    %76 = vector.multi_reduction <add>, %72, %cst_45 [1] : vector<4x4xf32> to vector<4xf32>
    %77 = vector.shape_cast %76 : vector<4xf32> to vector<4x1xf32>
    %78 = arith.addf %75, %77 : vector<4x1xf32>
    %c1_46 = arith.constant 1 : index
    %c0_47 = arith.constant 0 : index
    %c0_48 = arith.constant 0 : index
    %79 = vector.load %arg10[%c1_46, %c0_47, %c0_48] : memref<2x4x1xf32, #tpu.memory_space<vmem>>, vector<1x4x1xf32>
    %80 = vector.shape_cast %79 : vector<1x4x1xf32> to vector<4x1xf32>
    %81 = vector.shape_cast %78 : vector<4x1xf32> to vector<1x4x1xf32>
    tpu.vector_store %arg10[%c1_46, %c0_47, %c0_48], %81 {strides = array<i32>} : memref<2x4x1xf32, #tpu.memory_space<vmem>>, vector<1x4x1xf32>,
    %c1_49 = arith.constant 1 : index
    %c0_50 = arith.constant 0 : index
    %c0_51 = arith.constant 0 : index
    %82 = vector.load %arg11[%c1_49, %c0_50, %c0_51] : memref<2x4x32xf32, #tpu.memory_space<vmem>>, vector<1x4x32xf32>
    %83 = vector.shape_cast %82 : vector<1x4x32xf32> to vector<4x32xf32>
    %84 = vector.broadcast %69 : vector<4x1xf32> to vector<4x32xf32>
    %85 = arith.mulf %84, %83 : vector<4x32xf32>
    %86 = arith.truncf %72 : vector<4x4xf32> to vector<4x4xbf16>
    %cst_52 = arith.constant dense<0.000000e+00> : vector<4x32xf32>
    %87 = tpu.matmul %86, %57, %cst_52 {dimension_numbers = #tpu.dot_dimension_numbers<[1], [0], [0], [1], [0, 0, 1, 1], [], []>} : vector<4x4xbf16>, vector<4x32xbf16>, vector<4x32xf32> -> vector<4x32xf32>
    %88 = arith.addf %85, %87 : vector<4x32xf32>
    %c1_53 = arith.constant 1 : index
    %c0_54 = arith.constant 0 : index
    %c0_55 = arith.constant 0 : index
    %89 = vector.load %arg11[%c1_53, %c0_54, %c0_55] : memref<2x4x32xf32, #tpu.memory_space<vmem>>, vector<1x4x32xf32>
    %90 = vector.shape_cast %89 : vector<1x4x32xf32> to vector<4x32xf32>
    %91 = vector.shape_cast %88 : vector<4x32xf32> to vector<1x4x32xf32>
    tpu.vector_store %arg11[%c1_53, %c0_54, %c0_55], %91 {strides = array<i32>} : memref<2x4x32xf32, #tpu.memory_space<vmem>>, vector<1x4x32xf32>,
    %c1_56 = arith.constant 1 : index
    %c0_57 = arith.constant 0 : index
    %c0_58 = arith.constant 0 : index
    %92 = vector.load %arg9[%c1_56, %c0_57, %c0_58] : memref<2x4x1xf32, #tpu.memory_space<vmem>>, vector<1x4x1xf32>
    %93 = vector.shape_cast %92 : vector<1x4x1xf32> to vector<4x1xf32>
    %94 = vector.shape_cast %67 : vector<4x1xf32> to vector<1x4x1xf32>
    tpu.vector_store %arg9[%c1_56, %c0_57, %c0_58], %94 {strides = array<i32>} : memref<2x4x1xf32, #tpu.memory_space<vmem>>, vector<1x4x1xf32>,
    %c7_i32 = arith.constant 7 : i32
    %95 = arith.cmpi eq, %arg2, %c7_i32 : i32
    %96 = arith.extui %95 : i1 to i32
    %c0_i32_59 = arith.constant 0 : i32
    %97 = arith.cmpi ne, %96, %c0_i32_59 : i32
    scf.if %97 {
      %c0_60 = arith.constant 0 : index
      %c0_61 = arith.constant 0 : index
      %c0_62 = arith.constant 0 : index
      %98 = vector.load %arg10[%c0_60, %c0_61, %c0_62] : memref<2x4x1xf32, #tpu.memory_space<vmem>>, vector<1x4x1xf32>
      %99 = vector.shape_cast %98 : vector<1x4x1xf32> to vector<4x1xf32>
      %100 = tpu.reciprocal %99 {approx = true} : vector<4x1xf32> -> vector<4x1xf32>
      %c0_63 = arith.constant 0 : index
      %c0_64 = arith.constant 0 : index
      %c0_65 = arith.constant 0 : index
      %101 = vector.load %arg11[%c0_63, %c0_64, %c0_65] : memref<2x4x32xf32, #tpu.memory_space<vmem>>, vector<1x4x32xf32>
      %102 = vector.shape_cast %101 : vector<1x4x32xf32> to vector<4x32xf32>
      %103 = vector.broadcast %100 : vector<4x1xf32> to vector<4x32xf32>
      %104 = arith.mulf %102, %103 : vector<4x32xf32>
      %c1_66 = arith.constant 1 : index
      %c0_67 = arith.constant 0 : index
      %c0_68 = arith.constant 0 : index
      %105 = vector.load %arg10[%c1_66, %c0_67, %c0_68] : memref<2x4x1xf32, #tpu.memory_space<vmem>>, vector<1x4x1xf32>
      %106 = vector.shape_cast %105 : vector<1x4x1xf32> to vector<4x1xf32>
      %107 = tpu.reciprocal %106 {approx = true} : vector<4x1xf32> -> vector<4x1xf32>
      %c1_69 = arith.constant 1 : index
      %c0_70 = arith.constant 0 : index
      %c0_71 = arith.constant 0 : index
      %108 = vector.load %arg11[%c1_69, %c0_70, %c0_71] : memref<2x4x32xf32, #tpu.memory_space<vmem>>, vector<1x4x32xf32>
      %109 = vector.shape_cast %108 : vector<1x4x32xf32> to vector<4x32xf32>
      %110 = vector.broadcast %107 : vector<4x1xf32> to vector<4x32xf32>
      %111 = arith.mulf %109, %110 : vector<4x32xf32>
      %112 = tpu.concatenate %104, %111 in 1 : vector<4x32xf32>, vector<4x32xf32> -> vector<4x64xf32>
      %113 = arith.truncf %112 : vector<4x64xf32> to vector<4x64xbf16>
      %c0_72 = arith.constant 0 : index
      %c0_73 = arith.constant 0 : index
      %c0_74 = arith.constant 0 : index
      %c0_75 = arith.constant 0 : index
      %114 = vector.load %arg8[%c0_72, %c0_73, %c0_74, %c0_75] : memref<1x1x4x64xbf16, #tpu.memory_space<vmem>>, vector<1x1x4x64xbf16>
      %115 = vector.shape_cast %114 : vector<1x1x4x64xbf16> to vector<4x64xbf16>
      %116 = vector.shape_cast %113 : vector<4x64xbf16> to vector<1x1x4x64xbf16>
      tpu.vector_store %arg8[%c0_72, %c0_73, %c0_74, %c0_75], %116 {strides = array<i32>} : memref<1x1x4x64xbf16, #tpu.memory_space<vmem>>, vector<1x1x4x64xbf16>,
    } else {
    }
    return
  }
  func.func @transform_0(%arg0: i32, %arg1: i32, %arg2: i32, %arg3: memref<128xi32, #tpu.memory_space<smem>>, %arg4: memref<128xi32, #tpu.memory_space<smem>>) -> (i32, i32, i32, i32) {
    %c0_i32 = arith.constant 0 : i32
    %c0_i32_0 = arith.constant 0 : i32
    %c0_i32_1 = arith.constant 0 : i32
    return %arg0, %arg1, %c0_i32, %c0_i32_0 : i32, i32, i32, i32
  }
  func.func @transform_1(%arg0: i32, %arg1: i32, %arg2: i32, %arg3: memref<128xi32, #tpu.memory_space<smem>>, %arg4: memref<128xi32, #tpu.memory_space<smem>>) -> (i32, i32, i32, i32) {
    %c8_i32 = arith.constant 8 : i32
    %0 = arith.muli %arg1, %c8_i32 : i32
    %1 = arith.addi %0, %arg2 : i32
    %2 = arith.index_cast %1 : i32 to index
    %3 = memref.load %arg3[%2] : memref<128xi32, #tpu.memory_space<smem>>
    %c0_i32 = arith.constant 0 : i32
    %c0_i32_0 = arith.constant 0 : i32
    %c0_i32_1 = arith.constant 0 : i32
    return %arg0, %3, %c0_i32, %c0_i32_0 : i32, i32, i32, i32
  }
  func.func @transform_2(%arg0: i32, %arg1: i32, %arg2: i32, %arg3: memref<128xi32, #tpu.memory_space<smem>>, %arg4: memref<128xi32, #tpu.memory_space<smem>>) -> (i32, i32, i32, i32) {
    %c8_i32 = arith.constant 8 : i32
    %0 = arith.muli %arg1, %c8_i32 : i32
    %1 = arith.addi %0, %arg2 : i32
    %2 = arith.index_cast %1 : i32 to index
    %3 = memref.load %arg3[%2] : memref<128xi32, #tpu.memory_space<smem>>
    %c0_i32 = arith.constant 0 : i32
    %c0_i32_0 = arith.constant 0 : i32
    %c0_i32_1 = arith.constant 0 : i32
    return %arg0, %3, %c0_i32, %c0_i32_0 : i32, i32, i32, i32
  }
  func.func @transform_3(%arg0: i32, %arg1: i32, %arg2: i32, %arg3: memref<128xi32, #tpu.memory_space<smem>>, %arg4: memref<128xi32, #tpu.memory_space<smem>>) -> (i32, i32, i32, i32) {
    %c0_i32 = arith.constant 0 : i32
    %c0_i32_0 = arith.constant 0 : i32
    %c0_i32_1 = arith.constant 0 : i32
    return %arg0, %arg1, %c0_i32, %c0_i32_0 : i32, i32, i32, i32
  }
}

module attributes {stable_mosaic.version = 11 : i64} {
  func.func @_ln_mlp_res_kernel(%arg0: i32, %arg1: memref<64x64xf32, #tpu.memory_space<vmem>>, %arg2: memref<1x64xf32, #tpu.memory_space<vmem>>, %arg3: memref<1x64xf32, #tpu.memory_space<vmem>>, %arg4: memref<64x256xbf16, #tpu.memory_space<vmem>>, %arg5: memref<1x256xf32, #tpu.memory_space<vmem>>, %arg6: memref<256x64xbf16, #tpu.memory_space<vmem>>, %arg7: memref<1x64xf32, #tpu.memory_space<vmem>>, %arg8: memref<64x64xf32, #tpu.memory_space<vmem>>) attributes {dimension_semantics = [#tpu.dimension_semantics<parallel>], iteration_bounds = array<i64: 2>, scalar_prefetch = 0 : i64, scratch_operands = 0 : i64, tpu.core_type = #tpu.core_type<tc>, window_params = [{transform_indices = @transform_0, window_bounds = array<i64: 64, 64>}, {pipeline_mode = #tpu.pipeline_mode<synchronous>, transform_indices = @transform_1, window_bounds = array<i64: 1, 64>}, {pipeline_mode = #tpu.pipeline_mode<synchronous>, transform_indices = @transform_2, window_bounds = array<i64: 1, 64>}, {pipeline_mode = #tpu.pipeline_mode<synchronous>, transform_indices = @transform_3, window_bounds = array<i64: 64, 256>}, {pipeline_mode = #tpu.pipeline_mode<synchronous>, transform_indices = @transform_4, window_bounds = array<i64: 1, 256>}, {pipeline_mode = #tpu.pipeline_mode<synchronous>, transform_indices = @transform_5, window_bounds = array<i64: 256, 64>}, {pipeline_mode = #tpu.pipeline_mode<synchronous>, transform_indices = @transform_6, window_bounds = array<i64: 1, 64>}, {transform_indices = @transform_7, window_bounds = array<i64: 64, 64>}]} {
    %c0 = arith.constant 0 : index
    %c0_0 = arith.constant 0 : index
    %0 = vector.load %arg1[%c0, %c0_0] : memref<64x64xf32, #tpu.memory_space<vmem>>, vector<64x64xf32>
    %c0_1 = arith.constant 0 : index
    %c0_2 = arith.constant 0 : index
    %1 = vector.load %arg2[%c0_1, %c0_2] : memref<1x64xf32, #tpu.memory_space<vmem>>, vector<1x64xf32>
    %c0_3 = arith.constant 0 : index
    %c0_4 = arith.constant 0 : index
    %2 = vector.load %arg3[%c0_3, %c0_4] : memref<1x64xf32, #tpu.memory_space<vmem>>, vector<1x64xf32>
    %cst = arith.constant dense<0.000000e+00> : vector<64xf32>
    %3 = vector.multi_reduction <add>, %0, %cst [1] : vector<64x64xf32> to vector<64xf32>
    %4 = vector.shape_cast %3 : vector<64xf32> to vector<64x1xf32>
    %cst_5 = arith.constant 6.400000e+01 : f32
    %5 = vector.broadcast %cst_5 : f32 to vector<64x1xf32>
    %6 = arith.divf %4, %5 : vector<64x1xf32>
    %7 = vector.broadcast %6 : vector<64x1xf32> to vector<64x64xf32>
    %8 = arith.subf %0, %7 : vector<64x64xf32>
    %9 = arith.mulf %8, %8 : vector<64x64xf32>
    %cst_6 = arith.constant dense<0.000000e+00> : vector<64xf32>
    %10 = vector.multi_reduction <add>, %9, %cst_6 [1] : vector<64x64xf32> to vector<64xf32>
    %11 = vector.shape_cast %10 : vector<64xf32> to vector<64x1xf32>
    %cst_7 = arith.constant 6.400000e+01 : f32
    %12 = vector.broadcast %cst_7 : f32 to vector<64x1xf32>
    %13 = arith.divf %11, %12 : vector<64x1xf32>
    %cst_8 = arith.constant 9.99999974E-6 : f32
    %14 = vector.broadcast %cst_8 : f32 to vector<64x1xf32>
    %15 = arith.addf %13, %14 : vector<64x1xf32>
    %16 = math.rsqrt %15 : vector<64x1xf32>
    %17 = vector.broadcast %16 : vector<64x1xf32> to vector<64x64xf32>
    %18 = arith.mulf %8, %17 : vector<64x64xf32>
    %19 = vector.broadcast %1 : vector<1x64xf32> to vector<64x64xf32>
    %20 = arith.mulf %18, %19 : vector<64x64xf32>
    %21 = vector.broadcast %2 : vector<1x64xf32> to vector<64x64xf32>
    %22 = arith.addf %20, %21 : vector<64x64xf32>
    %23 = arith.truncf %22 : vector<64x64xf32> to vector<64x64xbf16>
    %c0_9 = arith.constant 0 : index
    %c0_10 = arith.constant 0 : index
    %24 = vector.load %arg4[%c0_9, %c0_10] : memref<64x256xbf16, #tpu.memory_space<vmem>>, vector<64x256xbf16>
    %cst_11 = arith.constant dense<0.000000e+00> : vector<64x256xf32>
    %25 = tpu.matmul %23, %24, %cst_11 {dimension_numbers = #tpu.dot_dimension_numbers<[1], [0], [0], [1], [0, 0, 1, 1], [], []>} : vector<64x64xbf16>, vector<64x256xbf16>, vector<64x256xf32> -> vector<64x256xf32>
    %c0_12 = arith.constant 0 : index
    %c0_13 = arith.constant 0 : index
    %26 = vector.load %arg5[%c0_12, %c0_13] : memref<1x256xf32, #tpu.memory_space<vmem>>, vector<1x256xf32>
    %27 = vector.broadcast %26 : vector<1x256xf32> to vector<64x256xf32>
    %28 = arith.addf %25, %27 : vector<64x256xf32>
    %cst_14 = arith.constant 5.000000e-01 : f32
    %29 = vector.broadcast %cst_14 : f32 to vector<64x256xf32>
    %30 = arith.mulf %29, %28 : vector<64x256xf32>
    %cst_15 = arith.constant 0.707106769 : f32
    %31 = vector.broadcast %cst_15 : f32 to vector<64x256xf32>
    %32 = arith.mulf %28, %31 : vector<64x256xf32>
    %cst_16 = arith.constant 0.000000e+00 : f32
    %33 = vector.broadcast %cst_16 : f32 to vector<64x256xf32>
    %34 = arith.cmpf oge, %32, %33 : vector<64x256xf32>
    %cst_17 = arith.constant 1.000000e+00 : f32
    %cst_18 = arith.constant -1.000000e+00 : f32
    %35 = vector.broadcast %cst_17 : f32 to vector<64x256xf32>
    %36 = vector.broadcast %cst_18 : f32 to vector<64x256xf32>
    %37 = arith.select %34, %35, %36 : vector<64x256xi1>, vector<64x256xf32>
    %38 = math.absf %32 : vector<64x256xf32>
    %cst_19 = arith.constant 0.327591091 : f32
    %39 = vector.broadcast %cst_19 : f32 to vector<64x256xf32>
    %40 = arith.mulf %39, %38 : vector<64x256xf32>
    %cst_20 = arith.constant 1.000000e+00 : f32
    %41 = vector.broadcast %cst_20 : f32 to vector<64x256xf32>
    %42 = arith.addf %41, %40 : vector<64x256xf32>
    %cst_21 = arith.constant 1.000000e+00 : f32
    %43 = vector.broadcast %cst_21 : f32 to vector<64x256xf32>
    %44 = arith.divf %43, %42 : vector<64x256xf32>
    %cst_22 = arith.constant 1.06140542 : f32
    %45 = vector.broadcast %cst_22 : f32 to vector<64x256xf32>
    %46 = arith.mulf %45, %44 : vector<64x256xf32>
    %cst_23 = arith.constant -1.45315206 : f32
    %47 = vector.broadcast %cst_23 : f32 to vector<64x256xf32>
    %48 = arith.addf %46, %47 : vector<64x256xf32>
    %49 = arith.mulf %48, %44 : vector<64x256xf32>
    %cst_24 = arith.constant 1.42141378 : f32
    %50 = vector.broadcast %cst_24 : f32 to vector<64x256xf32>
    %51 = arith.addf %49, %50 : vector<64x256xf32>
    %52 = arith.mulf %51, %44 : vector<64x256xf32>
    %cst_25 = arith.constant -0.284496725 : f32
    %53 = vector.broadcast %cst_25 : f32 to vector<64x256xf32>
    %54 = arith.addf %52, %53 : vector<64x256xf32>
    %55 = arith.mulf %54, %44 : vector<64x256xf32>
    %cst_26 = arith.constant 0.254829586 : f32
    %56 = vector.broadcast %cst_26 : f32 to vector<64x256xf32>
    %57 = arith.addf %55, %56 : vector<64x256xf32>
    %58 = arith.mulf %57, %44 : vector<64x256xf32>
    %cst_27 = arith.constant 0.000000e+00 : f32
    %59 = vector.broadcast %cst_27 : f32 to vector<64x256xf32>
    %60 = arith.subf %59, %38 : vector<64x256xf32>
    %61 = arith.mulf %60, %38 : vector<64x256xf32>
    %62 = math.exp %61 : vector<64x256xf32>
    %63 = arith.mulf %58, %62 : vector<64x256xf32>
    %cst_28 = arith.constant 1.000000e+00 : f32
    %64 = vector.broadcast %cst_28 : f32 to vector<64x256xf32>
    %65 = arith.subf %64, %63 : vector<64x256xf32>
    %66 = arith.mulf %37, %65 : vector<64x256xf32>
    %cst_29 = arith.constant 1.000000e+00 : f32
    %67 = vector.broadcast %cst_29 : f32 to vector<64x256xf32>
    %68 = arith.addf %67, %66 : vector<64x256xf32>
    %69 = arith.mulf %30, %68 : vector<64x256xf32>
    %70 = arith.truncf %69 : vector<64x256xf32> to vector<64x256xbf16>
    %c0_30 = arith.constant 0 : index
    %c0_31 = arith.constant 0 : index
    %71 = vector.load %arg6[%c0_30, %c0_31] : memref<256x64xbf16, #tpu.memory_space<vmem>>, vector<256x64xbf16>
    %cst_32 = arith.constant dense<0.000000e+00> : vector<64x64xf32>
    %72 = tpu.matmul %70, %71, %cst_32 {dimension_numbers = #tpu.dot_dimension_numbers<[1], [0], [0], [1], [0, 0, 1, 1], [], []>} : vector<64x256xbf16>, vector<256x64xbf16>, vector<64x64xf32> -> vector<64x64xf32>
    %c0_33 = arith.constant 0 : index
    %c0_34 = arith.constant 0 : index
    %73 = vector.load %arg7[%c0_33, %c0_34] : memref<1x64xf32, #tpu.memory_space<vmem>>, vector<1x64xf32>
    %74 = vector.broadcast %73 : vector<1x64xf32> to vector<64x64xf32>
    %75 = arith.addf %72, %74 : vector<64x64xf32>
    %76 = arith.addf %0, %75 : vector<64x64xf32>
    %c0_35 = arith.constant 0 : index
    %c0_36 = arith.constant 0 : index
    %77 = vector.load %arg8[%c0_35, %c0_36] : memref<64x64xf32, #tpu.memory_space<vmem>>, vector<64x64xf32>
    tpu.vector_store %arg8[%c0_35, %c0_36], %76 {strides = array<i32>} : memref<64x64xf32, #tpu.memory_space<vmem>>, vector<64x64xf32>,
    return
  }
  func.func @transform_0(%arg0: i32) -> (i32, i32) {
    %c0_i32 = arith.constant 0 : i32
    %c0_i32_0 = arith.constant 0 : i32
    return %arg0, %c0_i32 : i32, i32
  }
  func.func @transform_1(%arg0: i32) -> (i32, i32) {
    %c0_i32 = arith.constant 0 : i32
    %c0_i32_0 = arith.constant 0 : i32
    %c0_i32_1 = arith.constant 0 : i32
    return %c0_i32, %c0_i32_0 : i32, i32
  }
  func.func @transform_2(%arg0: i32) -> (i32, i32) {
    %c0_i32 = arith.constant 0 : i32
    %c0_i32_0 = arith.constant 0 : i32
    %c0_i32_1 = arith.constant 0 : i32
    return %c0_i32, %c0_i32_0 : i32, i32
  }
  func.func @transform_3(%arg0: i32) -> (i32, i32) {
    %c0_i32 = arith.constant 0 : i32
    %c0_i32_0 = arith.constant 0 : i32
    %c0_i32_1 = arith.constant 0 : i32
    return %c0_i32, %c0_i32_0 : i32, i32
  }
  func.func @transform_4(%arg0: i32) -> (i32, i32) {
    %c0_i32 = arith.constant 0 : i32
    %c0_i32_0 = arith.constant 0 : i32
    %c0_i32_1 = arith.constant 0 : i32
    return %c0_i32, %c0_i32_0 : i32, i32
  }
  func.func @transform_5(%arg0: i32) -> (i32, i32) {
    %c0_i32 = arith.constant 0 : i32
    %c0_i32_0 = arith.constant 0 : i32
    %c0_i32_1 = arith.constant 0 : i32
    return %c0_i32, %c0_i32_0 : i32, i32
  }
  func.func @transform_6(%arg0: i32) -> (i32, i32) {
    %c0_i32 = arith.constant 0 : i32
    %c0_i32_0 = arith.constant 0 : i32
    %c0_i32_1 = arith.constant 0 : i32
    return %c0_i32, %c0_i32_0 : i32, i32
  }
  func.func @transform_7(%arg0: i32) -> (i32, i32) {
    %c0_i32 = arith.constant 0 : i32
    %c0_i32_0 = arith.constant 0 : i32
    return %arg0, %c0_i32 : i32, i32
  }
}

module attributes {stable_mosaic.version = 11 : i64} {
  func.func @_proj_res_kernel(%arg0: i32, %arg1: memref<64x64xbf16, #tpu.memory_space<vmem>>, %arg2: memref<64x64xf32, #tpu.memory_space<vmem>>, %arg3: memref<64x64xbf16, #tpu.memory_space<vmem>>, %arg4: memref<1x64xf32, #tpu.memory_space<vmem>>, %arg5: memref<64x64xf32, #tpu.memory_space<vmem>>) attributes {dimension_semantics = [#tpu.dimension_semantics<parallel>], iteration_bounds = array<i64: 2>, scalar_prefetch = 0 : i64, scratch_operands = 0 : i64, tpu.core_type = #tpu.core_type<tc>, window_params = [{transform_indices = @transform_0, window_bounds = array<i64: 64, 64>}, {transform_indices = @transform_1, window_bounds = array<i64: 64, 64>}, {pipeline_mode = #tpu.pipeline_mode<synchronous>, transform_indices = @transform_2, window_bounds = array<i64: 64, 64>}, {pipeline_mode = #tpu.pipeline_mode<synchronous>, transform_indices = @transform_3, window_bounds = array<i64: 1, 64>}, {transform_indices = @transform_4, window_bounds = array<i64: 64, 64>}]} {
    %c0 = arith.constant 0 : index
    %c0_0 = arith.constant 0 : index
    %0 = vector.load %arg1[%c0, %c0_0] : memref<64x64xbf16, #tpu.memory_space<vmem>>, vector<64x64xbf16>
    %c0_1 = arith.constant 0 : index
    %c0_2 = arith.constant 0 : index
    %1 = vector.load %arg3[%c0_1, %c0_2] : memref<64x64xbf16, #tpu.memory_space<vmem>>, vector<64x64xbf16>
    %cst = arith.constant dense<0.000000e+00> : vector<64x64xf32>
    %2 = tpu.matmul %0, %1, %cst {dimension_numbers = #tpu.dot_dimension_numbers<[1], [0], [0], [1], [0, 0, 1, 1], [], []>} : vector<64x64xbf16>, vector<64x64xbf16>, vector<64x64xf32> -> vector<64x64xf32>
    %c0_3 = arith.constant 0 : index
    %c0_4 = arith.constant 0 : index
    %3 = vector.load %arg4[%c0_3, %c0_4] : memref<1x64xf32, #tpu.memory_space<vmem>>, vector<1x64xf32>
    %4 = vector.broadcast %3 : vector<1x64xf32> to vector<64x64xf32>
    %5 = arith.addf %2, %4 : vector<64x64xf32>
    %c0_5 = arith.constant 0 : index
    %c0_6 = arith.constant 0 : index
    %6 = vector.load %arg2[%c0_5, %c0_6] : memref<64x64xf32, #tpu.memory_space<vmem>>, vector<64x64xf32>
    %7 = arith.addf %6, %5 : vector<64x64xf32>
    %c0_7 = arith.constant 0 : index
    %c0_8 = arith.constant 0 : index
    %8 = vector.load %arg5[%c0_7, %c0_8] : memref<64x64xf32, #tpu.memory_space<vmem>>, vector<64x64xf32>
    tpu.vector_store %arg5[%c0_7, %c0_8], %7 {strides = array<i32>} : memref<64x64xf32, #tpu.memory_space<vmem>>, vector<64x64xf32>,
    return
  }
  func.func @transform_0(%arg0: i32) -> (i32, i32) {
    %c0_i32 = arith.constant 0 : i32
    %c0_i32_0 = arith.constant 0 : i32
    return %arg0, %c0_i32 : i32, i32
  }
  func.func @transform_1(%arg0: i32) -> (i32, i32) {
    %c0_i32 = arith.constant 0 : i32
    %c0_i32_0 = arith.constant 0 : i32
    return %arg0, %c0_i32 : i32, i32
  }
  func.func @transform_2(%arg0: i32) -> (i32, i32) {
    %c0_i32 = arith.constant 0 : i32
    %c0_i32_0 = arith.constant 0 : i32
    %c0_i32_1 = arith.constant 0 : i32
    return %c0_i32, %c0_i32_0 : i32, i32
  }
  func.func @transform_3(%arg0: i32) -> (i32, i32) {
    %c0_i32 = arith.constant 0 : i32
    %c0_i32_0 = arith.constant 0 : i32
    %c0_i32_1 = arith.constant 0 : i32
    return %c0_i32, %c0_i32_0 : i32, i32
  }
  func.func @transform_4(%arg0: i32) -> (i32, i32) {
    %c0_i32 = arith.constant 0 : i32
    %c0_i32_0 = arith.constant 0 : i32
    return %arg0, %c0_i32 : i32, i32
  }
}

module attributes {stable_mosaic.version = 11 : i64} {
  func.func @_ln_qkv_kernel(%arg0: i32, %arg1: memref<64x64xf32, #tpu.memory_space<vmem>>, %arg2: memref<1x64xf32, #tpu.memory_space<vmem>>, %arg3: memref<1x64xf32, #tpu.memory_space<vmem>>, %arg4: memref<64x64xbf16, #tpu.memory_space<vmem>>, %arg5: memref<64x64xbf16, #tpu.memory_space<vmem>>, %arg6: memref<64x64xbf16, #tpu.memory_space<vmem>>, %arg7: memref<1x64xf32, #tpu.memory_space<vmem>>, %arg8: memref<1x64xf32, #tpu.memory_space<vmem>>, %arg9: memref<1x64xf32, #tpu.memory_space<vmem>>, %arg10: memref<64x64xbf16, #tpu.memory_space<vmem>>, %arg11: memref<64x64xbf16, #tpu.memory_space<vmem>>, %arg12: memref<64x64xbf16, #tpu.memory_space<vmem>>) attributes {dimension_semantics = [#tpu.dimension_semantics<parallel>], iteration_bounds = array<i64: 2>, scalar_prefetch = 0 : i64, scratch_operands = 0 : i64, tpu.core_type = #tpu.core_type<tc>, window_params = [{transform_indices = @transform_0, window_bounds = array<i64: 64, 64>}, {pipeline_mode = #tpu.pipeline_mode<synchronous>, transform_indices = @transform_1, window_bounds = array<i64: 1, 64>}, {pipeline_mode = #tpu.pipeline_mode<synchronous>, transform_indices = @transform_2, window_bounds = array<i64: 1, 64>}, {pipeline_mode = #tpu.pipeline_mode<synchronous>, transform_indices = @transform_3, window_bounds = array<i64: 64, 64>}, {pipeline_mode = #tpu.pipeline_mode<synchronous>, transform_indices = @transform_4, window_bounds = array<i64: 64, 64>}, {pipeline_mode = #tpu.pipeline_mode<synchronous>, transform_indices = @transform_5, window_bounds = array<i64: 64, 64>}, {pipeline_mode = #tpu.pipeline_mode<synchronous>, transform_indices = @transform_6, window_bounds = array<i64: 1, 64>}, {pipeline_mode = #tpu.pipeline_mode<synchronous>, transform_indices = @transform_7, window_bounds = array<i64: 1, 64>}, {pipeline_mode = #tpu.pipeline_mode<synchronous>, transform_indices = @transform_8, window_bounds = array<i64: 1, 64>}, {transform_indices = @transform_9, window_bounds = array<i64: 64, 64>}, {transform_indices = @transform_10, window_bounds = array<i64: 64, 64>}, {transform_indices = @transform_11, window_bounds = array<i64: 64, 64>}]} {
    %c0 = arith.constant 0 : index
    %c0_0 = arith.constant 0 : index
    %0 = vector.load %arg1[%c0, %c0_0] : memref<64x64xf32, #tpu.memory_space<vmem>>, vector<64x64xf32>
    %c0_1 = arith.constant 0 : index
    %c0_2 = arith.constant 0 : index
    %1 = vector.load %arg2[%c0_1, %c0_2] : memref<1x64xf32, #tpu.memory_space<vmem>>, vector<1x64xf32>
    %c0_3 = arith.constant 0 : index
    %c0_4 = arith.constant 0 : index
    %2 = vector.load %arg3[%c0_3, %c0_4] : memref<1x64xf32, #tpu.memory_space<vmem>>, vector<1x64xf32>
    %cst = arith.constant dense<0.000000e+00> : vector<64xf32>
    %3 = vector.multi_reduction <add>, %0, %cst [1] : vector<64x64xf32> to vector<64xf32>
    %4 = vector.shape_cast %3 : vector<64xf32> to vector<64x1xf32>
    %cst_5 = arith.constant 6.400000e+01 : f32
    %5 = vector.broadcast %cst_5 : f32 to vector<64x1xf32>
    %6 = arith.divf %4, %5 : vector<64x1xf32>
    %7 = vector.broadcast %6 : vector<64x1xf32> to vector<64x64xf32>
    %8 = arith.subf %0, %7 : vector<64x64xf32>
    %9 = arith.mulf %8, %8 : vector<64x64xf32>
    %cst_6 = arith.constant dense<0.000000e+00> : vector<64xf32>
    %10 = vector.multi_reduction <add>, %9, %cst_6 [1] : vector<64x64xf32> to vector<64xf32>
    %11 = vector.shape_cast %10 : vector<64xf32> to vector<64x1xf32>
    %cst_7 = arith.constant 6.400000e+01 : f32
    %12 = vector.broadcast %cst_7 : f32 to vector<64x1xf32>
    %13 = arith.divf %11, %12 : vector<64x1xf32>
    %cst_8 = arith.constant 9.99999974E-6 : f32
    %14 = vector.broadcast %cst_8 : f32 to vector<64x1xf32>
    %15 = arith.addf %13, %14 : vector<64x1xf32>
    %16 = math.rsqrt %15 : vector<64x1xf32>
    %17 = vector.broadcast %16 : vector<64x1xf32> to vector<64x64xf32>
    %18 = arith.mulf %8, %17 : vector<64x64xf32>
    %19 = vector.broadcast %1 : vector<1x64xf32> to vector<64x64xf32>
    %20 = arith.mulf %18, %19 : vector<64x64xf32>
    %21 = vector.broadcast %2 : vector<1x64xf32> to vector<64x64xf32>
    %22 = arith.addf %20, %21 : vector<64x64xf32>
    %23 = arith.truncf %22 : vector<64x64xf32> to vector<64x64xbf16>
    %c0_9 = arith.constant 0 : index
    %c0_10 = arith.constant 0 : index
    %24 = vector.load %arg4[%c0_9, %c0_10] : memref<64x64xbf16, #tpu.memory_space<vmem>>, vector<64x64xbf16>
    %cst_11 = arith.constant dense<0.000000e+00> : vector<64x64xf32>
    %25 = tpu.matmul %23, %24, %cst_11 {dimension_numbers = #tpu.dot_dimension_numbers<[1], [0], [0], [1], [0, 0, 1, 1], [], []>} : vector<64x64xbf16>, vector<64x64xbf16>, vector<64x64xf32> -> vector<64x64xf32>
    %c0_12 = arith.constant 0 : index
    %c0_13 = arith.constant 0 : index
    %26 = vector.load %arg7[%c0_12, %c0_13] : memref<1x64xf32, #tpu.memory_space<vmem>>, vector<1x64xf32>
    %27 = vector.broadcast %26 : vector<1x64xf32> to vector<64x64xf32>
    %28 = arith.addf %25, %27 : vector<64x64xf32>
    %c0_14 = arith.constant 0 : index
    %c0_15 = arith.constant 0 : index
    %29 = vector.load %arg5[%c0_14, %c0_15] : memref<64x64xbf16, #tpu.memory_space<vmem>>, vector<64x64xbf16>
    %cst_16 = arith.constant dense<0.000000e+00> : vector<64x64xf32>
    %30 = tpu.matmul %23, %29, %cst_16 {dimension_numbers = #tpu.dot_dimension_numbers<[1], [0], [0], [1], [0, 0, 1, 1], [], []>} : vector<64x64xbf16>, vector<64x64xbf16>, vector<64x64xf32> -> vector<64x64xf32>
    %c0_17 = arith.constant 0 : index
    %c0_18 = arith.constant 0 : index
    %31 = vector.load %arg8[%c0_17, %c0_18] : memref<1x64xf32, #tpu.memory_space<vmem>>, vector<1x64xf32>
    %32 = vector.broadcast %31 : vector<1x64xf32> to vector<64x64xf32>
    %33 = arith.addf %30, %32 : vector<64x64xf32>
    %c0_19 = arith.constant 0 : index
    %c0_20 = arith.constant 0 : index
    %34 = vector.load %arg6[%c0_19, %c0_20] : memref<64x64xbf16, #tpu.memory_space<vmem>>, vector<64x64xbf16>
    %cst_21 = arith.constant dense<0.000000e+00> : vector<64x64xf32>
    %35 = tpu.matmul %23, %34, %cst_21 {dimension_numbers = #tpu.dot_dimension_numbers<[1], [0], [0], [1], [0, 0, 1, 1], [], []>} : vector<64x64xbf16>, vector<64x64xbf16>, vector<64x64xf32> -> vector<64x64xf32>
    %c0_22 = arith.constant 0 : index
    %c0_23 = arith.constant 0 : index
    %36 = vector.load %arg9[%c0_22, %c0_23] : memref<1x64xf32, #tpu.memory_space<vmem>>, vector<1x64xf32>
    %37 = vector.broadcast %36 : vector<1x64xf32> to vector<64x64xf32>
    %38 = arith.addf %35, %37 : vector<64x64xf32>
    %39 = arith.truncf %28 : vector<64x64xf32> to vector<64x64xbf16>
    %c0_24 = arith.constant 0 : index
    %c0_25 = arith.constant 0 : index
    %40 = vector.load %arg10[%c0_24, %c0_25] : memref<64x64xbf16, #tpu.memory_space<vmem>>, vector<64x64xbf16>
    tpu.vector_store %arg10[%c0_24, %c0_25], %39 {strides = array<i32>} : memref<64x64xbf16, #tpu.memory_space<vmem>>, vector<64x64xbf16>,
    %41 = arith.truncf %33 : vector<64x64xf32> to vector<64x64xbf16>
    %c0_26 = arith.constant 0 : index
    %c0_27 = arith.constant 0 : index
    %42 = vector.load %arg11[%c0_26, %c0_27] : memref<64x64xbf16, #tpu.memory_space<vmem>>, vector<64x64xbf16>
    tpu.vector_store %arg11[%c0_26, %c0_27], %41 {strides = array<i32>} : memref<64x64xbf16, #tpu.memory_space<vmem>>, vector<64x64xbf16>,
    %43 = arith.truncf %38 : vector<64x64xf32> to vector<64x64xbf16>
    %c0_28 = arith.constant 0 : index
    %c0_29 = arith.constant 0 : index
    %44 = vector.load %arg12[%c0_28, %c0_29] : memref<64x64xbf16, #tpu.memory_space<vmem>>, vector<64x64xbf16>
    tpu.vector_store %arg12[%c0_28, %c0_29], %43 {strides = array<i32>} : memref<64x64xbf16, #tpu.memory_space<vmem>>, vector<64x64xbf16>,
    return
  }
  func.func @transform_0(%arg0: i32) -> (i32, i32) {
    %c0_i32 = arith.constant 0 : i32
    %c0_i32_0 = arith.constant 0 : i32
    return %arg0, %c0_i32 : i32, i32
  }
  func.func @transform_1(%arg0: i32) -> (i32, i32) {
    %c0_i32 = arith.constant 0 : i32
    %c0_i32_0 = arith.constant 0 : i32
    %c0_i32_1 = arith.constant 0 : i32
    return %c0_i32, %c0_i32_0 : i32, i32
  }
  func.func @transform_2(%arg0: i32) -> (i32, i32) {
    %c0_i32 = arith.constant 0 : i32
    %c0_i32_0 = arith.constant 0 : i32
    %c0_i32_1 = arith.constant 0 : i32
    return %c0_i32, %c0_i32_0 : i32, i32
  }
  func.func @transform_3(%arg0: i32) -> (i32, i32) {
    %c0_i32 = arith.constant 0 : i32
    %c0_i32_0 = arith.constant 0 : i32
    %c0_i32_1 = arith.constant 0 : i32
    return %c0_i32, %c0_i32_0 : i32, i32
  }
  func.func @transform_4(%arg0: i32) -> (i32, i32) {
    %c0_i32 = arith.constant 0 : i32
    %c0_i32_0 = arith.constant 0 : i32
    %c0_i32_1 = arith.constant 0 : i32
    return %c0_i32, %c0_i32_0 : i32, i32
  }
  func.func @transform_5(%arg0: i32) -> (i32, i32) {
    %c0_i32 = arith.constant 0 : i32
    %c0_i32_0 = arith.constant 0 : i32
    %c0_i32_1 = arith.constant 0 : i32
    return %c0_i32, %c0_i32_0 : i32, i32
  }
  func.func @transform_6(%arg0: i32) -> (i32, i32) {
    %c0_i32 = arith.constant 0 : i32
    %c0_i32_0 = arith.constant 0 : i32
    %c0_i32_1 = arith.constant 0 : i32
    return %c0_i32, %c0_i32_0 : i32, i32
  }
  func.func @transform_7(%arg0: i32) -> (i32, i32) {
    %c0_i32 = arith.constant 0 : i32
    %c0_i32_0 = arith.constant 0 : i32
    %c0_i32_1 = arith.constant 0 : i32
    return %c0_i32, %c0_i32_0 : i32, i32
  }
  func.func @transform_8(%arg0: i32) -> (i32, i32) {
    %c0_i32 = arith.constant 0 : i32
    %c0_i32_0 = arith.constant 0 : i32
    %c0_i32_1 = arith.constant 0 : i32
    return %c0_i32, %c0_i32_0 : i32, i32
  }
  func.func @transform_9(%arg0: i32) -> (i32, i32) {
    %c0_i32 = arith.constant 0 : i32
    %c0_i32_0 = arith.constant 0 : i32
    return %arg0, %c0_i32 : i32, i32
  }
  func.func @transform_10(%arg0: i32) -> (i32, i32) {
    %c0_i32 = arith.constant 0 : i32
    %c0_i32_0 = arith.constant 0 : i32
    return %arg0, %c0_i32 : i32, i32
  }
  func.func @transform_11(%arg0: i32) -> (i32, i32) {
    %c0_i32 = arith.constant 0 : i32
    %c0_i32_0 = arith.constant 0 : i32
    return %arg0, %c0_i32 : i32, i32
  }
}

module attributes {stable_mosaic.version = 11 : i64} {
  func.func @_ln_mlp_res_kernel(%arg0: i32, %arg1: memref<64x64xf32, #tpu.memory_space<vmem>>, %arg2: memref<1x64xf32, #tpu.memory_space<vmem>>, %arg3: memref<1x64xf32, #tpu.memory_space<vmem>>, %arg4: memref<64x256xbf16, #tpu.memory_space<vmem>>, %arg5: memref<1x256xf32, #tpu.memory_space<vmem>>, %arg6: memref<256x64xbf16, #tpu.memory_space<vmem>>, %arg7: memref<1x64xf32, #tpu.memory_space<vmem>>, %arg8: memref<64x64xf32, #tpu.memory_space<vmem>>) attributes {dimension_semantics = [#tpu.dimension_semantics<parallel>], iteration_bounds = array<i64: 2>, scalar_prefetch = 0 : i64, scratch_operands = 0 : i64, tpu.core_type = #tpu.core_type<tc>, window_params = [{transform_indices = @transform_0, window_bounds = array<i64: 64, 64>}, {pipeline_mode = #tpu.pipeline_mode<synchronous>, transform_indices = @transform_1, window_bounds = array<i64: 1, 64>}, {pipeline_mode = #tpu.pipeline_mode<synchronous>, transform_indices = @transform_2, window_bounds = array<i64: 1, 64>}, {pipeline_mode = #tpu.pipeline_mode<synchronous>, transform_indices = @transform_3, window_bounds = array<i64: 64, 256>}, {pipeline_mode = #tpu.pipeline_mode<synchronous>, transform_indices = @transform_4, window_bounds = array<i64: 1, 256>}, {pipeline_mode = #tpu.pipeline_mode<synchronous>, transform_indices = @transform_5, window_bounds = array<i64: 256, 64>}, {pipeline_mode = #tpu.pipeline_mode<synchronous>, transform_indices = @transform_6, window_bounds = array<i64: 1, 64>}, {transform_indices = @transform_7, window_bounds = array<i64: 64, 64>}]} {
    %c0 = arith.constant 0 : index
    %c0_0 = arith.constant 0 : index
    %0 = vector.load %arg1[%c0, %c0_0] : memref<64x64xf32, #tpu.memory_space<vmem>>, vector<64x64xf32>
    %c0_1 = arith.constant 0 : index
    %c0_2 = arith.constant 0 : index
    %1 = vector.load %arg2[%c0_1, %c0_2] : memref<1x64xf32, #tpu.memory_space<vmem>>, vector<1x64xf32>
    %c0_3 = arith.constant 0 : index
    %c0_4 = arith.constant 0 : index
    %2 = vector.load %arg3[%c0_3, %c0_4] : memref<1x64xf32, #tpu.memory_space<vmem>>, vector<1x64xf32>
    %cst = arith.constant dense<0.000000e+00> : vector<64xf32>
    %3 = vector.multi_reduction <add>, %0, %cst [1] : vector<64x64xf32> to vector<64xf32>
    %4 = vector.shape_cast %3 : vector<64xf32> to vector<64x1xf32>
    %cst_5 = arith.constant 6.400000e+01 : f32
    %5 = vector.broadcast %cst_5 : f32 to vector<64x1xf32>
    %6 = arith.divf %4, %5 : vector<64x1xf32>
    %7 = vector.broadcast %6 : vector<64x1xf32> to vector<64x64xf32>
    %8 = arith.subf %0, %7 : vector<64x64xf32>
    %9 = arith.mulf %8, %8 : vector<64x64xf32>
    %cst_6 = arith.constant dense<0.000000e+00> : vector<64xf32>
    %10 = vector.multi_reduction <add>, %9, %cst_6 [1] : vector<64x64xf32> to vector<64xf32>
    %11 = vector.shape_cast %10 : vector<64xf32> to vector<64x1xf32>
    %cst_7 = arith.constant 6.400000e+01 : f32
    %12 = vector.broadcast %cst_7 : f32 to vector<64x1xf32>
    %13 = arith.divf %11, %12 : vector<64x1xf32>
    %cst_8 = arith.constant 9.99999974E-6 : f32
    %14 = vector.broadcast %cst_8 : f32 to vector<64x1xf32>
    %15 = arith.addf %13, %14 : vector<64x1xf32>
    %16 = math.rsqrt %15 : vector<64x1xf32>
    %17 = vector.broadcast %16 : vector<64x1xf32> to vector<64x64xf32>
    %18 = arith.mulf %8, %17 : vector<64x64xf32>
    %19 = vector.broadcast %1 : vector<1x64xf32> to vector<64x64xf32>
    %20 = arith.mulf %18, %19 : vector<64x64xf32>
    %21 = vector.broadcast %2 : vector<1x64xf32> to vector<64x64xf32>
    %22 = arith.addf %20, %21 : vector<64x64xf32>
    %23 = arith.truncf %22 : vector<64x64xf32> to vector<64x64xbf16>
    %c0_9 = arith.constant 0 : index
    %c0_10 = arith.constant 0 : index
    %24 = vector.load %arg4[%c0_9, %c0_10] : memref<64x256xbf16, #tpu.memory_space<vmem>>, vector<64x256xbf16>
    %cst_11 = arith.constant dense<0.000000e+00> : vector<64x256xf32>
    %25 = tpu.matmul %23, %24, %cst_11 {dimension_numbers = #tpu.dot_dimension_numbers<[1], [0], [0], [1], [0, 0, 1, 1], [], []>} : vector<64x64xbf16>, vector<64x256xbf16>, vector<64x256xf32> -> vector<64x256xf32>
    %c0_12 = arith.constant 0 : index
    %c0_13 = arith.constant 0 : index
    %26 = vector.load %arg5[%c0_12, %c0_13] : memref<1x256xf32, #tpu.memory_space<vmem>>, vector<1x256xf32>
    %27 = vector.broadcast %26 : vector<1x256xf32> to vector<64x256xf32>
    %28 = arith.addf %25, %27 : vector<64x256xf32>
    %cst_14 = arith.constant 5.000000e-01 : f32
    %29 = vector.broadcast %cst_14 : f32 to vector<64x256xf32>
    %30 = arith.mulf %29, %28 : vector<64x256xf32>
    %cst_15 = arith.constant 0.707106769 : f32
    %31 = vector.broadcast %cst_15 : f32 to vector<64x256xf32>
    %32 = arith.mulf %28, %31 : vector<64x256xf32>
    %cst_16 = arith.constant 0.000000e+00 : f32
    %33 = vector.broadcast %cst_16 : f32 to vector<64x256xf32>
    %34 = arith.cmpf oge, %32, %33 : vector<64x256xf32>
    %cst_17 = arith.constant 1.000000e+00 : f32
    %cst_18 = arith.constant -1.000000e+00 : f32
    %35 = vector.broadcast %cst_17 : f32 to vector<64x256xf32>
    %36 = vector.broadcast %cst_18 : f32 to vector<64x256xf32>
    %37 = arith.select %34, %35, %36 : vector<64x256xi1>, vector<64x256xf32>
    %38 = math.absf %32 : vector<64x256xf32>
    %cst_19 = arith.constant 0.327591091 : f32
    %39 = vector.broadcast %cst_19 : f32 to vector<64x256xf32>
    %40 = arith.mulf %39, %38 : vector<64x256xf32>
    %cst_20 = arith.constant 1.000000e+00 : f32
    %41 = vector.broadcast %cst_20 : f32 to vector<64x256xf32>
    %42 = arith.addf %41, %40 : vector<64x256xf32>
    %cst_21 = arith.constant 1.000000e+00 : f32
    %43 = vector.broadcast %cst_21 : f32 to vector<64x256xf32>
    %44 = arith.divf %43, %42 : vector<64x256xf32>
    %cst_22 = arith.constant 1.06140542 : f32
    %45 = vector.broadcast %cst_22 : f32 to vector<64x256xf32>
    %46 = arith.mulf %45, %44 : vector<64x256xf32>
    %cst_23 = arith.constant -1.45315206 : f32
    %47 = vector.broadcast %cst_23 : f32 to vector<64x256xf32>
    %48 = arith.addf %46, %47 : vector<64x256xf32>
    %49 = arith.mulf %48, %44 : vector<64x256xf32>
    %cst_24 = arith.constant 1.42141378 : f32
    %50 = vector.broadcast %cst_24 : f32 to vector<64x256xf32>
    %51 = arith.addf %49, %50 : vector<64x256xf32>
    %52 = arith.mulf %51, %44 : vector<64x256xf32>
    %cst_25 = arith.constant -0.284496725 : f32
    %53 = vector.broadcast %cst_25 : f32 to vector<64x256xf32>
    %54 = arith.addf %52, %53 : vector<64x256xf32>
    %55 = arith.mulf %54, %44 : vector<64x256xf32>
    %cst_26 = arith.constant 0.254829586 : f32
    %56 = vector.broadcast %cst_26 : f32 to vector<64x256xf32>
    %57 = arith.addf %55, %56 : vector<64x256xf32>
    %58 = arith.mulf %57, %44 : vector<64x256xf32>
    %cst_27 = arith.constant 0.000000e+00 : f32
    %59 = vector.broadcast %cst_27 : f32 to vector<64x256xf32>
    %60 = arith.subf %59, %38 : vector<64x256xf32>
    %61 = arith.mulf %60, %38 : vector<64x256xf32>
    %62 = math.exp %61 : vector<64x256xf32>
    %63 = arith.mulf %58, %62 : vector<64x256xf32>
    %cst_28 = arith.constant 1.000000e+00 : f32
    %64 = vector.broadcast %cst_28 : f32 to vector<64x256xf32>
    %65 = arith.subf %64, %63 : vector<64x256xf32>
    %66 = arith.mulf %37, %65 : vector<64x256xf32>
    %cst_29 = arith.constant 1.000000e+00 : f32
    %67 = vector.broadcast %cst_29 : f32 to vector<64x256xf32>
    %68 = arith.addf %67, %66 : vector<64x256xf32>
    %69 = arith.mulf %30, %68 : vector<64x256xf32>
    %70 = arith.truncf %69 : vector<64x256xf32> to vector<64x256xbf16>
    %c0_30 = arith.constant 0 : index
    %c0_31 = arith.constant 0 : index
    %71 = vector.load %arg6[%c0_30, %c0_31] : memref<256x64xbf16, #tpu.memory_space<vmem>>, vector<256x64xbf16>
    %cst_32 = arith.constant dense<0.000000e+00> : vector<64x64xf32>
    %72 = tpu.matmul %70, %71, %cst_32 {dimension_numbers = #tpu.dot_dimension_numbers<[1], [0], [0], [1], [0, 0, 1, 1], [], []>} : vector<64x256xbf16>, vector<256x64xbf16>, vector<64x64xf32> -> vector<64x64xf32>
    %c0_33 = arith.constant 0 : index
    %c0_34 = arith.constant 0 : index
    %73 = vector.load %arg7[%c0_33, %c0_34] : memref<1x64xf32, #tpu.memory_space<vmem>>, vector<1x64xf32>
    %74 = vector.broadcast %73 : vector<1x64xf32> to vector<64x64xf32>
    %75 = arith.addf %72, %74 : vector<64x64xf32>
    %76 = arith.addf %0, %75 : vector<64x64xf32>
    %c0_35 = arith.constant 0 : index
    %c0_36 = arith.constant 0 : index
    %77 = vector.load %arg8[%c0_35, %c0_36] : memref<64x64xf32, #tpu.memory_space<vmem>>, vector<64x64xf32>
    tpu.vector_store %arg8[%c0_35, %c0_36], %76 {strides = array<i32>} : memref<64x64xf32, #tpu.memory_space<vmem>>, vector<64x64xf32>,
    return
  }
  func.func @transform_0(%arg0: i32) -> (i32, i32) {
    %c0_i32 = arith.constant 0 : i32
    %c0_i32_0 = arith.constant 0 : i32
    return %arg0, %c0_i32 : i32, i32
  }
  func.func @transform_1(%arg0: i32) -> (i32, i32) {
    %c0_i32 = arith.constant 0 : i32
    %c0_i32_0 = arith.constant 0 : i32
    %c0_i32_1 = arith.constant 0 : i32
    return %c0_i32, %c0_i32_0 : i32, i32
  }
  func.func @transform_2(%arg0: i32) -> (i32, i32) {
    %c0_i32 = arith.constant 0 : i32
    %c0_i32_0 = arith.constant 0 : i32
    %c0_i32_1 = arith.constant 0 : i32
    return %c0_i32, %c0_i32_0 : i32, i32
  }
  func.func @transform_3(%arg0: i32) -> (i32, i32) {
    %c0_i32 = arith.constant 0 : i32
    %c0_i32_0 = arith.constant 0 : i32
    %c0_i32_1 = arith.constant 0 : i32
    return %c0_i32, %c0_i32_0 : i32, i32
  }
  func.func @transform_4(%arg0: i32) -> (i32, i32) {
    %c0_i32 = arith.constant 0 : i32
    %c0_i32_0 = arith.constant 0 : i32
    %c0_i32_1 = arith.constant 0 : i32
    return %c0_i32, %c0_i32_0 : i32, i32
  }
  func.func @transform_5(%arg0: i32) -> (i32, i32) {
    %c0_i32 = arith.constant 0 : i32
    %c0_i32_0 = arith.constant 0 : i32
    %c0_i32_1 = arith.constant 0 : i32
    return %c0_i32, %c0_i32_0 : i32, i32
  }
  func.func @transform_6(%arg0: i32) -> (i32, i32) {
    %c0_i32 = arith.constant 0 : i32
    %c0_i32_0 = arith.constant 0 : i32
    %c0_i32_1 = arith.constant 0 : i32
    return %c0_i32, %c0_i32_0 : i32, i32
  }
  func.func @transform_7(%arg0: i32) -> (i32, i32) {
    %c0_i32 = arith.constant 0 : i32
    %c0_i32_0 = arith.constant 0 : i32
    return %arg0, %c0_i32 : i32, i32
  }
}

</mosaic_0001>

<bundles_post_ra>
// kernel: ico_slide3d_forward.10
= control target key start
LH: loop header
LB: loop body
LE: loop exit
PB: predicated region body
PF: predicated region fallthrough
CT: control target
= control target key end

     0   :  { %9 = vsyncpa [#allocation3], 0  ;;  %s806_s0 = inlined_call_operand.vmem [shape: bf16[128,64], index: 0, kind: input, shape index: {}]   ;;  %s807_s1 = inlined_call_operand.hbm [shape: f32[128,64], index: 1, kind: input, shape index: {}]   ;;  %s808_s2 = inlined_call_operand.vmem [shape: bf16[64,64], index: 2, kind: input, shape index: {}]   ;;  %s809_s3 = inlined_call_operand.vmem [shape: f32[1,64], index: 3, kind: input, shape index: {}]   ;;  %s810_s4 = inlined_call_operand.vmem [shape: f32[128,64], index: 4, kind: output, shape index: {}]  }
   0x1   :  { %11 = vsyncpa [#allocation3 + $0x1], 0  ;;  %s661_s15 = smov 0   ;;  %s663_s16 = smov 0  }
   0x2   :  { %s665_s17 = smov 0   ;;  %s667_s18 = smov 0  }
   0x3 LB: > { %s454_s19 = sadd.s32 4294967295, %s632_s18   ;;  %s681_s20 = sadd.s32 1, %s632_s18   ;;  %s632_s18 = sphi %s667_s18, %s817_s18   ;;  %s628_s17 = sphi %s665_s17, %s816_s17   ;;  %s624_s16 = sphi %s663_s16, %s815_s16   ;;  %s620_s15 = sphi %s661_s15, %s814_s15  }
   0x4   : > { %s47_s21 = ssub.s32 %s632_s18, %s681_s20  ;;  %s50_s22 = sadd.s32 1, %s628_s17 }
   0x5   : > { %p48_p0 = scmp.eq.s32.totalorder %s47_s21, 0  ;;  %p57_p1 = scmp.ne.s32.totalorder %s628_s17, %s624_s16 }
   0x6   : > { %p58_p2 = scmp.eq.s32.totalorder %s632_s18, 0  ;;  %p63_p3 = scmp.ne.s32.totalorder %s624_s16, %s620_s15 }
   0x7   : > { %s691_s23 = scalar_select %p48_p0, %s628_s17, %s50_s22  }
   0x8   : > { %p693_p4 = por %p58_p2, %p57_p1  ;;  %p64_p5 = scmp.eq.s32.totalorder %s454_s19, 0 }
   0x9   : > { %p532_p6 = scmp.lt.s32.totalorder %s632_s18, 2  ;;  %s170_s26 = sand.u32 1, %s628_s17  }
   0xa   : > { %p700_p7 = por %p64_p5, %p63_p3  ;;  %s458_s27 = sshll.u32 %s170_s26, 6 }
   0xb   : > { %s505_s28 = sshll.u32 %s632_s18, 6  ;;  %s174_s6 = scalar_lea.vmem [#allocation2], %s458_s27 }
   0xc   : > { %s179_s5 = scalar_lea.hbm %s807_s1, %s505_s28  ;;  %s182_s7 = sshll.u32 %s174_s6, 4  ;;  %s183_s7 = int_to_ptr.vmem [resolvable:$true] %s182_s7 }
   0xd   : > { %s180_s8 = sshll.u32 %s179_s5, 4  ;;  %p711_p8 = pnand %p532_p6, %p693_p4  ;;  %s181_s8 = int_to_ptr.hbm [resolvable:$true] %s180_s8 }
   0xe   : > { %p461_p9 = scmp.ge.s32.totalorder %s632_s18, 1  ;;  %s171_s10 = scalar_lea.sflag [#allocation3], %s170_s26 }
   0xf   : > { %s568_s11 = sshra.s32 %s181_s8, 4  ;;  %p572_p11 = pneg %p711_p8  ;;  %s569_s11 = int_to_ptr.hbm [resolvable:$true] %s568_s11 }
  0x10   : > { %s570_s12 = scalar_lea.hbm %s569_s11, 64  ;;  %s575_s15 = scalar_lea.hbm %s807_s1, 128 }
  0x11   : > { %p571_p10 = scmp.ne.s32.totalorder %s569_s11, %s570_s12  ;;  %p576_p0 = scmp.lt.s32.totalorder %s569_s11, %s807_s1 }
  0x12   : > { %p577_p1 = scmp.lt.s32.totalorder %s575_s15, %s570_s12 }
  0x13   : > { %p573_p12 = pnand %p572_p11, %p571_p10 }
  0x14   : > { %p578_p2 = por %p577_p1, %p576_p0 }
  0x15   : > { %p574_p13 = pneg %p573_p12 }
  0x17   : > { %p579_p3 = pnand %p578_p2, %p574_p13 }
  0x19   : > { %582 = shalt.err (!%p579_p3)
}
  0x1a   : > { %s634_s24 = smov 128   ;;  %s635_s26 = smov 8  }
  0x1b   : > { %531 = dma.hbm_to_vmem [thread:$0]  (!%p711_p8), %s181_s8, 1024, %s183_s7, %s171_s10, %s634_s24, %s634_s24, %s635_s26  }
  0x1c   : > { %p190_p4 = scmp.lt.s32.totalorder %s632_s18, 3 }
  0x1e   : > { %p191_p5 = pnand %p461_p9, %p190_p4 }
  0x1f   : > { %s196_s27 = sand.u32 (!%p191_p5), 1, %s624_s16  }
  0x20   : > { %194 = sbr.rel (%p191_p5) target bundleno = 201 (0xc9), region = 36  ;;  %s462_s28 = sshll.u32 (!%p191_p5), %s196_s27, 6 }
  0x21   : > { %s197_s29 = scalar_lea.sflag (!%p191_p5), [#allocation3], %s196_s27  ;;  %s730_s30 = scalar_lea.vmem (!%p191_p5), [#allocation2], %s462_s28 }
  0x25   : > { %615 = dma.done.wait (%p700_p7), %s197_s29, 1024  }
  0x26   : > { %617 = vsyncadd (%p700_p7), %s197_s29, 4294966272  ;;  %s463_s5 = sshll.u32 %s454_s19, 3  ;;  %v513_v0 = vld [vmem:[%s808_s2 + $0x18] sm:$0xff]  ;;  %v512_v1 = vld [vmem:[%s808_s2 + $0x10] sm:$0xff]  ;;  %vm309_vm0 = vcmask 523264  }
  0x27   : > { %p232_p6 = scmp.lt.s32.totalorder %s463_s5, 15  ;;  %326 = vmatpush.bf16.msra.mxu0 %v513_v0  ;;  %514 = vmatpush.bf16.msra.mxu1 %v513_v0  ;;  %v511_v2 = vld [vmem:[%s808_s2 + $0x8] sm:$0xff]  ;;  %v510_v3 = vld [vmem:[%s808_s2] sm:$0xff]  ;;  %v353_v12 = vld [vmem:[%s730_s30 + $0x10] sm:$0xff] }
  0x28   : > { %515 = vmatpush.bf16.msra.mxu2 %v513_v0  ;;  %516 = vmatpush.bf16.msra.mxu3 %v513_v0  ;;  %v567_v8 = vld [vmem:[%s809_s3] ss:$0 sm:$0xff]  ;;  %v357_v20 = vld [vmem:[%s730_s30 + $0x30] sm:$0xff]  ;;  %v352_v24 = vld [vmem:[%s730_s30 + $0x8] sm:$0xff] }
  0x29   : > { %s819_s5 = smov (!%p232_p6, %s463_s5), 15  ;;  %v351_v10 = vld [vmem:[%s730_s30] sm:$0xff]  ;;  %v354_v26 = vld [vmem:[%s730_s30 + $0x18] sm:$0xff]  ;;  %v356_v34 = vld [vmem:[%s730_s30 + $0x28] sm:$0xff] }
  0x2a   : > { %s464_s25 = sshll.u32 %s819_s5, 2  ;;  %s466_s22 = sshll.u32 %s819_s5, 3  ;;  %v355_v18 = vld [vmem:[%s730_s30 + $0x20] sm:$0xff]  ;;  %v358_v36 = vld [vmem:[%s730_s30 + $0x38] sm:$0xff] }
  0x2b   : > { %327 = vmatpush.bf16.msra.mxu0 %v512_v1  ;;  %517 = vmatpush.bf16.msra.mxu1 %v512_v1  ;;  %s235_s14 = scalar_lea.vmem %s806_s0, %s464_s25  ;;  %s769_s27 = scalar_lea.vmem %s810_s4, %s466_s22 }
  0x2c   : > { %518 = vmatpush.bf16.msra.mxu2 %v512_v1  ;;  %519 = vmatpush.bf16.msra.mxu3 %v512_v1  ;;  %v506_v4 = vld [vmem:[%s235_s14] sm:$0xff]  ;;  %v507_v5 = vld [vmem:[%s235_s14 + $0x8] sm:$0xff]  ;;  %v508_v6 = vld [vmem:[%s235_s14 + $0x10] sm:$0xff] }
  0x2d   : > { %v509_v7 = vld [vmem:[%s235_s14 + $0x18] sm:$0xff] }
  0x2f   : > { %328 = vmatpush.bf16.msra.mxu0 %v511_v2  ;;  %520 = vmatpush.bf16.msra.mxu1 %v511_v2 }
  0x30   : > { %521 = vmatpush.bf16.msra.mxu2 %v511_v2  ;;  %522 = vmatpush.bf16.msra.mxu3 %v511_v2 }
  0x33   : > { %329 = vmatpush.bf16.msra.mxu0 %v510_v3  ;;  %523 = vmatpush.bf16.msra.mxu1 %v510_v3 }
  0x34   : > { %524 = vmatpush.bf16.msra.mxu2 %v510_v3  ;;  %525 = vmatpush.bf16.msra.mxu3 %v510_v3 }
  0x36   : > { %499 = vmatmul.msk.bf16.vlgmr.msra.gmra.mxu0 %vm309_vm0, %v506_v4  ;;  %500 = vmatmul.msk.bf16.vlgmr.msra.gmra.mxu1 %vm309_vm0, %v507_v5 }
  0x37   : > { %501 = vmatmul.msk.bf16.vlgmr.msra.gmra.mxu2 %vm309_vm0, %v508_v6  ;;  %502 = vmatmul.msk.bf16.vlgmr.msra.gmra.mxu3 %vm309_vm0, %v509_v7 }
  0xb3   : > { %v331_v9 = vpop.f32.mrf.mxu0  ;;  %v336_v11 = vpop.f32.mrf.mxu1 }
  0xb4   : > { %v332_v13 = vadd.f32 %v567_v8, %v331_v9  ;;  %v337_v14 = vadd.f32 %v567_v8, %v336_v11 }
  0xb6   : > { %v359_v15 = vadd.f32 %v351_v10, %v332_v13  ;;  %v361_v16 = vadd.f32 %v353_v12, %v337_v14 }
  0xb8   : > { %367 = vst.msk [vmem:[%s769_s27] sm:$0xff] %vm309_vm0, %v359_v15 }
  0xb9   : > { %369 = vst.msk [vmem:[%s769_s27 + $0x10] sm:$0xff] %vm309_vm0, %v361_v16 }
  0xba   : > { %v341_v17 = vpop.f32.mrf.mxu2  ;;  %v346_v19 = vpop.f32.mrf.mxu3 }
  0xbb   : > { %v342_v21 = vadd.f32 %v567_v8, %v341_v17  ;;  %v347_v22 = vadd.f32 %v567_v8, %v346_v19  ;;  %v333_v23 = vpop.f32.mrf.mxu0  ;;  %v338_v25 = vpop.f32.mrf.mxu1 }
  0xbc   : > { %v334_v27 = vadd.f32 %v567_v8, %v333_v23  ;;  %v339_v28 = vadd.f32 %v567_v8, %v338_v25 }
  0xbd   : > { %v363_v29 = vadd.f32 %v355_v18, %v342_v21  ;;  %v365_v30 = vadd.f32 %v357_v20, %v347_v22 }
  0xbe   : > { %v360_v31 = vadd.f32 %v352_v24, %v334_v27  ;;  %v362_v32 = vadd.f32 %v354_v26, %v339_v28 }
  0xbf   : > { %371 = vst.msk [vmem:[%s769_s27 + $0x20] sm:$0xff] %vm309_vm0, %v363_v29 }
  0xc0   : > { %373 = vst.msk [vmem:[%s769_s27 + $0x30] sm:$0xff] %vm309_vm0, %v365_v30 }
  0xc1   : > { %368 = vst.msk [vmem:[%s769_s27 + $0x8] sm:$0xff] %vm309_vm0, %v360_v31 }
  0xc2   : > { %370 = vst.msk [vmem:[%s769_s27 + $0x18] sm:$0xff] %vm309_vm0, %v362_v32  ;;  %v343_v33 = vpop.f32.mrf.mxu2  ;;  %v348_v35 = vpop.f32.mrf.mxu3 }
  0xc3   : > { %v344_v37 = vadd.f32 %v567_v8, %v343_v33  ;;  %v349_v38 = vadd.f32 %v567_v8, %v348_v35 }
  0xc5   : > { %v364_v39 = vadd.f32 %v356_v34, %v344_v37  ;;  %v366_v40 = vadd.f32 %v358_v36, %v349_v38 }
  0xc7   : > { %372 = vst.msk [vmem:[%s769_s27 + $0x28] sm:$0xff] %vm309_vm0, %v364_v39 }
  0xc8   : > { %374 = vst.msk [vmem:[%s769_s27 + $0x38] sm:$0xff] %vm309_vm0, %v366_v40 }
  0xc9 PF: > { %p14_p7 = scmp.ge.s32.totalorder %s681_s20, 4   ;;  %s814_s15 = smov %s624_s16 }
  0xca   : > { %s815_s16 = smov %s628_s17  ;;  %s816_s17 = smov %s691_s23 }
  0xcb   : > { %s817_s18 = smov %s681_s20  ;;  %16 = sbr.rel (!%p14_p7) target bundleno = 3 (0x3), region = 79 }
  0xd0   :  { %397 = vsyncpa [#allocation3], 1 }
  0xd1   :  { %399 = vsyncpa [#allocation3 + $0x1], 1 }

// kernel: ico_slide3d_forward.8
= control target key start
LH: loop header
LB: loop body
LE: loop exit
PB: predicated region body
PF: predicated region fallthrough
CT: control target
= control target key end

     0   :  { %s1973_s0 = inlined_call_operand.hbm [shape: f32[128,64], index: 0, kind: input, shape index: {}]   ;;  %s1974_s1 = inlined_call_operand.vmem [shape: f32[1,64], index: 1, kind: input, shape index: {}]   ;;  %s1975_s2 = inlined_call_operand.vmem [shape: f32[1,64], index: 2, kind: input, shape index: {}]   ;;  %s1976_s3 = inlined_call_operand.hbm [shape: bf16[64,64], index: 3, kind: input, shape index: {}]   ;;  %s1977_s4 = inlined_call_operand.hbm [shape: bf16[64,64], index: 4, kind: input, shape index: {}]   ;;  %s1978_s5 = inlined_call_operand.hbm [shape: bf16[64,64], index: 5, kind: input, shape index: {}]   ;;  %s1979_s6 = inlined_call_operand.vmem [shape: f32[1,64], index: 6, kind: input, shape index: {}]   ;;  %s1980_s7 = inlined_call_operand.vmem [shape: f32[1,64], index: 7, kind: input, shape index: {}]   ;;  %s1981_s8 = inlined_call_operand.vmem [shape: f32[1,64], index: 8, kind: input, shape index: {}]   ;;  %s1982_s9 = inlined_call_operand.vmem [shape: bf16[128,64], index: 9, kind: output, shape index: {0}]   ;;  %s1983_s10 = inlined_call_operand.vmem [shape: bf16[128,64], index: 10, kind: output, shape index: {1}]   ;;  %s1984_s11 = inlined_call_operand.vmem [shape: bf16[128,64], index: 11, kind: output, shape index: {2}]  }
   0x1   :  { %1986 = sst [smem:[#allocation12_spill]] %s1976_s3 }
   0x2   :  { %1987 = sst [smem:[#allocation13_spill]] %s1977_s4 }
   0x3   :  { %1988 = sst [smem:[#allocation14_spill]] %s1978_s5 }
   0x4   :  { %1989 = sst [smem:[#allocation15_spill]] %s1984_s11 }
   0x5   :  { %17 = vsyncpa [#allocation3], 0 }
   0x6   :  { %19 = vsyncpa [#allocation3 + $0x1], 0 }
   0x7   :  { %20 = vsyncpa [#allocation5], 0 }
   0x8   :  { %21 = vsyncpa [#allocation8], 0  ;;  %s1567_s17 = smov 0   ;;  %s1569_s18 = smov 0  }
   0x9   :  { %s1571_s19 = smov 0   ;;  %s1573_s20 = smov 0  }
   0xa LB: > { %s1985_s21 = sadd.s32 4294967295, %s1497_s20   ;;  %p47_p0 = scmp.ne.s32.totalorder %s1489_s18, %s1485_s17  ;;  %s1497_s20 = sphi %s1573_s20, %s2008_s20   ;;  %s1493_s19 = sphi %s1571_s19, %s2007_s19   ;;  %s1489_s18 = sphi %s1569_s18, %s2006_s18   ;;  %s1485_s17 = sphi %s1567_s17, %s2005_s17  }
   0xb   : > { %p1589_p1 = scmp.eq.s32.totalorder %s1985_s21, 0  ;;  %p1131_p2 = scmp.ge.s32.totalorder %s1497_s20, 1 }
   0xc   : > { %p304_p3 = scmp.lt.s32.totalorder %s1497_s20, 3  ;;  %s1992_s3 = sld [smem:[#allocation12_spill]] }
   0xd   : > { %p1597_p4 = por %p1589_p1, %p47_p0  ;;  %s1499_s28 = smov [#allocation4]  }
   0xe   : > { %p1604_p5 = pnand %p1131_p2, %p304_p3  ;;  %s323_s29 = sshll.u32 %s1499_s28, 4  ;;  %s324_s29 = int_to_ptr.vmem [resolvable:$true] %s323_s29 }
   0xf   : > { %s1995_s4 = sld [smem:[#allocation13_spill]]  ;;  %s1500_s15 = smov 64  }
  0x10   : > { %p1251_p6 = pneg %p1604_p5  ;;  %s1501_s16 = smov 4  }
  0x11   : > { %s1502_s17 = smov [#allocation6]   ;;  %s1996_s5 = sld [smem:[#allocation14_spill]] }
  0x12   : > { %s321_s26 = sshll.u32 %s1992_s3, 4  ;;  %p1612_p7 = pnand %p1251_p6, %p1589_p1  ;;  %s322_s26 = int_to_ptr.hbm [resolvable:$true] %s321_s26 }
  0x13   : > { %s337_s24 = sshll.u32 %s1502_s17, 4  ;;  %s1503_s13 = smov [#allocation7]   ;;  %s338_s24 = int_to_ptr.vmem [resolvable:$true] %s337_s24 }
  0x14   : > { %1254 = dma.hbm_to_vmem [thread:$0]  (!%p1612_p7), %s322_s26, 512, %s324_s29, [#allocation5], %s1500_s15, %s1500_s15, %s1501_s16  }
  0x15   : > { %s335_s14 = sshll.u32 %s1995_s4, 4  ;;  %s351_s21 = sshll.u32 %s1503_s13, 4  ;;  %s336_s14 = int_to_ptr.hbm [resolvable:$true] %s335_s14  ;;  %s352_s21 = int_to_ptr.vmem [resolvable:$true] %s351_s21 }
  0x16   : > { %1257 = dma.hbm_to_vmem [thread:$0]  (!%p1612_p7), %s336_s14, 512, %s338_s24, [#allocation5], %s1500_s15, %s1500_s15, %s1501_s16  }
  0x17   : > { %s349_s12 = sshll.u32 %s1996_s5, 4  ;;  %s1627_s3 = sadd.s32 1, %s1497_s20   ;;  %s350_s12 = int_to_ptr.hbm [resolvable:$true] %s349_s12 }
  0x18   : > { %1260 = dma.hbm_to_vmem [thread:$0]  (!%p1612_p7), %s350_s12, 512, %s352_s21, [#allocation8], %s1500_s15, %s1500_s15, %s1501_s16  }
  0x19   : > { %s31_s26 = ssub.s32 %s1497_s20, %s1627_s3  ;;  %s34_s29 = sadd.s32 1, %s1493_s19 }
  0x1a   : > { %p32_p8 = scmp.eq.s32.totalorder %s31_s26, 0  ;;  %p41_p9 = scmp.ne.s32.totalorder %s1493_s19, %s1489_s18 }
  0x1b   : > { %p42_p10 = scmp.eq.s32.totalorder %s1497_s20, 0  ;;  %p1268_p11 = scmp.lt.s32.totalorder %s1497_s20, 2 }
  0x1c   : > { %s1639_s17 = scalar_select %p32_p8, %s1493_s19, %s34_s29  }
  0x1d   : > { %p43_p12 = por %p42_p10, %p41_p9  ;;  %s374_s25 = sand.u32 1, %s1493_s19  }
  0x1e   : > { %s1136_s14 = sshll.u32 %s374_s25, 6  ;;  %s1212_s24 = sshll.u32 %s1497_s20, 6 }
  0x1f   : > { %s383_s4 = scalar_lea.hbm %s1973_s0, %s1212_s24  ;;  %s378_s5 = scalar_lea.vmem [#allocation2], %s1136_s14 }
  0x20   : > { %s386_s30 = sshll.u32 %s378_s5, 4  ;;  %s384_s11 = sshll.u32 %s383_s4, 4  ;;  %s387_s30 = int_to_ptr.vmem [resolvable:$true] %s386_s30  ;;  %s385_s11 = int_to_ptr.hbm [resolvable:$true] %s384_s11 }
  0x21   : > { %p1646_p13 = pnand %p1268_p11, %p43_p12  ;;  %s375_s15 = scalar_lea.sflag [#allocation3], %s374_s25 }
  0x22   : > { %s1425_s16 = sshra.s32 %s385_s11, 4  ;;  %s1432_s4 = scalar_lea.hbm %s1973_s0, 128  ;;  %s1426_s16 = int_to_ptr.hbm [resolvable:$true] %s1425_s16 }
  0x23   : > { %s1427_s12 = scalar_lea.hbm %s1426_s16, 64  ;;  %p1429_p2 = pneg %p1646_p13 }
  0x24   : > { %p1428_p0 = scmp.ne.s32.totalorder %s1426_s16, %s1427_s12  ;;  %p1433_p7 = scmp.lt.s32.totalorder %s1426_s16, %s1973_s0 }
  0x25   : > { %p1434_p8 = scmp.lt.s32.totalorder %s1432_s4, %s1427_s12 }
  0x26   : > { %p1430_p3 = pnand %p1429_p2, %p1428_p0 }
  0x27   : > { %p1435_p9 = por %p1434_p8, %p1433_p7 }
  0x28   : > { %p1431_p6 = pneg %p1430_p3 }
  0x2a   : > { %p1436_p10 = pnand %p1435_p9, %p1431_p6 }
  0x2c   : > { %1439 = shalt.err (!%p1436_p10)
}
  0x2d   : > { %s1504_s25 = smov 128   ;;  %s1505_s24 = smov 8  }
  0x2e   : > { %1264 = dma.hbm_to_vmem [thread:$0]  (!%p1646_p13), %s385_s11, 1024, %s387_s30, %s375_s15, %s1504_s25, %s1504_s25, %s1505_s24  }
  0x2f   : > { %398 = sbr.rel (%p1604_p5) target bundleno = 514 (0x202), region = 56  ;;  %s400_s28 = sand.u32 (!%p1604_p5), 1, %s1489_s18  }
  0x30   : > { %s1140_s13 = sshll.u32 (!%p1604_p5), %s400_s28, 6  ;;  %s401_s26 = scalar_lea.sflag (!%p1604_p5), [#allocation3], %s400_s28 }
  0x31   : > { %s404_s29 = scalar_lea.vmem (!%p1604_p5), [#allocation2], %s1140_s13 }
  0x34   : > { %1472 = dma.done.wait (%p1597_p4), %s401_s26, 1024  }
  0x35   : > { %1474 = vsyncadd (%p1597_p4), %s401_s26, 4294966272 }
  0x36   : > { %1476 = dma.done.wait (%p1589_p1), [#allocation5], 1024  }
  0x37   : > { %1478 = vsyncadd (%p1589_p1), [#allocation5], 4294966272 }
  0x38   : > { %1480 = dma.done.wait (%p1589_p1), [#allocation8], 512  }
  0x39   : > { %1482 = vsyncadd (%p1589_p1), [#allocation8], 4294966784  ;;  %vm499_vm0 = vcmask 523264   ;;  %v493_v0 = vld [vmem:[%s404_s29 + $0x20] sm:$0xff]  ;;  %v491_v1 = vld [vmem:[%s404_s29 + $0x10] sm:$0xff]  ;;  %v1506_v16 = vmov 64.0  }
  0x3a   : > { %v489_v2 = vld [vmem:[%s404_s29] sm:$0xff]  ;;  %v512_v3 = vsel %vm499_vm0, %v493_v0, 0.0  ;;  %v506_v4 = vsel %vm499_vm0, %v491_v1, 0.0  ;;  %v494_v6 = vld [vmem:[%s404_s29 + $0x28] sm:$0xff]  ;;  %v492_v7 = vld [vmem:[%s404_s29 + $0x18] sm:$0xff]  ;;  %1317 = vrcp.f32 %v1506_v16  ;;  %s2002_s30 = sadd.s32 4294967295, %s1497_s20  }
  0x3b   : > { %v500_v5 = vsel %vm499_vm0, %v489_v2, 0.0  ;;  %513 = vadd.xlane.f32.xlu2 %v512_v3  ;;  %507 = vadd.xlane.f32.xlu0 %v506_v4  ;;  %v490_v8 = vld [vmem:[%s404_s29 + $0x8] sm:$0xff]  ;;  %v515_v9 = vsel %vm499_vm0, %v494_v6, 0.0  ;;  %v509_v10 = vsel %vm499_vm0, %v492_v7, 0.0  ;;  %v495_v12 = vld [vmem:[%s404_s29 + $0x30] sm:$0xff]  ;;  %v496_v13 = vld [vmem:[%s404_s29 + $0x38] sm:$0xff] }
  0x3c   : > { %501 = vadd.xlane.f32.xlu1 %v500_v5  ;;  %v503_v11 = vsel %vm499_vm0, %v490_v8, 0.0  ;;  %v518_v14 = vsel %vm499_vm0, %v495_v12, 0.0  ;;  %v521_v15 = vsel %vm499_vm0, %v496_v13, 0.0  ;;  %v1216_v63 = vld [vmem:[#allocation4 + $0x18] sm:$0xff]  ;;  %v1219_v3 = vld [vmem:[#allocation6 + $0x10] sm:$0xff]  ;;  %v1744_v16 = vld [vmem:[#allocation7] sm:$0xff] }
  0x3d   : > { %761 = vmatpush.bf16.msra.mxu0 %v1216_v63  ;;  %1225 = vmatpush.bf16.msra.mxu3 %v1216_v63  ;;  %v1736_v4 = vld [vmem:[#allocation7 + $0x10] sm:$0xff]  ;;  %s1144_s21 = sshll.u32 %s2002_s30, 3  ;;  %s2003_s23 = sld [smem:[#allocation15_spill]] }
  0x3e   : > { %p471_p1 = scmp.lt.s32.totalorder %s1144_s21, 15 }
  0x40   : > { %v1318_v17 = vpop.eup %1317  ;;  %s2010_s21 = smov (!%p471_p1, %s1144_s21), 15 }
  0x41   : > { %v525_v18 = vmul.f32 64.0, %v1318_v17  ;;  %vm529_vm1 = vweird.f32 %v1318_v17  ;;  %s1145_s5 = sshll.u32 %s2010_s21, 2 }
  0x42   : > { %s1873_s25 = scalar_lea.vmem %s1983_s10, %s1145_s5  ;;  %s1878_s13 = scalar_lea.vmem %s1982_s9, %s1145_s5 }
  0x43   : > { %516 = vadd.xlane.f32.xlu2 %v515_v9  ;;  %510 = vadd.xlane.f32.xlu0 %v509_v10  ;;  %v526_v19 = vsub.f32 1.0, %v525_v18  ;;  %v1218_v9 = vld [vmem:[#allocation6 + $0x8] sm:$0xff]  ;;  %s1894_s27 = scalar_lea.vmem %s2003_s23, %s1145_s5 }
  0x44   : > { %504 = vadd.xlane.f32.xlu1 %v503_v11  ;;  %v1740_v10 = vld [vmem:[#allocation7 + $0x8] sm:$0xff] }
  0x45   : > { %v527_v20 = vmul.f32 %v1318_v17, %v526_v19 }
  0x47   : > { %v528_v21 = vadd.f32 %v1318_v17, %v527_v20 }
  0x49   : > { %v1683_v22 = vsel %vm529_vm1, %v1318_v17, %v528_v21 }
  0x4b   : > { %519 = vadd.xlane.f32.xlu0 %v518_v14  ;;  %v1213_v14 = vld [vmem:[#allocation4] sm:$0xff] }
  0x4c   : > { %522 = vadd.xlane.f32.xlu1 %v521_v15  ;;  %v1217_v15 = vld [vmem:[#allocation6] sm:$0xff] }
  0xae   : > { %v514_v23 = vpop.xlane.xlu2 %513  ;;  %v508_v24 = vpop.xlane.xlu0 %507 }
  0xaf   : > { %v533_v25 = vmul.f32 %v1683_v22, %v508_v24  ;;  %v502_v26 = vpop.xlane.xlu1 %501  ;;  %v535_v36 = vmul.f32 %v1683_v22, %v514_v23 }
  0xb0   : > { %v531_v27 = vmul.f32 %v1683_v22, %v502_v26 }
  0xb1   : > { %v1687_v28 = vsub.f32 %v491_v1, %v533_v25  ;;  %v1707_v44 = vsub.f32 %v493_v0, %v535_v36  ;;  %v1220_v0 = vld [vmem:[#allocation6 + $0x18] sm:$0xff] }
  0xb2   : > { %v1689_v29 = vsub.f32 %v489_v2, %v531_v27  ;;  %v1733_v1 = vld [vmem:[#allocation7 + $0x18] sm:$0xff]  ;;  %1229 = vmatpush.bf16.msra.mxu1 %v1220_v0  ;;  %v1215_v2 = vld [vmem:[#allocation4 + $0x10] sm:$0xff] }
  0xb3   : > { %v549_v30 = vmul.f32 %v1687_v28, %v1687_v28  ;;  %v551_v53 = vmul.f32 %v1707_v44, %v1707_v44  ;;  %1233 = vmatpush.bf16.msra.mxu2 %v1733_v1  ;;  %762 = vmatpush.bf16.msra.mxu0 %v1215_v2 }
  0xb4   : > { %v547_v31 = vmul.f32 %v1689_v29, %v1689_v29  ;;  %1226 = vmatpush.bf16.msra.mxu3 %v1215_v2 }
  0xb5   : > { %v561_v32 = vsel %vm499_vm0, %v549_v30, 0.0  ;;  %v567_v57 = vsel %vm499_vm0, %v551_v53, 0.0 }
  0xb6   : > { %v517_v33 = vpop.xlane.xlu2 %516  ;;  %562 = vadd.xlane.f32.xlu2 %v561_v32  ;;  %v511_v34 = vpop.xlane.xlu0 %510  ;;  %v555_v35 = vsel %vm499_vm0, %v547_v31, 0.0  ;;  %1230 = vmatpush.bf16.msra.mxu1 %v1219_v3 }
  0xb7   : > { %v536_v37 = vmul.f32 %v1683_v22, %v517_v33  ;;  %v534_v38 = vmul.f32 %v1683_v22, %v511_v34  ;;  %556 = vadd.xlane.f32.xlu1 %v555_v35  ;;  %v505_v39 = vpop.xlane.xlu1 %504  ;;  %1234 = vmatpush.bf16.msra.mxu2 %v1736_v4 }
  0xb8   : > { %v532_v40 = vmul.f32 %v1683_v22, %v505_v39 }
  0xb9   : > { %v1701_v41 = vsub.f32 %v494_v6, %v536_v37  ;;  %v1703_v42 = vsub.f32 %v492_v7, %v534_v38 }
  0xba   : > { %v1705_v43 = vsub.f32 %v490_v8, %v532_v40  ;;  %v1214_v8 = vld [vmem:[#allocation4 + $0x8] sm:$0xff]  ;;  %1231 = vmatpush.bf16.msra.mxu1 %v1218_v9 }
  0xbb   : > { %v550_v45 = vmul.f32 %v1703_v42, %v1703_v42  ;;  %v552_v46 = vmul.f32 %v1701_v41, %v1701_v41  ;;  %763 = vmatpush.bf16.msra.mxu0 %v1214_v8  ;;  %1227 = vmatpush.bf16.msra.mxu3 %v1214_v8 }
  0xbc   : > { %v548_v47 = vmul.f32 %v1705_v43, %v1705_v43  ;;  %1235 = vmatpush.bf16.msra.mxu2 %v1740_v10 }
  0xbd   : > { %v564_v48 = vsel %vm499_vm0, %v550_v45, 0.0  ;;  %v570_v49 = vsel %vm499_vm0, %v552_v46, 0.0 }
  0xbe   : > { %565 = vadd.xlane.f32.xlu0 %v564_v48  ;;  %v520_v50 = vpop.xlane.xlu0 %519  ;;  %v558_v51 = vsel %vm499_vm0, %v548_v47, 0.0  ;;  %1232 = vmatpush.bf16.msra.mxu1 %v1217_v15 }
  0xbf   : > { %v537_v52 = vmul.f32 %v1683_v22, %v520_v50  ;;  %571 = vadd.xlane.f32.xlu1 %v570_v49  ;;  %559 = vadd.xlane.f32.xlu2 %v558_v51  ;;  %v523_v54 = vpop.xlane.xlu1 %522 }
  0xc0   : > { %v538_v55 = vmul.f32 %v1683_v22, %v523_v54  ;;  %764 = vmatpush.bf16.msra.mxu0 %v1213_v14  ;;  %1228 = vmatpush.bf16.msra.mxu3 %v1213_v14 }
  0xc1   : > { %v1722_v56 = vsub.f32 %v495_v12, %v537_v52  ;;  %1236 = vmatpush.bf16.msra.mxu2 %v1744_v16 }
  0xc2   : > { %v1727_v59 = vsub.f32 %v496_v13, %v538_v55 }
  0xc3   : > { %v553_v58 = vmul.f32 %v1722_v56, %v1722_v56 }
  0xc4   : > { %v554_v61 = vmul.f32 %v1727_v59, %v1727_v59  ;;  %826 = vmatpush.bf16.msrb.mxu0 %v1220_v0 }
  0xc5   : > { %v573_v60 = vsel %vm499_vm0, %v553_v58, 0.0 }
  0xc6   : > { %568 = vadd.xlane.f32.xlu0 %v567_v57  ;;  %v576_v62 = vsel %vm499_vm0, %v554_v61, 0.0 }
  0xc7   : > { %574 = vadd.xlane.f32.xlu2 %v573_v60 }
  0xc8   : > { %827 = vmatpush.bf16.msrb.mxu0 %v1219_v3 }
  0xcc   : > { %828 = vmatpush.bf16.msrb.mxu0 %v1218_v9 }
  0xce   : > { %577 = vadd.xlane.f32.xlu0 %v576_v62 }
  0xd0   : > { %829 = vmatpush.bf16.msrb.mxu0 %v1217_v15 }
 0x129   : > { %v563_v5 = vpop.xlane.xlu2 %562 }
 0x12a   : > { %v581_v6 = vmul.f32 %v563_v5, %v1683_v22  ;;  %v557_v7 = vpop.xlane.xlu1 %556 }
 0x12b   : > { %v579_v11 = vmul.f32 %v557_v7, %v1683_v22 }
 0x12c   : > { %v589_v12 = vadd.f32 1e-05, %v581_v6 }
 0x12d   : > { %v587_v13 = vadd.f32 1e-05, %v579_v11  ;;  %v1787_v11 = vld [vmem:[%s1974_s1] ss:$0 sm:$0xff] }
 0x12e   : > { %1319 = vrsqrt.f32 %v589_v12  ;;  %vm621_vm5 = vweird.f32 %v589_v12 }
 0x12f   : > { %1321 = vrsqrt.f32 %v587_v13  ;;  %vm601_vm3 = vweird.f32 %v587_v13 }
 0x131   : > { %v566_v17 = vpop.xlane.xlu0 %565 }
 0x132   : > { %v582_v18 = vmul.f32 %v566_v17, %v1683_v22  ;;  %v560_v19 = vpop.xlane.xlu2 %559  ;;  %v572_v20 = vpop.xlane.xlu1 %571 }
 0x133   : > { %v580_v21 = vmul.f32 %v560_v19, %v1683_v22  ;;  %v584_v23 = vmul.f32 %v572_v20, %v1683_v22 }
 0x134   : > { %v1320_v24 = vpop.eup %1319  ;;  %v1750_v25 = vadd.f32 1e-05, %v582_v18 }
 0x135   : > { %v1322_v26 = vpop.eup %1321  ;;  %v616_v27 = vmul.f32 %v1320_v24, %v589_v12  ;;  %v1752_v30 = vadd.f32 1e-05, %v580_v21  ;;  %v1754_v31 = vadd.f32 1e-05, %v584_v23  ;;  %vm622_vm2 = vweird.f32 %v1320_v24 }
 0x136   : > { %v596_v32 = vmul.f32 %v1322_v26, %v587_v13  ;;  %1323 = vrsqrt.f32 %v1750_v25  ;;  %vm602_vm4 = vweird.f32 %v1322_v26  ;;  %vm1766_vm6 = vmor %vm621_vm5, %vm622_vm2  ;;  %vm631_vm11 = vweird.f32 %v1750_v25 }
 0x137   : > { %v617_v33 = vmul.f32 %v1320_v24, %v616_v27  ;;  %1325 = vrsqrt.f32 %v1752_v30  ;;  %vm603_vm7 = vmor %vm601_vm3, %vm602_vm4  ;;  %vm611_vm9 = vweird.f32 %v1752_v30  ;;  %vm651_vm14 = vweird.f32 %v1754_v31 }
 0x138   : > { %v597_v34 = vmul.f32 %v1322_v26, %v596_v32  ;;  %1327 = vrsqrt.f32 %v1754_v31 }
 0x139   : > { %v618_v35 = vmul.f32 0.5, %v617_v33  ;;  %v569_v36 = vpop.xlane.xlu0 %568 }
 0x13a   : > { %v598_v37 = vmul.f32 0.5, %v597_v34  ;;  %v583_v38 = vmul.f32 %v569_v36, %v1683_v22  ;;  %v575_v39 = vpop.xlane.xlu2 %574 }
 0x13b   : > { %v619_v40 = vsub.f32 1.5, %v618_v35  ;;  %v585_v48 = vmul.f32 %v575_v39, %v1683_v22 }
 0x13c   : > { %v1324_v45 = vpop.eup %1323  ;;  %v599_v46 = vsub.f32 1.5, %v598_v37  ;;  %v1760_v47 = vadd.f32 1e-05, %v583_v38 }
 0x13d   : > { %v1326_v49 = vpop.eup %1325  ;;  %v620_v50 = vmul.f32 %v1320_v24, %v619_v40  ;;  %v626_v51 = vmul.f32 %v1324_v45, %v1750_v25  ;;  %v1777_v63 = vadd.f32 1e-05, %v585_v48  ;;  %vm632_vm8 = vweird.f32 %v1324_v45  ;;  %v1804_v25 = vld [vmem:[%s1975_s2] ss:$0 sm:$0xff] }
 0x13e   : > { %v1764_v52 = vpop.eup %1327  ;;  %v600_v54 = vmul.f32 %v1322_v26, %v599_v46  ;;  %v606_v55 = vmul.f32 %v1326_v49, %v1752_v30  ;;  %1329 = vrsqrt.f32 %v1760_v47  ;;  %vm612_vm10 = vweird.f32 %v1326_v49  ;;  %vm633_vm12 = vmor %vm631_vm11, %vm632_vm8 }
 0x13f   : > { %v627_v57 = vmul.f32 %v1324_v45, %v626_v51  ;;  %v646_v58 = vmul.f32 %v1764_v52, %v1754_v31  ;;  %v624_v60 = vsel %vm1766_vm6, %v1320_v24, %v620_v50  ;;  %1331 = vrsqrt.f32 %v1777_v63  ;;  %vm613_vm13 = vmor %vm611_vm9, %vm612_vm10 }
 0x140   : > { %v604_v61 = vsel %vm603_vm7, %v1322_v26, %v600_v54  ;;  %v607_v62 = vmul.f32 %v1326_v49, %v606_v55  ;;  %v677_v7 = vmul.f32 %v624_v60, %v1687_v28  ;;  %vm652_vm15 = vweird.f32 %v1764_v52 }
 0x141   : > { %v628_v0 = vmul.f32 0.5, %v627_v57  ;;  %v647_v2 = vmul.f32 %v1764_v52, %v646_v58  ;;  %v578_v3 = vpop.xlane.xlu0 %577  ;;  %v675_v8 = vmul.f32 %v604_v61, %v1689_v29  ;;  %vm641_vm1 = vweird.f32 %v1760_v47  ;;  %vm1816_vm3 = vmor %vm651_vm14, %vm652_vm15 }
 0x142   : > { %v608_v5 = vmul.f32 0.5, %v607_v62  ;;  %v586_v6 = vmul.f32 %v578_v3, %v1683_v22  ;;  %v688_v19 = vmul.f32 %v1787_v11, %v677_v7  ;;  %vm661_vm7 = vweird.f32 %v1777_v63 }
 0x143   : > { %v629_v9 = vsub.f32 1.5, %v628_v0  ;;  %v648_v14 = vmul.f32 0.5, %v647_v2  ;;  %v686_v24 = vmul.f32 %v1787_v11, %v675_v8 }
 0x144   : > { %v1330_v12 = vpop.eup %1329  ;;  %v609_v13 = vsub.f32 1.5, %v608_v5  ;;  %v1790_v15 = vadd.f32 1e-05, %v586_v6 }
 0x145   : > { %v630_v17 = vmul.f32 %v1324_v45, %v629_v9  ;;  %v636_v22 = vmul.f32 %v1330_v12, %v1760_v47  ;;  %v649_v23 = vsub.f32 1.5, %v648_v14  ;;  %v1332_v32 = vpop.eup %1331  ;;  %vm642_vm2 = vweird.f32 %v1330_v12 }
 0x146   : > { %v610_v28 = vmul.f32 %v1326_v49, %v609_v13  ;;  %1333 = vrsqrt.f32 %v1790_v15  ;;  %v697_v36 = vadd.f32 %v1804_v25, %v686_v24  ;;  %v656_v39 = vmul.f32 %v1332_v32, %v1777_v63  ;;  %vm643_vm4 = vmor %vm641_vm1, %vm642_vm2 }
 0x147   : > { %v634_v29 = vsel %vm633_vm12, %v1324_v45, %v630_v17  ;;  %v637_v18 = vmul.f32 %v1330_v12, %v636_v22  ;;  %v650_v35 = vmul.f32 %v1764_v52, %v649_v23  ;;  %vm671_vm5 = vweird.f32 %v1790_v15 }
 0x148   : > { %v678_v20 = vmul.f32 %v634_v29, %v1703_v42  ;;  %v614_v21 = vsel %vm613_vm13, %v1326_v49, %v610_v28  ;;  %v657_v51 = vmul.f32 %v1332_v32, %v656_v39  ;;  %vm662_vm8 = vweird.f32 %v1332_v32 }
 0x149   : > { %v676_v26 = vmul.f32 %v614_v21, %v1705_v43  ;;  %v638_v27 = vmul.f32 0.5, %v637_v18  ;;  %v699_v43 = vadd.f32 %v1804_v25, %v688_v19  ;;  %v654_v50 = vsel %vm1816_vm3, %v1764_v52, %v650_v35  ;;  %vm663_vm10 = vmor %vm661_vm7, %vm662_vm8 }
 0x14a   : > { %v689_v30 = vmul.f32 %v1787_v11, %v678_v20  ;;  %v680_v55 = vmul.f32 %v654_v50, %v1701_v41  ;;  %v658_v57 = vmul.f32 0.5, %v657_v51 }
 0x14b   : > { %v639_v42 = vsub.f32 1.5, %v638_v27  ;;  %v687_v33 = vmul.f32 %v1787_v11, %v676_v26 }
 0x14c   : > { %v1334_v34 = vpop.eup %1333  ;;  %v700_v37 = vadd.f32 %v1804_v25, %v689_v30  ;;  %v691_v52 = vmul.f32 %v1787_v11, %v680_v55  ;;  %v659_v61 = vsub.f32 1.5, %v658_v57 }
 0x14d   : > { %v640_v38 = vmul.f32 %v1330_v12, %v639_v42  ;;  %v666_v40 = vmul.f32 %v1334_v34, %v1790_v15  ;;  %v698_v45 = vadd.f32 %v1804_v25, %v687_v33  ;;  %vm672_vm6 = vweird.f32 %v1334_v34  ;;  %v1883_v15 = vld [vmem:[%s1981_s8] ss:$0 sm:$0xff] }
 0x14e   : > { %v706_v46 = vpack.c.bf16 %v700_v37, %v699_v43  ;;  %vm673_vm9 = vmor %vm671_vm5, %vm672_vm6 }
 0x14f   : > { %v644_v47 = vsel %vm643_vm4, %v1330_v12, %v640_v38  ;;  %v667_v48 = vmul.f32 %v1334_v34, %v666_v40  ;;  %v705_v49 = vpack.c.bf16 %v698_v45, %v697_v36 }
 0x150   : > { %1167 = vmatmul.msk.bf16.vlgmr.msra.gmra.mxu3 %vm499_vm0, %v706_v46  ;;  %1187 = vmatmul.msk.bf16.vlgmr.msra.gmra.mxu1 %vm499_vm0, %v706_v46  ;;  %v679_v53 = vmul.f32 %v644_v47, %v1707_v44  ;;  %v702_v44 = vadd.f32 %v1804_v25, %v691_v52 }
 0x151   : > { %1166 = vmatmul.msk.bf16.vlgmr.msra.gmra.mxu0 %vm499_vm0, %v705_v49  ;;  %1207 = vmatmul.msk.bf16.vlgmr.msra.gmra.mxu2 %vm499_vm0, %v706_v46  ;;  %v668_v54 = vmul.f32 0.5, %v667_v48 }
 0x152   : > { %891 = vmatpush.bf16.msra.mxu0 %v1733_v1  ;;  %v690_v58 = vmul.f32 %v1787_v11, %v679_v53  ;;  %v660_v1 = vmul.f32 %v1332_v32, %v659_v61 }
 0x153   : > { %v669_v60 = vsub.f32 1.5, %v668_v54 }
 0x154   : > { %v701_v62 = vadd.f32 %v1804_v25, %v690_v58  ;;  %v664_v2 = vsel %vm663_vm10, %v1332_v32, %v660_v1 }
 0x155   : > { %v670_v41 = vmul.f32 %v1334_v34, %v669_v60  ;;  %v681_v63 = vmul.f32 %v664_v2, %v1722_v56  ;;  %v1861_v56 = vld [vmem:[%s1980_s7] ss:$0 sm:$0xff] }
 0x156   : > { %892 = vmatpush.bf16.msra.mxu0 %v1736_v4  ;;  %v707_v4 = vpack.c.bf16 %v702_v44, %v701_v62 }
 0x157   : > { %v674_v0 = vsel %vm673_vm9, %v1334_v34, %v670_v41  ;;  %v692_v5 = vmul.f32 %v1787_v11, %v681_v63 }
 0x159   : > { %v703_v6 = vadd.f32 %v1804_v25, %v692_v5 }
 0x15a   : > { %893 = vmatpush.bf16.msra.mxu0 %v1740_v10  ;;  %v682_v10 = vmul.f32 %v674_v0, %v1727_v59  ;;  %v1866_v59 = vld [vmem:[%s1979_s6] ss:$0 sm:$0xff] }
 0x15c   : > { %v693_v3 = vmul.f32 %v1787_v11, %v682_v10 }
 0x15e   : > { %894 = vmatpush.bf16.msra.mxu0 %v1744_v16  ;;  %v704_v16 = vadd.f32 %v1804_v25, %v693_v3 }
 0x160   : > { %1168 = vmatmul.msk.bf16.gmra.mxu3 %vm499_vm0, %v707_v4  ;;  %1188 = vmatmul.msk.bf16.gmra.mxu1 %vm499_vm0, %v707_v4  ;;  %v708_v7 = vpack.c.bf16 %v704_v16, %v703_v6 }
 0x161   : > { %1186 = vmatmul.msk.bf16.vlgmr.msrb.gmra.mxu0 %vm499_vm0, %v705_v49  ;;  %1208 = vmatmul.msk.bf16.gmra.mxu2 %vm499_vm0, %v707_v4 }
 0x170   : > { %1169 = vmatmul.msk.bf16.gmra.mxu3 %vm499_vm0, %v708_v7  ;;  %1189 = vmatmul.msk.bf16.gmra.mxu1 %vm499_vm0, %v708_v7 }
 0x171   : > { %1206 = vmatmul.msk.bf16.vlgmr.msra.gmra.mxu0 %vm499_vm0, %v705_v49  ;;  %1209 = vmatmul.msk.bf16.gmra.mxu2 %vm499_vm0, %v708_v7  ;;  %vm924_vm0 = vcmask 519168  }
 0x1cd   : > { %v836_v8 = vpop.f32.mrf.mxu1 }
 0x1ce   : > { %v766_v9 = vpop.f32.mrf.mxu0  ;;  %v837_v11 = vadd.f32 %v1861_v56, %v836_v8 }
 0x1cf   : > { %v767_v12 = vadd.f32 %v1866_v59, %v766_v9 }
 0x1d0   : > { %v935_v13 = vpack.c.bf16 %v837_v11, %v837_v11 }
 0x1d1   : > { %v916_v14 = vpack.c.bf16 %v767_v12, %v767_v12 }
 0x1d2   : > { %943 = vst.msk [vmem:[%s1873_s25 + $0x8] sm:$0xf] %vm924_vm0, %v935_v13 }
 0x1d3   : > { %925 = vst.msk [vmem:[%s1878_s13] sm:$0xf] %vm924_vm0, %v916_v14  ;;  %v771_v17 = vpop.f32.mrf.mxu3 }
 0x1d4   : > { %v772_v22 = vadd.f32 %v1866_v59, %v771_v17  ;;  %v901_v28 = vpop.f32.mrf.mxu2 }
 0x1d5   : > { %v902_v29 = vadd.f32 %v1883_v15, %v901_v28  ;;  %v838_v18 = vpop.f32.mrf.mxu1 }
 0x1d6   : > { %v918_v19 = vpack.c.bf16 %v772_v22, %v772_v22  ;;  %v768_v20 = vpop.f32.mrf.mxu0  ;;  %v839_v21 = vadd.f32 %v1861_v56, %v838_v18 }
 0x1d7   : > { %v951_v23 = vpack.c.bf16 %v902_v29, %v902_v29  ;;  %v769_v24 = vadd.f32 %v1866_v59, %v768_v20 }
 0x1d8   : > { %927 = vst.msk [vmem:[%s1878_s13 + $0x8] sm:$0xf] %vm924_vm0, %v918_v19  ;;  %v936_v25 = vpack.c.bf16 %v839_v21, %v839_v21 }
 0x1d9   : > { %959 = vst.msk [vmem:[%s1894_s27 + $0x8] sm:$0xf] %vm924_vm0, %v951_v23  ;;  %v917_v26 = vpack.c.bf16 %v769_v24, %v769_v24 }
 0x1da   : > { %944 = vst.msk [vmem:[%s1873_s25 + $0xc] sm:$0xf] %vm924_vm0, %v936_v25 }
 0x1db   : > { %926 = vst.msk [vmem:[%s1878_s13 + $0x4] sm:$0xf] %vm924_vm0, %v917_v26  ;;  %v773_v27 = vpop.f32.mrf.mxu3 }
 0x1dc   : > { %v774_v32 = vadd.f32 %v1866_v59, %v773_v27  ;;  %v903_v30 = vpop.f32.mrf.mxu2 }
 0x1dd   : > { %v904_v42 = vadd.f32 %v1883_v15, %v903_v30  ;;  %v841_v33 = vpop.f32.mrf.mxu1 }
 0x1de   : > { %v919_v34 = vpack.c.bf16 %v774_v32, %v774_v32  ;;  %v831_v35 = vpop.f32.mrf.mxu0  ;;  %v842_v36 = vadd.f32 %v1861_v56, %v841_v33 }
 0x1df   : > { %v952_v43 = vpack.c.bf16 %v904_v42, %v904_v42  ;;  %v832_v37 = vadd.f32 %v1861_v56, %v831_v35 }
 0x1e0   : > { %928 = vst.msk [vmem:[%s1878_s13 + $0xc] sm:$0xf] %vm924_vm0, %v919_v34  ;;  %v937_v31 = vpack.c.bf16 %v842_v36, %v842_v36 }
 0x1e1   : > { %960 = vst.msk [vmem:[%s1894_s27 + $0xc] sm:$0xf] %vm924_vm0, %v952_v43  ;;  %v933_v38 = vpack.c.bf16 %v832_v37, %v832_v37 }
 0x1e2   : > { %945 = vst.msk [vmem:[%s1873_s25 + $0x10] sm:$0xf] %vm924_vm0, %v937_v31 }
 0x1e3   : > { %941 = vst.msk [vmem:[%s1873_s25] sm:$0xf] %vm924_vm0, %v933_v38  ;;  %v776_v39 = vpop.f32.mrf.mxu3 }
 0x1e4   : > { %v777_v40 = vadd.f32 %v1866_v59, %v776_v39  ;;  %v906_v45 = vpop.f32.mrf.mxu2 }
 0x1e5   : > { %v907_v46 = vadd.f32 %v1883_v15, %v906_v45  ;;  %v843_v47 = vpop.f32.mrf.mxu1 }
 0x1e6   : > { %v920_v48 = vpack.c.bf16 %v777_v40, %v777_v40  ;;  %v833_v49 = vpop.f32.mrf.mxu0  ;;  %v844_v50 = vadd.f32 %v1861_v56, %v843_v47 }
 0x1e7   : > { %v953_v51 = vpack.c.bf16 %v907_v46, %v907_v46  ;;  %v834_v53 = vadd.f32 %v1861_v56, %v833_v49 }
 0x1e8   : > { %929 = vst.msk [vmem:[%s1878_s13 + $0x10] sm:$0xf] %vm924_vm0, %v920_v48  ;;  %v938_v54 = vpack.c.bf16 %v844_v50, %v844_v50 }
 0x1e9   : > { %961 = vst.msk [vmem:[%s1894_s27 + $0x10] sm:$0xf] %vm924_vm0, %v953_v51  ;;  %v934_v55 = vpack.c.bf16 %v834_v53, %v834_v53 }
 0x1ea   : > { %946 = vst.msk [vmem:[%s1873_s25 + $0x14] sm:$0xf] %vm924_vm0, %v938_v54 }
 0x1eb   : > { %942 = vst.msk [vmem:[%s1873_s25 + $0x4] sm:$0xf] %vm924_vm0, %v934_v55  ;;  %v778_v57 = vpop.f32.mrf.mxu3 }
 0x1ec   : > { %v779_v58 = vadd.f32 %v1866_v59, %v778_v57  ;;  %v908_v60 = vpop.f32.mrf.mxu2 }
 0x1ed   : > { %v909_v52 = vadd.f32 %v1883_v15, %v908_v60  ;;  %v846_v61 = vpop.f32.mrf.mxu1 }
 0x1ee   : > { %v921_v62 = vpack.c.bf16 %v779_v58, %v779_v58  ;;  %v847_v41 = vadd.f32 %v1861_v56, %v846_v61  ;;  %v896_v44 = vpop.f32.mrf.mxu0 }
 0x1ef   : > { %v954_v1 = vpack.c.bf16 %v909_v52, %v909_v52  ;;  %v897_v4 = vadd.f32 %v1883_v15, %v896_v44 }
 0x1f0   : > { %930 = vst.msk [vmem:[%s1878_s13 + $0x14] sm:$0xf] %vm924_vm0, %v921_v62  ;;  %v939_v0 = vpack.c.bf16 %v847_v41, %v847_v41 }
 0x1f1   : > { %962 = vst.msk [vmem:[%s1894_s27 + $0x14] sm:$0xf] %vm924_vm0, %v954_v1  ;;  %v949_v2 = vpack.c.bf16 %v897_v4, %v897_v4 }
 0x1f2   : > { %947 = vst.msk [vmem:[%s1873_s25 + $0x18] sm:$0xf] %vm924_vm0, %v939_v0 }
 0x1f3   : > { %957 = vst.msk [vmem:[%s1894_s27] sm:$0xf] %vm924_vm0, %v949_v2  ;;  %v781_v10 = vpop.f32.mrf.mxu3 }
 0x1f4   : > { %v782_v63 = vadd.f32 %v1866_v59, %v781_v10  ;;  %v911_v3 = vpop.f32.mrf.mxu2 }
 0x1f5   : > { %v912_v5 = vadd.f32 %v1883_v15, %v911_v3  ;;  %v848_v16 = vpop.f32.mrf.mxu1 }
 0x1f6   : > { %v922_v6 = vpack.c.bf16 %v782_v63, %v782_v63  ;;  %v849_v7 = vadd.f32 %v1861_v56, %v848_v16  ;;  %v898_v8 = vpop.f32.mrf.mxu0 }
 0x1f7   : > { %v955_v9 = vpack.c.bf16 %v912_v5, %v912_v5  ;;  %v899_v11 = vadd.f32 %v1883_v15, %v898_v8 }
 0x1f8   : > { %931 = vst.msk [vmem:[%s1878_s13 + $0x18] sm:$0xf] %vm924_vm0, %v922_v6  ;;  %v940_v12 = vpack.c.bf16 %v849_v7, %v849_v7 }
 0x1f9   : > { %963 = vst.msk [vmem:[%s1894_s27 + $0x18] sm:$0xf] %vm924_vm0, %v955_v9  ;;  %v950_v13 = vpack.c.bf16 %v899_v11, %v899_v11 }
 0x1fa   : > { %948 = vst.msk [vmem:[%s1873_s25 + $0x1c] sm:$0xf] %vm924_vm0, %v940_v12 }
 0x1fb   : > { %958 = vst.msk [vmem:[%s1894_s27 + $0x4] sm:$0xf] %vm924_vm0, %v950_v13  ;;  %v783_v14 = vpop.f32.mrf.mxu3 }
 0x1fc   : > { %v784_v17 = vadd.f32 %v1866_v59, %v783_v14  ;;  %v913_v56 = vpop.f32.mrf.mxu2 }
 0x1fd   : > { %v914_v22 = vadd.f32 %v1883_v15, %v913_v56 }
 0x1fe   : > { %v923_v28 = vpack.c.bf16 %v784_v17, %v784_v17 }
 0x1ff   : > { %v956_v29 = vpack.c.bf16 %v914_v22, %v914_v22 }
 0x200   : > { %932 = vst.msk [vmem:[%s1878_s13 + $0x1c] sm:$0xf] %vm924_vm0, %v923_v28 }
 0x201   : > { %964 = vst.msk [vmem:[%s1894_s27 + $0x1c] sm:$0xf] %vm924_vm0, %v956_v29 }
 0x202 PF: > { %s2004_s30 = smov %s1639_s17  ;;  %p24_p4 = scmp.ge.s32.totalorder %s1627_s3, 4  }
 0x203   : > { %s2005_s17 = smov %s1489_s18  ;;  %s2006_s18 = smov %s1493_s19 }
 0x204   : > { %s2007_s19 = smov %s2004_s30  ;;  %s2008_s20 = smov %s1627_s3 }
 0x205   :  { %26 = sbr.rel (!%p24_p4) target bundleno = 10 (0xa), region = 132 }
 0x20a   :  { %1021 = vsyncpa [#allocation3], 1 }
 0x20b   :  { %1023 = vsyncpa [#allocation3 + $0x1], 1 }
 0x20c   :  { %1024 = vsyncpa [#allocation5], 1 }
 0x20d   :  { %1025 = vsyncpa [#allocation8], 1 }

// kernel: ico_slide3d_forward.9
= control target key start
LH: loop header
LB: loop body
LE: loop exit
PB: predicated region body
PF: predicated region fallthrough
CT: control target
= control target key end

     0   :  { %s869_s24 = smov [#allocation6]   ;;  %s870_s25 = smov [#allocation7]   ;;  %s1020_s0 = inlined_call_operand.vmem [shape: s32[128], index: 0, kind: input, shape index: {}]   ;;  %s1021_s2 = inlined_call_operand.vmem [shape: bf16[2,16,4,64], index: 2, kind: input, shape index: {}]   ;;  %s1022_s3 = inlined_call_operand.vmem [shape: bf16[2,16,4,64], index: 3, kind: input, shape index: {}]   ;;  %s1023_s4 = inlined_call_operand.vmem [shape: bf16[2,16,4,64], index: 4, kind: input, shape index: {}]   ;;  %s1024_s5 = inlined_call_operand.vmem [shape: bf16[2,16,4,64], index: 5, kind: output, shape index: {}]   ;;  %s1025_s1 = inlined_call_operand.vmem [shape: s32[128], index: 1, kind: input, shape index: {}]  }
   0x1   :  { %s11_s20 = sshll.u32 %s1020_s0, 4  ;;  %s16_s23 = sshll.u32 %s1025_s1, 4  ;;  %s12_s20 = int_to_ptr.vmem [resolvable:$true] %s11_s20  ;;  %s17_s23 = int_to_ptr.vmem [resolvable:$true] %s16_s23 }
   0x2   :  { %14 = dma.vmem_to_smem %s12_s20, 16, %s869_s24, [#allocation5] }
   0x3   :  { %19 = dma.vmem_to_smem %s17_s23, 16, %s870_s25, [#allocation5] }
   0x4   :  { %839 = dma.done.wait [#allocation5], 32 }
   0x5   :  { %840 = vsyncadd [#allocation5], 4294967264 }
   0x6   :  { %22 = sfence }
   0x7   :  { %s913_s26 = smov 0   ;;  %s915_s27 = smov 0  }
   0x8   :  { %s917_s28 = smov 0   ;;  %s919_s0 = smov 0  }
   0x9   :  { %s921_s29 = smov 0   ;;  %s923_s1 = smov 0  }
   0xa   :  { %s925_s30 = smov 0  }
   0xb LB: > { %s40_s6 = sadd.s32 1, %s855_s0  ;;  %s43_s7 = sadd.s32 1, %s859_s29  ;;  %s867_s30 = sphi %s925_s30, %s28_s30   ;;  %s863_s1 = sphi %s923_s1, %s1033_s1   ;;  %s859_s29 = sphi %s921_s29, %s1032_s29   ;;  %s855_s0 = sphi %s919_s0, %s1031_s0   ;;  %s851_s28 = sphi %s917_s28, %s1030_s28   ;;  %s847_s27 = sphi %s915_s27, %s1029_s27   ;;  %s843_s26 = sphi %s913_s26, %s1028_s26  }
   0xc   : > { %p41_p0 = scmp.ge.s32.totalorder %s40_s6, 8  ;;  %p688_p1 = scmp.ge.s32.totalorder %s867_s30, 1 }
   0xd   : > { %p232_p2 = scmp.lt.s32.totalorder %s867_s30, 257  ;;  %s47_s8 = sadd.s32 1, %s863_s1 }
   0xe   : > { %s1035_s6 = smov (%p41_p0, %s40_s6), 0  ;;  %s1037_s7 = smov (!%p41_p0, %s43_s7), %s859_s29 }
   0xf   : > { %p233_p3 = pnand %p688_p1, %p232_p2  ;;  %p45_p4 = scmp.ge.s32.totalorder %s1037_s7, 16 }
  0x10   : > { %p284_p6 = scmp.lt.s32.totalorder (!%p233_p3), %s851_s28, 1  ;;  %p286_p7 = scmp.lt.s32.totalorder (!%p233_p3), %s847_s27, 15 }
  0x11   : > { %s1039_s7 = smov (%p45_p4, %s1037_s7), 0  ;;  %s1041_s8 = smov (!%p45_p4, %s47_s8), %s863_s1 }
  0x12   : > { %p49_p5 = scmp.ge.s32.totalorder %s1041_s8, 2  ;;  %236 = sbr.rel (%p233_p3) target bundleno = 928 (0x3a0), region = 32 }
  0x13   : > { %s691_s9 = sshll.u32 (!%p233_p3), %s847_s27, 3  ;;  %p699_p10 = scmp.ne.s32.totalorder (!%p233_p3), %s843_s26, 0 }
  0x14   : > { %s1043_s8 = smov (%p49_p5, %s1041_s8), 0  ;;  %s958_s11 = sadd.s32 (!%p233_p3), %s843_s26, %s691_s9 }
  0x15   : > { %1026 = sst [smem:[#allocation9_spill]] %s1043_s8 }
  0x16   : > { %s294_s13 = sld [smem:[#allocation6 + %s958_s11]] (!%p233_p3) }
  0x17   : > { %s1045_s28 = smov (!%p284_p6, %s851_s28), 1  ;;  %s1047_s27 = smov (!%p286_p7, %s847_s27), 15 }
  0x18   : > { %s689_s10 = sshll.u32 %s1045_s28, 4  ;;  %s308_s15 = sld [smem:[#allocation6 + %s958_s11]] }
  0x19   : > { %s289_s12 = sadd.s32 %s689_s10, %s1047_s27 }
  0x1a   : > { %s961_s14 = sshll.u32 %s289_s12, 1 }
  0x1b   : > { %s291_s18 = scalar_lea.vmem %s1021_s2, %s961_s14  ;;  %s327_s21 = scalar_lea.vmem %s1024_s5, %s961_s14 }
  0x1c   : > { %p297_p8 = scmp.lt.s32.totalorder %s294_s13, 15 }
  0x1e   : > { %p311_p9 = scmp.lt.s32.totalorder %s308_s15, 15  ;;  %s1049_s13 = smov (!%p297_p8, %s294_s13), 15 }
  0x1f   : > { %s300_s22 = sadd.s32 %s689_s10, %s1049_s13  ;;  %332 = sbr.rel (%p699_p10) target bundleno = 43 (0x2b), region = 36 }
  0x20   : > { %s1051_s15 = smov (!%p311_p9, %s308_s15), 15  ;;  %s693_s23 = sshll.u32 %s300_s22, 1 }
  0x21   : > { %s314_s24 = sadd.s32 %s689_s10, %s1051_s15  ;;  %s302_s28 = scalar_lea.vmem %s1022_s3, %s693_s23 }
  0x22   : > { %s696_s9 = sshll.u32 %s314_s24, 1 }
  0x23   : > { %s316_s16 = scalar_lea.vmem %s1023_s4, %s696_s9 }
  0x24   : > { %vm333_vm0 = vcmask 3072   ;;  %v871_v0 = vmov -inf   ;;  %vm338_vm1 = vcmask 257024   ;;  %v872_v1 = vmov 0.0  }
  0x25   : > { %334 = vst.msk [vmem:[#allocation2] sm:$0xf] %vm333_vm0, %v871_v0 }
  0x26   : > { %335 = vst.msk [vmem:[#allocation2 + $0x4] sm:$0xf] %vm333_vm0, %v871_v0 }
  0x27   : > { %336 = vst.msk [vmem:[#allocation3] sm:$0xf] %vm333_vm0, %v872_v1 }
  0x28   : > { %337 = vst.msk [vmem:[#allocation3 + $0x4] sm:$0xf] %vm333_vm0, %v872_v1 }
  0x29   : > { %339 = vst.msk [vmem:[#allocation4] sm:$0xf] %vm338_vm1, %v872_v1 }
  0x2a   : > { %340 = vst.msk [vmem:[#allocation4 + $0x4] sm:$0xf] %vm338_vm1, %v872_v1 }
  0x2b PF: > { %v346_v2 = vld [vmem:[%s291_s18] sm:$0x3]  ;;  %s873_s8 = smov 96   ;;  %vm349_vm2 = vcmask 261120   ;;  %s343_s10 = sld [smem:[#allocation7 + %s958_s11]]  ;;  %vm373_vm3 = vcmask 27648  }
  0x2c   : > { %430 = vst [vmem:[#allocation1] ss:$4 sm:$0xff] %v346_v2  ;;  %v347_v3 = vld [vmem:[%s302_s28] sm:$0x3]  ;;  %v874_v23 = vmov 0   ;;  %vm395_vm4 = vcmask 3072  }
  0x2d   : > { %v348_v5 = vld [vmem:[%s316_s16] sm:$0x3]  ;;  %v354_v7 = vsel %vm349_vm2, %v347_v3, 0  ;;  %772 = vset.pattern.permute.xlu2 %v874_v23  ;;  %773 = vset.pattern.permute.xlu0 %v874_v23  ;;  %v462_v24 = vld [vmem:[#allocation2 + $0x4] sm:$0xf]  ;;  %vm409_vm5 = vcmask 1041408  }
  0x2e   : > { %363 = vmatpush.bf16.xpose.msra.mxu0 %v354_v7  ;;  %v372_v29 = vld [vmem:[#allocation2] sm:$0xf]  ;;  %v411_v38 = vsel %vm409_vm5, %v348_v5, 0  ;;  %vm405_vm6 = vcmask 31744   ;;  %v389_v51 = vld [vmem:[#allocation3] sm:$0xf] }
  0x2f   : > { %420 = vmatpush.bf16.msra.mxu1 %v411_v38  ;;  %v479_v55 = vld [vmem:[#allocation3 + $0x4] sm:$0xf]  ;;  %vm427_vm7 = vcmask 257024   ;;  %p705_p12 = scmp.ne.s32.totalorder %s843_s26, 7 }
  0x30   : > { %v397_v58 = vld [vmem:[#allocation4] sm:$0xf]  ;;  %s876_s11 = smov (!%p705_p12), 32  }
  0x31   : > { %p344_p11 = scmp.gt.s32.totalorder %s343_s10, 0  ;;  %v487_v56 = vld [vmem:[#allocation4 + $0x4] sm:$0xf] }
  0x33   : > { %v431_v4 = vld.sshfl [vmem:[#allocation1] sm:$0xff pattern:$0x73625140]  ;;  %s345_s13 = scalar_select %p344_p11, 0.0, -1e+30 }
  0x34   : > { %435 = vst [vmem:[#allocation1] ss:$4 sm:$0xff] %v347_v3 }
  0x35   : > { %701 = vmatmul.msk.bf16.vlgmr.msra.gmra.mxu0 %vm349_vm2, %v346_v2  ;;  %v370_v15 = vstv %s345_s13 }
  0x3b   : > { %v436_v6 = vld.sshfl [vmem:[#allocation1] sm:$0xff pattern:$0x73625140] }
  0x3c   : > { %438 = vrot.lane.b32.xlu0 %v436_v6, %s873_s8  ;;  %495 = vst [vmem:[#allocation1] ss:$4 sm:$0xff] %v348_v5 }
  0x43   : > { %v496_v13 = vld.sshfl [vmem:[#allocation1] sm:$0xff pattern:$0x73625140] }
  0x44   : > { %433 = vrot.lane.b32.xlu0 %v431_v4, %s873_s8 }
  0x4c   : > { %498 = vrot.lane.b32.xlu0 %v496_v13, %s873_s8 }
  0xae   : > { %v439_v8 = vpop.permute.xlu0 %438 }
  0xaf   : > { %v444_v9 = vsel %vm349_vm2, %v439_v8, 0 }
  0xb0   : > { %453 = vmatpush.bf16.xpose.msra.mxu2 %v444_v9 }
  0xb2   : > { %v365_v11 = vpop.f32.mrf.mxu0 }
  0xb3   : > { %v369_v17 = vmul.f32 5.656854, %v365_v11 }
  0xb5   : > { %v371_v20 = vadd.f32 %v370_v15, %v369_v17 }
  0xb6   : > { %v434_v10 = vpop.permute.xlu0 %433 }
  0xb7   : > { %703 = vmatmul.msk.bf16.vlgmr.msra.gmra.mxu2 %vm349_vm2, %v434_v10  ;;  %v374_v22 = vsel %vm373_vm3, %v371_v20, -inf }
  0xba   : > { %v367_v12 = vpop.f32.mrf.mxu0 }
  0xbe   : > { %v499_v36 = vpop.permute.xlu0 %498 }
  0xbf   : > { %v504_v37 = vsel %vm409_vm5, %v499_v36, 0 }
  0xc0   : > { %513 = vmatpush.bf16.msra.mxu3 %v504_v37 }
 0x13a   : > { %v455_v14 = vpop.f32.mrf.mxu2 }
 0x13b   : > { %v459_v16 = vmul.f32 5.656854, %v455_v14 }
 0x13d   : > { %v460_v18 = vadd.f32 %v459_v16, %v370_v15 }
 0x13f   : > { %v463_v19 = vsel %vm373_vm3, %v460_v18, -inf }
 0x140   : > { %464 = vmax.xlane.f32.xlu1 %v463_v19 }
 0x142   : > { %v457_v21 = vpop.f32.mrf.mxu2 }
 0x148   : > { %375 = vmax.xlane.f32.xlu1 %v374_v22 }
 0x1b3   : > { %v465_v25 = vpop.xlane.xlu1 %464 }
 0x1b4   : > { %v466_v26 = vmax.f32 %v462_v24, %v465_v25 }
 0x1b6   : > { %v467_v27 = vsub.f32 %v462_v24, %v466_v26  ;;  %521 = vst.msk [vmem:[#allocation2 + $0x4] sm:$0xf] %vm395_vm4, %v466_v26  ;;  %472 = vperm.xlu2 %772, %v466_v26  }
 0x1b8   : > { %v468_v28 = vmul.f32 1.442695, %v467_v27 }
 0x1ba   : > { %774 = vpow2.f32 %v468_v28 }
 0x1bb   : > { %v376_v30 = vpop.xlane.xlu1 %375 }
 0x1bc   : > { %v377_v31 = vmax.f32 %v372_v29, %v376_v30 }
 0x1be   : > { %v378_v32 = vsub.f32 %v372_v29, %v377_v31  ;;  %429 = vst.msk [vmem:[#allocation2] sm:$0xf] %vm395_vm4, %v377_v31  ;;  %383 = vperm.xlu2 %772, %v377_v31  }
 0x1c0   : > { %v775_v33 = vpop.eup %774  ;;  %v379_v34 = vmul.f32 1.442695, %v378_v32 }
 0x1c1   : > { %490 = vperm.xlu0 %773, %v775_v33   ;;  %v480_v60 = vmul.f32 %v775_v33, %v479_v55 }
 0x1c2   : > { %776 = vpow2.f32 %v379_v34 }
 0x1c8   : > { %v777_v35 = vpop.eup %776 }
 0x1c9   : > { %400 = vperm.xlu2 %772, %v777_v35   ;;  %v390_v52 = vmul.f32 %v777_v35, %v389_v51 }
 0x210   : > { %v473_v39 = vpop.permute.xlu2 %472 }
 0x211   : > { %v475_v40 = vsub.f32 %v460_v18, %v473_v39 }
 0x213   : > { %v476_v41 = vmul.f32 1.442695, %v475_v40 }
 0x215   : > { %778 = vpow2.f32 %v476_v41 }
 0x218   : > { %v384_v42 = vpop.permute.xlu2 %383 }
 0x219   : > { %v386_v43 = vsub.f32 %v371_v20, %v384_v42 }
 0x21b   : > { %v779_v44 = vpop.eup %778  ;;  %v387_v45 = vmul.f32 1.442695, %v386_v43 }
 0x21c   : > { %v494_v46 = vpack.c.bf16 %v779_v44, %v779_v44  ;;  %v481_v50 = vsel %vm373_vm3, %v779_v44, 0.0 }
 0x21d   : > { %780 = vpow2.f32 %v387_v45 }
 0x21e   : > { %704 = vmatmul.msk.bf16.vlgmr.msra.gmra.mxu3 %vm405_vm6, %v494_v46 }
 0x223   : > { %v781_v47 = vpop.eup %780  ;;  %v401_v59 = vpop.permute.xlu2 %400 }
 0x224   : > { %v391_v48 = vsel %vm373_vm3, %v781_v47, 0.0  ;;  %v404_v49 = vpack.c.bf16 %v781_v47, %v781_v47  ;;  %v403_v1 = vmul.f32 %v401_v59, %v397_v58 }
 0x225   : > { %392 = vadd.xlane.f32.xlu1 %v391_v48 }
 0x226   : > { %702 = vmatmul.msk.bf16.vlgmr.msra.gmra.mxu1 %vm405_vm6, %v404_v49 }
 0x22d   : > { %482 = vadd.xlane.f32.xlu1 %v481_v50 }
 0x233   : > { %v491_v57 = vpop.permute.xlu0 %490 }
 0x234   : > { %v493_v61 = vmul.f32 %v491_v57, %v487_v56 }
 0x298   : > { %v393_v53 = vpop.xlane.xlu1 %392 }
 0x299   : > { %v394_v54 = vadd.f32 %v393_v53, %v390_v52 }
 0x29b   : > { %396 = vst.msk [vmem:[#allocation3] sm:$0xf] %vm395_vm4, %v394_v54 }
 0x2a0   : > { %v483_v62 = vpop.xlane.xlu1 %482 }
 0x2a1   : > { %v484_v63 = vadd.f32 %v483_v62, %v480_v60  ;;  %v515_v0 = vpop.f32.mrf.mxu3 }
 0x2a2   : > { %v519_v2 = vadd.f32 %v515_v0, %v493_v61 }
 0x2a3   : > { %485 = vst.msk [vmem:[#allocation3 + $0x4] sm:$0xf] %vm395_vm4, %v484_v63  ;;  %v422_v3 = vpop.f32.mrf.mxu1 }
 0x2a4   : > { %520 = vst.msk [vmem:[#allocation4 + $0x4] sm:$0xf] %vm427_vm7, %v519_v2  ;;  %v426_v4 = vadd.f32 %v422_v3, %v403_v1 }
 0x2a6   : > { %428 = vst.msk [vmem:[#allocation4] sm:$0xf] %vm427_vm7, %v426_v4 }
 0x2a7   : > { %525 = sbr.rel (%p705_p12) target bundleno = 928 (0x3a0), region = 40 }
 0x2a9   : > { %v517_v5 = vpop.f32.mrf.mxu3 }
 0x2ab   : > { %v424_v6 = vpop.f32.mrf.mxu1 }
 0x2ac   : > { %v535_v7 = vld [vmem:[#allocation3 + $0x4] sm:$0xf]  ;;  %v875_v8 = vmov 0   ;;  %v526_v9 = vld [vmem:[#allocation3] sm:$0xf]  ;;  %vm550_vm8 = vcmask 517120  }
 0x2ad   : > { %782 = vset.pattern.permute.xlu0 %v875_v8  ;;  %783 = vrcp.f32 %v535_v7  ;;  %v537_v12 = vld [vmem:[#allocation4 + $0x4] sm:$0xf]  ;;  %v528_v15 = vld [vmem:[#allocation4] sm:$0xf] }
 0x2ae   : > { %785 = vrcp.f32 %v526_v9 }
 0x2b3   : > { %v784_v10 = vpop.eup %783 }
 0x2b4   : > { %540 = vperm.xlu0 %782, %v784_v10   ;;  %v786_v11 = vpop.eup %785 }
 0x2bc   : > { %531 = vperm.xlu0 %782, %v786_v11  }
 0x326   : > { %v541_v13 = vpop.permute.xlu0 %540 }
 0x327   : > { %v543_v14 = vmul.f32 %v541_v13, %v537_v12 }
 0x329   : > { %545 = vrot.lane.b32.xlu1 %v543_v14, %s876_s11 }
 0x32e   : > { %v532_v16 = vpop.permute.xlu0 %531 }
 0x32f   : > { %v534_v17 = vmul.f32 %v532_v16, %v528_v15 }
 0x39b   : > { %v546_v18 = vpop.permute.xlu1 %545 }
 0x39c   : > { %v548_v19 = vsel %vm349_vm2, %v534_v17, %v546_v18 }
 0x39d   : > { %v549_v20 = vpack.c.bf16 %v548_v19, %v548_v19 }
 0x39f   : > { %551 = vst.msk [vmem:[%s327_s21] sm:$0x3] %vm550_vm8, %v549_v20 }
 0x3a0 PF: > { %s28_s30 = sadd.s32 1, %s867_s30   ;;  %s1027_s17 = sld [smem:[#allocation9_spill]] }
 0x3a1   : > { %p25_p13 = scmp.ge.s32.totalorder %s28_s30, 258   ;;  %s1028_s26 = smov %s855_s0 }
 0x3a2   : > { %s1029_s27 = smov %s859_s29  ;;  %s1030_s28 = smov %s863_s1 }
 0x3a3   : > { %s1031_s0 = smov %s1035_s6  ;;  %s1032_s29 = smov %s1039_s7 }
 0x3a4   :  { %27 = sbr.rel (!%p25_p13) target bundleno = 11 (0xb), region = 79 }
 0x3a6   : > { %s1033_s1 = smov %s1027_s17 }

// kernel: ico_slide3d_forward.11
= control target key start
LH: loop header
LB: loop body
LE: loop exit
PB: predicated region body
PF: predicated region fallthrough
CT: control target
= control target key end

     0   :  { %s1829_s24 = smov 0   ;;  %s2817_s0 = inlined_call_operand.vmem [shape: f32[128,64], index: 0, kind: input, shape index: {}]   ;;  %s2818_s1 = inlined_call_operand.vmem [shape: f32[1,64], index: 1, kind: input, shape index: {}]   ;;  %s2819_s2 = inlined_call_operand.vmem [shape: f32[1,64], index: 2, kind: input, shape index: {}]   ;;  %s2820_s3 = inlined_call_operand.vmem [shape: bf16[64,256], index: 3, kind: input, shape index: {}]   ;;  %s2821_s4 = inlined_call_operand.vmem [shape: f32[1,256], index: 4, kind: input, shape index: {}]   ;;  %s2822_s5 = inlined_call_operand.vmem [shape: bf16[256,64], index: 5, kind: input, shape index: {}]   ;;  %s2823_s6 = inlined_call_operand.vmem [shape: f32[1,64], index: 6, kind: input, shape index: {}]   ;;  %s2824_s7 = inlined_call_operand.vmem [shape: f32[128,64], index: 7, kind: output, shape index: {}]  }
   0x1 LB: > { %s1537_s25 = sadd.s32 4294967295, %s1785_s24   ;;  %p1541_p0 = scmp.ge.s32.totalorder %s1785_s24, 1  ;;  %s1785_s24 = sphi %s1829_s24, %s17_s24  }
   0x2   : > { %p238_p1 = scmp.lt.s32.totalorder %s1785_s24, 3 }
   0x4   : > { %p239_p2 = pnand %p1541_p0, %p238_p1 }
   0x6   : > { %242 = sbr.rel (%p239_p2) target bundleno = 758 (0x2f6), region = 48 }
   0xb   : > { %s1542_s26 = sshll.u32 %s1537_s25, 3  ;;  %vm293_vm0 = vcmask 523264   ;;  %v1787_v14 = vmov 64.0   ;;  %v1572_v58 = vld [vmem:[%s2820_s3 + $0x30] sm:$0xf] }
   0xc   : > { %p271_p3 = scmp.lt.s32.totalorder %s1542_s26, 15  ;;  %1689 = vrcp.f32 %v1787_v14  ;;  %v1659_v59 = vld [vmem:[%s2820_s3 + $0x34] sm:$0xf0]  ;;  %v1658_v60 = vld [vmem:[%s2820_s3 + $0x34] sm:$0xf] }
   0xd   : > { %v1573_v61 = vor.u32 %v1659_v59, %v1572_v58  ;;  %v1574_v62 = vld [vmem:[%s2820_s3 + $0x38] sm:$0xf0]  ;;  %v1548_v14 = vld [vmem:[%s2820_s3] sm:$0xf] }
   0xe   : > { %s2912_s26 = smov (!%p271_p3, %s1542_s26), 15  ;;  %v1577_v63 = vor.u32 %v1658_v60, %v1574_v62 }
   0xf   : > { %s1543_s27 = sshll.u32 %s2912_s26, 3  ;;  %573 = vmatpush.bf16.msra.mxu0 %v1573_v61 }
  0x10   : > { %s1845_s30 = scalar_lea.vmem %s2817_s0, %s1543_s27  ;;  %602 = vmatpush.bf16.msra.mxu1 %v1577_v63  ;;  %s2788_s28 = scalar_lea.vmem %s2824_s7, %s1543_s27 }
  0x11   : > { %v287_v0 = vld [vmem:[%s1845_s30 + $0x20] sm:$0xff]  ;;  %v285_v1 = vld [vmem:[%s1845_s30 + $0x10] sm:$0xff]  ;;  %v288_v6 = vld [vmem:[%s1845_s30 + $0x28] sm:$0xff] }
  0x12   : > { %v283_v2 = vld [vmem:[%s1845_s30] sm:$0xff]  ;;  %v306_v3 = vsel %vm293_vm0, %v287_v0, 0.0  ;;  %v300_v4 = vsel %vm293_vm0, %v285_v1, 0.0  ;;  %v286_v7 = vld [vmem:[%s1845_s30 + $0x18] sm:$0xff]  ;;  %v284_v8 = vld [vmem:[%s1845_s30 + $0x8] sm:$0xff]  ;;  %v309_v9 = vsel %vm293_vm0, %v288_v6, 0.0  ;;  %v1690_v15 = vpop.eup %1689 }
  0x13   : > { %v294_v5 = vsel %vm293_vm0, %v283_v2, 0.0  ;;  %307 = vadd.xlane.f32.xlu2 %v306_v3  ;;  %301 = vadd.xlane.f32.xlu1 %v300_v4  ;;  %v303_v10 = vsel %vm293_vm0, %v286_v7, 0.0  ;;  %v297_v11 = vsel %vm293_vm0, %v284_v8, 0.0  ;;  %v289_v12 = vld [vmem:[%s1845_s30 + $0x30] sm:$0xff]  ;;  %v319_v16 = vmul.f32 64.0, %v1690_v15  ;;  %v1876_v36 = vld [vmem:[%s1845_s30 + $0x38] sm:$0xff] }
  0x14   : > { %295 = vadd.xlane.f32.xlu0 %v294_v5  ;;  %v312_v13 = vsel %vm293_vm0, %v289_v12, 0.0  ;;  %vm323_vm1 = vweird.f32 %v1690_v15  ;;  %v315_v41 = vsel %vm293_vm0, %v1876_v36, 0.0  ;;  %v1566_v4 = vld [vmem:[%s2820_s3 + $0x28] sm:$0xf0] }
  0x15   : > { %v320_v17 = vsub.f32 1.0, %v319_v16  ;;  %v1652_v16 = vld [vmem:[%s2820_s3 + $0x4] sm:$0xf] }
  0x17   : > { %v321_v18 = vmul.f32 %v1690_v15, %v320_v17 }
  0x19   : > { %v322_v19 = vadd.f32 %v1690_v15, %v321_v18 }
  0x1b   : > { %310 = vadd.xlane.f32.xlu2 %v309_v9  ;;  %304 = vadd.xlane.f32.xlu1 %v303_v10  ;;  %v1861_v20 = vsel %vm323_vm1, %v1690_v15, %v322_v19  ;;  %v1558_v10 = vld [vmem:[%s2820_s3 + $0x18] sm:$0xf0]  ;;  %v1653_v15 = vld [vmem:[%s2820_s3 + $0x4] sm:$0xf0]  ;;  %v1550_v19 = vld [vmem:[%s2820_s3 + $0x8] sm:$0xf0] }
  0x1c   : > { %298 = vadd.xlane.f32.xlu0 %v297_v11  ;;  %v1549_v18 = vor.u32 %v1653_v15, %v1548_v14 }
  0x23   : > { %313 = vadd.xlane.f32.xlu2 %v312_v13 }
  0x86   : > { %v308_v21 = vpop.xlane.xlu2 %307  ;;  %v302_v22 = vpop.xlane.xlu1 %301 }
  0x87   : > { %v296_v23 = vpop.xlane.xlu0 %295  ;;  %v329_v32 = vmul.f32 %v1861_v20, %v308_v21  ;;  %v327_v33 = vmul.f32 %v1861_v20, %v302_v22  ;;  %v1553_v21 = vor.u32 %v1652_v16, %v1550_v19 }
  0x88   : > { %v325_v24 = vmul.f32 %v1861_v20, %v296_v23 }
  0x89   : > { %v1882_v39 = vsub.f32 %v287_v0, %v329_v32  ;;  %v1884_v40 = vsub.f32 %v285_v1, %v327_v33  ;;  %v1564_v0 = vld [vmem:[%s2820_s3 + $0x20] sm:$0xf]  ;;  %v1657_v1 = vld [vmem:[%s2820_s3 + $0x24] sm:$0xf0] }
  0x8a   : > { %v1864_v25 = vsub.f32 %v283_v2, %v325_v24  ;;  %v1656_v2 = vld [vmem:[%s2820_s3 + $0x24] sm:$0xf]  ;;  %v1565_v3 = vor.u32 %v1657_v1, %v1564_v0 }
  0x8b   : > { %v345_v48 = vmul.f32 %v1882_v39, %v1882_v39  ;;  %v343_v49 = vmul.f32 %v1884_v40, %v1884_v40  ;;  %v1569_v5 = vor.u32 %v1656_v2, %v1566_v4  ;;  %v1986_v4 = vld [vmem:[%s2818_s1] ss:$0 sm:$0xff] }
  0x8c   : > { %v341_v26 = vmul.f32 %v1864_v25, %v1864_v25  ;;  %574 = vmatpush.bf16.msra.mxu0 %v1565_v3 }
  0x8d   : > { %v361_v53 = vsel %vm293_vm0, %v345_v48, 0.0  ;;  %v355_v54 = vsel %vm293_vm0, %v343_v49, 0.0  ;;  %603 = vmatpush.bf16.msra.mxu1 %v1569_v5 }
  0x8e   : > { %v311_v27 = vpop.xlane.xlu2 %310  ;;  %v305_v28 = vpop.xlane.xlu1 %304  ;;  %v349_v29 = vsel %vm293_vm0, %v341_v26, 0.0 }
  0x8f   : > { %v328_v30 = vmul.f32 %v1861_v20, %v305_v28  ;;  %350 = vadd.xlane.f32.xlu0 %v349_v29  ;;  %v299_v31 = vpop.xlane.xlu0 %298  ;;  %v330_v47 = vmul.f32 %v1861_v20, %v311_v27 }
  0x90   : > { %v326_v34 = vmul.f32 %v1861_v20, %v299_v31 }
  0x91   : > { %v1873_v35 = vsub.f32 %v286_v7, %v328_v30  ;;  %v1902_v52 = vsub.f32 %v288_v6, %v330_v47  ;;  %v1556_v6 = vld [vmem:[%s2820_s3 + $0x10] sm:$0xf]  ;;  %v1655_v7 = vld [vmem:[%s2820_s3 + $0x14] sm:$0xf0] }
  0x92   : > { %v1878_v37 = vsub.f32 %v284_v8, %v326_v34  ;;  %v1654_v8 = vld [vmem:[%s2820_s3 + $0x14] sm:$0xf]  ;;  %v1557_v9 = vor.u32 %v1655_v7, %v1556_v6 }
  0x93   : > { %v344_v38 = vmul.f32 %v1873_v35, %v1873_v35  ;;  %v346_v56 = vmul.f32 %v1902_v52, %v1902_v52 }
  0x94   : > { %v342_v42 = vmul.f32 %v1878_v37, %v1878_v37  ;;  %575 = vmatpush.bf16.msra.mxu0 %v1557_v9 }
  0x95   : > { %v358_v43 = vsel %vm293_vm0, %v344_v38, 0.0  ;;  %v364_v57 = vsel %vm293_vm0, %v346_v56, 0.0 }
  0x96   : > { %v314_v44 = vpop.xlane.xlu2 %313  ;;  %359 = vadd.xlane.f32.xlu2 %v358_v43  ;;  %v352_v45 = vsel %vm293_vm0, %v342_v42, 0.0 }
  0x97   : > { %v331_v46 = vmul.f32 %v1861_v20, %v314_v44  ;;  %316 = vadd.xlane.f32.xlu0 %v315_v41  ;;  %353 = vadd.xlane.f32.xlu1 %v352_v45 }
  0x98   : > { %576 = vmatpush.bf16.msra.mxu0 %v1549_v18 }
  0x99   : > { %v1898_v50 = vsub.f32 %v289_v12, %v331_v46  ;;  %v1561_v12 = vor.u32 %v1654_v8, %v1558_v10 }
  0x9b   : > { %v347_v51 = vmul.f32 %v1898_v50, %v1898_v50  ;;  %604 = vmatpush.bf16.msra.mxu1 %v1561_v12 }
  0x9d   : > { %v367_v55 = vsel %vm293_vm0, %v347_v51, 0.0 }
  0x9e   : > { %368 = vadd.xlane.f32.xlu2 %v367_v55 }
  0x9f   : > { %362 = vadd.xlane.f32.xlu0 %v361_v53  ;;  %356 = vadd.xlane.f32.xlu1 %v355_v54 }
  0xa0   : > { %605 = vmatpush.bf16.msra.mxu1 %v1553_v21 }
  0xa7   : > { %365 = vadd.xlane.f32.xlu1 %v364_v57 }
 0x102   : > { %v351_v11 = vpop.xlane.xlu0 %350 }
 0x103   : > { %v373_v13 = vmul.f32 %v351_v11, %v1861_v20 }
 0x105   : > { %v381_v17 = vadd.f32 1e-05, %v373_v13 }
 0x107   : > { %1691 = vrsqrt.f32 %v381_v17  ;;  %vm395_vm3 = vweird.f32 %v381_v17 }
 0x109   : > { %v360_v22 = vpop.xlane.xlu2 %359 }
 0x10a   : > { %v376_v23 = vmul.f32 %v360_v22, %v1861_v20  ;;  %v354_v24 = vpop.xlane.xlu1 %353  ;;  %v317_v26 = vpop.xlane.xlu0 %316 }
 0x10b   : > { %v374_v27 = vmul.f32 %v354_v24, %v1861_v20  ;;  %v332_v28 = vmul.f32 %v1861_v20, %v317_v26 }
 0x10c   : > { %v1962_v29 = vadd.f32 1e-05, %v376_v23 }
 0x10d   : > { %v1692_v30 = vpop.eup %1691  ;;  %v382_v31 = vadd.f32 1e-05, %v374_v27  ;;  %v1965_v32 = vsub.f32 %v1876_v36, %v332_v28 }
 0x10e   : > { %v390_v33 = vmul.f32 %v1692_v30, %v381_v17  ;;  %1693 = vrsqrt.f32 %v1962_v29  ;;  %vm396_vm2 = vweird.f32 %v1692_v30  ;;  %vm425_vm10 = vweird.f32 %v1962_v29 }
 0x10f   : > { %1695 = vrsqrt.f32 %v382_v31  ;;  %v348_v34 = vmul.f32 %v1965_v32, %v1965_v32  ;;  %vm397_vm4 = vmor %vm395_vm3, %vm396_vm2  ;;  %vm405_vm5 = vweird.f32 %v382_v31 }
 0x110   : > { %v391_v38 = vmul.f32 %v1692_v30, %v390_v33 }
 0x111   : > { %v370_v41 = vsel %vm293_vm0, %v348_v34, 0.0 }
 0x112   : > { %v392_v42 = vmul.f32 0.5, %v391_v38  ;;  %v357_v43 = vpop.xlane.xlu1 %356  ;;  %371 = vadd.xlane.f32.xlu0 %v370_v41  ;;  %v363_v45 = vpop.xlane.xlu0 %362 }
 0x113   : > { %v375_v44 = vmul.f32 %v357_v43, %v1861_v20  ;;  %v377_v51 = vmul.f32 %v363_v45, %v1861_v20 }
 0x114   : > { %v1972_v46 = vpop.eup %1693  ;;  %v393_v36 = vsub.f32 1.5, %v392_v42 }
 0x115   : > { %v1696_v47 = vpop.eup %1695  ;;  %v383_v48 = vadd.f32 1e-05, %v375_v44  ;;  %v420_v54 = vmul.f32 %v1972_v46, %v1962_v29  ;;  %v1977_v57 = vadd.f32 1e-05, %v377_v51  ;;  %vm426_vm11 = vweird.f32 %v1972_v46 }
 0x116   : > { %v400_v49 = vmul.f32 %v1696_v47, %v382_v31  ;;  %v394_v53 = vmul.f32 %v1692_v30, %v393_v36  ;;  %vm406_vm6 = vweird.f32 %v1696_v47  ;;  %vm427_vm13 = vmor %vm425_vm10, %vm426_vm11 }
 0x117   : > { %1697 = vrsqrt.f32 %v383_v48  ;;  %v421_v60 = vmul.f32 %v1972_v46, %v420_v54  ;;  %vm407_vm7 = vmor %vm405_vm5, %vm406_vm6  ;;  %vm415_vm8 = vweird.f32 %v383_v48  ;;  %vm435_vm1 = vweird.f32 %v1977_v57 }
 0x118   : > { %v401_v55 = vmul.f32 %v1696_v47, %v400_v49  ;;  %v398_v59 = vsel %vm397_vm4, %v1692_v30, %v394_v53  ;;  %1699 = vrsqrt.f32 %v1977_v57 }
 0x119   : > { %v469_v1 = vmul.f32 %v398_v59, %v1864_v25  ;;  %v422_v5 = vmul.f32 0.5, %v421_v60  ;;  %v1993_v25 = vld [vmem:[%s2819_s2] ss:$0 sm:$0xff] }
 0x11a   : > { %v402_v56 = vmul.f32 0.5, %v401_v55  ;;  %v366_v58 = vpop.xlane.xlu1 %365  ;;  %v369_v55 = vpop.xlane.xlu2 %368 }
 0x11b   : > { %v378_v61 = vmul.f32 %v366_v58, %v1861_v20  ;;  %v480_v10 = vmul.f32 %v1986_v4, %v469_v1  ;;  %v423_v11 = vsub.f32 1.5, %v422_v5 }
 0x11c   : > { %v403_v62 = vsub.f32 1.5, %v402_v56  ;;  %v379_v56 = vmul.f32 %v369_v55, %v1861_v20 }
 0x11d   : > { %v1698_v63 = vpop.eup %1697  ;;  %v386_v0 = vadd.f32 1e-05, %v378_v61  ;;  %v491_v17 = vadd.f32 %v1993_v25, %v480_v10  ;;  %v424_v18 = vmul.f32 %v1972_v46, %v423_v11 }
 0x11e   : > { %v404_v2 = vmul.f32 %v1696_v47, %v403_v62  ;;  %v410_v3 = vmul.f32 %v1698_v63, %v383_v48  ;;  %vm416_vm9 = vweird.f32 %v1698_v63  ;;  %v1700_v13 = vpop.eup %1699 }
 0x11f   : > { %1701 = vrsqrt.f32 %v386_v0  ;;  %vm417_vm12 = vmor %vm415_vm8, %vm416_vm9  ;;  %v430_v19 = vmul.f32 %v1700_v13, %v1977_v57  ;;  %v428_v26 = vsel %vm427_vm13, %v1972_v46, %v424_v18  ;;  %vm445_vm14 = vweird.f32 %v386_v0 }
 0x120   : > { %v408_v6 = vsel %vm407_vm7, %v1696_v47, %v404_v2  ;;  %v411_v7 = vmul.f32 %v1698_v63, %v410_v3  ;;  %v472_v30 = vmul.f32 %v428_v26, %v1873_v35  ;;  %vm436_vm2 = vweird.f32 %v1700_v13  ;;  %v1667_v26 = vld [vmem:[%s2822_s5 + $0x38] sm:$0xff] }
 0x121   : > { %v470_v8 = vmul.f32 %v408_v6, %v1878_v37  ;;  %v431_v27 = vmul.f32 %v1700_v13, %v430_v19  ;;  %vm437_vm4 = vmor %vm435_vm1, %vm436_vm2  ;;  %v387_v57 = vadd.f32 1e-05, %v379_v56  ;;  %1407 = vmatpush.bf16.msra.mxu2 %v1667_v26  ;;  %v1664_v56 = vld [vmem:[%s2822_s5 + $0x20] sm:$0xff] }
 0x122   : > { %v412_v9 = vmul.f32 0.5, %v411_v7  ;;  %v483_v38 = vmul.f32 %v1986_v4, %v472_v30  ;;  %v1666_v30 = vld [vmem:[%s2822_s5 + $0x30] sm:$0xff] }
 0x123   : > { %v481_v12 = vmul.f32 %v1986_v4, %v470_v8  ;;  %v432_v31 = vmul.f32 0.5, %v431_v27  ;;  %1703 = vrsqrt.f32 %v387_v57  ;;  %vm455_vm5 = vweird.f32 %v387_v57  ;;  %v1675_v27 = vld [vmem:[%s2822_s5 + $0x78] sm:$0xff] }
 0x124   : > { %v413_v14 = vsub.f32 1.5, %v412_v9  ;;  %1436 = vmatpush.bf16.msra.mxu3 %v1675_v27 }
 0x125   : > { %v492_v37 = vadd.f32 %v1993_v25, %v481_v12  ;;  %v1702_v15 = vpop.eup %1701  ;;  %v433_v41 = vsub.f32 1.5, %v432_v31  ;;  %v1674_v31 = vld [vmem:[%s2822_s5 + $0x70] sm:$0xff]  ;;  %1408 = vmatpush.bf16.msra.mxu2 %v1666_v30 }
 0x126   : > { %v414_v16 = vmul.f32 %v1698_v63, %v413_v14  ;;  %v440_v21 = vmul.f32 %v1702_v15, %v386_v0  ;;  %vm446_vm15 = vweird.f32 %v1702_v15 }
 0x127   : > { %v499_v22 = vpack.c.bf16 %v492_v37, %v491_v17  ;;  %vm447_vm3 = vmor %vm445_vm14, %vm446_vm15  ;;  %v434_v44 = vmul.f32 %v1700_v13, %v433_v41  ;;  %v511_v37 = vld [vmem:[%s2821_s4] sm:$0x3] }
 0x128   : > { %v418_v23 = vsel %vm417_vm12, %v1698_v63, %v414_v16  ;;  %v441_v24 = vmul.f32 %v1702_v15, %v440_v21  ;;  %1437 = vmatpush.bf16.msra.mxu3 %v1674_v31 }
 0x129   : > { %1578 = vmatmul.msk.bf16.vlgmr.msra.gmra.mxu0 %vm293_vm0, %v499_v22  ;;  %1582 = vmatmul.msk.bf16.vlgmr.msra.gmra.mxu1 %vm293_vm0, %v499_v22  ;;  %v471_v28 = vmul.f32 %v418_v23, %v1884_v40  ;;  %v494_v40 = vadd.f32 %v1993_v25, %v483_v38  ;;  %v438_v46 = vsel %vm437_vm4, %v1700_v13, %v434_v44 }
 0x12a   : > { %v442_v29 = vmul.f32 0.5, %v441_v24  ;;  %v473_v47 = vmul.f32 %v438_v46, %v1882_v39  ;;  %v1665_v46 = vld [vmem:[%s2822_s5 + $0x28] sm:$0xff] }
 0x12b   : > { %v482_v33 = vmul.f32 %v1986_v4, %v471_v28  ;;  %1409 = vmatpush.bf16.msra.mxu2 %v1665_v46 }
 0x12c   : > { %v443_v34 = vsub.f32 1.5, %v442_v29  ;;  %v484_v49 = vmul.f32 %v1986_v4, %v473_v47 }
 0x12d   : > { %v493_v42 = vadd.f32 %v1993_v25, %v482_v33 }
 0x12e   : > { %v444_v43 = vmul.f32 %v1702_v15, %v443_v34  ;;  %v495_v53 = vadd.f32 %v1993_v25, %v484_v49 }
 0x12f   : > { %v500_v35 = vpack.c.bf16 %v494_v40, %v493_v42  ;;  %1410 = vmatpush.bf16.msra.mxu2 %v1664_v56 }
 0x130   : > { %v448_v45 = vsel %vm447_vm3, %v1702_v15, %v444_v43 }
 0x131   : > { %v474_v36 = vmul.f32 %v448_v45, %v1902_v52  ;;  %v1704_v52 = vpop.eup %1703 }
 0x132   : > { %v450_v39 = vmul.f32 %v1704_v52, %v387_v57  ;;  %vm456_vm6 = vweird.f32 %v1704_v52  ;;  %v1672_v57 = vld [vmem:[%s2822_s5 + $0x60] sm:$0xff] }
 0x133   : > { %v485_v48 = vmul.f32 %v1986_v4, %v474_v36  ;;  %vm457_vm7 = vmor %vm455_vm5, %vm456_vm6  ;;  %v1673_v36 = vld [vmem:[%s2822_s5 + $0x68] sm:$0xff] }
 0x134   : > { %v451_v58 = vmul.f32 %v1704_v52, %v450_v39  ;;  %1438 = vmatpush.bf16.msra.mxu3 %v1673_v36 }
 0x135   : > { %v496_v51 = vadd.f32 %v1993_v25, %v485_v48 }
 0x136   : > { %v452_v62 = vmul.f32 0.5, %v451_v58 }
 0x137   : > { %v501_v54 = vpack.c.bf16 %v496_v51, %v495_v53 }
 0x138   : > { %v453_v63 = vsub.f32 1.5, %v452_v62  ;;  %1439 = vmatpush.bf16.msra.mxu3 %v1672_v57 }
 0x139   : > { %1579 = vmatmul.msk.bf16.gmra.mxu0 %vm293_vm0, %v500_v35  ;;  %1583 = vmatmul.msk.bf16.gmra.mxu1 %vm293_vm0, %v500_v35 }
 0x13a   : > { %v454_v1 = vmul.f32 %v1704_v52, %v453_v63  ;;  %v2825_v63 = vmov -1.0  }
 0x13c   : > { %v458_v5 = vsel %vm457_vm7, %v1704_v52, %v454_v1 }
 0x13d   : > { %v475_v8 = vmul.f32 %v458_v5, %v1898_v50  ;;  %v2035_v50 = vperm.slane %v511_v37, 0 }
 0x13f   : > { %v486_v11 = vmul.f32 %v1986_v4, %v475_v8  ;;  %2844 = vst [vmem:[#allocation2_spill] sm:$0xff] %v2035_v50 }
 0x141   : > { %v497_v13 = vadd.f32 %v1993_v25, %v486_v11  ;;  %v1671_v11 = vld [vmem:[%s2822_s5 + $0x58] sm:$0xff] }
 0x142   : > { %1440 = vmatpush.bf16.msra.mxu3 %v1671_v11 }
 0x149   : > { %1580 = vmatmul.msk.bf16.gmra.mxu0 %vm293_vm0, %v501_v54  ;;  %1584 = vmatmul.msk.bf16.gmra.mxu1 %vm293_vm0, %v501_v54 }
 0x185   : > { %v372_v59 = vpop.xlane.xlu0 %371 }
 0x186   : > { %v380_v60 = vmul.f32 %v372_v59, %v1861_v20 }
 0x188   : > { %v388_v61 = vadd.f32 1e-05, %v380_v60 }
 0x18a   : > { %1705 = vrsqrt.f32 %v388_v61  ;;  %vm465_vm9 = vweird.f32 %v388_v61 }
 0x190   : > { %v1706_v0 = vpop.eup %1705 }
 0x191   : > { %v460_v2 = vmul.f32 %v1706_v0, %v388_v61  ;;  %vm466_vm8 = vweird.f32 %v1706_v0 }
 0x192   : > { %vm467_vm10 = vmor %vm465_vm9, %vm466_vm8 }
 0x193   : > { %v461_v3 = vmul.f32 %v1706_v0, %v460_v2 }
 0x195   : > { %v462_v6 = vmul.f32 0.5, %v461_v3 }
 0x197   : > { %v463_v7 = vsub.f32 1.5, %v462_v6 }
 0x199   : > { %v464_v9 = vmul.f32 %v1706_v0, %v463_v7 }
 0x19b   : > { %v468_v20 = vsel %vm467_vm10, %v1706_v0, %v464_v9 }
 0x19c   : > { %v476_v10 = vmul.f32 %v468_v20, %v1965_v32  ;;  %v2037_v32 = vperm.slane %v511_v37, 1 }
 0x19e   : > { %v487_v12 = vmul.f32 %v1986_v4, %v476_v10  ;;  %2845 = vst [vmem:[#allocation3_spill] sm:$0xff] %v2037_v32  ;;  %v1663_v10 = vld [vmem:[%s2822_s5 + $0x18] sm:$0xff] }
 0x19f   : > { %1411 = vmatpush.bf16.msra.mxu2 %v1663_v10 }
 0x1a0   : > { %v498_v14 = vadd.f32 %v1993_v25, %v487_v12 }
 0x1a2   : > { %v502_v15 = vpack.c.bf16 %v498_v14, %v497_v13 }
 0x1a4   : > { %1581 = vmatmul.msk.bf16.gmra.mxu0 %vm293_vm0, %v502_v15  ;;  %1585 = vmatmul.msk.bf16.gmra.mxu1 %vm293_vm0, %v502_v15 }
 0x1a6   : > { %v578_v16 = vpop.f32.mrf.mxu0  ;;  %v607_v17 = vpop.f32.mrf.mxu1 }
 0x1a7   : > { %v579_v4 = vadd.f32 %v578_v16, %v2035_v50  ;;  %v608_v18 = vadd.f32 %v607_v17, %v2037_v32 }
 0x1a9   : > { %v643_v25 = vmul.f32 0.70710677, %v579_v4  ;;  %v644_v19 = vmul.f32 0.70710677, %v608_v18  ;;  %v2082_v55 = vmul.f32 0.5, %v579_v4  ;;  %v2090_v52 = vmul.f32 0.5, %v608_v18 }
 0x1ab   : > { %v691_v21 = vand.u32 2147483647, %v643_v25  ;;  %v692_v22 = vand.u32 2147483647, %v644_v19  ;;  %vm659_vm11 = vcmp.ge.f32.partialorder %v643_v25, 0.0  ;;  %vm660_vm12 = vcmp.ge.f32.partialorder %v644_v19, 0.0 }
 0x1ac   : > { %v2101_v0 = vsel %vm659_vm11, 1.0, %v2825_v63  ;;  %v2108_v7 = vsel %vm660_vm12, 1.0, %v2825_v63 }
 0x1ad   : > { %v707_v28 = vmul.f32 0.3275911, %v691_v21  ;;  %v708_v33 = vmul.f32 0.3275911, %v692_v22  ;;  %v1123_v42 = vsub.f32 0.0, %v691_v21  ;;  %v1124_v43 = vsub.f32 0.0, %v692_v22 }
 0x1ae   : > { %v580_v23 = vpop.f32.mrf.mxu0  ;;  %v609_v24 = vpop.f32.mrf.mxu1 }
 0x1af   : > { %v581_v29 = vadd.f32 %v580_v23, %v2035_v50  ;;  %v2055_v34 = vadd.f32 %v609_v24, %v2037_v32  ;;  %v2057_v38 = vadd.f32 1.0, %v707_v28  ;;  %v2061_v40 = vadd.f32 1.0, %v708_v33  ;;  %v1662_v23 = vld [vmem:[%s2822_s5 + $0x10] sm:$0xff] }
 0x1b0   : > { %v1139_v49 = vmul.f32 %v1123_v42, %v691_v21  ;;  %v1140_v51 = vmul.f32 %v1124_v43, %v692_v22  ;;  %v1670_v24 = vld [vmem:[%s2822_s5 + $0x50] sm:$0xff]  ;;  %1412 = vmatpush.bf16.msra.mxu2 %v1662_v23 }
 0x1b1   : > { %v2059_v41 = vmul.f32 0.70710677, %v581_v29  ;;  %v2064_v44 = vmul.f32 0.70710677, %v2055_v34  ;;  %1707 = vrcp.f32 %v2057_v38  ;;  %v2110_v8 = vmul.f32 0.5, %v581_v29  ;;  %1441 = vmatpush.bf16.msra.mxu3 %v1670_v24 }
 0x1b2   : > { %1709 = vrcp.f32 %v2061_v40  ;;  %v1155_v60 = vmul.f32 1.442695, %v1139_v49  ;;  %v1157_v61 = vmul.f32 1.442695, %v1140_v51  ;;  %v750_v17 = vand.u32 2147483648, %v2057_v38  ;;  %v1661_v49 = vld [vmem:[%s2822_s5 + $0x8] sm:$0xff] }
 0x1b3   : > { %v693_v47 = vand.u32 2147483647, %v2059_v41  ;;  %v694_v54 = vand.u32 2147483647, %v2064_v44  ;;  %vm661_vm13 = vcmp.ge.f32.partialorder %v2059_v41, 0.0  ;;  %vm662_vm14 = vcmp.ge.f32.partialorder %v2064_v44, 0.0 }
 0x1b4   : > { %1711 = vpow2.f32 %v1155_v60  ;;  %v2143_v21 = vmul.f32 0.5, %v2055_v34  ;;  %v748_v26 = vand.u32 2147483647, %v2057_v38  ;;  %v2161_v30 = vsel %vm661_vm13, 1.0, %v2825_v63  ;;  %v1669_v51 = vld [vmem:[%s2822_s5 + $0x48] sm:$0xff]  ;;  %1413 = vmatpush.bf16.msra.mxu2 %v1661_v49 }
 0x1b5   : > { %v709_v39 = vmul.f32 0.3275911, %v693_v47  ;;  %v1125_v1 = vsub.f32 0.0, %v693_v47  ;;  %v710_v2 = vmul.f32 0.3275911, %v694_v54  ;;  %v1126_v37 = vsub.f32 0.0, %v694_v54  ;;  %1442 = vmatpush.bf16.msra.mxu3 %v1669_v51 }
 0x1b6   : > { %v583_v35 = vpop.f32.mrf.mxu0  ;;  %v612_v45 = vpop.f32.mrf.mxu1  ;;  %v2164_v31 = vsel %vm662_vm14, 1.0, %v2825_v63  ;;  %v2172_v44 = vor.u32 1.1754944e-38, %v750_v17  ;;  %vm744_vm3 = vweird.f32 %v2057_v38  ;;  %vm2285_vm5 = vcmp.eq.f32.partialorder %v748_v26, 8.507059e+37 }
 0x1b7   : > { %v2075_v48 = vadd.f32 %v583_v35, %v2035_v50  ;;  %v2078_v53 = vadd.f32 %v612_v45, %v2037_v32  ;;  %v2095_v59 = vpop.eup %1707  ;;  %v2128_v14 = vadd.f32 1.0, %v709_v39  ;;  %v1141_v4 = vmul.f32 %v1125_v1, %v693_v47 }
 0x1b8   : > { %v2124_v12 = vpop.eup %1709  ;;  %v740_v13 = vmul.f32 %v2095_v59, %v2057_v38  ;;  %v2135_v18 = vadd.f32 1.0, %v710_v2  ;;  %v1142_v28 = vmul.f32 %v1126_v37, %v694_v54  ;;  %vm745_vm1 = vweird.f32 %v2095_v59 }
 0x1b9   : > { %v2093_v58 = vmul.f32 0.70710677, %v2075_v48  ;;  %v2098_v62 = vmul.f32 0.70710677, %v2078_v53  ;;  %v755_v19 = vmul.f32 %v2124_v12, %v2061_v40  ;;  %1713 = vrcp.f32 %v2128_v14  ;;  %vm2320_vm7 = vmor %vm744_vm3, %vm745_vm1 }
 0x1ba   : > { %v741_v27 = vsub.f32 1.0, %v740_v13  ;;  %1715 = vpow2.f32 %v1157_v61  ;;  %v1159_v34 = vmul.f32 1.442695, %v1141_v4  ;;  %v2174_v35 = vpop.eup %1711  ;;  %v1161_v56 = vmul.f32 1.442695, %v1142_v28 }
 0x1bb   : > { %v2104_v3 = vand.u32 2147483647, %v2093_v58  ;;  %v2113_v9 = vand.u32 2147483647, %v2098_v62  ;;  %1717 = vrcp.f32 %v2135_v18  ;;  %v756_v41 = vsub.f32 1.0, %v755_v19 }
 0x1bc   : > { %v742_v54 = vmul.f32 %v2095_v59, %v741_v27  ;;  %v2193_v39 = vmul.f32 0.5, %v2075_v48  ;;  %v2201_v2 = vmul.f32 0.5, %v2078_v53  ;;  %v1660_v53 = vld [vmem:[%s2822_s5] sm:$0xff]  ;;  %vm663_vm15 = vcmp.ge.f32.partialorder %v2093_v58, 0.0 }
 0x1bd   : > { %v711_v15 = vmul.f32 0.3275911, %v2104_v3  ;;  %v712_v16 = vmul.f32 0.3275911, %v2113_v9  ;;  %v1127_v45 = vsub.f32 0.0, %v2104_v3  ;;  %v1128_v60 = vsub.f32 0.0, %v2113_v9  ;;  %1414 = vmatpush.bf16.msra.mxu2 %v1660_v53 }
 0x1be   : > { %v585_v5 = vpop.f32.mrf.mxu0  ;;  %v614_v6 = vpop.f32.mrf.mxu1  ;;  %2848 = vst [vmem:[#allocation6_spill] sm:$0xff] %v2201_v2  ;;  %v2212_v10 = vmul.f32 %v2124_v12, %v756_v41  ;;  %v2227_v17 = vadd.f32 %v2095_v59, %v742_v54  ;;  %vm664_vm2 = vcmp.ge.f32.partialorder %v2098_v62, 0.0  ;;  %v2258_v54 = vsel %vm663_vm15, 1.0, %v2825_v63 }
 0x1bf   : > { %v2116_v20 = vadd.f32 %v585_v5, %v2035_v50  ;;  %v2146_v22 = vadd.f32 %v614_v6, %v2037_v32  ;;  %v2156_v29 = vadd.f32 1.0, %v711_v15  ;;  %v2166_v33 = vadd.f32 1.0, %v712_v16  ;;  %v2198_v1 = vpop.eup %1713  ;;  %v1668_v15 = vld [vmem:[%s2822_s5 + $0x40] sm:$0xff] }
 0x1c0   : > { %v2209_v6 = vpop.eup %1715  ;;  %v1143_v11 = vmul.f32 %v1127_v45, %v2104_v3  ;;  %v770_v4 = vmul.f32 %v2198_v1, %v2128_v14  ;;  %v1144_v19 = vmul.f32 %v1128_v60, %v2113_v9  ;;  %1443 = vmatpush.bf16.msra.mxu3 %v1668_v15  ;;  %vm774_vm4 = vweird.f32 %v2128_v14 }
 0x1c1   : > { %v2138_v25 = vmul.f32 0.70710677, %v2116_v20  ;;  %2846 = vst [vmem:[#allocation4_spill] sm:$0xff] %v2146_v22  ;;  %v2178_v46 = vmul.f32 0.70710677, %v2146_v22  ;;  %1719 = vrcp.f32 %v2156_v29  ;;  %v2223_v16 = vpop.eup %1717  ;;  %vm759_vm8 = vweird.f32 %v2061_v40 }
 0x1c2   : > { %1721 = vrcp.f32 %v2166_v33  ;;  %v785_v45 = vmul.f32 %v2223_v16, %v2135_v18  ;;  %v771_v60 = vsub.f32 1.0, %v770_v4  ;;  %vm775_vm9 = vweird.f32 %v2198_v1 }
 0x1c3   : > { %v2170_v42 = vand.u32 2147483647, %v2138_v25  ;;  %v698_v61 = vand.u32 2147483647, %v2178_v46  ;;  %1723 = vpow2.f32 %v1159_v34  ;;  %vm665_vm6 = vcmp.ge.f32.partialorder %v2138_v25, 0.0  ;;  %vm2365_vm10 = vmor %vm774_vm4, %vm775_vm9 }
 0x1c4   : > { %1725 = vpow2.f32 %v1161_v56  ;;  %v2263_v56 = vsel %vm664_vm2, 1.0, %v2825_v63  ;;  %v786_v41 = vsub.f32 1.0, %v785_v45  ;;  %v772_v26 = vmul.f32 %v2198_v1, %v771_v60 }
 0x1c5   : > { %v713_v57 = vmul.f32 0.3275911, %v2170_v42  ;;  %v714_v37 = vmul.f32 0.3275911, %v698_v61  ;;  %v1129_v27 = vsub.f32 0.0, %v2170_v42  ;;  %v1130_v49 = vsub.f32 0.0, %v698_v61 }
 0x1c6   : > { %v588_v43 = vpop.f32.mrf.mxu0  ;;  %v617_v47 = vpop.f32.mrf.mxu1  ;;  %2852 = vst [vmem:[#allocation10_spill] sm:$0xff] %v2263_v56  ;;  %vm789_vm11 = vweird.f32 %v2135_v18  ;;  %v2866_v2 = vand.u32 2147483648, %v2128_v14  ;;  %vm760_vm13 = vweird.f32 %v2124_v12  ;;  %vm804_vm14 = vweird.f32 %v2156_v29 }
 0x1c7   : > { %v2181_v36 = vadd.f32 %v588_v43, %v2035_v50  ;;  %v2207_v48 = vadd.f32 %v617_v47, %v2037_v32  ;;  %v2215_v13 = vadd.f32 1.0, %v713_v57  ;;  %v2235_v23 = vadd.f32 1.0, %v714_v37  ;;  %v2237_v24 = vpop.eup %1719  ;;  %vm2417_vm15 = vmor %vm759_vm8, %vm760_vm13 }
 0x1c8   : > { %v2248_v9 = vpop.eup %1721  ;;  %v1163_v47 = vmul.f32 1.442695, %v1143_v11  ;;  %v1165_v11 = vmul.f32 1.442695, %v1144_v19  ;;  %v800_v62 = vmul.f32 %v2237_v24, %v2156_v29  ;;  %v1145_v3 = vmul.f32 %v1129_v27, %v2170_v42 }
 0x1c9   : > { %2847 = vst [vmem:[#allocation5_spill] sm:$0xff] %v2181_v36  ;;  %v2204_v5 = vmul.f32 0.70710677, %v2181_v36  ;;  %v2245_v34 = vmul.f32 0.70710677, %v2207_v48  ;;  %1727 = vrcp.f32 %v2215_v13  ;;  %v2253_v51 = vpop.eup %1723  ;;  %v815_v15 = vmul.f32 %v2248_v9, %v2166_v33 }
 0x1ca   : > { %2850 = vst [vmem:[#allocation8_spill] sm:$0xff] %v2207_v48  ;;  %1729 = vrcp.f32 %v2235_v23  ;;  %v2273_v58 = vpop.eup %1725  ;;  %v1146_v63 = vmul.f32 %v1130_v49, %v698_v61  ;;  %v1167_v25 = vmul.f32 1.442695, %v1145_v3  ;;  %v2859_v36 = vmov -1.0  }
 0x1cb   : > { %2849 = vst [vmem:[#allocation7_spill] sm:$0xff] %v2204_v5  ;;  %v2242_v28 = vand.u32 2147483647, %v2204_v5  ;;  %v2268_v37 = vand.u32 2147483647, %v2245_v34  ;;  %1731 = vpow2.f32 %v1163_v47  ;;  %v816_v49 = vsub.f32 1.0, %v815_v15 }
 0x1cc   : > { %2851 = vst [vmem:[#allocation9_spill] sm:$0xff] %v2245_v34  ;;  %v2291_v34 = vmul.f32 0.5, %v2116_v20  ;;  %v801_v20 = vsub.f32 1.0, %v800_v62  ;;  %v1169_v60 = vmul.f32 1.442695, %v1146_v63  ;;  %v747_v63 = vsel %vm2320_vm7, %v2095_v59, %v2227_v17 }
 0x1cd   : > { %v715_v57 = vmul.f32 0.3275911, %v2242_v28  ;;  %2853 = vst [vmem:[#allocation11_spill] sm:$0xff] %v2268_v37  ;;  %v716_v48 = vmul.f32 0.3275911, %v2268_v37  ;;  %v2347_v59 = vmul.f32 %v2248_v9, %v816_v49  ;;  %v781_v5 = vor.u32 1.1754944e-38, %v2866_v2 }
 0x1ce   : > { %v590_v43 = vpop.f32.mrf.mxu0  ;;  %v619_v19 = vpop.f32.mrf.mxu1  ;;  %v758_v49 = vadd.f32 %v2124_v12, %v2212_v10  ;;  %v763_v10 = vand.u32 2147483647, %v2061_v40  ;;  %vm790_vm1 = vweird.f32 %v2223_v16  ;;  %vm834_vm2 = vweird.f32 %v2215_v13 }
 0x1cf   : > { %v2271_v53 = vadd.f32 %v590_v43, %v2035_v50  ;;  %v2281_v4 = vadd.f32 1.0, %v715_v57  ;;  %v2298_v27 = vpop.eup %1727  ;;  %v2301_v45 = vadd.f32 1.0, %v716_v48  ;;  %v2304_v61 = vadd.f32 %v619_v19, %v2037_v32  ;;  %vm2434_vm4 = vmor %vm789_vm11, %vm790_vm1 }
 0x1d0   : > { %v2306_v47 = vpop.eup %1729  ;;  %v2313_v50 = vsel %vm665_vm6, 1.0, %v2859_v36  ;;  %v830_v3 = vmul.f32 %v2298_v27, %v2215_v13  ;;  %v773_v19 = vadd.f32 %v2198_v1, %v772_v26  ;;  %vm764_vm3 = vcmp.eq.f32.partialorder %v763_v10, 8.507059e+37 }
 0x1d1   : > { %2854 = vst [vmem:[#allocation12_spill] sm:$0xff] %v2271_v53  ;;  %1733 = vrcp.f32 %v2281_v4  ;;  %v2296_v42 = vmul.f32 0.70710677, %v2271_v53  ;;  %v2310_v53 = vmul.f32 %v2223_v16, %v786_v41  ;;  %v1131_v41 = vsub.f32 0.0, %v2242_v28  ;;  %v2331_v62 = vpop.eup %1731 }
 0x1d2   : > { %1735 = vpow2.f32 %v1165_v11  ;;  %2858 = vst [vmem:[#allocation14_spill] sm:$0xff] %v2304_v61  ;;  %v845_v38 = vmul.f32 %v2306_v47, %v2235_v23  ;;  %v2337_v15 = vmul.f32 0.70710677, %v2304_v61  ;;  %vm805_vm6 = vweird.f32 %v2237_v24 }
 0x1d3   : > { %2857 = vst [vmem:[#allocation13_spill] sm:$0xff] %v2296_v42  ;;  %v701_v57 = vand.u32 2147483647, %v2296_v42  ;;  %1737 = vrcp.f32 %v2301_v45  ;;  %v2344_v42 = vmul.f32 %v2237_v24, %v801_v20  ;;  %v2361_v20 = vsel %vm2285_vm5, %v2172_v44, %v747_v63  ;;  %vm806_vm7 = vmor %vm804_vm14, %vm805_vm6 }
 0x1d4   : > { %2862 = vst [vmem:[#allocation15_spill] sm:$0xff] %v2337_v15  ;;  %1739 = vpow2.f32 %v1167_v25  ;;  %v2356_v26 = vand.u32 2147483647, %v2337_v15  ;;  %v831_v25 = vsub.f32 1.0, %v830_v3  ;;  %v846_v44 = vsub.f32 1.0, %v845_v38 }
 0x1d5   : > { %v717_v11 = vmul.f32 0.3275911, %v701_v57  ;;  %1741 = vpow2.f32 %v1169_v60  ;;  %v1147_v60 = vmul.f32 %v1131_v41, %v2242_v28  ;;  %v1133_v63 = vsub.f32 0.0, %v701_v57 }
 0x1d6   : > { %2863 = vst [vmem:[#allocation16_spill] sm:$0xff] %v2356_v26  ;;  %v718_v15 = vmul.f32 0.3275911, %v2356_v26  ;;  %v2867_v28 = vand.u32 2147483647, %v2128_v14  ;;  %v810_v56 = vand.u32 2147483648, %v2156_v29  ;;  %vm819_vm8 = vweird.f32 %v2166_v33 }
 0x1d7   : > { %v2341_v32 = vpop.eup %1733  ;;  %v2349_v17 = vadd.f32 1.0, %v717_v11  ;;  %v777_v11 = vsel %vm2365_vm10, %v2198_v1, %v773_v19  ;;  %v979_v41 = vmul.f32 1.0614054, %v2361_v20  ;;  %v2394_v2 = vmul.f32 1.442695, %v1147_v60 }
 0x1d8   : > { %v2351_v48 = vpop.eup %1735  ;;  %v860_v61 = vmul.f32 %v2341_v32, %v2281_v4  ;;  %vm779_vm12 = vcmp.eq.f32.partialorder %v2867_v28, 8.507059e+37  ;;  %v2386_v19 = vadd.f32 1.0, %v718_v15  ;;  %v832_v15 = vmul.f32 %v2298_v27, %v831_v25 }
 0x1d9   : > { %1743 = vrcp.f32 %v2349_v17  ;;  %v2375_v43 = vpop.eup %1737  ;;  %v2388_v38 = vsel %vm779_vm12, %v781_v5, %v777_v11  ;;  %2868 = vst [vmem:[#allocation17_spill] sm:$0xff] %v2394_v2  ;;  %v995_v14 = vadd.f32 -1.4531521, %v979_v41  ;;  %v2403_v5 = vmul.f32 %v2306_v47, %v846_v44 }
 0x1da   : > { %v861_v22 = vsub.f32 1.0, %v860_v61  ;;  %v875_v1 = vmul.f32 %v2375_v43, %v2301_v45  ;;  %v2392_v26 = vpop.eup %1739  ;;  %v981_v61 = vmul.f32 1.0614054, %v2388_v38  ;;  %v2405_v11 = vmul.f32 %v1133_v63, %v701_v57 }
 0x1db   : > { %v2398_v28 = vpop.eup %1741  ;;  %1745 = vrcp.f32 %v2386_v19  ;;  %v1011_v37 = vmul.f32 %v995_v14, %v2361_v20  ;;  %v765_v63 = vand.u32 2147483648, %v2061_v40  ;;  %v788_v14 = vadd.f32 %v2223_v16, %v2310_v53 }
 0x1dc   : > { %2869 = vst [vmem:[#allocation18_spill] sm:$0xff] %v2398_v28  ;;  %v2411_v3 = vmul.f32 %v2341_v32, %v861_v22  ;;  %v997_v41 = vadd.f32 -1.4531521, %v981_v61  ;;  %v876_v57 = vsub.f32 1.0, %v875_v1  ;;  %v762_v22 = vsel %vm2417_vm15, %v2124_v12, %v758_v49 }
 0x1dd   : > { %2870 = vst [vmem:[#allocation19_spill] sm:$0xff] %v2405_v11  ;;  %v1027_v36 = vadd.f32 1.4214138, %v1011_v37  ;;  %v766_v1 = vor.u32 1.1754944e-38, %v765_v63  ;;  %v793_v40 = vand.u32 2147483647, %v2135_v18  ;;  %v803_v28 = vadd.f32 %v2237_v24, %v2344_v42 }
 0x1de   : > { %v1013_v61 = vmul.f32 %v997_v41, %v2388_v38  ;;  %v795_v12 = vand.u32 2147483648, %v2135_v18  ;;  %v792_v41 = vsel %vm2434_vm4, %v2223_v16, %v788_v14  ;;  %v2445_v10 = vmul.f32 %v2375_v43, %v876_v57 }
 0x1df   : > { %v2408_v60 = vpop.eup %1743  ;;  %v1043_v53 = vmul.f32 %v1027_v36, %v2361_v20  ;;  %v2447_v25 = vsel %vm764_vm3, %v766_v1, %v762_v22  ;;  %vm794_vm5 = vcmp.eq.f32.partialorder %v793_v40, 8.507059e+37  ;;  %v808_v16 = vand.u32 2147483647, %v2156_v29 }
 0x1e0   : > { %v890_v44 = vmul.f32 %v2408_v60, %v2349_v17  ;;  %v1029_v49 = vadd.f32 1.4214138, %v1013_v61  ;;  %v796_v63 = vor.u32 1.1754944e-38, %v795_v12  ;;  %v980_v36 = vmul.f32 1.0614054, %v2447_v25 }
 0x1e1   : > { %v2451_v11 = vpop.eup %1745  ;;  %v807_v12 = vsel %vm806_vm7, %v2237_v24, %v803_v28  ;;  %vm809_vm9 = vcmp.eq.f32.partialorder %v808_v16, 8.507059e+37  ;;  %v833_v29 = vadd.f32 %v2298_v27, %v832_v15  ;;  %vm835_vm10 = vweird.f32 %v2298_v27 }
 0x1e2   : > { %v891_v37 = vsub.f32 1.0, %v890_v44  ;;  %v1045_v18 = vmul.f32 %v1029_v49, %v2388_v38  ;;  %v1059_v44 = vadd.f32 -0.28449672, %v1043_v53  ;;  %v2455_v61 = vsel %vm794_vm5, %v796_v63, %v792_v41  ;;  %vm2483_vm11 = vmor %vm834_vm2, %vm835_vm10 }
 0x1e3   : > { %v982_v14 = vmul.f32 1.0614054, %v2455_v61  ;;  %v2470_v1 = vmul.f32 %v2451_v11, %v2386_v19  ;;  %v996_v40 = vadd.f32 -1.4531521, %v980_v36  ;;  %v811_v49 = vor.u32 1.1754944e-38, %v810_v56 }
 0x1e4   : > { %v2461_v57 = vmul.f32 %v2408_v60, %v891_v37  ;;  %v1061_v42 = vadd.f32 -0.28449672, %v1045_v18  ;;  %v1075_v22 = vmul.f32 %v1059_v44, %v2361_v20  ;;  %v838_v28 = vand.u32 2147483647, %v2215_v13 }
 0x1e5   : > { %v998_v41 = vadd.f32 -1.4531521, %v982_v14  ;;  %v1012_v63 = vmul.f32 %v996_v40, %v2447_v25  ;;  %v2475_v18 = vsel %vm809_vm9, %v811_v49, %v807_v12  ;;  %v837_v15 = vsel %vm2483_vm11, %v2298_v27, %v833_v29 }
 0x1e6   : > { %v1077_v37 = vmul.f32 %v1061_v42, %v2388_v38  ;;  %v1091_v53 = vadd.f32 0.2548296, %v1075_v22  ;;  %v840_v56 = vand.u32 2147483648, %v2215_v13  ;;  %v983_v42 = vmul.f32 1.0614054, %v2475_v18 }
 0x1e7   : > { %v1014_v36 = vmul.f32 %v998_v41, %v2455_v61  ;;  %v1028_v16 = vadd.f32 1.4214138, %v1012_v63  ;;  %vm839_vm12 = vcmp.eq.f32.partialorder %v838_v28, 8.507059e+37  ;;  %vm849_vm13 = vweird.f32 %v2235_v23 }
 0x1e8   : > { %v1093_v44 = vadd.f32 0.2548296, %v1077_v37  ;;  %v1107_v2 = vmul.f32 %v1091_v53, %v2361_v20  ;;  %v841_v12 = vor.u32 1.1754944e-38, %v840_v56  ;;  %v999_v49 = vadd.f32 -1.4531521, %v983_v42 }
 0x1e9   : > { %v1030_v14 = vadd.f32 1.4214138, %v1014_v36  ;;  %v1044_v40 = vmul.f32 %v1028_v16, %v2447_v25  ;;  %v818_v37 = vadd.f32 %v2248_v9, %v2347_v59  ;;  %vm820_vm14 = vweird.f32 %v2248_v9 }
 0x1ea   : > { %v1109_v20 = vmul.f32 %v1093_v44, %v2388_v38  ;;  %v1187_v22 = vmul.f32 %v2174_v35, %v1107_v2  ;;  %v2502_v35 = vsel %vm839_vm12, %v841_v12, %v837_v15  ;;  %v1015_v2 = vmul.f32 %v999_v49, %v2475_v18  ;;  %vm2510_vm15 = vmor %vm819_vm8, %vm820_vm14 }
 0x1eb   : > { %v1046_v53 = vmul.f32 %v1030_v14, %v2455_v61  ;;  %v1060_v38 = vadd.f32 -0.28449672, %v1044_v40  ;;  %v823_v41 = vand.u32 2147483647, %v2166_v33  ;;  %v985_v44 = vmul.f32 1.0614054, %v2502_v35 }
 0x1ec   : > { %v1189_v27 = vmul.f32 %v2253_v51, %v1109_v20  ;;  %v1203_v13 = vsub.f32 1.0, %v1187_v22  ;;  %v906_v36 = vsub.f32 1.0, %v2470_v1  ;;  %v1031_v28 = vadd.f32 1.4214138, %v1015_v2 }
 0x1ed   : > { %v1062_v59 = vadd.f32 -0.28449672, %v1046_v53  ;;  %v1076_v24 = vmul.f32 %v1060_v38, %v2447_v25  ;;  %v822_v16 = vsel %vm2510_vm15, %v2248_v9, %v818_v37  ;;  %v1001_v42 = vadd.f32 -1.4531521, %v985_v44 }
 0x1ee   : > { %v1205_v63 = vsub.f32 1.0, %v1189_v27  ;;  %v1219_v29 = vmul.f32 %v1203_v13, %v2101_v0  ;;  %v1047_v22 = vmul.f32 %v1031_v28, %v2475_v18  ;;  %vm2522_vm1 = vcmp.eq.f32.partialorder %v823_v41, 8.507059e+37 }
 0x1ef   : > { %v1078_v56 = vmul.f32 %v1062_v59, %v2455_v61  ;;  %v1092_v20 = vadd.f32 0.2548296, %v1076_v24  ;;  %v825_v40 = vand.u32 2147483648, %v2166_v33  ;;  %vm864_vm2 = vweird.f32 %v2281_v4 }
 0x1f0   : > { %v1221_v0 = vmul.f32 %v1205_v63, %v2161_v30  ;;  %v1235_v15 = vadd.f32 1.0, %v1219_v29  ;;  %v1017_v9 = vmul.f32 %v1001_v42, %v2502_v35  ;;  %v848_v30 = vadd.f32 %v2306_v47, %v2403_v5 }
 0x1f1   : > { %v1094_v49 = vadd.f32 0.2548296, %v1078_v56  ;;  %v1108_v37 = vmul.f32 %v1092_v20, %v2447_v25  ;;  %v1063_v27 = vadd.f32 -0.28449672, %v1047_v22  ;;  %v826_v13 = vor.u32 1.1754944e-38, %v825_v40 }
 0x1f2   : > { %v1237_v12 = vadd.f32 1.0, %v1221_v0  ;;  %vm850_vm3 = vweird.f32 %v2306_v47  ;;  %v1251_v53 = vmul.f32 %v1235_v15, %v2082_v55  ;;  %v1033_v2 = vadd.f32 1.4214138, %v1017_v9 }
 0x1f3   : > { %v1110_v33 = vmul.f32 %v1094_v49, %v2455_v61  ;;  %v1188_v41 = vmul.f32 %v2209_v6, %v1108_v37  ;;  %v1079_v63 = vmul.f32 %v1063_v27, %v2475_v18  ;;  %v2540_v5 = vsel %vm2522_vm1, %v826_v13, %v822_v16  ;;  %vm2544_vm4 = vmor %vm849_vm13, %vm850_vm3 }
 0x1f4   : > { %v1253_v38 = vmul.f32 %v1237_v12, %v2110_v8  ;;  %v853_v55 = vand.u32 2147483647, %v2235_v23  ;;  %v1049_v29 = vmul.f32 %v1033_v2, %v2502_v35  ;;  %v852_v6 = vsel %vm2544_vm4, %v2306_v47, %v848_v30 }
 0x1f5   : > { %v1190_v61 = vmul.f32 %v2273_v58, %v1110_v33  ;;  %v1204_v59 = vsub.f32 1.0, %v1188_v41  ;;  %v1095_v44 = vadd.f32 0.2548296, %v1079_v63  ;;  %v855_v51 = vand.u32 2147483648, %v2235_v23 }
 0x1f6   : > { %v1267_v8 = vpack.c.bf16 %v1253_v38, %v1251_v53  ;;  %v984_v24 = vmul.f32 1.0614054, %v2540_v5  ;;  %v1065_v16 = vadd.f32 -0.28449672, %v1049_v29  ;;  %v863_v0 = vadd.f32 %v2341_v32, %v2411_v3 }
 0x1f7   : > { %v1206_v28 = vsub.f32 1.0, %v1190_v61  ;;  %vm865_vm5 = vweird.f32 %v2341_v32  ;;  %vm894_vm6 = vweird.f32 %v2349_v17  ;;  %v1220_v58 = vmul.f32 %v1204_v59, %v2108_v7 }
 0x1f8   : > { %1415 = vmatmul.bf16.vlgmr.msra.gmra.mxu2 %v1267_v8  ;;  %v1111_v47 = vmul.f32 %v1095_v44, %v2475_v18  ;;  %v856_v15 = vor.u32 1.1754944e-38, %v855_v51  ;;  %v1000_v56 = vadd.f32 -1.4531521, %v984_v24  ;;  %v1081_v42 = vmul.f32 %v1065_v16, %v2502_v35  ;;  %vm2571_vm8 = vmor %vm864_vm2, %vm865_vm5 }
 0x1f9   : > { %v1222_v23 = vmul.f32 %v1206_v28, %v2164_v31  ;;  %vm854_vm7 = vcmp.eq.f32.partialorder %v853_v55, 8.507059e+37  ;;  %v868_v20 = vand.u32 2147483647, %v2281_v4  ;;  %v1236_v22 = vadd.f32 1.0, %v1220_v58 }
 0x1fa   : > { %v1191_v3 = vmul.f32 %v2331_v62, %v1111_v47  ;;  %v2566_v14 = vsel %vm854_vm7, %v856_v15, %v852_v6  ;;  %v1016_v40 = vmul.f32 %v1000_v56, %v2540_v5  ;;  %v1097_v31 = vadd.f32 0.2548296, %v1081_v42 }
 0x1fb   : > { %v1238_v18 = vadd.f32 1.0, %v1222_v23  ;;  %v986_v12 = vmul.f32 1.0614054, %v2566_v14  ;;  %v867_v49 = vsel %vm2571_vm8, %v2341_v32, %v863_v0  ;;  %v1252_v62 = vmul.f32 %v1236_v22, %v2090_v52 }
 0x1fc   : > { %v1207_v9 = vsub.f32 1.0, %v1191_v3  ;;  %v1032_v30 = vadd.f32 1.4214138, %v1016_v40  ;;  %v870_v37 = vand.u32 2147483648, %v2281_v4  ;;  %vm879_vm9 = vweird.f32 %v2301_v45 }
 0x1fd   : > { %v1254_v27 = vmul.f32 %v1238_v18, %v2143_v21  ;;  %v1113_v13 = vmul.f32 %v1097_v31, %v2502_v35  ;;  %v1002_v53 = vadd.f32 -1.4531521, %v986_v12  ;;  %v893_v38 = vadd.f32 %v2408_v60, %v2461_v57 }
 0x1fe   : > { %v1223_v33 = vmul.f32 %v1207_v9, %v2258_v54  ;;  %v1048_v32 = vmul.f32 %v1032_v30, %v2540_v5  ;;  %v871_v2 = vor.u32 1.1754944e-38, %v870_v37  ;;  %vm895_vm10 = vweird.f32 %v2408_v60 }
 0x1ff   : > { %v1268_v52 = vpack.c.bf16 %v1254_v27, %v1252_v62  ;;  %v1193_v4 = vmul.f32 %v2392_v26, %v1113_v13  ;;  %v1018_v41 = vmul.f32 %v1002_v53, %v2566_v14  ;;  %vm869_vm11 = vcmp.eq.f32.partialorder %v868_v20, 8.507059e+37  ;;  %vm2599_vm12 = vmor %vm894_vm6, %vm895_vm10  ;;  %v2892_v13 = vld [vmem:[#allocation19_spill] sm:$0xff]  ;;  %v2893_v53 = vld [vmem:[#allocation18_spill] sm:$0xff] }
 0x200   : > { %v1239_v21 = vadd.f32 1.0, %v1223_v33  ;;  %v1064_v63 = vadd.f32 -0.28449672, %v1048_v32  ;;  %v2591_v35 = vsel %vm869_vm11, %v871_v2, %v867_v49  ;;  %v898_v25 = vand.u32 2147483647, %v2349_v17  ;;  %v2894_v33 = vld [vmem:[#allocation10_spill] sm:$0xff] }
 0x201   : > { %v907_v54 = vmul.f32 %v2451_v11, %v906_v36  ;;  %1444 = vmatmul.bf16.vlgmr.msra.gmra.mxu3 %v1268_v52  ;;  %v1209_v57 = vsub.f32 1.0, %v1193_v4  ;;  %v1034_v55 = vadd.f32 1.4214138, %v1018_v41  ;;  %v900_v8 = vand.u32 2147483648, %v2349_v17 }
 0x202   : > { %vm909_vm13 = vweird.f32 %v2386_v19  ;;  %v1080_v61 = vmul.f32 %v1064_v63, %v2540_v5  ;;  %v897_v1 = vsel %vm2599_vm12, %v2408_v60, %v893_v38  ;;  %v987_v36 = vmul.f32 1.0614054, %v2591_v35 }
 0x203   : > { %v878_v29 = vadd.f32 %v2375_v43, %v2445_v10  ;;  %v1225_v6 = vmul.f32 %v1209_v57, %v2313_v50  ;;  %v1050_v59 = vmul.f32 %v1034_v55, %v2566_v14  ;;  %v901_v44 = vor.u32 1.1754944e-38, %v900_v8  ;;  %v2897_v57 = vld [vmem:[#allocation11_spill] sm:$0xff] }
 0x204   : > { %vm880_vm14 = vweird.f32 %v2375_v43  ;;  %vm666_vm15 = vcmp.ge.f32.partialorder %v2178_v46, 0.0  ;;  %v1255_v17 = vmul.f32 %v1239_v21, %v2193_v39  ;;  %v1096_v51 = vadd.f32 0.2548296, %v1080_v61 }
 0x205   : > { %vm899_vm1 = vcmp.eq.f32.partialorder %v898_v25, 8.507059e+37  ;;  %v1003_v24 = vadd.f32 -1.4531521, %v987_v36  ;;  %v1241_v60 = vadd.f32 1.0, %v1225_v6  ;;  %v1066_v28 = vadd.f32 -0.28449672, %v1050_v59  ;;  %vm2625_vm2 = vmor %vm879_vm9, %vm880_vm14 }
 0x206   : > { %v2617_v16 = vsel %vm899_vm1, %v901_v44, %v897_v1  ;;  %v883_v10 = vand.u32 2147483647, %v2301_v45  ;;  %v1112_v50 = vmul.f32 %v1096_v51, %v2540_v5  ;;  %v908_v39 = vadd.f32 %v2451_v11, %v907_v54  ;;  %v2899_v59 = vld [vmem:[#allocation4_spill] sm:$0xff] }
 0x207   : > { %v989_v0 = vmul.f32 1.0614054, %v2617_v16  ;;  %v1019_v58 = vmul.f32 %v1003_v24, %v2591_v35  ;;  %v1257_v15 = vmul.f32 %v1241_v60, %v2291_v34  ;;  %v1082_v56 = vmul.f32 %v1066_v28, %v2566_v14  ;;  %v2900_v60 = vld [vmem:[#allocation7_spill] sm:$0xff] }
 0x208   : > { %v882_v5 = vsel %vm2625_vm2, %v2375_v43, %v878_v29  ;;  %v885_v23 = vand.u32 2147483648, %v2301_v45  ;;  %v1192_v42 = vmul.f32 %v2351_v48, %v1112_v50  ;;  %vm910_vm3 = vweird.f32 %v2451_v11  ;;  %v2889_v43 = vld [vmem:[#allocation17_spill] sm:$0xff] }
 0x209   : > { %v1005_v20 = vadd.f32 -1.4531521, %v989_v0  ;;  %v1035_v22 = vadd.f32 1.4214138, %v1019_v58  ;;  %v1269_v3 = vpack.c.bf16 %v1257_v15, %v1255_v17  ;;  %v1098_v40 = vadd.f32 0.2548296, %v1082_v56  ;;  %vm2647_vm5 = vmor %vm909_vm13, %vm910_vm3 }
 0x20a   : > { %vm884_vm4 = vcmp.eq.f32.partialorder %v883_v10, 8.507059e+37  ;;  %v886_v7 = vor.u32 1.1754944e-38, %v885_v23  ;;  %v1208_v18 = vsub.f32 1.0, %v1192_v42  ;;  %v913_v12 = vand.u32 2147483647, %v2386_v19  ;;  %v2901_v15 = vld [vmem:[#allocation6_spill] sm:$0xff] }
 0x20b   : > { %v1021_v34 = vmul.f32 %v1005_v20, %v2617_v16  ;;  %v1051_v31 = vmul.f32 %v1035_v22, %v2591_v35  ;;  %1747 = vpow2.f32 %v2889_v43  ;;  %1420 = vmatmul.bf16.gmra.mxu2 %v1269_v3  ;;  %v1114_v45 = vmul.f32 %v1098_v40, %v2566_v14  ;;  %v2902_v40 = vld [vmem:[#allocation13_spill] sm:$0xff] }
 0x20c   : > { %v2643_v48 = vsel %vm884_vm4, %v886_v7, %v882_v5  ;;  %v915_v62 = vand.u32 2147483648, %v2386_v19  ;;  %v912_v37 = vsel %vm2647_vm5, %v2451_v11, %v908_v39  ;;  %v1175_v14 = vmul.f32 1.442695, %v2892_v13  ;;  %v2896_v11 = vld [vmem:[#allocation16_spill] sm:$0xff] }
 0x20d   : > { %v1037_v9 = vadd.f32 1.4214138, %v1021_v34  ;;  %v1067_v30 = vadd.f32 -0.28449672, %v1051_v31  ;;  %v988_v27 = vmul.f32 1.0614054, %v2643_v48  ;;  %v1194_v38 = vmul.f32 %v2893_v53, %v1114_v45 }
 0x20e   : > { %v1224_v32 = vmul.f32 %v1208_v18, %v2894_v33  ;;  %v916_v2 = vor.u32 1.1754944e-38, %v915_v62  ;;  %vm914_vm6 = vcmp.eq.f32.partialorder %v913_v12, 8.507059e+37  ;;  %v2895_v41 = vmov -1.0  }
 0x20f   : > { %v1053_v52 = vmul.f32 %v1037_v9, %v2617_v16  ;;  %v1083_v4 = vmul.f32 %v1067_v30, %v2591_v35  ;;  %v1004_v19 = vadd.f32 -1.4531521, %v988_v27  ;;  %v682_v21 = vsel %vm666_vm15, 1.0, %v2895_v41  ;;  %v2903_v30 = vld [vmem:[#allocation2_spill] sm:$0xff] }
 0x210   : > { %v1134_v63 = vsub.f32 0.0, %v2896_v11  ;;  %v1210_v25 = vsub.f32 1.0, %v1194_v38  ;;  %v2665_v54 = vsel %vm914_vm6, %v916_v2, %v912_v37  ;;  %v2898_v55 = vsub.f32 0.0, %v2897_v57  ;;  %v2905_v2 = vld [vmem:[#allocation5_spill] sm:$0xff] }
 0x211   : > { %v1069_v8 = vadd.f32 -0.28449672, %v1053_v52  ;;  %v1099_v61 = vadd.f32 0.2548296, %v1083_v4  ;;  %v990_v1 = vmul.f32 1.0614054, %v2665_v54  ;;  %v1748_v36 = vpop.eup %1747  ;;  %1749 = vpow2.f32 %v1175_v14 }
 0x212   : > { %v1148_v26 = vmul.f32 %v2898_v55, %v2897_v57  ;;  %v1226_v29 = vmul.f32 %v1210_v25, %v682_v21  ;;  %v1240_v6 = vadd.f32 1.0, %v1224_v32  ;;  %v1020_v46 = vmul.f32 %v1004_v19, %v2643_v48  ;;  %v2904_v14 = vld [vmem:[#allocation3_spill] sm:$0xff]  ;;  %v2907_v25 = vld [vmem:[#allocation12_spill] sm:$0xff] }
 0x213   : > { %v634_v44 = vmul.f32 0.5, %v2899_v59  ;;  %v1085_v17 = vmul.f32 %v1069_v8, %v2617_v16  ;;  %v1115_v51 = vmul.f32 %v1099_v61, %v2591_v35  ;;  %v1006_v24 = vadd.f32 -1.4531521, %v990_v1 }
 0x214   : > { %vm667_vm7 = vcmp.ge.f32.partialorder %v2900_v60, 0.0  ;;  %v1150_v28 = vmul.f32 %v1134_v63, %v2896_v11  ;;  %v1242_v10 = vadd.f32 1.0, %v1226_v29  ;;  %v1036_v50 = vadd.f32 1.4214138, %v1020_v46  ;;  %v2906_v63 = vld [vmem:[#allocation9_spill] sm:$0xff] }
 0x215   : > { %v1173_v0 = vmul.f32 1.442695, %v1148_v26  ;;  %v1101_v58 = vadd.f32 0.2548296, %v1085_v17  ;;  %v1195_v47 = vmul.f32 %v1748_v36, %v1115_v51  ;;  %v1022_v39 = vmul.f32 %v1006_v24, %v2665_v54  ;;  %v2908_v51 = vld [vmem:[#allocation15_spill] sm:$0xff] }
 0x216   : > { %v1256_v56 = vmul.f32 %v1240_v6, %v2901_v15  ;;  %v1258_v5 = vmul.f32 %v1242_v10, %v634_v44  ;;  %v1052_v23 = vmul.f32 %v1036_v50, %v2643_v48  ;;  %v683_v42 = vsel %vm667_vm7, 1.0, %v2895_v41 }
 0x217   : > { %v1117_v35 = vmul.f32 %v1101_v58, %v2617_v16  ;;  %v1211_v20 = vsub.f32 1.0, %v1195_v47  ;;  %v1038_v22 = vadd.f32 1.4214138, %v1022_v39  ;;  %v1750_v3 = vpop.eup %1749  ;;  %vm669_vm8 = vcmp.ge.f32.partialorder %v2902_v40, 0.0 }
 0x218   : > { %v1177_v7 = vmul.f32 1.442695, %v1150_v28  ;;  %v1270_v18 = vpack.c.bf16 %v1258_v5, %v1256_v56  ;;  %v1068_v34 = vadd.f32 -0.28449672, %v1052_v23  ;;  %1751 = vpow2.f32 %v1173_v0 }
 0x219   : > { %v1197_v31 = vmul.f32 %v1750_v3, %v1117_v35  ;;  %v1227_v12 = vmul.f32 %v1211_v20, %v683_v42  ;;  %v1054_v43 = vmul.f32 %v1038_v22, %v2665_v54  ;;  %v685_v27 = vsel %vm669_vm8, 1.0, %v2895_v41  ;;  %v2909_v35 = vld [vmem:[#allocation8_spill] sm:$0xff]  ;;  %v2910_v22 = vld [vmem:[#allocation14_spill] sm:$0xff] }
 0x21a   : > { %1449 = vmatmul.bf16.gmra.mxu3 %v1270_v18  ;;  %v1084_v45 = vmul.f32 %v1068_v34, %v2643_v48  ;;  %1753 = vpow2.f32 %v1177_v7  ;;  %v635_v52 = vmul.f32 0.5, %v2905_v2  ;;  %vm668_vm9 = vcmp.ge.f32.partialorder %v2906_v63, 0.0 }
 0x21b   : > { %v1213_v9 = vsub.f32 1.0, %v1197_v31  ;;  %v1070_v16 = vadd.f32 -0.28449672, %v1054_v43  ;;  %v1243_v33 = vadd.f32 1.0, %v1227_v12  ;;  %v637_v57 = vmul.f32 0.5, %v2907_v25 }
 0x21c   : > { %v1100_v13 = vadd.f32 0.2548296, %v1084_v45  ;;  %v684_v6 = vsel %vm668_vm9, 1.0, %v2895_v41  ;;  %vm670_vm10 = vcmp.ge.f32.partialorder %v2908_v51, 0.0  ;;  %v636_v20 = vmul.f32 0.5, %v2909_v35 }
 0x21d   : > { %v1229_v38 = vmul.f32 %v1213_v9, %v685_v27  ;;  %v1086_v32 = vmul.f32 %v1070_v16, %v2665_v54  ;;  %v1259_v1 = vmul.f32 %v1243_v33, %v635_v52  ;;  %v686_v39 = vsel %vm670_vm10, 1.0, %v2895_v41 }
 0x21e   : > { %v1116_v4 = vmul.f32 %v1100_v13, %v2643_v48  ;;  %v1752_v11 = vpop.eup %1751  ;;  %v638_v3 = vmul.f32 0.5, %v2910_v22 }
 0x21f   : > { %v1245_v55 = vadd.f32 1.0, %v1229_v38  ;;  %v1102_v26 = vadd.f32 0.2548296, %v1086_v32 }
 0x220   : > { %v1196_v8 = vmul.f32 %v1752_v11, %v1116_v4  ;;  %v1754_v29 = vpop.eup %1753 }
 0x221   : > { %v593_v49 = vpop.f32.mrf.mxu0  ;;  %v622_v62 = vpop.f32.mrf.mxu1  ;;  %v1261_v36 = vmul.f32 %v1245_v55, %v637_v57  ;;  %v1118_v48 = vmul.f32 %v1102_v26, %v2665_v54 }
 0x222   : > { %v2686_v37 = vadd.f32 %v593_v49, %v2903_v30  ;;  %v2690_v53 = vadd.f32 %v622_v62, %v2904_v14  ;;  %v1212_v46 = vsub.f32 1.0, %v1196_v8 }
 0x223   : > { %v1271_v24 = vpack.c.bf16 %v1261_v36, %v1259_v1  ;;  %v1198_v60 = vmul.f32 %v1754_v29, %v1118_v48 }
 0x224   : > { %v2696_v19 = vmul.f32 0.70710677, %v2686_v37  ;;  %v2699_v21 = vmul.f32 0.70710677, %v2690_v53  ;;  %v1228_v50 = vmul.f32 %v1212_v46, %v684_v6 }
 0x225   : > { %1425 = vmatmul.bf16.gmra.mxu2 %v1271_v24  ;;  %v1214_v58 = vsub.f32 1.0, %v1198_v60 }
 0x226   : > { %v2704_v61 = vand.u32 2147483647, %v2696_v19  ;;  %v2710_v44 = vand.u32 2147483647, %v2699_v21  ;;  %v1244_v5 = vadd.f32 1.0, %v1228_v50 }
 0x227   : > { %v1230_v56 = vmul.f32 %v1214_v58, %v686_v39 }
 0x228   : > { %v719_v59 = vmul.f32 0.3275911, %v2704_v61  ;;  %v720_v0 = vmul.f32 0.3275911, %v2710_v44  ;;  %v1260_v34 = vmul.f32 %v1244_v5, %v636_v20  ;;  %v1135_v32 = vsub.f32 0.0, %v2704_v61 }
 0x229   : > { %v595_v17 = vpop.f32.mrf.mxu0  ;;  %v624_v10 = vpop.f32.mrf.mxu1  ;;  %v1246_v40 = vadd.f32 1.0, %v1230_v56  ;;  %v1136_v51 = vsub.f32 0.0, %v2710_v44 }
 0x22a   : > { %v2714_v28 = vadd.f32 %v595_v17, %v2903_v30  ;;  %v735_v54 = vadd.f32 1.0, %v719_v59  ;;  %v2722_v15 = vadd.f32 %v624_v10, %v2904_v14  ;;  %v2724_v23 = vadd.f32 1.0, %v720_v0 }
 0x22b   : > { %v1262_v31 = vmul.f32 %v1246_v40, %v638_v3  ;;  %v1151_v57 = vmul.f32 %v1135_v32, %v2704_v61 }
 0x22c   : > { %v2718_v47 = vmul.f32 0.70710677, %v2714_v28  ;;  %1755 = vrcp.f32 %v735_v54  ;;  %v2734_v18 = vmul.f32 0.70710677, %v2722_v15  ;;  %v930_v14 = vand.u32 2147483648, %v735_v54 }
 0x22d   : > { %1757 = vrcp.f32 %v2724_v23  ;;  %v1272_v49 = vpack.c.bf16 %v1262_v31, %v1260_v34  ;;  %v928_v33 = vand.u32 2147483647, %v735_v54  ;;  %vm924_vm12 = vweird.f32 %v735_v54 }
 0x22e   : > { %v2727_v42 = vand.u32 2147483647, %v2718_v47  ;;  %v2737_v45 = vand.u32 2147483647, %v2734_v18  ;;  %v931_v11 = vor.u32 1.1754944e-38, %v930_v14  ;;  %vm939_vm2 = vweird.f32 %v2724_v23 }
 0x22f   : > { %1454 = vmatmul.bf16.gmra.mxu3 %v1272_v49  ;;  %vm929_vm14 = vcmp.eq.f32.partialorder %v928_v33, 8.507059e+37  ;;  %v1179_v17 = vmul.f32 1.442695, %v1151_v57  ;;  %v943_v5 = vand.u32 2147483647, %v2724_v23  ;;  %v945_v35 = vand.u32 2147483648, %v2724_v23 }
 0x230   : > { %v721_v7 = vmul.f32 0.3275911, %v2727_v42  ;;  %v722_v9 = vmul.f32 0.3275911, %v2737_v45  ;;  %v1137_v10 = vsub.f32 0.0, %v2727_v42 }
 0x231   : > { %vm944_vm9 = vcmp.eq.f32.partialorder %v943_v5, 8.507059e+37 }
 0x232   : > { %v1756_v12 = vpop.eup %1755  ;;  %v737_v43 = vadd.f32 1.0, %v721_v7  ;;  %v2744_v13 = vadd.f32 1.0, %v722_v9  ;;  %v946_v7 = vor.u32 1.1754944e-38, %v945_v35  ;;  %v1153_v49 = vmul.f32 %v1137_v10, %v2727_v42 }
 0x233   : > { %v920_v62 = vmul.f32 %v1756_v12, %v735_v54  ;;  %v2740_v16 = vpop.eup %1757  ;;  %vm925_vm11 = vweird.f32 %v1756_v12 }
 0x234   : > { %1759 = vrcp.f32 %v737_v43  ;;  %v935_v27 = vmul.f32 %v2740_v16, %v2724_v23  ;;  %vm926_vm13 = vmor %vm924_vm12, %vm925_vm11  ;;  %v958_v48 = vand.u32 2147483647, %v737_v43  ;;  %v960_v29 = vand.u32 2147483648, %v737_v43 }
 0x235   : > { %v921_v30 = vsub.f32 1.0, %v920_v62  ;;  %1761 = vrcp.f32 %v2744_v13  ;;  %vm954_vm1 = vweird.f32 %v737_v43  ;;  %vm940_vm5 = vweird.f32 %v2740_v16 }
 0x236   : > { %v936_v4 = vsub.f32 1.0, %v935_v27  ;;  %vm959_vm4 = vcmp.eq.f32.partialorder %v958_v48, 8.507059e+37  ;;  %v961_v50 = vor.u32 1.1754944e-38, %v960_v29  ;;  %vm941_vm6 = vmor %vm939_vm2, %vm940_vm5  ;;  %vm969_vm8 = vweird.f32 %v2744_v13 }
 0x237   : > { %v922_v38 = vmul.f32 %v1756_v12, %v921_v30  ;;  %v973_v34 = vand.u32 2147483647, %v2744_v13  ;;  %1763 = vpow2.f32 %v1179_v17  ;;  %vm671_vm12 = vcmp.ge.f32.partialorder %v2696_v19, 0.0 }
 0x238   : > { %v937_v36 = vmul.f32 %v2740_v16, %v936_v4  ;;  %v1183_v4 = vmul.f32 1.442695, %v1153_v49  ;;  %v687_v10 = vsel %vm671_vm12, 1.0, %v2895_v41 }
 0x239   : > { %v923_v2 = vadd.f32 %v1756_v12, %v922_v38  ;;  %vm974_vm11 = vcmp.eq.f32.partialorder %v973_v34, 8.507059e+37 }
 0x23a   : > { %v1760_v52 = vpop.eup %1759  ;;  %v938_v39 = vadd.f32 %v2740_v16, %v937_v36  ;;  %1765 = vpow2.f32 %v1183_v4 }
 0x23b   : > { %v950_v63 = vmul.f32 %v1760_v52, %v737_v43  ;;  %v927_v25 = vsel %vm926_vm13, %v1756_v12, %v923_v2  ;;  %v1762_v1 = vpop.eup %1761  ;;  %vm955_vm15 = vweird.f32 %v1760_v52  ;;  %v975_v43 = vand.u32 2147483648, %v2744_v13 }
 0x23c   : > { %v932_v55 = vsel %vm929_vm14, %v931_v11, %v927_v25  ;;  %v965_v46 = vmul.f32 %v1762_v1, %v2744_v13  ;;  %vm956_vm3 = vmor %vm954_vm1, %vm955_vm15  ;;  %vm970_vm7 = vweird.f32 %v1762_v1  ;;  %v942_v40 = vsel %vm941_vm6, %v2740_v16, %v938_v39 }
 0x23d   : > { %v951_v26 = vsub.f32 1.0, %v950_v63  ;;  %v991_v8 = vmul.f32 1.0614054, %v932_v55  ;;  %vm971_vm10 = vmor %vm969_vm8, %vm970_vm7  ;;  %v947_v23 = vsel %vm944_vm9, %v946_v7, %v942_v40  ;;  %v976_v27 = vor.u32 1.1754944e-38, %v975_v43  ;;  %v1764_v25 = vpop.eup %1763 }
 0x23e   : > { %v966_v24 = vsub.f32 1.0, %v965_v46  ;;  %v992_v14 = vmul.f32 1.0614054, %v947_v23  ;;  %v1138_v16 = vsub.f32 0.0, %v2737_v45  ;;  %vm673_vm13 = vcmp.ge.f32.partialorder %v2718_v47, 0.0 }
 0x23f   : > { %v952_v6 = vmul.f32 %v1760_v52, %v951_v26  ;;  %v1007_v59 = vadd.f32 -1.4531521, %v991_v8  ;;  %vm672_vm14 = vcmp.ge.f32.partialorder %v2699_v21, 0.0  ;;  %v639_v47 = vmul.f32 0.5, %v2686_v37 }
 0x240   : > { %v967_v54 = vmul.f32 %v1762_v1, %v966_v24  ;;  %v1008_v2 = vadd.f32 -1.4531521, %v992_v14  ;;  %v1154_v57 = vmul.f32 %v1138_v16, %v2737_v45  ;;  %v688_v49 = vsel %vm672_vm14, 1.0, %v2895_v41 }
 0x241   : > { %v953_v60 = vadd.f32 %v1760_v52, %v952_v6  ;;  %v1023_v61 = vmul.f32 %v1007_v59, %v932_v55  ;;  %vm674_vm15 = vcmp.ge.f32.partialorder %v2734_v18, 0.0  ;;  %v640_v37 = vmul.f32 0.5, %v2690_v53 }
 0x242   : > { %v968_v3 = vadd.f32 %v1762_v1, %v967_v54  ;;  %v1024_v42 = vmul.f32 %v1008_v2, %v947_v23  ;;  %v1185_v59 = vmul.f32 1.442695, %v1154_v57 }
 0x243   : > { %v957_v0 = vsel %vm956_vm3, %v1760_v52, %v953_v60  ;;  %v1039_v58 = vadd.f32 1.4214138, %v1023_v61  ;;  %v1152_v52 = vmul.f32 %v1136_v51, %v2710_v44  ;;  %v1766_v61 = vpop.eup %1765 }
 0x244   : > { %v962_v56 = vsel %vm959_vm4, %v961_v50, %v957_v0  ;;  %v972_v62 = vsel %vm971_vm10, %v1762_v1, %v968_v3  ;;  %v1040_v36 = vadd.f32 1.4214138, %v1024_v42 }
 0x245   : > { %v993_v20 = vmul.f32 1.0614054, %v962_v56  ;;  %v1055_v22 = vmul.f32 %v1039_v58, %v932_v55  ;;  %v977_v32 = vsel %vm974_vm11, %v976_v27, %v972_v62  ;;  %v1181_v48 = vmul.f32 1.442695, %v1152_v52 }
 0x246   : > { %v994_v13 = vmul.f32 1.0614054, %v977_v32  ;;  %v1056_v46 = vmul.f32 %v1040_v36, %v947_v23  ;;  %v690_v27 = vsel %vm674_vm15, 1.0, %v2895_v41 }
 0x247   : > { %v1009_v31 = vadd.f32 -1.4531521, %v993_v20  ;;  %v1071_v12 = vadd.f32 -0.28449672, %v1055_v22  ;;  %1767 = vpow2.f32 %v1181_v48  ;;  %v689_v20 = vsel %vm673_vm13, 1.0, %v2895_v41 }
 0x248   : > { %v1010_v26 = vadd.f32 -1.4531521, %v994_v13  ;;  %1769 = vpow2.f32 %v1185_v59  ;;  %v1688_v41 = vld [vmem:[%s2823_s6] ss:$0 sm:$0xff] }
 0x249   : > { %v1025_v9 = vmul.f32 %v1009_v31, %v962_v56  ;;  %v1087_v30 = vmul.f32 %v1071_v12, %v932_v55  ;;  %v641_v31 = vmul.f32 0.5, %v2714_v28  ;;  %v642_v28 = vmul.f32 0.5, %v2722_v15  ;;  %v1771_v15 = vld [vmem:[%s1845_s30] sm:$0xff] }
 0x24a   : > { %v1026_v29 = vmul.f32 %v1010_v26, %v977_v32  ;;  %v1772_v26 = vld [vmem:[%s1845_s30 + $0x8] sm:$0xff] }
 0x24b   : > { %v1041_v38 = vadd.f32 1.4214138, %v1025_v9  ;;  %v1103_v33 = vadd.f32 0.2548296, %v1087_v30 }
 0x24c   : > { %v1042_v17 = vadd.f32 1.4214138, %v1026_v29 }
 0x24d   : > { %v1057_v11 = vmul.f32 %v1041_v38, %v962_v56  ;;  %v1119_v63 = vmul.f32 %v1103_v33, %v932_v55  ;;  %v1072_v55 = vadd.f32 -0.28449672, %v1056_v46  ;;  %v1768_v35 = vpop.eup %1767  ;;  %v1773_v46 = vld [vmem:[%s1845_s30 + $0x10] sm:$0xff] }
 0x24e   : > { %v1058_v24 = vmul.f32 %v1042_v17, %v977_v32  ;;  %v1770_v34 = vpop.eup %1769 }
 0x24f   : > { %v1073_v8 = vadd.f32 -0.28449672, %v1057_v11  ;;  %v1199_v1 = vmul.f32 %v1764_v25, %v1119_v63  ;;  %v1088_v45 = vmul.f32 %v1072_v55, %v947_v23  ;;  %v1774_v55 = vld [vmem:[%s1845_s30 + $0x18] sm:$0xff] }
 0x250   : > { %v1074_v50 = vadd.f32 -0.28449672, %v1058_v24 }
 0x251   : > { %v1089_v6 = vmul.f32 %v1073_v8, %v962_v56  ;;  %v1215_v51 = vsub.f32 1.0, %v1199_v1  ;;  %v1104_v58 = vadd.f32 0.2548296, %v1088_v45 }
 0x252   : > { %v1090_v39 = vmul.f32 %v1074_v50, %v977_v32 }
 0x253   : > { %v1105_v44 = vadd.f32 0.2548296, %v1089_v6  ;;  %v1231_v0 = vmul.f32 %v1215_v51, %v687_v10  ;;  %v1120_v19 = vmul.f32 %v1104_v58, %v947_v23 }
 0x254   : > { %v1106_v22 = vadd.f32 0.2548296, %v1090_v39 }
 0x255   : > { %v1121_v60 = vmul.f32 %v1105_v44, %v962_v56  ;;  %v1247_v3 = vadd.f32 1.0, %v1231_v0  ;;  %v1200_v40 = vmul.f32 %v1768_v35, %v1120_v19  ;;  %v1776_v19 = vld [vmem:[%s1845_s30 + $0x28] sm:$0xff] }
 0x256   : > { %v1122_v7 = vmul.f32 %v1106_v22, %v977_v32 }
 0x257   : > { %v1201_v54 = vmul.f32 %v1766_v61, %v1121_v60  ;;  %v1216_v43 = vsub.f32 1.0, %v1200_v40  ;;  %v1263_v62 = vmul.f32 %v1247_v3, %v639_v47 }
 0x258   : > { %v1202_v23 = vmul.f32 %v1770_v34, %v1122_v7  ;;  %v1777_v7 = vld [vmem:[%s1845_s30 + $0x30] sm:$0xff] }
 0x259   : > { %v1217_v5 = vsub.f32 1.0, %v1201_v54  ;;  %v1232_v30 = vmul.f32 %v1216_v43, %v688_v49  ;;  %v1775_v54 = vld [vmem:[%s1845_s30 + $0x20] sm:$0xff]  ;;  %v1778_v43 = vld [vmem:[%s1845_s30 + $0x38] sm:$0xff] }
 0x25a   : > { %v1218_v21 = vsub.f32 1.0, %v1202_v23 }
 0x25b   : > { %v1233_v56 = vmul.f32 %v1217_v5, %v689_v20  ;;  %v1248_v38 = vadd.f32 1.0, %v1232_v30 }
 0x25c   : > { %v1234_v16 = vmul.f32 %v1218_v21, %v690_v27 }
 0x25d   : > { %v1249_v12 = vadd.f32 1.0, %v1233_v56  ;;  %v1264_v32 = vmul.f32 %v1248_v38, %v640_v37 }
 0x25e   : > { %v1250_v33 = vadd.f32 1.0, %v1234_v16 }
 0x25f   : > { %v1265_v9 = vmul.f32 %v1249_v12, %v641_v31 }
 0x260   : > { %v1266_v18 = vmul.f32 %v1250_v33, %v642_v28 }
 0x261   : > { %v1273_v14 = vpack.c.bf16 %v1265_v9, %v1263_v62 }
 0x262   : > { %v1274_v2 = vpack.c.bf16 %v1266_v18, %v1264_v32 }
 0x263   : > { %1430 = vmatmul.bf16.gmra.mxu2 %v1273_v14 }
 0x264   : > { %1459 = vmatmul.bf16.gmra.mxu3 %v1274_v2 }
 0x27b   : > { %v1416_v52 = vpop.f32.mrf.mxu2 }
 0x27c   : > { %v1417_v4 = vadd.f32 %v1688_v41, %v1416_v52 }
 0x283   : > { %v1418_v53 = vpop.f32.mrf.mxu2 }
 0x284   : > { %v1445_v13 = vpop.f32.mrf.mxu3  ;;  %v1419_v42 = vadd.f32 %v1688_v41, %v1418_v53 }
 0x285   : > { %v1446_v11 = vadd.f32 %v1445_v13, %v1417_v4 }
 0x287   : > { %v1465_v63 = vadd.f32 %v1771_v15, %v1446_v11 }
 0x289   : > { %1473 = vst.msk [vmem:[%s2788_s28] sm:$0xff] %vm293_vm0, %v1465_v63 }
 0x28c   : > { %v1447_v25 = vpop.f32.mrf.mxu3 }
 0x28d   : > { %v1448_v57 = vadd.f32 %v1447_v25, %v1419_v42 }
 0x28e   : > { %v1421_v1 = vpop.f32.mrf.mxu2 }
 0x28f   : > { %v1466_v8 = vadd.f32 %v1772_v26, %v1448_v57  ;;  %v1422_v36 = vadd.f32 %v1688_v41, %v1421_v1 }
 0x291   : > { %1474 = vst.msk [vmem:[%s2788_s28 + $0x8] sm:$0xff] %vm293_vm0, %v1466_v8 }
 0x296   : > { %v1423_v6 = vpop.f32.mrf.mxu2 }
 0x297   : > { %v1424_v17 = vadd.f32 %v1688_v41, %v1423_v6 }
 0x29d   : > { %v1450_v48 = vpop.f32.mrf.mxu3 }
 0x29e   : > { %v1451_v29 = vadd.f32 %v1450_v48, %v1422_v36 }
 0x2a0   : > { %v1467_v59 = vadd.f32 %v1773_v46, %v1451_v29 }
 0x2a2   : > { %1475 = vst.msk [vmem:[%s2788_s28 + $0x10] sm:$0xff] %vm293_vm0, %v1467_v59 }
 0x2a5   : > { %v1452_v44 = vpop.f32.mrf.mxu3 }
 0x2a6   : > { %v1453_v51 = vadd.f32 %v1452_v44, %v1424_v17 }
 0x2a8   : > { %v1468_v24 = vadd.f32 %v1774_v55, %v1453_v51  ;;  %v1426_v60 = vpop.f32.mrf.mxu2 }
 0x2a9   : > { %v1427_v45 = vadd.f32 %v1688_v41, %v1426_v60 }
 0x2aa   : > { %1476 = vst.msk [vmem:[%s2788_s28 + $0x18] sm:$0xff] %vm293_vm0, %v1468_v24 }
 0x2b0   : > { %v1428_v50 = vpop.f32.mrf.mxu2 }
 0x2b1   : > { %v1429_v58 = vadd.f32 %v1688_v41, %v1428_v50 }
 0x2b2   : > { %v1455_v61 = vpop.f32.mrf.mxu3 }
 0x2b3   : > { %v1456_v10 = vadd.f32 %v1455_v61, %v1427_v45 }
 0x2b5   : > { %v1469_v0 = vadd.f32 %v1775_v54, %v1456_v10 }
 0x2b7   : > { %1477 = vst.msk [vmem:[%s2788_s28 + $0x20] sm:$0xff] %vm293_vm0, %v1469_v0 }
 0x2ba   : > { %v1457_v39 = vpop.f32.mrf.mxu3 }
 0x2bb   : > { %v1458_v5 = vadd.f32 %v1457_v39, %v1429_v58 }
 0x2bd   : > { %v1470_v35 = vadd.f32 %v1776_v19, %v1458_v5 }
 0x2bf   : > { %1478 = vst.msk [vmem:[%s2788_s28 + $0x28] sm:$0xff] %vm293_vm0, %v1470_v35 }
 0x2e6   : > { %v1431_v20 = vpop.f32.mrf.mxu2 }
 0x2e7   : > { %v1432_v22 = vadd.f32 %v1688_v41, %v1431_v20  ;;  %v1460_v56 = vpop.f32.mrf.mxu3 }
 0x2e9   : > { %v1461_v3 = vadd.f32 %v1460_v56, %v1432_v22 }
 0x2eb   : > { %v1471_v34 = vadd.f32 %v1777_v7, %v1461_v3 }
 0x2ed   : > { %1479 = vst.msk [vmem:[%s2788_s28 + $0x30] sm:$0xff] %vm293_vm0, %v1471_v34 }
 0x2ee   : > { %v1433_v40 = vpop.f32.mrf.mxu2 }
 0x2ef   : > { %v1434_v47 = vadd.f32 %v1688_v41, %v1433_v40  ;;  %v1462_v31 = vpop.f32.mrf.mxu3 }
 0x2f1   : > { %v1463_v12 = vadd.f32 %v1462_v31, %v1434_v47 }
 0x2f3   : > { %v1472_v49 = vadd.f32 %v1778_v43, %v1463_v12 }
 0x2f5   : > { %1480 = vst.msk [vmem:[%s2788_s28 + $0x38] sm:$0xff] %vm293_vm0, %v1472_v49 }
 0x2f6 PF: > { %s17_s24 = sadd.s32 1, %s1785_s24  }
 0x2f7   : > { %p14_p4 = scmp.ge.s32.totalorder %s17_s24, 4  }
 0x2f9   :  { %16 = sbr.rel (!%p14_p4) target bundleno = 1 (0x1), region = 78 }

// kernel: ico_slide3d_forward.14
= control target key start
LH: loop header
LB: loop body
LE: loop exit
PB: predicated region body
PF: predicated region fallthrough
CT: control target
= control target key end

     0   :  { %9 = vsyncpa [#allocation3], 0  ;;  %s614_s15 = smov 0   ;;  %s676_s0 = inlined_call_operand.vmem [shape: bf16[128,64], index: 0, kind: input, shape index: {}]   ;;  %s677_s1 = inlined_call_operand.vmem [shape: f32[128,64], index: 1, kind: input, shape index: {}]   ;;  %s678_s2 = inlined_call_operand.hbm [shape: bf16[64,64], index: 2, kind: input, shape index: {}]   ;;  %s679_s3 = inlined_call_operand.vmem [shape: f32[1,64], index: 3, kind: input, shape index: {}]   ;;  %s680_s4 = inlined_call_operand.vmem [shape: f32[128,64], index: 4, kind: output, shape index: {}]  }
   0x1 LB: > { %s151_s18 = sshll.u32 %s678_s2, 4  ;;  %s451_s19 = sadd.s32 4294967295, %s584_s15   ;;  %s584_s15 = sphi %s614_s15, %s15_s15   ;;  %s152_s18 = int_to_ptr.hbm [resolvable:$true] %s151_s18 }
   0x2   : > { %p453_p0 = scmp.ge.s32.totalorder %s584_s15, 1  ;;  %p140_p1 = scmp.lt.s32.totalorder %s584_s15, 3 }
   0x3   : > { %p530_p2 = scmp.eq.s32.totalorder %s451_s19, 0  ;;  %s586_s20 = smov [#allocation2]  }
   0x4   : > { %p141_p3 = pnand %p453_p0, %p140_p1  ;;  %s153_s21 = sshll.u32 %s586_s20, 4  ;;  %s154_s21 = int_to_ptr.vmem [resolvable:$true] %s153_s21 }
   0x5   : > { %s587_s22 = smov 64   ;;  %s588_s23 = smov 4  }
   0x6   : > { %p526_p4 = pneg %p141_p3  ;;  %190 = sbr.rel (%p141_p3) target bundleno = 175 (0xaf), region = 36 }
   0x8   : > { %p527_p5 = pnand %p530_p2, %p526_p4 }
   0xa   : > { %529 = dma.hbm_to_vmem [thread:$0]  (!%p527_p5), %s152_s18, 512, %s154_s21, [#allocation3], %s587_s22, %s587_s22, %s588_s23  }
   0xb   : > { %579 = dma.done.wait (%p530_p2), [#allocation3], 512  }
   0xc   : > { %581 = vsyncadd (%p530_p2), [#allocation3], 4294966784  ;;  %s458_s24 = sshll.u32 %s451_s19, 3  ;;  %v509_v0 = vld [vmem:[#allocation2 + $0x18] sm:$0xff]  ;;  %v508_v1 = vld [vmem:[#allocation2 + $0x10] sm:$0xff]  ;;  %vm305_vm0 = vcmask 523264  }
   0xd   : > { %p223_p6 = scmp.lt.s32.totalorder %s458_s24, 15  ;;  %322 = vmatpush.bf16.msra.mxu0 %v509_v0  ;;  %510 = vmatpush.bf16.msra.mxu1 %v509_v0  ;;  %v507_v2 = vld [vmem:[#allocation2 + $0x8] sm:$0xff]  ;;  %v506_v3 = vld [vmem:[#allocation2] sm:$0xff] }
   0xe   : > { %511 = vmatpush.bf16.msra.mxu2 %v509_v0  ;;  %512 = vmatpush.bf16.msra.mxu3 %v509_v0  ;;  %v543_v8 = vld [vmem:[%s679_s3] ss:$0 sm:$0xff] }
   0xf   : > { %s682_s24 = smov (!%p223_p6, %s458_s24), 15 }
  0x10   : > { %s459_s25 = sshll.u32 %s682_s24, 2  ;;  %s461_s29 = sshll.u32 %s682_s24, 3 }
  0x11   : > { %323 = vmatpush.bf16.msra.mxu0 %v508_v1  ;;  %513 = vmatpush.bf16.msra.mxu1 %v508_v1  ;;  %s226_s28 = scalar_lea.vmem %s676_s0, %s459_s25  ;;  %s639_s6 = scalar_lea.vmem %s677_s1, %s461_s29 }
  0x12   : > { %514 = vmatpush.bf16.msra.mxu2 %v508_v1  ;;  %515 = vmatpush.bf16.msra.mxu3 %v508_v1  ;;  %v502_v4 = vld [vmem:[%s226_s28] sm:$0xff]  ;;  %v503_v5 = vld [vmem:[%s226_s28 + $0x8] sm:$0xff]  ;;  %v504_v6 = vld [vmem:[%s226_s28 + $0x10] sm:$0xff]  ;;  %s649_s11 = scalar_lea.vmem %s680_s4, %s461_s29 }
  0x13   : > { %v505_v7 = vld [vmem:[%s226_s28 + $0x18] sm:$0xff]  ;;  %v347_v10 = vld [vmem:[%s639_s6] sm:$0xff]  ;;  %v349_v12 = vld [vmem:[%s639_s6 + $0x10] sm:$0xff] }
  0x14   : > { %v351_v18 = vld [vmem:[%s639_s6 + $0x20] sm:$0xff]  ;;  %v353_v20 = vld [vmem:[%s639_s6 + $0x30] sm:$0xff]  ;;  %v348_v24 = vld [vmem:[%s639_s6 + $0x8] sm:$0xff] }
  0x15   : > { %324 = vmatpush.bf16.msra.mxu0 %v507_v2  ;;  %516 = vmatpush.bf16.msra.mxu1 %v507_v2  ;;  %v350_v26 = vld [vmem:[%s639_s6 + $0x18] sm:$0xff]  ;;  %v352_v34 = vld [vmem:[%s639_s6 + $0x28] sm:$0xff] }
  0x16   : > { %517 = vmatpush.bf16.msra.mxu2 %v507_v2  ;;  %518 = vmatpush.bf16.msra.mxu3 %v507_v2  ;;  %v354_v36 = vld [vmem:[%s639_s6 + $0x38] sm:$0xff] }
  0x19   : > { %325 = vmatpush.bf16.msra.mxu0 %v506_v3  ;;  %519 = vmatpush.bf16.msra.mxu1 %v506_v3 }
  0x1a   : > { %520 = vmatpush.bf16.msra.mxu2 %v506_v3  ;;  %521 = vmatpush.bf16.msra.mxu3 %v506_v3 }
  0x1c   : > { %496 = vmatmul.msk.bf16.vlgmr.msra.gmra.mxu0 %vm305_vm0, %v502_v4  ;;  %497 = vmatmul.msk.bf16.vlgmr.msra.gmra.mxu1 %vm305_vm0, %v503_v5 }
  0x1d   : > { %498 = vmatmul.msk.bf16.vlgmr.msra.gmra.mxu2 %vm305_vm0, %v504_v6  ;;  %499 = vmatmul.msk.bf16.vlgmr.msra.gmra.mxu3 %vm305_vm0, %v505_v7 }
  0x99   : > { %v327_v9 = vpop.f32.mrf.mxu0  ;;  %v332_v11 = vpop.f32.mrf.mxu1 }
  0x9a   : > { %v328_v13 = vadd.f32 %v543_v8, %v327_v9  ;;  %v333_v14 = vadd.f32 %v543_v8, %v332_v11 }
  0x9c   : > { %v355_v15 = vadd.f32 %v347_v10, %v328_v13  ;;  %v357_v16 = vadd.f32 %v349_v12, %v333_v14 }
  0x9e   : > { %363 = vst.msk [vmem:[%s649_s11] sm:$0xff] %vm305_vm0, %v355_v15 }
  0x9f   : > { %365 = vst.msk [vmem:[%s649_s11 + $0x10] sm:$0xff] %vm305_vm0, %v357_v16 }
  0xa0   : > { %v337_v17 = vpop.f32.mrf.mxu2  ;;  %v342_v19 = vpop.f32.mrf.mxu3 }
  0xa1   : > { %v338_v21 = vadd.f32 %v543_v8, %v337_v17  ;;  %v343_v22 = vadd.f32 %v543_v8, %v342_v19  ;;  %v329_v23 = vpop.f32.mrf.mxu0  ;;  %v334_v25 = vpop.f32.mrf.mxu1 }
  0xa2   : > { %v330_v27 = vadd.f32 %v543_v8, %v329_v23  ;;  %v335_v28 = vadd.f32 %v543_v8, %v334_v25 }
  0xa3   : > { %v359_v29 = vadd.f32 %v351_v18, %v338_v21  ;;  %v361_v30 = vadd.f32 %v353_v20, %v343_v22 }
  0xa4   : > { %v356_v31 = vadd.f32 %v348_v24, %v330_v27  ;;  %v358_v32 = vadd.f32 %v350_v26, %v335_v28 }
  0xa5   : > { %367 = vst.msk [vmem:[%s649_s11 + $0x20] sm:$0xff] %vm305_vm0, %v359_v29 }
  0xa6   : > { %369 = vst.msk [vmem:[%s649_s11 + $0x30] sm:$0xff] %vm305_vm0, %v361_v30 }
  0xa7   : > { %364 = vst.msk [vmem:[%s649_s11 + $0x8] sm:$0xff] %vm305_vm0, %v356_v31 }
  0xa8   : > { %366 = vst.msk [vmem:[%s649_s11 + $0x18] sm:$0xff] %vm305_vm0, %v358_v32  ;;  %v339_v33 = vpop.f32.mrf.mxu2  ;;  %v344_v35 = vpop.f32.mrf.mxu3 }
  0xa9   : > { %v340_v37 = vadd.f32 %v543_v8, %v339_v33  ;;  %v345_v38 = vadd.f32 %v543_v8, %v344_v35 }
  0xab   : > { %v360_v39 = vadd.f32 %v352_v34, %v340_v37  ;;  %v362_v40 = vadd.f32 %v354_v36, %v345_v38 }
  0xad   : > { %368 = vst.msk [vmem:[%s649_s11 + $0x28] sm:$0xff] %vm305_vm0, %v360_v39 }
  0xae   : > { %370 = vst.msk [vmem:[%s649_s11 + $0x38] sm:$0xff] %vm305_vm0, %v362_v40 }
  0xaf PF: > { %s15_s15 = sadd.s32 1, %s584_s15  }
  0xb0   : > { %p12_p7 = scmp.ge.s32.totalorder %s15_s15, 4  }
  0xb2   :  { %14 = sbr.rel (!%p12_p7) target bundleno = 1 (0x1), region = 74 }
  0xb7   :  { %393 = vsyncpa [#allocation3], 1 }
  0xb8   :  { %395 = vsyncpa [#allocation3 + $0x1], 1 }

// kernel: ico_slide3d_forward.12
= control target key start
LH: loop header
LB: loop body
LE: loop exit
PB: predicated region body
PF: predicated region fallthrough
CT: control target
= control target key end

     0   :  { %17 = vsyncpa [#allocation3], 0  ;;  %s1299_s17 = smov 0   ;;  %s1627_s0 = inlined_call_operand.vmem [shape: f32[128,64], index: 0, kind: input, shape index: {}]   ;;  %s1628_s1 = inlined_call_operand.vmem [shape: f32[1,64], index: 1, kind: input, shape index: {}]   ;;  %s1629_s2 = inlined_call_operand.vmem [shape: f32[1,64], index: 2, kind: input, shape index: {}]   ;;  %s1630_s3 = inlined_call_operand.vmem [shape: bf16[64,64], index: 3, kind: input, shape index: {}]   ;;  %s1631_s4 = inlined_call_operand.vmem [shape: bf16[64,64], index: 4, kind: input, shape index: {}]   ;;  %s1632_s5 = inlined_call_operand.hbm [shape: bf16[64,64], index: 5, kind: input, shape index: {}]   ;;  %s1633_s6 = inlined_call_operand.vmem [shape: f32[1,64], index: 6, kind: input, shape index: {}]   ;;  %s1634_s7 = inlined_call_operand.vmem [shape: f32[1,64], index: 7, kind: input, shape index: {}]   ;;  %s1635_s8 = inlined_call_operand.vmem [shape: f32[1,64], index: 8, kind: input, shape index: {}]   ;;  %s1636_s9 = inlined_call_operand.vmem [shape: bf16[128,64], index: 9, kind: output, shape index: {0}]   ;;  %s1637_s10 = inlined_call_operand.vmem [shape: bf16[128,64], index: 10, kind: output, shape index: {1}]   ;;  %s1638_s11 = inlined_call_operand.vmem [shape: bf16[128,64], index: 11, kind: output, shape index: {2}]  }
   0x1 LB: > { %s323_s20 = sshll.u32 %s1632_s5, 4  ;;  %s1047_s21 = sadd.s32 4294967295, %s1233_s17   ;;  %s1233_s17 = sphi %s1299_s17, %s23_s17   ;;  %s324_s20 = int_to_ptr.hbm [resolvable:$true] %s323_s20 }
   0x2   : > { %p1049_p0 = scmp.ge.s32.totalorder %s1233_s17, 1  ;;  %p300_p1 = scmp.lt.s32.totalorder %s1233_s17, 3 }
   0x3   : > { %p1156_p2 = scmp.eq.s32.totalorder %s1047_s21, 0  ;;  %s1235_s22 = smov [#allocation2]  }
   0x4   : > { %p301_p3 = pnand %p1049_p0, %p300_p1  ;;  %s325_s23 = sshll.u32 %s1235_s22, 4  ;;  %s326_s23 = int_to_ptr.vmem [resolvable:$true] %s325_s23 }
   0x5   : > { %s1236_s24 = smov 64   ;;  %s1237_s25 = smov 4  }
   0x6   : > { %p1152_p4 = pneg %p301_p3  ;;  %359 = sbr.rel (%p301_p3) target bundleno = 475 (0x1db), region = 56 }
   0x8   : > { %p1153_p5 = pnand %p1156_p2, %p1152_p4 }
   0xa   : > { %1155 = dma.hbm_to_vmem [thread:$0]  (!%p1153_p5), %s324_s20, 512, %s326_s23, [#allocation3], %s1236_s24, %s1236_s24, %s1237_s25  }
   0xb   : > { %1228 = dma.done.wait (%p1156_p2), [#allocation3], 512  }
   0xc   : > { %1230 = vsyncadd (%p1156_p2), [#allocation3], 4294966784  ;;  %s1054_s26 = sshll.u32 %s1047_s21, 3  ;;  %vm445_vm0 = vcmask 523264   ;;  %v1238_v16 = vmov 64.0   ;;  %v1127_v63 = vld [vmem:[%s1630_s3 + $0x18] sm:$0xff] }
   0xd   : > { %p411_p6 = scmp.lt.s32.totalorder %s1054_s26, 15  ;;  %1175 = vrcp.f32 %v1238_v16  ;;  %707 = vmatpush.bf16.msra.mxu0 %v1127_v63  ;;  %1136 = vmatpush.bf16.msra.mxu3 %v1127_v63  ;;  %v1409_v16 = vld [vmem:[#allocation2] sm:$0xff] }
   0xf   : > { %s1644_s26 = smov (!%p411_p6, %s1054_s26), 15 }
  0x10   : > { %s1055_s27 = sshll.u32 %s1644_s26, 3  ;;  %s1057_s20 = sshll.u32 %s1644_s26, 2 }
  0x11   : > { %s414_s30 = scalar_lea.vmem %s1627_s0, %s1055_s27  ;;  %s1536_s23 = scalar_lea.vmem %s1637_s10, %s1057_s20 }
  0x12   : > { %v439_v0 = vld [vmem:[%s414_s30 + $0x20] sm:$0xff]  ;;  %v437_v1 = vld [vmem:[%s414_s30 + $0x10] sm:$0xff]  ;;  %v440_v6 = vld [vmem:[%s414_s30 + $0x28] sm:$0xff]  ;;  %s1542_s27 = scalar_lea.vmem %s1636_s9, %s1057_s20  ;;  %s1558_s12 = scalar_lea.vmem %s1638_s11, %s1057_s20 }
  0x13   : > { %v435_v2 = vld [vmem:[%s414_s30] sm:$0xff]  ;;  %v458_v3 = vsel %vm445_vm0, %v439_v0, 0.0  ;;  %v452_v4 = vsel %vm445_vm0, %v437_v1, 0.0  ;;  %v438_v7 = vld [vmem:[%s414_s30 + $0x18] sm:$0xff]  ;;  %v436_v8 = vld [vmem:[%s414_s30 + $0x8] sm:$0xff]  ;;  %v461_v9 = vsel %vm445_vm0, %v440_v6, 0.0  ;;  %v1176_v17 = vpop.eup %1175 }
  0x14   : > { %v446_v5 = vsel %vm445_vm0, %v435_v2, 0.0  ;;  %459 = vadd.xlane.f32.xlu2 %v458_v3  ;;  %453 = vadd.xlane.f32.xlu0 %v452_v4  ;;  %v455_v10 = vsel %vm445_vm0, %v438_v7, 0.0  ;;  %v449_v11 = vsel %vm445_vm0, %v436_v8, 0.0  ;;  %v441_v12 = vld [vmem:[%s414_s30 + $0x30] sm:$0xff]  ;;  %v442_v13 = vld [vmem:[%s414_s30 + $0x38] sm:$0xff]  ;;  %v471_v18 = vmul.f32 64.0, %v1176_v17 }
  0x15   : > { %447 = vadd.xlane.f32.xlu1 %v446_v5  ;;  %v464_v14 = vsel %vm445_vm0, %v441_v12, 0.0  ;;  %v467_v15 = vsel %vm445_vm0, %v442_v13, 0.0  ;;  %vm475_vm1 = vweird.f32 %v1176_v17  ;;  %v1130_v3 = vld [vmem:[%s1631_s4 + $0x10] sm:$0xff] }
  0x16   : > { %v472_v19 = vsub.f32 1.0, %v471_v18  ;;  %v1389_v4 = vld [vmem:[#allocation2 + $0x10] sm:$0xff] }
  0x18   : > { %v473_v20 = vmul.f32 %v1176_v17, %v472_v19 }
  0x1a   : > { %v474_v21 = vadd.f32 %v1176_v17, %v473_v20 }
  0x1c   : > { %462 = vadd.xlane.f32.xlu2 %v461_v9  ;;  %456 = vadd.xlane.f32.xlu0 %v455_v10  ;;  %v1324_v22 = vsel %vm475_vm1, %v1176_v17, %v474_v21  ;;  %v1129_v9 = vld [vmem:[%s1631_s4 + $0x8] sm:$0xff] }
  0x1d   : > { %450 = vadd.xlane.f32.xlu1 %v449_v11  ;;  %v1399_v10 = vld [vmem:[#allocation2 + $0x8] sm:$0xff] }
  0x24   : > { %465 = vadd.xlane.f32.xlu0 %v464_v14  ;;  %v1124_v14 = vld [vmem:[%s1630_s3] sm:$0xff] }
  0x25   : > { %468 = vadd.xlane.f32.xlu1 %v467_v15  ;;  %v1128_v15 = vld [vmem:[%s1631_s4] sm:$0xff] }
  0x87   : > { %v460_v23 = vpop.xlane.xlu2 %459  ;;  %v454_v24 = vpop.xlane.xlu0 %453 }
  0x88   : > { %v479_v25 = vmul.f32 %v1324_v22, %v454_v24  ;;  %v448_v26 = vpop.xlane.xlu1 %447  ;;  %v481_v36 = vmul.f32 %v1324_v22, %v460_v23 }
  0x89   : > { %v477_v27 = vmul.f32 %v1324_v22, %v448_v26 }
  0x8a   : > { %v1328_v28 = vsub.f32 %v437_v1, %v479_v25  ;;  %v1348_v44 = vsub.f32 %v439_v0, %v481_v36  ;;  %v1131_v0 = vld [vmem:[%s1631_s4 + $0x18] sm:$0xff] }
  0x8b   : > { %v1330_v29 = vsub.f32 %v435_v2, %v477_v27  ;;  %v1380_v1 = vld [vmem:[#allocation2 + $0x18] sm:$0xff]  ;;  %1140 = vmatpush.bf16.msra.mxu1 %v1131_v0  ;;  %v1126_v2 = vld [vmem:[%s1630_s3 + $0x10] sm:$0xff] }
  0x8c   : > { %v495_v30 = vmul.f32 %v1328_v28, %v1328_v28  ;;  %v497_v53 = vmul.f32 %v1348_v44, %v1348_v44  ;;  %1144 = vmatpush.bf16.msra.mxu2 %v1380_v1  ;;  %708 = vmatpush.bf16.msra.mxu0 %v1126_v2 }
  0x8d   : > { %v493_v31 = vmul.f32 %v1330_v29, %v1330_v29  ;;  %1137 = vmatpush.bf16.msra.mxu3 %v1126_v2 }
  0x8e   : > { %v507_v32 = vsel %vm445_vm0, %v495_v30, 0.0  ;;  %v513_v57 = vsel %vm445_vm0, %v497_v53, 0.0 }
  0x8f   : > { %v463_v33 = vpop.xlane.xlu2 %462  ;;  %508 = vadd.xlane.f32.xlu2 %v507_v32  ;;  %v457_v34 = vpop.xlane.xlu0 %456  ;;  %v501_v35 = vsel %vm445_vm0, %v493_v31, 0.0  ;;  %1141 = vmatpush.bf16.msra.mxu1 %v1130_v3 }
  0x90   : > { %v482_v37 = vmul.f32 %v1324_v22, %v463_v33  ;;  %v480_v38 = vmul.f32 %v1324_v22, %v457_v34  ;;  %502 = vadd.xlane.f32.xlu1 %v501_v35  ;;  %v451_v39 = vpop.xlane.xlu1 %450  ;;  %1145 = vmatpush.bf16.msra.mxu2 %v1389_v4 }
  0x91   : > { %v478_v40 = vmul.f32 %v1324_v22, %v451_v39 }
  0x92   : > { %v1342_v41 = vsub.f32 %v440_v6, %v482_v37  ;;  %v1344_v42 = vsub.f32 %v438_v7, %v480_v38 }
  0x93   : > { %v1346_v43 = vsub.f32 %v436_v8, %v478_v40  ;;  %v1125_v8 = vld [vmem:[%s1630_s3 + $0x8] sm:$0xff]  ;;  %1142 = vmatpush.bf16.msra.mxu1 %v1129_v9 }
  0x94   : > { %v496_v45 = vmul.f32 %v1344_v42, %v1344_v42  ;;  %v498_v46 = vmul.f32 %v1342_v41, %v1342_v41  ;;  %709 = vmatpush.bf16.msra.mxu0 %v1125_v8  ;;  %1138 = vmatpush.bf16.msra.mxu3 %v1125_v8 }
  0x95   : > { %v494_v47 = vmul.f32 %v1346_v43, %v1346_v43  ;;  %1146 = vmatpush.bf16.msra.mxu2 %v1399_v10 }
  0x96   : > { %v510_v48 = vsel %vm445_vm0, %v496_v45, 0.0  ;;  %v516_v49 = vsel %vm445_vm0, %v498_v46, 0.0 }
  0x97   : > { %511 = vadd.xlane.f32.xlu0 %v510_v48  ;;  %v466_v50 = vpop.xlane.xlu0 %465  ;;  %v504_v51 = vsel %vm445_vm0, %v494_v47, 0.0  ;;  %1143 = vmatpush.bf16.msra.mxu1 %v1128_v15 }
  0x98   : > { %v483_v52 = vmul.f32 %v1324_v22, %v466_v50  ;;  %517 = vadd.xlane.f32.xlu1 %v516_v49  ;;  %505 = vadd.xlane.f32.xlu2 %v504_v51  ;;  %v469_v54 = vpop.xlane.xlu1 %468 }
  0x99   : > { %v484_v55 = vmul.f32 %v1324_v22, %v469_v54  ;;  %710 = vmatpush.bf16.msra.mxu0 %v1124_v14  ;;  %1139 = vmatpush.bf16.msra.mxu3 %v1124_v14 }
  0x9a   : > { %v1363_v56 = vsub.f32 %v441_v12, %v483_v52  ;;  %1147 = vmatpush.bf16.msra.mxu2 %v1409_v16 }
  0x9b   : > { %v1368_v59 = vsub.f32 %v442_v13, %v484_v55 }
  0x9c   : > { %v499_v58 = vmul.f32 %v1363_v56, %v1363_v56 }
  0x9d   : > { %v500_v61 = vmul.f32 %v1368_v59, %v1368_v59  ;;  %772 = vmatpush.bf16.msrb.mxu0 %v1131_v0 }
  0x9e   : > { %v519_v60 = vsel %vm445_vm0, %v499_v58, 0.0 }
  0x9f   : > { %514 = vadd.xlane.f32.xlu0 %v513_v57  ;;  %v522_v62 = vsel %vm445_vm0, %v500_v61, 0.0 }
  0xa0   : > { %520 = vadd.xlane.f32.xlu2 %v519_v60 }
  0xa1   : > { %773 = vmatpush.bf16.msrb.mxu0 %v1130_v3 }
  0xa5   : > { %774 = vmatpush.bf16.msrb.mxu0 %v1129_v9 }
  0xa7   : > { %523 = vadd.xlane.f32.xlu0 %v522_v62 }
  0xa9   : > { %775 = vmatpush.bf16.msrb.mxu0 %v1128_v15 }
 0x102   : > { %v509_v5 = vpop.xlane.xlu2 %508 }
 0x103   : > { %v527_v6 = vmul.f32 %v509_v5, %v1324_v22  ;;  %v503_v7 = vpop.xlane.xlu1 %502 }
 0x104   : > { %v525_v11 = vmul.f32 %v503_v7, %v1324_v22 }
 0x105   : > { %v535_v12 = vadd.f32 1e-05, %v527_v6 }
 0x106   : > { %v533_v13 = vadd.f32 1e-05, %v525_v11  ;;  %v1452_v11 = vld [vmem:[%s1628_s1] ss:$0 sm:$0xff] }
 0x107   : > { %1177 = vrsqrt.f32 %v535_v12  ;;  %vm567_vm5 = vweird.f32 %v535_v12 }
 0x108   : > { %1179 = vrsqrt.f32 %v533_v13  ;;  %vm547_vm3 = vweird.f32 %v533_v13 }
 0x10a   : > { %v512_v17 = vpop.xlane.xlu0 %511 }
 0x10b   : > { %v528_v18 = vmul.f32 %v512_v17, %v1324_v22  ;;  %v506_v19 = vpop.xlane.xlu2 %505  ;;  %v518_v20 = vpop.xlane.xlu1 %517 }
 0x10c   : > { %v526_v21 = vmul.f32 %v506_v19, %v1324_v22  ;;  %v530_v23 = vmul.f32 %v518_v20, %v1324_v22 }
 0x10d   : > { %v1178_v24 = vpop.eup %1177  ;;  %v1415_v25 = vadd.f32 1e-05, %v528_v18 }
 0x10e   : > { %v1180_v26 = vpop.eup %1179  ;;  %v562_v27 = vmul.f32 %v1178_v24, %v535_v12  ;;  %v1417_v30 = vadd.f32 1e-05, %v526_v21  ;;  %v1419_v31 = vadd.f32 1e-05, %v530_v23  ;;  %vm568_vm2 = vweird.f32 %v1178_v24 }
 0x10f   : > { %v542_v32 = vmul.f32 %v1180_v26, %v533_v13  ;;  %1181 = vrsqrt.f32 %v1415_v25  ;;  %vm548_vm4 = vweird.f32 %v1180_v26  ;;  %vm1431_vm6 = vmor %vm567_vm5, %vm568_vm2  ;;  %vm577_vm11 = vweird.f32 %v1415_v25 }
 0x110   : > { %v563_v33 = vmul.f32 %v1178_v24, %v562_v27  ;;  %1183 = vrsqrt.f32 %v1417_v30  ;;  %vm549_vm7 = vmor %vm547_vm3, %vm548_vm4  ;;  %vm557_vm9 = vweird.f32 %v1417_v30  ;;  %vm597_vm14 = vweird.f32 %v1419_v31 }
 0x111   : > { %v543_v34 = vmul.f32 %v1180_v26, %v542_v32  ;;  %1185 = vrsqrt.f32 %v1419_v31 }
 0x112   : > { %v564_v35 = vmul.f32 0.5, %v563_v33  ;;  %v515_v36 = vpop.xlane.xlu0 %514 }
 0x113   : > { %v544_v37 = vmul.f32 0.5, %v543_v34  ;;  %v529_v38 = vmul.f32 %v515_v36, %v1324_v22  ;;  %v521_v39 = vpop.xlane.xlu2 %520 }
 0x114   : > { %v565_v40 = vsub.f32 1.5, %v564_v35  ;;  %v531_v48 = vmul.f32 %v521_v39, %v1324_v22 }
 0x115   : > { %v1182_v45 = vpop.eup %1181  ;;  %v545_v46 = vsub.f32 1.5, %v544_v37  ;;  %v1425_v47 = vadd.f32 1e-05, %v529_v38 }
 0x116   : > { %v1184_v49 = vpop.eup %1183  ;;  %v566_v50 = vmul.f32 %v1178_v24, %v565_v40  ;;  %v572_v51 = vmul.f32 %v1182_v45, %v1415_v25  ;;  %v1442_v63 = vadd.f32 1e-05, %v531_v48  ;;  %vm578_vm8 = vweird.f32 %v1182_v45  ;;  %v1469_v25 = vld [vmem:[%s1629_s2] ss:$0 sm:$0xff] }
 0x117   : > { %v1429_v52 = vpop.eup %1185  ;;  %v546_v54 = vmul.f32 %v1180_v26, %v545_v46  ;;  %v552_v55 = vmul.f32 %v1184_v49, %v1417_v30  ;;  %1187 = vrsqrt.f32 %v1425_v47  ;;  %vm558_vm10 = vweird.f32 %v1184_v49  ;;  %vm579_vm12 = vmor %vm577_vm11, %vm578_vm8 }
 0x118   : > { %v573_v57 = vmul.f32 %v1182_v45, %v572_v51  ;;  %v592_v58 = vmul.f32 %v1429_v52, %v1419_v31  ;;  %v570_v60 = vsel %vm1431_vm6, %v1178_v24, %v566_v50  ;;  %1189 = vrsqrt.f32 %v1442_v63  ;;  %vm559_vm13 = vmor %vm557_vm9, %vm558_vm10 }
 0x119   : > { %v550_v61 = vsel %vm549_vm7, %v1180_v26, %v546_v54  ;;  %v553_v62 = vmul.f32 %v1184_v49, %v552_v55  ;;  %v623_v7 = vmul.f32 %v570_v60, %v1328_v28  ;;  %vm598_vm15 = vweird.f32 %v1429_v52 }
 0x11a   : > { %v574_v0 = vmul.f32 0.5, %v573_v57  ;;  %v593_v2 = vmul.f32 %v1429_v52, %v592_v58  ;;  %v524_v3 = vpop.xlane.xlu0 %523  ;;  %v621_v8 = vmul.f32 %v550_v61, %v1330_v29  ;;  %vm587_vm1 = vweird.f32 %v1425_v47  ;;  %vm1481_vm3 = vmor %vm597_vm14, %vm598_vm15 }
 0x11b   : > { %v554_v5 = vmul.f32 0.5, %v553_v62  ;;  %v532_v6 = vmul.f32 %v524_v3, %v1324_v22  ;;  %v634_v19 = vmul.f32 %v1452_v11, %v623_v7  ;;  %vm607_vm7 = vweird.f32 %v1442_v63 }
 0x11c   : > { %v575_v9 = vsub.f32 1.5, %v574_v0  ;;  %v594_v14 = vmul.f32 0.5, %v593_v2  ;;  %v632_v24 = vmul.f32 %v1452_v11, %v621_v8 }
 0x11d   : > { %v1188_v12 = vpop.eup %1187  ;;  %v555_v13 = vsub.f32 1.5, %v554_v5  ;;  %v1455_v15 = vadd.f32 1e-05, %v532_v6 }
 0x11e   : > { %v576_v17 = vmul.f32 %v1182_v45, %v575_v9  ;;  %v582_v22 = vmul.f32 %v1188_v12, %v1425_v47  ;;  %v595_v23 = vsub.f32 1.5, %v594_v14  ;;  %v1190_v32 = vpop.eup %1189  ;;  %vm588_vm2 = vweird.f32 %v1188_v12 }
 0x11f   : > { %v556_v28 = vmul.f32 %v1184_v49, %v555_v13  ;;  %1191 = vrsqrt.f32 %v1455_v15  ;;  %v643_v36 = vadd.f32 %v1469_v25, %v632_v24  ;;  %v602_v39 = vmul.f32 %v1190_v32, %v1442_v63  ;;  %vm589_vm4 = vmor %vm587_vm1, %vm588_vm2 }
 0x120   : > { %v580_v29 = vsel %vm579_vm12, %v1182_v45, %v576_v17  ;;  %v583_v18 = vmul.f32 %v1188_v12, %v582_v22  ;;  %v596_v35 = vmul.f32 %v1429_v52, %v595_v23  ;;  %vm617_vm5 = vweird.f32 %v1455_v15 }
 0x121   : > { %v624_v20 = vmul.f32 %v580_v29, %v1344_v42  ;;  %v560_v21 = vsel %vm559_vm13, %v1184_v49, %v556_v28  ;;  %v603_v51 = vmul.f32 %v1190_v32, %v602_v39  ;;  %vm608_vm8 = vweird.f32 %v1190_v32 }
 0x122   : > { %v622_v26 = vmul.f32 %v560_v21, %v1346_v43  ;;  %v584_v27 = vmul.f32 0.5, %v583_v18  ;;  %v645_v43 = vadd.f32 %v1469_v25, %v634_v19  ;;  %v600_v50 = vsel %vm1481_vm3, %v1429_v52, %v596_v35  ;;  %vm609_vm10 = vmor %vm607_vm7, %vm608_vm8 }
 0x123   : > { %v635_v30 = vmul.f32 %v1452_v11, %v624_v20  ;;  %v626_v55 = vmul.f32 %v600_v50, %v1342_v41  ;;  %v604_v57 = vmul.f32 0.5, %v603_v51 }
 0x124   : > { %v585_v42 = vsub.f32 1.5, %v584_v27  ;;  %v633_v33 = vmul.f32 %v1452_v11, %v622_v26 }
 0x125   : > { %v1192_v34 = vpop.eup %1191  ;;  %v646_v37 = vadd.f32 %v1469_v25, %v635_v30  ;;  %v637_v52 = vmul.f32 %v1452_v11, %v626_v55  ;;  %v605_v61 = vsub.f32 1.5, %v604_v57 }
 0x126   : > { %v586_v38 = vmul.f32 %v1188_v12, %v585_v42  ;;  %v612_v40 = vmul.f32 %v1192_v34, %v1455_v15  ;;  %v644_v45 = vadd.f32 %v1469_v25, %v633_v33  ;;  %vm618_vm6 = vweird.f32 %v1192_v34  ;;  %v1547_v15 = vld [vmem:[%s1635_s8] ss:$0 sm:$0xff] }
 0x127   : > { %v652_v46 = vpack.c.bf16 %v646_v37, %v645_v43  ;;  %vm619_vm9 = vmor %vm617_vm5, %vm618_vm6 }
 0x128   : > { %v590_v47 = vsel %vm589_vm4, %v1188_v12, %v586_v38  ;;  %v613_v48 = vmul.f32 %v1192_v34, %v612_v40  ;;  %v651_v49 = vpack.c.bf16 %v644_v45, %v643_v36 }
 0x129   : > { %1079 = vmatmul.msk.bf16.vlgmr.msra.gmra.mxu3 %vm445_vm0, %v652_v46  ;;  %1099 = vmatmul.msk.bf16.vlgmr.msra.gmra.mxu1 %vm445_vm0, %v652_v46  ;;  %v625_v53 = vmul.f32 %v590_v47, %v1348_v44  ;;  %v648_v44 = vadd.f32 %v1469_v25, %v637_v52 }
 0x12a   : > { %1078 = vmatmul.msk.bf16.vlgmr.msra.gmra.mxu0 %vm445_vm0, %v651_v49  ;;  %1119 = vmatmul.msk.bf16.vlgmr.msra.gmra.mxu2 %vm445_vm0, %v652_v46  ;;  %v614_v54 = vmul.f32 0.5, %v613_v48 }
 0x12b   : > { %837 = vmatpush.bf16.msra.mxu0 %v1380_v1  ;;  %v636_v58 = vmul.f32 %v1452_v11, %v625_v53  ;;  %v606_v1 = vmul.f32 %v1190_v32, %v605_v61 }
 0x12c   : > { %v615_v60 = vsub.f32 1.5, %v614_v54 }
 0x12d   : > { %v647_v62 = vadd.f32 %v1469_v25, %v636_v58  ;;  %v610_v2 = vsel %vm609_vm10, %v1190_v32, %v606_v1 }
 0x12e   : > { %v616_v41 = vmul.f32 %v1192_v34, %v615_v60  ;;  %v627_v63 = vmul.f32 %v610_v2, %v1363_v56  ;;  %v1524_v56 = vld [vmem:[%s1634_s7] ss:$0 sm:$0xff] }
 0x12f   : > { %838 = vmatpush.bf16.msra.mxu0 %v1389_v4  ;;  %v653_v4 = vpack.c.bf16 %v648_v44, %v647_v62 }
 0x130   : > { %v620_v0 = vsel %vm619_vm9, %v1192_v34, %v616_v41  ;;  %v638_v5 = vmul.f32 %v1452_v11, %v627_v63 }
 0x132   : > { %v649_v6 = vadd.f32 %v1469_v25, %v638_v5 }
 0x133   : > { %839 = vmatpush.bf16.msra.mxu0 %v1399_v10  ;;  %v628_v10 = vmul.f32 %v620_v0, %v1368_v59  ;;  %v1529_v59 = vld [vmem:[%s1633_s6] ss:$0 sm:$0xff] }
 0x135   : > { %v639_v3 = vmul.f32 %v1452_v11, %v628_v10 }
 0x137   : > { %840 = vmatpush.bf16.msra.mxu0 %v1409_v16  ;;  %v650_v16 = vadd.f32 %v1469_v25, %v639_v3 }
 0x139   : > { %1080 = vmatmul.msk.bf16.gmra.mxu3 %vm445_vm0, %v653_v4  ;;  %1100 = vmatmul.msk.bf16.gmra.mxu1 %vm445_vm0, %v653_v4  ;;  %v654_v7 = vpack.c.bf16 %v650_v16, %v649_v6 }
 0x13a   : > { %1098 = vmatmul.msk.bf16.vlgmr.msrb.gmra.mxu0 %vm445_vm0, %v651_v49  ;;  %1120 = vmatmul.msk.bf16.gmra.mxu2 %vm445_vm0, %v653_v4 }
 0x149   : > { %1081 = vmatmul.msk.bf16.gmra.mxu3 %vm445_vm0, %v654_v7  ;;  %1101 = vmatmul.msk.bf16.gmra.mxu1 %vm445_vm0, %v654_v7 }
 0x14a   : > { %1118 = vmatmul.msk.bf16.vlgmr.msra.gmra.mxu0 %vm445_vm0, %v651_v49  ;;  %1121 = vmatmul.msk.bf16.gmra.mxu2 %vm445_vm0, %v654_v7  ;;  %vm870_vm0 = vcmask 519168  }
 0x1a6   : > { %v782_v8 = vpop.f32.mrf.mxu1 }
 0x1a7   : > { %v712_v9 = vpop.f32.mrf.mxu0  ;;  %v783_v11 = vadd.f32 %v1524_v56, %v782_v8 }
 0x1a8   : > { %v713_v12 = vadd.f32 %v1529_v59, %v712_v9 }
 0x1a9   : > { %v881_v13 = vpack.c.bf16 %v783_v11, %v783_v11 }
 0x1aa   : > { %v862_v14 = vpack.c.bf16 %v713_v12, %v713_v12 }
 0x1ab   : > { %889 = vst.msk [vmem:[%s1536_s23 + $0x8] sm:$0xf] %vm870_vm0, %v881_v13 }
 0x1ac   : > { %871 = vst.msk [vmem:[%s1542_s27] sm:$0xf] %vm870_vm0, %v862_v14  ;;  %v717_v17 = vpop.f32.mrf.mxu3 }
 0x1ad   : > { %v718_v22 = vadd.f32 %v1529_v59, %v717_v17  ;;  %v847_v28 = vpop.f32.mrf.mxu2 }
 0x1ae   : > { %v848_v29 = vadd.f32 %v1547_v15, %v847_v28  ;;  %v784_v18 = vpop.f32.mrf.mxu1 }
 0x1af   : > { %v864_v19 = vpack.c.bf16 %v718_v22, %v718_v22  ;;  %v714_v20 = vpop.f32.mrf.mxu0  ;;  %v785_v21 = vadd.f32 %v1524_v56, %v784_v18 }
 0x1b0   : > { %v897_v23 = vpack.c.bf16 %v848_v29, %v848_v29  ;;  %v715_v24 = vadd.f32 %v1529_v59, %v714_v20 }
 0x1b1   : > { %873 = vst.msk [vmem:[%s1542_s27 + $0x8] sm:$0xf] %vm870_vm0, %v864_v19  ;;  %v882_v25 = vpack.c.bf16 %v785_v21, %v785_v21 }
 0x1b2   : > { %905 = vst.msk [vmem:[%s1558_s12 + $0x8] sm:$0xf] %vm870_vm0, %v897_v23  ;;  %v863_v26 = vpack.c.bf16 %v715_v24, %v715_v24 }
 0x1b3   : > { %890 = vst.msk [vmem:[%s1536_s23 + $0xc] sm:$0xf] %vm870_vm0, %v882_v25 }
 0x1b4   : > { %872 = vst.msk [vmem:[%s1542_s27 + $0x4] sm:$0xf] %vm870_vm0, %v863_v26  ;;  %v719_v27 = vpop.f32.mrf.mxu3 }
 0x1b5   : > { %v720_v32 = vadd.f32 %v1529_v59, %v719_v27  ;;  %v849_v30 = vpop.f32.mrf.mxu2 }
 0x1b6   : > { %v850_v42 = vadd.f32 %v1547_v15, %v849_v30  ;;  %v787_v33 = vpop.f32.mrf.mxu1 }
 0x1b7   : > { %v865_v34 = vpack.c.bf16 %v720_v32, %v720_v32  ;;  %v777_v35 = vpop.f32.mrf.mxu0  ;;  %v788_v36 = vadd.f32 %v1524_v56, %v787_v33 }
 0x1b8   : > { %v898_v43 = vpack.c.bf16 %v850_v42, %v850_v42  ;;  %v778_v37 = vadd.f32 %v1524_v56, %v777_v35 }
 0x1b9   : > { %874 = vst.msk [vmem:[%s1542_s27 + $0xc] sm:$0xf] %vm870_vm0, %v865_v34  ;;  %v883_v31 = vpack.c.bf16 %v788_v36, %v788_v36 }
 0x1ba   : > { %906 = vst.msk [vmem:[%s1558_s12 + $0xc] sm:$0xf] %vm870_vm0, %v898_v43  ;;  %v879_v38 = vpack.c.bf16 %v778_v37, %v778_v37 }
 0x1bb   : > { %891 = vst.msk [vmem:[%s1536_s23 + $0x10] sm:$0xf] %vm870_vm0, %v883_v31 }
 0x1bc   : > { %887 = vst.msk [vmem:[%s1536_s23] sm:$0xf] %vm870_vm0, %v879_v38  ;;  %v722_v39 = vpop.f32.mrf.mxu3 }
 0x1bd   : > { %v723_v40 = vadd.f32 %v1529_v59, %v722_v39  ;;  %v852_v45 = vpop.f32.mrf.mxu2 }
 0x1be   : > { %v853_v46 = vadd.f32 %v1547_v15, %v852_v45  ;;  %v789_v47 = vpop.f32.mrf.mxu1 }
 0x1bf   : > { %v866_v48 = vpack.c.bf16 %v723_v40, %v723_v40  ;;  %v779_v49 = vpop.f32.mrf.mxu0  ;;  %v790_v50 = vadd.f32 %v1524_v56, %v789_v47 }
 0x1c0   : > { %v899_v51 = vpack.c.bf16 %v853_v46, %v853_v46  ;;  %v780_v53 = vadd.f32 %v1524_v56, %v779_v49 }
 0x1c1   : > { %875 = vst.msk [vmem:[%s1542_s27 + $0x10] sm:$0xf] %vm870_vm0, %v866_v48  ;;  %v884_v54 = vpack.c.bf16 %v790_v50, %v790_v50 }
 0x1c2   : > { %907 = vst.msk [vmem:[%s1558_s12 + $0x10] sm:$0xf] %vm870_vm0, %v899_v51  ;;  %v880_v55 = vpack.c.bf16 %v780_v53, %v780_v53 }
 0x1c3   : > { %892 = vst.msk [vmem:[%s1536_s23 + $0x14] sm:$0xf] %vm870_vm0, %v884_v54 }
 0x1c4   : > { %888 = vst.msk [vmem:[%s1536_s23 + $0x4] sm:$0xf] %vm870_vm0, %v880_v55  ;;  %v724_v57 = vpop.f32.mrf.mxu3 }
 0x1c5   : > { %v725_v58 = vadd.f32 %v1529_v59, %v724_v57  ;;  %v854_v60 = vpop.f32.mrf.mxu2 }
 0x1c6   : > { %v855_v52 = vadd.f32 %v1547_v15, %v854_v60  ;;  %v792_v61 = vpop.f32.mrf.mxu1 }
 0x1c7   : > { %v867_v62 = vpack.c.bf16 %v725_v58, %v725_v58  ;;  %v793_v41 = vadd.f32 %v1524_v56, %v792_v61  ;;  %v842_v44 = vpop.f32.mrf.mxu0 }
 0x1c8   : > { %v900_v1 = vpack.c.bf16 %v855_v52, %v855_v52  ;;  %v843_v4 = vadd.f32 %v1547_v15, %v842_v44 }
 0x1c9   : > { %876 = vst.msk [vmem:[%s1542_s27 + $0x14] sm:$0xf] %vm870_vm0, %v867_v62  ;;  %v885_v0 = vpack.c.bf16 %v793_v41, %v793_v41 }
 0x1ca   : > { %908 = vst.msk [vmem:[%s1558_s12 + $0x14] sm:$0xf] %vm870_vm0, %v900_v1  ;;  %v895_v2 = vpack.c.bf16 %v843_v4, %v843_v4 }
 0x1cb   : > { %893 = vst.msk [vmem:[%s1536_s23 + $0x18] sm:$0xf] %vm870_vm0, %v885_v0 }
 0x1cc   : > { %903 = vst.msk [vmem:[%s1558_s12] sm:$0xf] %vm870_vm0, %v895_v2  ;;  %v727_v10 = vpop.f32.mrf.mxu3 }
 0x1cd   : > { %v728_v63 = vadd.f32 %v1529_v59, %v727_v10  ;;  %v857_v3 = vpop.f32.mrf.mxu2 }
 0x1ce   : > { %v858_v5 = vadd.f32 %v1547_v15, %v857_v3  ;;  %v794_v16 = vpop.f32.mrf.mxu1 }
 0x1cf   : > { %v868_v6 = vpack.c.bf16 %v728_v63, %v728_v63  ;;  %v795_v7 = vadd.f32 %v1524_v56, %v794_v16  ;;  %v844_v8 = vpop.f32.mrf.mxu0 }
 0x1d0   : > { %v901_v9 = vpack.c.bf16 %v858_v5, %v858_v5  ;;  %v845_v11 = vadd.f32 %v1547_v15, %v844_v8 }
 0x1d1   : > { %877 = vst.msk [vmem:[%s1542_s27 + $0x18] sm:$0xf] %vm870_vm0, %v868_v6  ;;  %v886_v12 = vpack.c.bf16 %v795_v7, %v795_v7 }
 0x1d2   : > { %909 = vst.msk [vmem:[%s1558_s12 + $0x18] sm:$0xf] %vm870_vm0, %v901_v9  ;;  %v896_v13 = vpack.c.bf16 %v845_v11, %v845_v11 }
 0x1d3   : > { %894 = vst.msk [vmem:[%s1536_s23 + $0x1c] sm:$0xf] %vm870_vm0, %v886_v12 }
 0x1d4   : > { %904 = vst.msk [vmem:[%s1558_s12 + $0x4] sm:$0xf] %vm870_vm0, %v896_v13  ;;  %v729_v14 = vpop.f32.mrf.mxu3 }
 0x1d5   : > { %v730_v17 = vadd.f32 %v1529_v59, %v729_v14  ;;  %v859_v56 = vpop.f32.mrf.mxu2 }
 0x1d6   : > { %v860_v22 = vadd.f32 %v1547_v15, %v859_v56 }
 0x1d7   : > { %v869_v28 = vpack.c.bf16 %v730_v17, %v730_v17 }
 0x1d8   : > { %v902_v29 = vpack.c.bf16 %v860_v22, %v860_v22 }
 0x1d9   : > { %878 = vst.msk [vmem:[%s1542_s27 + $0x1c] sm:$0xf] %vm870_vm0, %v869_v28 }
 0x1da   : > { %910 = vst.msk [vmem:[%s1558_s12 + $0x1c] sm:$0xf] %vm870_vm0, %v902_v29 }
 0x1db PF: > { %s23_s17 = sadd.s32 1, %s1233_s17  }
 0x1dc   : > { %p20_p7 = scmp.ge.s32.totalorder %s23_s17, 4  }
 0x1de   :  { %22 = sbr.rel (!%p20_p7) target bundleno = 1 (0x1), region = 115 }
 0x1e3   :  { %967 = vsyncpa [#allocation3], 1 }
 0x1e4   :  { %969 = vsyncpa [#allocation3 + $0x1], 1 }

// kernel: ico_slide3d_forward.15
= control target key start
LH: loop header
LB: loop body
LE: loop exit
PB: predicated region body
PF: predicated region fallthrough
CT: control target
= control target key end

     0   :  { %12 = vsyncpa [#allocation3], 0  ;;  %s2995_s0 = inlined_call_operand.vmem [shape: f32[128,64], index: 0, kind: input, shape index: {}]   ;;  %s2996_s1 = inlined_call_operand.vmem [shape: f32[1,64], index: 1, kind: input, shape index: {}]   ;;  %s2997_s2 = inlined_call_operand.vmem [shape: f32[1,64], index: 2, kind: input, shape index: {}]   ;;  %s2998_s3 = inlined_call_operand.vmem [shape: bf16[64,256], index: 3, kind: input, shape index: {}]   ;;  %s2999_s4 = inlined_call_operand.vmem [shape: f32[1,256], index: 4, kind: input, shape index: {}]   ;;  %s3000_s5 = inlined_call_operand.vmem [shape: bf16[256,64], index: 5, kind: input, shape index: {}]   ;;  %s3001_s6 = inlined_call_operand.vmem [shape: f32[1,64], index: 6, kind: input, shape index: {}]   ;;  %s3002_s7 = inlined_call_operand.hbm [shape: f32[128,64], index: 7, kind: output, shape index: {}]  }
   0x1   :  { %14 = vsyncpa [#allocation3 + $0x1], 0  ;;  %s1942_s24 = smov 0   ;;  %s1944_s25 = smov 0  }
   0x2   :  { %s1946_s26 = smov 0   ;;  %s1948_s27 = smov 0  }
   0x3 LB: > { %s1963_s28 = sadd.s32 4294967295, %s1896_s27   ;;  %s1557_s29 = sadd.s32 4294967294, %s1896_s27   ;;  %s1896_s27 = sphi %s1948_s27, %s3094_s27   ;;  %s1892_s26 = sphi %s1946_s26, %s3093_s26   ;;  %s1888_s25 = sphi %s1944_s25, %s3092_s25   ;;  %s1884_s24 = sphi %s1942_s24, %s3091_s24  }
   0x4   : > { %s1967_s30 = sadd.s32 1, %s1896_s27   ;;  %s179_s8 = sadd.s32 1, %s1892_s26 }
   0x5   : > { %s176_s9 = ssub.s32 %s1896_s27, %s1967_s30  ;;  %p189_p0 = scmp.ne.s32.totalorder %s1892_s26, %s1888_s25 }
   0x6   : > { %p177_p1 = scmp.eq.s32.totalorder %s176_s9, 0  ;;  %p190_p2 = scmp.eq.s32.totalorder %s1963_s28, 1 }
   0x7   : > { %p195_p3 = scmp.ne.s32.totalorder %s1888_s25, %s1884_s24  ;;  %p196_p4 = scmp.eq.s32.totalorder %s1557_s29, 1 }
   0x8   : > { %s1978_s10 = scalar_select %p177_p1, %s1892_s26, %s179_s8  }
   0x9   : > { %p1980_p5 = por %p190_p2, %p189_p0  ;;  %p1984_p6 = por %p196_p4, %p195_p3 }
   0xa   : > { %p1560_p7 = scmp.ge.s32.totalorder %s1896_s27, 1  ;;  %p241_p8 = scmp.lt.s32.totalorder %s1896_s27, 3 }
   0xc   : > { %p242_p9 = pnand %p1560_p7, %p241_p8 }
   0xe   : > { %245 = sbr.rel (%p242_p9) target bundleno = 769 (0x301), region = 48 }
  0x13   : > { %s1562_s13 = sshll.u32 %s1963_s28, 3  ;;  %vm291_vm0 = vcmask 523264   ;;  %v1898_v14 = vmov 64.0   ;;  %v1590_v58 = vld [vmem:[%s2998_s3 + $0x30] sm:$0xf]  ;;  %s270_s8 = sand.u32 1, %s1888_s25  }
  0x14   : > { %p274_p10 = scmp.lt.s32.totalorder %s1562_s13, 15  ;;  %1744 = vrcp.f32 %v1898_v14  ;;  %v1680_v59 = vld [vmem:[%s2998_s3 + $0x34] sm:$0xf0]  ;;  %v1679_v60 = vld [vmem:[%s2998_s3 + $0x34] sm:$0xf]  ;;  %s1561_s9 = sshll.u32 %s270_s8, 6 }
  0x15   : > { %v1591_v61 = vor.u32 %v1680_v59, %v1590_v58  ;;  %v1592_v62 = vld [vmem:[%s2998_s3 + $0x38] sm:$0xf0]  ;;  %v1566_v14 = vld [vmem:[%s2998_s3] sm:$0xf] }
  0x16   : > { %s3096_s13 = smov (!%p274_p10, %s1562_s13), 15  ;;  %v1595_v63 = vor.u32 %v1679_v60, %v1592_v62 }
  0x17   : > { %s1563_s14 = sshll.u32 %s3096_s13, 3  ;;  %571 = vmatpush.bf16.msra.mxu0 %v1591_v61  ;;  %s2936_s13 = scalar_lea.vmem [#allocation2], %s1561_s9 }
  0x18   : > { %s1994_s17 = scalar_lea.vmem %s2995_s0, %s1563_s14  ;;  %600 = vmatpush.bf16.msra.mxu1 %v1595_v63  ;;  %s1697_s14 = sshll.u32 %s1963_s28, 6 }
  0x19   : > { %v285_v0 = vld [vmem:[%s1994_s17 + $0x20] sm:$0xff]  ;;  %v283_v1 = vld [vmem:[%s1994_s17 + $0x10] sm:$0xff]  ;;  %v286_v6 = vld [vmem:[%s1994_s17 + $0x28] sm:$0xff]  ;;  %s1491_s18 = scalar_lea.hbm %s3002_s7, %s1697_s14  ;;  %s1492_s19 = sshll.u32 %s2936_s13, 4  ;;  %s1493_s19 = int_to_ptr.vmem [resolvable:$true] %s1492_s19 }
  0x1a   : > { %v281_v2 = vld [vmem:[%s1994_s17] sm:$0xff]  ;;  %v304_v3 = vsel %vm291_vm0, %v285_v0, 0.0  ;;  %v298_v4 = vsel %vm291_vm0, %v283_v1, 0.0  ;;  %v284_v7 = vld [vmem:[%s1994_s17 + $0x18] sm:$0xff]  ;;  %v282_v8 = vld [vmem:[%s1994_s17 + $0x8] sm:$0xff]  ;;  %v307_v9 = vsel %vm291_vm0, %v286_v6, 0.0  ;;  %v1745_v15 = vpop.eup %1744 }
  0x1b   : > { %v292_v5 = vsel %vm291_vm0, %v281_v2, 0.0  ;;  %305 = vadd.xlane.f32.xlu2 %v304_v3  ;;  %299 = vadd.xlane.f32.xlu1 %v298_v4  ;;  %v301_v10 = vsel %vm291_vm0, %v284_v7, 0.0  ;;  %v295_v11 = vsel %vm291_vm0, %v282_v8, 0.0  ;;  %v287_v12 = vld [vmem:[%s1994_s17 + $0x30] sm:$0xff]  ;;  %v317_v16 = vmul.f32 64.0, %v1745_v15  ;;  %v2025_v36 = vld [vmem:[%s1994_s17 + $0x38] sm:$0xff] }
  0x1c   : > { %293 = vadd.xlane.f32.xlu0 %v292_v5  ;;  %v310_v13 = vsel %vm291_vm0, %v287_v12, 0.0  ;;  %vm321_vm1 = vweird.f32 %v1745_v15  ;;  %v313_v41 = vsel %vm291_vm0, %v2025_v36, 0.0  ;;  %v1584_v4 = vld [vmem:[%s2998_s3 + $0x28] sm:$0xf0]  ;;  %s1494_s20 = sshll.u32 %s1491_s18, 4  ;;  %s1480_s28 = scalar_lea.sflag [#allocation3], %s270_s8  ;;  %s1495_s20 = int_to_ptr.hbm [resolvable:$true] %s1494_s20 }
  0x1d   : > { %v318_v17 = vsub.f32 1.0, %v317_v16  ;;  %v1673_v16 = vld [vmem:[%s2998_s3 + $0x4] sm:$0xf]  ;;  %s1848_s21 = sshra.s32 %s1495_s20, 4  ;;  %s1854_s9 = scalar_lea.hbm %s3002_s7, 128  ;;  %s1849_s21 = int_to_ptr.hbm [resolvable:$true] %s1848_s21 }
  0x1e   : > { %s1850_s22 = scalar_lea.hbm %s1849_s21, 64  ;;  %p1855_p0 = scmp.lt.s32.totalorder %s1849_s21, %s3002_s7 }
  0x1f   : > { %v319_v18 = vmul.f32 %v1745_v15, %v318_v17  ;;  %p1851_p11 = scmp.ne.s32.totalorder %s1849_s21, %s1850_s22  ;;  %p1856_p1 = scmp.lt.s32.totalorder %s1854_s9, %s1850_s22 }
  0x21   : > { %v320_v19 = vadd.f32 %v1745_v15, %v319_v18  ;;  %p1852_p12 = pnand %p1851_p11, %p1980_p5  ;;  %p1857_p2 = por %p1856_p1, %p1855_p0 }
  0x23   : > { %308 = vadd.xlane.f32.xlu2 %v307_v9  ;;  %302 = vadd.xlane.f32.xlu1 %v301_v10  ;;  %v2010_v20 = vsel %vm321_vm1, %v1745_v15, %v320_v19  ;;  %v1576_v10 = vld [vmem:[%s2998_s3 + $0x18] sm:$0xf0]  ;;  %v1674_v15 = vld [vmem:[%s2998_s3 + $0x4] sm:$0xf0]  ;;  %v1568_v19 = vld [vmem:[%s2998_s3 + $0x8] sm:$0xf0]  ;;  %p1853_p13 = pneg %p1852_p12 }
  0x24   : > { %296 = vadd.xlane.f32.xlu0 %v295_v11  ;;  %v1567_v18 = vor.u32 %v1674_v15, %v1566_v14 }
  0x25   : > { %p1858_p3 = pnand %p1857_p2, %p1853_p13 }
  0x2b   : > { %311 = vadd.xlane.f32.xlu2 %v310_v13 }
  0x8e   : > { %v306_v21 = vpop.xlane.xlu2 %305  ;;  %v300_v22 = vpop.xlane.xlu1 %299 }
  0x8f   : > { %v294_v23 = vpop.xlane.xlu0 %293  ;;  %v327_v32 = vmul.f32 %v2010_v20, %v306_v21  ;;  %v325_v33 = vmul.f32 %v2010_v20, %v300_v22  ;;  %v1571_v21 = vor.u32 %v1673_v16, %v1568_v19 }
  0x90   : > { %v323_v24 = vmul.f32 %v2010_v20, %v294_v23 }
  0x91   : > { %v2031_v39 = vsub.f32 %v285_v0, %v327_v32  ;;  %v2033_v40 = vsub.f32 %v283_v1, %v325_v33  ;;  %v1582_v0 = vld [vmem:[%s2998_s3 + $0x20] sm:$0xf]  ;;  %v1678_v1 = vld [vmem:[%s2998_s3 + $0x24] sm:$0xf0] }
  0x92   : > { %v2013_v25 = vsub.f32 %v281_v2, %v323_v24  ;;  %v1677_v2 = vld [vmem:[%s2998_s3 + $0x24] sm:$0xf]  ;;  %v1583_v3 = vor.u32 %v1678_v1, %v1582_v0 }
  0x93   : > { %v343_v48 = vmul.f32 %v2031_v39, %v2031_v39  ;;  %v341_v49 = vmul.f32 %v2033_v40, %v2033_v40  ;;  %v1587_v5 = vor.u32 %v1677_v2, %v1584_v4  ;;  %v2135_v4 = vld [vmem:[%s2996_s1] ss:$0 sm:$0xff] }
  0x94   : > { %v339_v26 = vmul.f32 %v2013_v25, %v2013_v25  ;;  %572 = vmatpush.bf16.msra.mxu0 %v1583_v3 }
  0x95   : > { %v359_v53 = vsel %vm291_vm0, %v343_v48, 0.0  ;;  %v353_v54 = vsel %vm291_vm0, %v341_v49, 0.0  ;;  %601 = vmatpush.bf16.msra.mxu1 %v1587_v5 }
  0x96   : > { %v309_v27 = vpop.xlane.xlu2 %308  ;;  %v303_v28 = vpop.xlane.xlu1 %302  ;;  %v347_v29 = vsel %vm291_vm0, %v339_v26, 0.0 }
  0x97   : > { %v326_v30 = vmul.f32 %v2010_v20, %v303_v28  ;;  %348 = vadd.xlane.f32.xlu0 %v347_v29  ;;  %v297_v31 = vpop.xlane.xlu0 %296  ;;  %v328_v47 = vmul.f32 %v2010_v20, %v309_v27 }
  0x98   : > { %v324_v34 = vmul.f32 %v2010_v20, %v297_v31 }
  0x99   : > { %v2022_v35 = vsub.f32 %v284_v7, %v326_v30  ;;  %v2051_v52 = vsub.f32 %v286_v6, %v328_v47  ;;  %v1574_v6 = vld [vmem:[%s2998_s3 + $0x10] sm:$0xf]  ;;  %v1676_v7 = vld [vmem:[%s2998_s3 + $0x14] sm:$0xf0] }
  0x9a   : > { %v2027_v37 = vsub.f32 %v282_v8, %v324_v34  ;;  %v1675_v8 = vld [vmem:[%s2998_s3 + $0x14] sm:$0xf]  ;;  %v1575_v9 = vor.u32 %v1676_v7, %v1574_v6 }
  0x9b   : > { %v342_v38 = vmul.f32 %v2022_v35, %v2022_v35  ;;  %v344_v56 = vmul.f32 %v2051_v52, %v2051_v52 }
  0x9c   : > { %v340_v42 = vmul.f32 %v2027_v37, %v2027_v37  ;;  %573 = vmatpush.bf16.msra.mxu0 %v1575_v9 }
  0x9d   : > { %v356_v43 = vsel %vm291_vm0, %v342_v38, 0.0  ;;  %v362_v57 = vsel %vm291_vm0, %v344_v56, 0.0 }
  0x9e   : > { %v312_v44 = vpop.xlane.xlu2 %311  ;;  %357 = vadd.xlane.f32.xlu2 %v356_v43  ;;  %v350_v45 = vsel %vm291_vm0, %v340_v42, 0.0 }
  0x9f   : > { %v329_v46 = vmul.f32 %v2010_v20, %v312_v44  ;;  %314 = vadd.xlane.f32.xlu0 %v313_v41  ;;  %351 = vadd.xlane.f32.xlu1 %v350_v45 }
  0xa0   : > { %574 = vmatpush.bf16.msra.mxu0 %v1567_v18 }
  0xa1   : > { %v2047_v50 = vsub.f32 %v287_v12, %v329_v46  ;;  %v1579_v12 = vor.u32 %v1675_v8, %v1576_v10 }
  0xa3   : > { %v345_v51 = vmul.f32 %v2047_v50, %v2047_v50  ;;  %602 = vmatpush.bf16.msra.mxu1 %v1579_v12 }
  0xa5   : > { %v365_v55 = vsel %vm291_vm0, %v345_v51, 0.0 }
  0xa6   : > { %366 = vadd.xlane.f32.xlu2 %v365_v55 }
  0xa7   : > { %360 = vadd.xlane.f32.xlu0 %v359_v53  ;;  %354 = vadd.xlane.f32.xlu1 %v353_v54 }
  0xa8   : > { %603 = vmatpush.bf16.msra.mxu1 %v1571_v21 }
  0xaf   : > { %363 = vadd.xlane.f32.xlu1 %v362_v57 }
 0x10a   : > { %v349_v11 = vpop.xlane.xlu0 %348 }
 0x10b   : > { %v371_v13 = vmul.f32 %v349_v11, %v2010_v20 }
 0x10d   : > { %v379_v17 = vadd.f32 1e-05, %v371_v13 }
 0x10f   : > { %1746 = vrsqrt.f32 %v379_v17  ;;  %vm393_vm3 = vweird.f32 %v379_v17 }
 0x111   : > { %v358_v22 = vpop.xlane.xlu2 %357 }
 0x112   : > { %v374_v23 = vmul.f32 %v358_v22, %v2010_v20  ;;  %v352_v24 = vpop.xlane.xlu1 %351  ;;  %v315_v26 = vpop.xlane.xlu0 %314 }
 0x113   : > { %v372_v27 = vmul.f32 %v352_v24, %v2010_v20  ;;  %v330_v28 = vmul.f32 %v2010_v20, %v315_v26 }
 0x114   : > { %v2111_v29 = vadd.f32 1e-05, %v374_v23 }
 0x115   : > { %v1747_v30 = vpop.eup %1746  ;;  %v380_v31 = vadd.f32 1e-05, %v372_v27  ;;  %v2114_v32 = vsub.f32 %v2025_v36, %v330_v28 }
 0x116   : > { %v388_v33 = vmul.f32 %v1747_v30, %v379_v17  ;;  %1748 = vrsqrt.f32 %v2111_v29  ;;  %vm394_vm2 = vweird.f32 %v1747_v30  ;;  %vm423_vm10 = vweird.f32 %v2111_v29 }
 0x117   : > { %1750 = vrsqrt.f32 %v380_v31  ;;  %v346_v34 = vmul.f32 %v2114_v32, %v2114_v32  ;;  %vm395_vm4 = vmor %vm393_vm3, %vm394_vm2  ;;  %vm403_vm5 = vweird.f32 %v380_v31 }
 0x118   : > { %v389_v38 = vmul.f32 %v1747_v30, %v388_v33 }
 0x119   : > { %v368_v41 = vsel %vm291_vm0, %v346_v34, 0.0 }
 0x11a   : > { %v390_v42 = vmul.f32 0.5, %v389_v38  ;;  %v355_v43 = vpop.xlane.xlu1 %354  ;;  %369 = vadd.xlane.f32.xlu0 %v368_v41  ;;  %v361_v45 = vpop.xlane.xlu0 %360 }
 0x11b   : > { %v373_v44 = vmul.f32 %v355_v43, %v2010_v20  ;;  %v375_v51 = vmul.f32 %v361_v45, %v2010_v20 }
 0x11c   : > { %v2121_v46 = vpop.eup %1748  ;;  %v391_v36 = vsub.f32 1.5, %v390_v42 }
 0x11d   : > { %v1751_v47 = vpop.eup %1750  ;;  %v381_v48 = vadd.f32 1e-05, %v373_v44  ;;  %v418_v54 = vmul.f32 %v2121_v46, %v2111_v29  ;;  %v2126_v57 = vadd.f32 1e-05, %v375_v51  ;;  %vm424_vm11 = vweird.f32 %v2121_v46 }
 0x11e   : > { %v398_v49 = vmul.f32 %v1751_v47, %v380_v31  ;;  %v392_v53 = vmul.f32 %v1747_v30, %v391_v36  ;;  %vm404_vm6 = vweird.f32 %v1751_v47  ;;  %vm425_vm13 = vmor %vm423_vm10, %vm424_vm11 }
 0x11f   : > { %1752 = vrsqrt.f32 %v381_v48  ;;  %v419_v60 = vmul.f32 %v2121_v46, %v418_v54  ;;  %vm405_vm7 = vmor %vm403_vm5, %vm404_vm6  ;;  %vm413_vm8 = vweird.f32 %v381_v48  ;;  %vm433_vm1 = vweird.f32 %v2126_v57 }
 0x120   : > { %v399_v55 = vmul.f32 %v1751_v47, %v398_v49  ;;  %v396_v59 = vsel %vm395_vm4, %v1747_v30, %v392_v53  ;;  %1754 = vrsqrt.f32 %v2126_v57 }
 0x121   : > { %v467_v1 = vmul.f32 %v396_v59, %v2013_v25  ;;  %v420_v5 = vmul.f32 0.5, %v419_v60  ;;  %v2142_v25 = vld [vmem:[%s2997_s2] ss:$0 sm:$0xff] }
 0x122   : > { %v400_v56 = vmul.f32 0.5, %v399_v55  ;;  %v364_v58 = vpop.xlane.xlu1 %363  ;;  %v367_v55 = vpop.xlane.xlu2 %366 }
 0x123   : > { %v376_v61 = vmul.f32 %v364_v58, %v2010_v20  ;;  %v478_v10 = vmul.f32 %v2135_v4, %v467_v1  ;;  %v421_v11 = vsub.f32 1.5, %v420_v5 }
 0x124   : > { %v401_v62 = vsub.f32 1.5, %v400_v56  ;;  %v377_v56 = vmul.f32 %v367_v55, %v2010_v20 }
 0x125   : > { %v1753_v63 = vpop.eup %1752  ;;  %v384_v0 = vadd.f32 1e-05, %v376_v61  ;;  %v489_v17 = vadd.f32 %v2142_v25, %v478_v10  ;;  %v422_v18 = vmul.f32 %v2121_v46, %v421_v11 }
 0x126   : > { %v402_v2 = vmul.f32 %v1751_v47, %v401_v62  ;;  %v408_v3 = vmul.f32 %v1753_v63, %v381_v48  ;;  %vm414_vm9 = vweird.f32 %v1753_v63  ;;  %v1755_v13 = vpop.eup %1754 }
 0x127   : > { %1756 = vrsqrt.f32 %v384_v0  ;;  %vm415_vm12 = vmor %vm413_vm8, %vm414_vm9  ;;  %v428_v19 = vmul.f32 %v1755_v13, %v2126_v57  ;;  %v426_v26 = vsel %vm425_vm13, %v2121_v46, %v422_v18  ;;  %vm443_vm14 = vweird.f32 %v384_v0 }
 0x128   : > { %v406_v6 = vsel %vm405_vm7, %v1751_v47, %v402_v2  ;;  %v409_v7 = vmul.f32 %v1753_v63, %v408_v3  ;;  %v470_v30 = vmul.f32 %v426_v26, %v2022_v35  ;;  %vm434_vm2 = vweird.f32 %v1755_v13  ;;  %v1688_v26 = vld [vmem:[%s3000_s5 + $0x38] sm:$0xff] }
 0x129   : > { %v468_v8 = vmul.f32 %v406_v6, %v2027_v37  ;;  %v429_v27 = vmul.f32 %v1755_v13, %v428_v19  ;;  %vm435_vm4 = vmor %vm433_vm1, %vm434_vm2  ;;  %v385_v57 = vadd.f32 1e-05, %v377_v56  ;;  %1405 = vmatpush.bf16.msra.mxu2 %v1688_v26  ;;  %v1685_v56 = vld [vmem:[%s3000_s5 + $0x20] sm:$0xff] }
 0x12a   : > { %v410_v9 = vmul.f32 0.5, %v409_v7  ;;  %v481_v38 = vmul.f32 %v2135_v4, %v470_v30  ;;  %v1687_v30 = vld [vmem:[%s3000_s5 + $0x30] sm:$0xff] }
 0x12b   : > { %v479_v12 = vmul.f32 %v2135_v4, %v468_v8  ;;  %v430_v31 = vmul.f32 0.5, %v429_v27  ;;  %1758 = vrsqrt.f32 %v385_v57  ;;  %vm453_vm5 = vweird.f32 %v385_v57  ;;  %v1696_v27 = vld [vmem:[%s3000_s5 + $0x78] sm:$0xff] }
 0x12c   : > { %v411_v14 = vsub.f32 1.5, %v410_v9  ;;  %1434 = vmatpush.bf16.msra.mxu3 %v1696_v27 }
 0x12d   : > { %v490_v37 = vadd.f32 %v2142_v25, %v479_v12  ;;  %v1757_v15 = vpop.eup %1756  ;;  %v431_v41 = vsub.f32 1.5, %v430_v31  ;;  %v1695_v31 = vld [vmem:[%s3000_s5 + $0x70] sm:$0xff]  ;;  %1406 = vmatpush.bf16.msra.mxu2 %v1687_v30 }
 0x12e   : > { %v412_v16 = vmul.f32 %v1753_v63, %v411_v14  ;;  %v438_v21 = vmul.f32 %v1757_v15, %v384_v0  ;;  %vm444_vm15 = vweird.f32 %v1757_v15 }
 0x12f   : > { %v497_v22 = vpack.c.bf16 %v490_v37, %v489_v17  ;;  %vm445_vm3 = vmor %vm443_vm14, %vm444_vm15  ;;  %v432_v44 = vmul.f32 %v1755_v13, %v431_v41  ;;  %v509_v37 = vld [vmem:[%s2999_s4] sm:$0x3] }
 0x130   : > { %v416_v23 = vsel %vm415_vm12, %v1753_v63, %v412_v16  ;;  %v439_v24 = vmul.f32 %v1757_v15, %v438_v21  ;;  %1435 = vmatpush.bf16.msra.mxu3 %v1695_v31 }
 0x131   : > { %1596 = vmatmul.msk.bf16.vlgmr.msra.gmra.mxu0 %vm291_vm0, %v497_v22  ;;  %1600 = vmatmul.msk.bf16.vlgmr.msra.gmra.mxu1 %vm291_vm0, %v497_v22  ;;  %v469_v28 = vmul.f32 %v416_v23, %v2033_v40  ;;  %v492_v40 = vadd.f32 %v2142_v25, %v481_v38  ;;  %v436_v46 = vsel %vm435_vm4, %v1755_v13, %v432_v44 }
 0x132   : > { %v440_v29 = vmul.f32 0.5, %v439_v24  ;;  %v471_v47 = vmul.f32 %v436_v46, %v2031_v39  ;;  %v1686_v46 = vld [vmem:[%s3000_s5 + $0x28] sm:$0xff] }
 0x133   : > { %v480_v33 = vmul.f32 %v2135_v4, %v469_v28  ;;  %1407 = vmatpush.bf16.msra.mxu2 %v1686_v46 }
 0x134   : > { %v441_v34 = vsub.f32 1.5, %v440_v29  ;;  %v482_v49 = vmul.f32 %v2135_v4, %v471_v47 }
 0x135   : > { %v491_v42 = vadd.f32 %v2142_v25, %v480_v33 }
 0x136   : > { %v442_v43 = vmul.f32 %v1757_v15, %v441_v34  ;;  %v493_v53 = vadd.f32 %v2142_v25, %v482_v49 }
 0x137   : > { %v498_v35 = vpack.c.bf16 %v492_v40, %v491_v42  ;;  %1408 = vmatpush.bf16.msra.mxu2 %v1685_v56 }
 0x138   : > { %v446_v45 = vsel %vm445_vm3, %v1757_v15, %v442_v43 }
 0x139   : > { %v472_v36 = vmul.f32 %v446_v45, %v2051_v52  ;;  %v1759_v52 = vpop.eup %1758 }
 0x13a   : > { %v448_v39 = vmul.f32 %v1759_v52, %v385_v57  ;;  %vm454_vm6 = vweird.f32 %v1759_v52  ;;  %v1693_v57 = vld [vmem:[%s3000_s5 + $0x60] sm:$0xff] }
 0x13b   : > { %v483_v48 = vmul.f32 %v2135_v4, %v472_v36  ;;  %vm455_vm7 = vmor %vm453_vm5, %vm454_vm6  ;;  %v1694_v36 = vld [vmem:[%s3000_s5 + $0x68] sm:$0xff] }
 0x13c   : > { %v449_v58 = vmul.f32 %v1759_v52, %v448_v39  ;;  %1436 = vmatpush.bf16.msra.mxu3 %v1694_v36 }
 0x13d   : > { %v494_v51 = vadd.f32 %v2142_v25, %v483_v48 }
 0x13e   : > { %v450_v62 = vmul.f32 0.5, %v449_v58 }
 0x13f   : > { %v499_v54 = vpack.c.bf16 %v494_v51, %v493_v53 }
 0x140   : > { %v451_v63 = vsub.f32 1.5, %v450_v62  ;;  %1437 = vmatpush.bf16.msra.mxu3 %v1693_v57 }
 0x141   : > { %1597 = vmatmul.msk.bf16.gmra.mxu0 %vm291_vm0, %v498_v35  ;;  %1601 = vmatmul.msk.bf16.gmra.mxu1 %vm291_vm0, %v498_v35 }
 0x142   : > { %v452_v1 = vmul.f32 %v1759_v52, %v451_v63  ;;  %v3003_v63 = vmov -1.0  }
 0x144   : > { %v456_v5 = vsel %vm455_vm7, %v1759_v52, %v452_v1 }
 0x145   : > { %v473_v8 = vmul.f32 %v456_v5, %v2047_v50  ;;  %v2184_v50 = vperm.slane %v509_v37, 0 }
 0x147   : > { %v484_v11 = vmul.f32 %v2135_v4, %v473_v8  ;;  %3024 = vst [vmem:[#allocation5_spill] sm:$0xff] %v2184_v50 }
 0x149   : > { %v495_v13 = vadd.f32 %v2142_v25, %v484_v11  ;;  %v1692_v11 = vld [vmem:[%s3000_s5 + $0x58] sm:$0xff] }
 0x14a   : > { %1438 = vmatpush.bf16.msra.mxu3 %v1692_v11 }
 0x151   : > { %1598 = vmatmul.msk.bf16.gmra.mxu0 %vm291_vm0, %v499_v54  ;;  %1602 = vmatmul.msk.bf16.gmra.mxu1 %vm291_vm0, %v499_v54 }
 0x18d   : > { %v370_v59 = vpop.xlane.xlu0 %369 }
 0x18e   : > { %v378_v60 = vmul.f32 %v370_v59, %v2010_v20 }
 0x190   : > { %v386_v61 = vadd.f32 1e-05, %v378_v60 }
 0x192   : > { %1760 = vrsqrt.f32 %v386_v61  ;;  %vm463_vm9 = vweird.f32 %v386_v61 }
 0x198   : > { %v1761_v0 = vpop.eup %1760 }
 0x199   : > { %v458_v2 = vmul.f32 %v1761_v0, %v386_v61  ;;  %vm464_vm8 = vweird.f32 %v1761_v0 }
 0x19a   : > { %vm465_vm10 = vmor %vm463_vm9, %vm464_vm8 }
 0x19b   : > { %v459_v3 = vmul.f32 %v1761_v0, %v458_v2 }
 0x19d   : > { %v460_v6 = vmul.f32 0.5, %v459_v3 }
 0x19f   : > { %v461_v7 = vsub.f32 1.5, %v460_v6 }
 0x1a1   : > { %v462_v9 = vmul.f32 %v1761_v0, %v461_v7 }
 0x1a3   : > { %v466_v20 = vsel %vm465_vm10, %v1761_v0, %v462_v9 }
 0x1a4   : > { %v474_v10 = vmul.f32 %v466_v20, %v2114_v32  ;;  %v2186_v32 = vperm.slane %v509_v37, 1 }
 0x1a6   : > { %v485_v12 = vmul.f32 %v2135_v4, %v474_v10  ;;  %3025 = vst [vmem:[#allocation6_spill] sm:$0xff] %v2186_v32  ;;  %v1684_v10 = vld [vmem:[%s3000_s5 + $0x18] sm:$0xff] }
 0x1a7   : > { %1409 = vmatpush.bf16.msra.mxu2 %v1684_v10 }
 0x1a8   : > { %v496_v14 = vadd.f32 %v2142_v25, %v485_v12 }
 0x1aa   : > { %v500_v15 = vpack.c.bf16 %v496_v14, %v495_v13 }
 0x1ac   : > { %1599 = vmatmul.msk.bf16.gmra.mxu0 %vm291_vm0, %v500_v15  ;;  %1603 = vmatmul.msk.bf16.gmra.mxu1 %vm291_vm0, %v500_v15 }
 0x1ae   : > { %v576_v16 = vpop.f32.mrf.mxu0  ;;  %v605_v17 = vpop.f32.mrf.mxu1 }
 0x1af   : > { %v577_v4 = vadd.f32 %v576_v16, %v2184_v50  ;;  %v606_v18 = vadd.f32 %v605_v17, %v2186_v32 }
 0x1b1   : > { %v641_v25 = vmul.f32 0.70710677, %v577_v4  ;;  %v642_v19 = vmul.f32 0.70710677, %v606_v18  ;;  %v2231_v55 = vmul.f32 0.5, %v577_v4  ;;  %v2239_v52 = vmul.f32 0.5, %v606_v18 }
 0x1b3   : > { %v689_v21 = vand.u32 2147483647, %v641_v25  ;;  %v690_v22 = vand.u32 2147483647, %v642_v19  ;;  %vm657_vm11 = vcmp.ge.f32.partialorder %v641_v25, 0.0  ;;  %vm658_vm12 = vcmp.ge.f32.partialorder %v642_v19, 0.0 }
 0x1b4   : > { %v2250_v0 = vsel %vm657_vm11, 1.0, %v3003_v63  ;;  %v2257_v7 = vsel %vm658_vm12, 1.0, %v3003_v63 }
 0x1b5   : > { %v705_v28 = vmul.f32 0.3275911, %v689_v21  ;;  %v706_v33 = vmul.f32 0.3275911, %v690_v22  ;;  %v1121_v42 = vsub.f32 0.0, %v689_v21  ;;  %v1122_v43 = vsub.f32 0.0, %v690_v22 }
 0x1b6   : > { %v578_v23 = vpop.f32.mrf.mxu0  ;;  %v607_v24 = vpop.f32.mrf.mxu1 }
 0x1b7   : > { %v579_v29 = vadd.f32 %v578_v23, %v2184_v50  ;;  %v2204_v34 = vadd.f32 %v607_v24, %v2186_v32  ;;  %v2206_v38 = vadd.f32 1.0, %v705_v28  ;;  %v2210_v40 = vadd.f32 1.0, %v706_v33  ;;  %v1683_v23 = vld [vmem:[%s3000_s5 + $0x10] sm:$0xff] }
 0x1b8   : > { %v1137_v49 = vmul.f32 %v1121_v42, %v689_v21  ;;  %v1138_v51 = vmul.f32 %v1122_v43, %v690_v22  ;;  %v1691_v24 = vld [vmem:[%s3000_s5 + $0x50] sm:$0xff]  ;;  %1410 = vmatpush.bf16.msra.mxu2 %v1683_v23 }
 0x1b9   : > { %v2208_v41 = vmul.f32 0.70710677, %v579_v29  ;;  %v2213_v44 = vmul.f32 0.70710677, %v2204_v34  ;;  %1762 = vrcp.f32 %v2206_v38  ;;  %v2259_v8 = vmul.f32 0.5, %v579_v29  ;;  %1439 = vmatpush.bf16.msra.mxu3 %v1691_v24 }
 0x1ba   : > { %1764 = vrcp.f32 %v2210_v40  ;;  %v1153_v60 = vmul.f32 1.442695, %v1137_v49  ;;  %v1155_v61 = vmul.f32 1.442695, %v1138_v51  ;;  %v748_v17 = vand.u32 2147483648, %v2206_v38  ;;  %v1682_v49 = vld [vmem:[%s3000_s5 + $0x8] sm:$0xff] }
 0x1bb   : > { %v691_v47 = vand.u32 2147483647, %v2208_v41  ;;  %v692_v54 = vand.u32 2147483647, %v2213_v44  ;;  %vm659_vm13 = vcmp.ge.f32.partialorder %v2208_v41, 0.0  ;;  %vm660_vm14 = vcmp.ge.f32.partialorder %v2213_v44, 0.0 }
 0x1bc   : > { %1766 = vpow2.f32 %v1153_v60  ;;  %v2292_v21 = vmul.f32 0.5, %v2204_v34  ;;  %v746_v26 = vand.u32 2147483647, %v2206_v38  ;;  %v2310_v30 = vsel %vm659_vm13, 1.0, %v3003_v63  ;;  %v1690_v51 = vld [vmem:[%s3000_s5 + $0x48] sm:$0xff]  ;;  %1411 = vmatpush.bf16.msra.mxu2 %v1682_v49 }
 0x1bd   : > { %v707_v39 = vmul.f32 0.3275911, %v691_v47  ;;  %v1123_v1 = vsub.f32 0.0, %v691_v47  ;;  %v708_v2 = vmul.f32 0.3275911, %v692_v54  ;;  %v1124_v37 = vsub.f32 0.0, %v692_v54  ;;  %1440 = vmatpush.bf16.msra.mxu3 %v1690_v51 }
 0x1be   : > { %v581_v35 = vpop.f32.mrf.mxu0  ;;  %v610_v45 = vpop.f32.mrf.mxu1  ;;  %v2313_v31 = vsel %vm660_vm14, 1.0, %v3003_v63  ;;  %v2321_v44 = vor.u32 1.1754944e-38, %v748_v17  ;;  %vm742_vm3 = vweird.f32 %v2206_v38  ;;  %vm2434_vm5 = vcmp.eq.f32.partialorder %v746_v26, 8.507059e+37 }
 0x1bf   : > { %v2224_v48 = vadd.f32 %v581_v35, %v2184_v50  ;;  %v2227_v53 = vadd.f32 %v610_v45, %v2186_v32  ;;  %v2244_v59 = vpop.eup %1762  ;;  %v2277_v14 = vadd.f32 1.0, %v707_v39  ;;  %v1139_v4 = vmul.f32 %v1123_v1, %v691_v47 }
 0x1c0   : > { %v2273_v12 = vpop.eup %1764  ;;  %v738_v13 = vmul.f32 %v2244_v59, %v2206_v38  ;;  %v2284_v18 = vadd.f32 1.0, %v708_v2  ;;  %v1140_v28 = vmul.f32 %v1124_v37, %v692_v54  ;;  %vm743_vm1 = vweird.f32 %v2244_v59 }
 0x1c1   : > { %v2242_v58 = vmul.f32 0.70710677, %v2224_v48  ;;  %v2247_v62 = vmul.f32 0.70710677, %v2227_v53  ;;  %v753_v19 = vmul.f32 %v2273_v12, %v2210_v40  ;;  %1768 = vrcp.f32 %v2277_v14  ;;  %vm2469_vm7 = vmor %vm742_vm3, %vm743_vm1 }
 0x1c2   : > { %v739_v27 = vsub.f32 1.0, %v738_v13  ;;  %1770 = vpow2.f32 %v1155_v61  ;;  %v1157_v34 = vmul.f32 1.442695, %v1139_v4  ;;  %v2323_v35 = vpop.eup %1766  ;;  %v1159_v56 = vmul.f32 1.442695, %v1140_v28 }
 0x1c3   : > { %v2253_v3 = vand.u32 2147483647, %v2242_v58  ;;  %v2262_v9 = vand.u32 2147483647, %v2247_v62  ;;  %1772 = vrcp.f32 %v2284_v18  ;;  %v754_v41 = vsub.f32 1.0, %v753_v19 }
 0x1c4   : > { %v740_v54 = vmul.f32 %v2244_v59, %v739_v27  ;;  %v2342_v39 = vmul.f32 0.5, %v2224_v48  ;;  %v2350_v2 = vmul.f32 0.5, %v2227_v53  ;;  %v1681_v53 = vld [vmem:[%s3000_s5] sm:$0xff]  ;;  %vm661_vm15 = vcmp.ge.f32.partialorder %v2242_v58, 0.0 }
 0x1c5   : > { %v709_v15 = vmul.f32 0.3275911, %v2253_v3  ;;  %v710_v16 = vmul.f32 0.3275911, %v2262_v9  ;;  %v1125_v45 = vsub.f32 0.0, %v2253_v3  ;;  %v1126_v60 = vsub.f32 0.0, %v2262_v9  ;;  %1412 = vmatpush.bf16.msra.mxu2 %v1681_v53 }
 0x1c6   : > { %v583_v5 = vpop.f32.mrf.mxu0  ;;  %v612_v6 = vpop.f32.mrf.mxu1  ;;  %3028 = vst [vmem:[#allocation9_spill] sm:$0xff] %v2350_v2  ;;  %v2361_v10 = vmul.f32 %v2273_v12, %v754_v41  ;;  %v2376_v17 = vadd.f32 %v2244_v59, %v740_v54  ;;  %vm662_vm2 = vcmp.ge.f32.partialorder %v2247_v62, 0.0  ;;  %v2407_v54 = vsel %vm661_vm15, 1.0, %v3003_v63 }
 0x1c7   : > { %v2265_v20 = vadd.f32 %v583_v5, %v2184_v50  ;;  %v2295_v22 = vadd.f32 %v612_v6, %v2186_v32  ;;  %v2305_v29 = vadd.f32 1.0, %v709_v15  ;;  %v2315_v33 = vadd.f32 1.0, %v710_v16  ;;  %v2347_v1 = vpop.eup %1768  ;;  %v1689_v15 = vld [vmem:[%s3000_s5 + $0x40] sm:$0xff] }
 0x1c8   : > { %v2358_v6 = vpop.eup %1770  ;;  %v1141_v11 = vmul.f32 %v1125_v45, %v2253_v3  ;;  %v768_v4 = vmul.f32 %v2347_v1, %v2277_v14  ;;  %v1142_v19 = vmul.f32 %v1126_v60, %v2262_v9  ;;  %1441 = vmatpush.bf16.msra.mxu3 %v1689_v15  ;;  %vm772_vm4 = vweird.f32 %v2277_v14 }
 0x1c9   : > { %v2287_v25 = vmul.f32 0.70710677, %v2265_v20  ;;  %3026 = vst [vmem:[#allocation7_spill] sm:$0xff] %v2295_v22  ;;  %v2327_v46 = vmul.f32 0.70710677, %v2295_v22  ;;  %1774 = vrcp.f32 %v2305_v29  ;;  %v2372_v16 = vpop.eup %1772  ;;  %vm757_vm8 = vweird.f32 %v2210_v40 }
 0x1ca   : > { %1776 = vrcp.f32 %v2315_v33  ;;  %v783_v45 = vmul.f32 %v2372_v16, %v2284_v18  ;;  %v769_v60 = vsub.f32 1.0, %v768_v4  ;;  %vm773_vm9 = vweird.f32 %v2347_v1 }
 0x1cb   : > { %v2319_v42 = vand.u32 2147483647, %v2287_v25  ;;  %v696_v61 = vand.u32 2147483647, %v2327_v46  ;;  %1778 = vpow2.f32 %v1157_v34  ;;  %vm663_vm6 = vcmp.ge.f32.partialorder %v2287_v25, 0.0  ;;  %vm2514_vm10 = vmor %vm772_vm4, %vm773_vm9 }
 0x1cc   : > { %1780 = vpow2.f32 %v1159_v56  ;;  %v2412_v56 = vsel %vm662_vm2, 1.0, %v3003_v63  ;;  %v784_v41 = vsub.f32 1.0, %v783_v45  ;;  %v770_v26 = vmul.f32 %v2347_v1, %v769_v60 }
 0x1cd   : > { %v711_v57 = vmul.f32 0.3275911, %v2319_v42  ;;  %v712_v37 = vmul.f32 0.3275911, %v696_v61  ;;  %v1127_v27 = vsub.f32 0.0, %v2319_v42  ;;  %v1128_v49 = vsub.f32 0.0, %v696_v61 }
 0x1ce   : > { %v586_v43 = vpop.f32.mrf.mxu0  ;;  %v615_v47 = vpop.f32.mrf.mxu1  ;;  %3032 = vst [vmem:[#allocation13_spill] sm:$0xff] %v2412_v56  ;;  %vm787_vm11 = vweird.f32 %v2284_v18  ;;  %v3046_v2 = vand.u32 2147483648, %v2277_v14  ;;  %vm758_vm13 = vweird.f32 %v2273_v12  ;;  %vm802_vm14 = vweird.f32 %v2305_v29 }
 0x1cf   : > { %v2330_v36 = vadd.f32 %v586_v43, %v2184_v50  ;;  %v2356_v48 = vadd.f32 %v615_v47, %v2186_v32  ;;  %v2364_v13 = vadd.f32 1.0, %v711_v57  ;;  %v2384_v23 = vadd.f32 1.0, %v712_v37  ;;  %v2386_v24 = vpop.eup %1774  ;;  %vm2566_vm15 = vmor %vm757_vm8, %vm758_vm13 }
 0x1d0   : > { %v2397_v9 = vpop.eup %1776  ;;  %v1161_v47 = vmul.f32 1.442695, %v1141_v11  ;;  %v1163_v11 = vmul.f32 1.442695, %v1142_v19  ;;  %v798_v62 = vmul.f32 %v2386_v24, %v2305_v29  ;;  %v1143_v3 = vmul.f32 %v1127_v27, %v2319_v42 }
 0x1d1   : > { %3027 = vst [vmem:[#allocation8_spill] sm:$0xff] %v2330_v36  ;;  %v2353_v5 = vmul.f32 0.70710677, %v2330_v36  ;;  %v2394_v34 = vmul.f32 0.70710677, %v2356_v48  ;;  %1782 = vrcp.f32 %v2364_v13  ;;  %v2402_v51 = vpop.eup %1778  ;;  %v813_v15 = vmul.f32 %v2397_v9, %v2315_v33 }
 0x1d2   : > { %3030 = vst [vmem:[#allocation11_spill] sm:$0xff] %v2356_v48  ;;  %1784 = vrcp.f32 %v2384_v23  ;;  %v2422_v58 = vpop.eup %1780  ;;  %v1144_v63 = vmul.f32 %v1128_v49, %v696_v61  ;;  %v1165_v25 = vmul.f32 1.442695, %v1143_v3  ;;  %v3039_v36 = vmov -1.0  }
 0x1d3   : > { %3029 = vst [vmem:[#allocation10_spill] sm:$0xff] %v2353_v5  ;;  %v2391_v28 = vand.u32 2147483647, %v2353_v5  ;;  %v2417_v37 = vand.u32 2147483647, %v2394_v34  ;;  %1786 = vpow2.f32 %v1161_v47  ;;  %v814_v49 = vsub.f32 1.0, %v813_v15 }
 0x1d4   : > { %3031 = vst [vmem:[#allocation12_spill] sm:$0xff] %v2394_v34  ;;  %v2440_v34 = vmul.f32 0.5, %v2265_v20  ;;  %v799_v20 = vsub.f32 1.0, %v798_v62  ;;  %v1167_v60 = vmul.f32 1.442695, %v1144_v63  ;;  %v745_v63 = vsel %vm2469_vm7, %v2244_v59, %v2376_v17 }
 0x1d5   : > { %v713_v57 = vmul.f32 0.3275911, %v2391_v28  ;;  %3033 = vst [vmem:[#allocation14_spill] sm:$0xff] %v2417_v37  ;;  %v714_v48 = vmul.f32 0.3275911, %v2417_v37  ;;  %v2496_v59 = vmul.f32 %v2397_v9, %v814_v49  ;;  %v779_v5 = vor.u32 1.1754944e-38, %v3046_v2 }
 0x1d6   : > { %v588_v43 = vpop.f32.mrf.mxu0  ;;  %v617_v19 = vpop.f32.mrf.mxu1  ;;  %v756_v49 = vadd.f32 %v2273_v12, %v2361_v10  ;;  %v761_v10 = vand.u32 2147483647, %v2210_v40  ;;  %vm788_vm1 = vweird.f32 %v2372_v16  ;;  %vm832_vm2 = vweird.f32 %v2364_v13 }
 0x1d7   : > { %v2420_v53 = vadd.f32 %v588_v43, %v2184_v50  ;;  %v2430_v4 = vadd.f32 1.0, %v713_v57  ;;  %v2447_v27 = vpop.eup %1782  ;;  %v2450_v45 = vadd.f32 1.0, %v714_v48  ;;  %v2453_v61 = vadd.f32 %v617_v19, %v2186_v32  ;;  %vm2583_vm4 = vmor %vm787_vm11, %vm788_vm1 }
 0x1d8   : > { %v2455_v47 = vpop.eup %1784  ;;  %v2462_v50 = vsel %vm663_vm6, 1.0, %v3039_v36  ;;  %v828_v3 = vmul.f32 %v2447_v27, %v2364_v13  ;;  %v771_v19 = vadd.f32 %v2347_v1, %v770_v26  ;;  %vm762_vm3 = vcmp.eq.f32.partialorder %v761_v10, 8.507059e+37 }
 0x1d9   : > { %3034 = vst [vmem:[#allocation15_spill] sm:$0xff] %v2420_v53  ;;  %1788 = vrcp.f32 %v2430_v4  ;;  %v2445_v42 = vmul.f32 0.70710677, %v2420_v53  ;;  %v2459_v53 = vmul.f32 %v2372_v16, %v784_v41  ;;  %v1129_v41 = vsub.f32 0.0, %v2391_v28  ;;  %v2480_v62 = vpop.eup %1786 }
 0x1da   : > { %1790 = vpow2.f32 %v1163_v11  ;;  %3038 = vst [vmem:[#allocation17_spill] sm:$0xff] %v2453_v61  ;;  %v843_v38 = vmul.f32 %v2455_v47, %v2384_v23  ;;  %v2486_v15 = vmul.f32 0.70710677, %v2453_v61  ;;  %vm803_vm6 = vweird.f32 %v2386_v24 }
 0x1db   : > { %3037 = vst [vmem:[#allocation16_spill] sm:$0xff] %v2445_v42  ;;  %v699_v57 = vand.u32 2147483647, %v2445_v42  ;;  %1792 = vrcp.f32 %v2450_v45  ;;  %v2493_v42 = vmul.f32 %v2386_v24, %v799_v20  ;;  %v2510_v20 = vsel %vm2434_vm5, %v2321_v44, %v745_v63  ;;  %vm804_vm7 = vmor %vm802_vm14, %vm803_vm6 }
 0x1dc   : > { %3042 = vst [vmem:[#allocation18_spill] sm:$0xff] %v2486_v15  ;;  %1794 = vpow2.f32 %v1165_v25  ;;  %v2505_v26 = vand.u32 2147483647, %v2486_v15  ;;  %v829_v25 = vsub.f32 1.0, %v828_v3  ;;  %v844_v44 = vsub.f32 1.0, %v843_v38 }
 0x1dd   : > { %v715_v11 = vmul.f32 0.3275911, %v699_v57  ;;  %1796 = vpow2.f32 %v1167_v60  ;;  %v1145_v60 = vmul.f32 %v1129_v41, %v2391_v28  ;;  %v1131_v63 = vsub.f32 0.0, %v699_v57 }
 0x1de   : > { %3043 = vst [vmem:[#allocation19_spill] sm:$0xff] %v2505_v26  ;;  %v716_v15 = vmul.f32 0.3275911, %v2505_v26  ;;  %v3047_v28 = vand.u32 2147483647, %v2277_v14  ;;  %v808_v56 = vand.u32 2147483648, %v2305_v29  ;;  %vm817_vm8 = vweird.f32 %v2315_v33 }
 0x1df   : > { %v2490_v32 = vpop.eup %1788  ;;  %v2498_v17 = vadd.f32 1.0, %v715_v11  ;;  %v775_v11 = vsel %vm2514_vm10, %v2347_v1, %v771_v19  ;;  %v977_v41 = vmul.f32 1.0614054, %v2510_v20  ;;  %v2543_v2 = vmul.f32 1.442695, %v1145_v60 }
 0x1e0   : > { %v2500_v48 = vpop.eup %1790  ;;  %v858_v61 = vmul.f32 %v2490_v32, %v2430_v4  ;;  %vm777_vm12 = vcmp.eq.f32.partialorder %v3047_v28, 8.507059e+37  ;;  %v2535_v19 = vadd.f32 1.0, %v716_v15  ;;  %v830_v15 = vmul.f32 %v2447_v27, %v829_v25 }
 0x1e1   : > { %1798 = vrcp.f32 %v2498_v17  ;;  %v2524_v43 = vpop.eup %1792  ;;  %v2537_v38 = vsel %vm777_vm12, %v779_v5, %v775_v11  ;;  %3048 = vst [vmem:[#allocation20_spill] sm:$0xff] %v2543_v2  ;;  %v993_v14 = vadd.f32 -1.4531521, %v977_v41  ;;  %v2552_v5 = vmul.f32 %v2455_v47, %v844_v44 }
 0x1e2   : > { %v859_v22 = vsub.f32 1.0, %v858_v61  ;;  %v873_v1 = vmul.f32 %v2524_v43, %v2450_v45  ;;  %v2541_v26 = vpop.eup %1794  ;;  %v979_v61 = vmul.f32 1.0614054, %v2537_v38  ;;  %v2554_v11 = vmul.f32 %v1131_v63, %v699_v57 }
 0x1e3   : > { %v2547_v28 = vpop.eup %1796  ;;  %1800 = vrcp.f32 %v2535_v19  ;;  %v1009_v37 = vmul.f32 %v993_v14, %v2510_v20  ;;  %v763_v63 = vand.u32 2147483648, %v2210_v40  ;;  %v786_v14 = vadd.f32 %v2372_v16, %v2459_v53 }
 0x1e4   : > { %3049 = vst [vmem:[#allocation21_spill] sm:$0xff] %v2547_v28  ;;  %v2560_v3 = vmul.f32 %v2490_v32, %v859_v22  ;;  %v995_v41 = vadd.f32 -1.4531521, %v979_v61  ;;  %v874_v57 = vsub.f32 1.0, %v873_v1  ;;  %v760_v22 = vsel %vm2566_vm15, %v2273_v12, %v756_v49 }
 0x1e5   : > { %3050 = vst [vmem:[#allocation22_spill] sm:$0xff] %v2554_v11  ;;  %v1025_v36 = vadd.f32 1.4214138, %v1009_v37  ;;  %v764_v1 = vor.u32 1.1754944e-38, %v763_v63  ;;  %v791_v40 = vand.u32 2147483647, %v2284_v18  ;;  %v801_v28 = vadd.f32 %v2386_v24, %v2493_v42 }
 0x1e6   : > { %v1011_v61 = vmul.f32 %v995_v41, %v2537_v38  ;;  %v793_v12 = vand.u32 2147483648, %v2284_v18  ;;  %v790_v41 = vsel %vm2583_vm4, %v2372_v16, %v786_v14  ;;  %v2594_v10 = vmul.f32 %v2524_v43, %v874_v57 }
 0x1e7   : > { %v2557_v60 = vpop.eup %1798  ;;  %v1041_v53 = vmul.f32 %v1025_v36, %v2510_v20  ;;  %v2596_v25 = vsel %vm762_vm3, %v764_v1, %v760_v22  ;;  %vm792_vm5 = vcmp.eq.f32.partialorder %v791_v40, 8.507059e+37  ;;  %v806_v16 = vand.u32 2147483647, %v2305_v29 }
 0x1e8   : > { %v888_v44 = vmul.f32 %v2557_v60, %v2498_v17  ;;  %v1027_v49 = vadd.f32 1.4214138, %v1011_v61  ;;  %v794_v63 = vor.u32 1.1754944e-38, %v793_v12  ;;  %v978_v36 = vmul.f32 1.0614054, %v2596_v25 }
 0x1e9   : > { %v2600_v11 = vpop.eup %1800  ;;  %v805_v12 = vsel %vm804_vm7, %v2386_v24, %v801_v28  ;;  %vm807_vm9 = vcmp.eq.f32.partialorder %v806_v16, 8.507059e+37  ;;  %v831_v29 = vadd.f32 %v2447_v27, %v830_v15  ;;  %vm833_vm10 = vweird.f32 %v2447_v27 }
 0x1ea   : > { %v889_v37 = vsub.f32 1.0, %v888_v44  ;;  %v1043_v18 = vmul.f32 %v1027_v49, %v2537_v38  ;;  %v1057_v44 = vadd.f32 -0.28449672, %v1041_v53  ;;  %v2604_v61 = vsel %vm792_vm5, %v794_v63, %v790_v41  ;;  %vm2632_vm11 = vmor %vm832_vm2, %vm833_vm10 }
 0x1eb   : > { %v980_v14 = vmul.f32 1.0614054, %v2604_v61  ;;  %v2619_v1 = vmul.f32 %v2600_v11, %v2535_v19  ;;  %v994_v40 = vadd.f32 -1.4531521, %v978_v36  ;;  %v809_v49 = vor.u32 1.1754944e-38, %v808_v56 }
 0x1ec   : > { %v2610_v57 = vmul.f32 %v2557_v60, %v889_v37  ;;  %v1059_v42 = vadd.f32 -0.28449672, %v1043_v18  ;;  %v1073_v22 = vmul.f32 %v1057_v44, %v2510_v20  ;;  %v836_v28 = vand.u32 2147483647, %v2364_v13 }
 0x1ed   : > { %v996_v41 = vadd.f32 -1.4531521, %v980_v14  ;;  %v1010_v63 = vmul.f32 %v994_v40, %v2596_v25  ;;  %v2624_v18 = vsel %vm807_vm9, %v809_v49, %v805_v12  ;;  %v835_v15 = vsel %vm2632_vm11, %v2447_v27, %v831_v29 }
 0x1ee   : > { %v1075_v37 = vmul.f32 %v1059_v42, %v2537_v38  ;;  %v1089_v53 = vadd.f32 0.2548296, %v1073_v22  ;;  %v838_v56 = vand.u32 2147483648, %v2364_v13  ;;  %v981_v42 = vmul.f32 1.0614054, %v2624_v18 }
 0x1ef   : > { %v1012_v36 = vmul.f32 %v996_v41, %v2604_v61  ;;  %v1026_v16 = vadd.f32 1.4214138, %v1010_v63  ;;  %vm837_vm12 = vcmp.eq.f32.partialorder %v836_v28, 8.507059e+37  ;;  %vm847_vm13 = vweird.f32 %v2384_v23 }
 0x1f0   : > { %v1091_v44 = vadd.f32 0.2548296, %v1075_v37  ;;  %v1105_v2 = vmul.f32 %v1089_v53, %v2510_v20  ;;  %v839_v12 = vor.u32 1.1754944e-38, %v838_v56  ;;  %v997_v49 = vadd.f32 -1.4531521, %v981_v42 }
 0x1f1   : > { %v1028_v14 = vadd.f32 1.4214138, %v1012_v36  ;;  %v1042_v40 = vmul.f32 %v1026_v16, %v2596_v25  ;;  %v816_v37 = vadd.f32 %v2397_v9, %v2496_v59  ;;  %vm818_vm14 = vweird.f32 %v2397_v9 }
 0x1f2   : > { %v1107_v20 = vmul.f32 %v1091_v44, %v2537_v38  ;;  %v1185_v22 = vmul.f32 %v2323_v35, %v1105_v2  ;;  %v2651_v35 = vsel %vm837_vm12, %v839_v12, %v835_v15  ;;  %v1013_v2 = vmul.f32 %v997_v49, %v2624_v18  ;;  %vm2659_vm15 = vmor %vm817_vm8, %vm818_vm14 }
 0x1f3   : > { %v1044_v53 = vmul.f32 %v1028_v14, %v2604_v61  ;;  %v1058_v38 = vadd.f32 -0.28449672, %v1042_v40  ;;  %v821_v41 = vand.u32 2147483647, %v2315_v33  ;;  %v983_v44 = vmul.f32 1.0614054, %v2651_v35 }
 0x1f4   : > { %v1187_v27 = vmul.f32 %v2402_v51, %v1107_v20  ;;  %v1201_v13 = vsub.f32 1.0, %v1185_v22  ;;  %v904_v36 = vsub.f32 1.0, %v2619_v1  ;;  %v1029_v28 = vadd.f32 1.4214138, %v1013_v2 }
 0x1f5   : > { %v1060_v59 = vadd.f32 -0.28449672, %v1044_v53  ;;  %v1074_v24 = vmul.f32 %v1058_v38, %v2596_v25  ;;  %v820_v16 = vsel %vm2659_vm15, %v2397_v9, %v816_v37  ;;  %v999_v42 = vadd.f32 -1.4531521, %v983_v44 }
 0x1f6   : > { %v1203_v63 = vsub.f32 1.0, %v1187_v27  ;;  %v1217_v29 = vmul.f32 %v1201_v13, %v2250_v0  ;;  %v1045_v22 = vmul.f32 %v1029_v28, %v2624_v18  ;;  %vm2671_vm1 = vcmp.eq.f32.partialorder %v821_v41, 8.507059e+37 }
 0x1f7   : > { %v1076_v56 = vmul.f32 %v1060_v59, %v2604_v61  ;;  %v1090_v20 = vadd.f32 0.2548296, %v1074_v24  ;;  %v823_v40 = vand.u32 2147483648, %v2315_v33  ;;  %vm862_vm2 = vweird.f32 %v2430_v4 }
 0x1f8   : > { %v1219_v0 = vmul.f32 %v1203_v63, %v2310_v30  ;;  %v1233_v15 = vadd.f32 1.0, %v1217_v29  ;;  %v1015_v9 = vmul.f32 %v999_v42, %v2651_v35  ;;  %v846_v30 = vadd.f32 %v2455_v47, %v2552_v5 }
 0x1f9   : > { %v1092_v49 = vadd.f32 0.2548296, %v1076_v56  ;;  %v1106_v37 = vmul.f32 %v1090_v20, %v2596_v25  ;;  %v1061_v27 = vadd.f32 -0.28449672, %v1045_v22  ;;  %v824_v13 = vor.u32 1.1754944e-38, %v823_v40 }
 0x1fa   : > { %v1235_v12 = vadd.f32 1.0, %v1219_v0  ;;  %vm848_vm3 = vweird.f32 %v2455_v47  ;;  %v1249_v53 = vmul.f32 %v1233_v15, %v2231_v55  ;;  %v1031_v2 = vadd.f32 1.4214138, %v1015_v9 }
 0x1fb   : > { %v1108_v33 = vmul.f32 %v1092_v49, %v2604_v61  ;;  %v1186_v41 = vmul.f32 %v2358_v6, %v1106_v37  ;;  %v1077_v63 = vmul.f32 %v1061_v27, %v2624_v18  ;;  %v2689_v5 = vsel %vm2671_vm1, %v824_v13, %v820_v16  ;;  %vm2693_vm4 = vmor %vm847_vm13, %vm848_vm3 }
 0x1fc   : > { %v1251_v38 = vmul.f32 %v1235_v12, %v2259_v8  ;;  %v851_v55 = vand.u32 2147483647, %v2384_v23  ;;  %v1047_v29 = vmul.f32 %v1031_v2, %v2651_v35  ;;  %v850_v6 = vsel %vm2693_vm4, %v2455_v47, %v846_v30 }
 0x1fd   : > { %v1188_v61 = vmul.f32 %v2422_v58, %v1108_v33  ;;  %v1202_v59 = vsub.f32 1.0, %v1186_v41  ;;  %v1093_v44 = vadd.f32 0.2548296, %v1077_v63  ;;  %v853_v51 = vand.u32 2147483648, %v2384_v23 }
 0x1fe   : > { %v1265_v8 = vpack.c.bf16 %v1251_v38, %v1249_v53  ;;  %v982_v24 = vmul.f32 1.0614054, %v2689_v5  ;;  %v1063_v16 = vadd.f32 -0.28449672, %v1047_v29  ;;  %v861_v0 = vadd.f32 %v2490_v32, %v2560_v3 }
 0x1ff   : > { %v1204_v28 = vsub.f32 1.0, %v1188_v61  ;;  %vm863_vm5 = vweird.f32 %v2490_v32  ;;  %vm892_vm6 = vweird.f32 %v2498_v17  ;;  %v1218_v58 = vmul.f32 %v1202_v59, %v2257_v7 }
 0x200   : > { %1413 = vmatmul.bf16.vlgmr.msra.gmra.mxu2 %v1265_v8  ;;  %v1109_v47 = vmul.f32 %v1093_v44, %v2624_v18  ;;  %v854_v15 = vor.u32 1.1754944e-38, %v853_v51  ;;  %v998_v56 = vadd.f32 -1.4531521, %v982_v24  ;;  %v1079_v42 = vmul.f32 %v1063_v16, %v2651_v35  ;;  %vm2720_vm8 = vmor %vm862_vm2, %vm863_vm5 }
 0x201   : > { %v1220_v23 = vmul.f32 %v1204_v28, %v2313_v31  ;;  %vm852_vm7 = vcmp.eq.f32.partialorder %v851_v55, 8.507059e+37  ;;  %v866_v20 = vand.u32 2147483647, %v2430_v4  ;;  %v1234_v22 = vadd.f32 1.0, %v1218_v58 }
 0x202   : > { %v1189_v3 = vmul.f32 %v2480_v62, %v1109_v47  ;;  %v2715_v14 = vsel %vm852_vm7, %v854_v15, %v850_v6  ;;  %v1014_v40 = vmul.f32 %v998_v56, %v2689_v5  ;;  %v1095_v31 = vadd.f32 0.2548296, %v1079_v42 }
 0x203   : > { %v1236_v18 = vadd.f32 1.0, %v1220_v23  ;;  %v984_v12 = vmul.f32 1.0614054, %v2715_v14  ;;  %v865_v49 = vsel %vm2720_vm8, %v2490_v32, %v861_v0  ;;  %v1250_v62 = vmul.f32 %v1234_v22, %v2239_v52 }
 0x204   : > { %v1205_v9 = vsub.f32 1.0, %v1189_v3  ;;  %v1030_v30 = vadd.f32 1.4214138, %v1014_v40  ;;  %v868_v37 = vand.u32 2147483648, %v2430_v4  ;;  %vm877_vm9 = vweird.f32 %v2450_v45 }
 0x205   : > { %v1252_v27 = vmul.f32 %v1236_v18, %v2292_v21  ;;  %v1111_v13 = vmul.f32 %v1095_v31, %v2651_v35  ;;  %v1000_v53 = vadd.f32 -1.4531521, %v984_v12  ;;  %v891_v38 = vadd.f32 %v2557_v60, %v2610_v57 }
 0x206   : > { %v1221_v33 = vmul.f32 %v1205_v9, %v2407_v54  ;;  %v1046_v32 = vmul.f32 %v1030_v30, %v2689_v5  ;;  %v869_v2 = vor.u32 1.1754944e-38, %v868_v37  ;;  %vm893_vm10 = vweird.f32 %v2557_v60 }
 0x207   : > { %v1266_v52 = vpack.c.bf16 %v1252_v27, %v1250_v62  ;;  %v1191_v4 = vmul.f32 %v2541_v26, %v1111_v13  ;;  %v1016_v41 = vmul.f32 %v1000_v53, %v2715_v14  ;;  %vm867_vm11 = vcmp.eq.f32.partialorder %v866_v20, 8.507059e+37  ;;  %vm2748_vm12 = vmor %vm892_vm6, %vm893_vm10  ;;  %v3072_v13 = vld [vmem:[#allocation22_spill] sm:$0xff]  ;;  %v3073_v53 = vld [vmem:[#allocation21_spill] sm:$0xff] }
 0x208   : > { %v1237_v21 = vadd.f32 1.0, %v1221_v33  ;;  %v1062_v63 = vadd.f32 -0.28449672, %v1046_v32  ;;  %v2740_v35 = vsel %vm867_vm11, %v869_v2, %v865_v49  ;;  %v896_v25 = vand.u32 2147483647, %v2498_v17  ;;  %v3074_v33 = vld [vmem:[#allocation13_spill] sm:$0xff] }
 0x209   : > { %v905_v54 = vmul.f32 %v2600_v11, %v904_v36  ;;  %1442 = vmatmul.bf16.vlgmr.msra.gmra.mxu3 %v1266_v52  ;;  %v1207_v57 = vsub.f32 1.0, %v1191_v4  ;;  %v1032_v55 = vadd.f32 1.4214138, %v1016_v41  ;;  %v898_v8 = vand.u32 2147483648, %v2498_v17 }
 0x20a   : > { %vm907_vm13 = vweird.f32 %v2535_v19  ;;  %v1078_v61 = vmul.f32 %v1062_v63, %v2689_v5  ;;  %v895_v1 = vsel %vm2748_vm12, %v2557_v60, %v891_v38  ;;  %v985_v36 = vmul.f32 1.0614054, %v2740_v35 }
 0x20b   : > { %v876_v29 = vadd.f32 %v2524_v43, %v2594_v10  ;;  %v1223_v6 = vmul.f32 %v1207_v57, %v2462_v50  ;;  %v1048_v59 = vmul.f32 %v1032_v55, %v2715_v14  ;;  %v899_v44 = vor.u32 1.1754944e-38, %v898_v8  ;;  %v3077_v57 = vld [vmem:[#allocation14_spill] sm:$0xff] }
 0x20c   : > { %vm878_vm14 = vweird.f32 %v2524_v43  ;;  %vm664_vm15 = vcmp.ge.f32.partialorder %v2327_v46, 0.0  ;;  %v1253_v17 = vmul.f32 %v1237_v21, %v2342_v39  ;;  %v1094_v51 = vadd.f32 0.2548296, %v1078_v61 }
 0x20d   : > { %vm897_vm1 = vcmp.eq.f32.partialorder %v896_v25, 8.507059e+37  ;;  %v1001_v24 = vadd.f32 -1.4531521, %v985_v36  ;;  %v1239_v60 = vadd.f32 1.0, %v1223_v6  ;;  %v1064_v28 = vadd.f32 -0.28449672, %v1048_v59  ;;  %vm2774_vm2 = vmor %vm877_vm9, %vm878_vm14 }
 0x20e   : > { %v2766_v16 = vsel %vm897_vm1, %v899_v44, %v895_v1  ;;  %v881_v10 = vand.u32 2147483647, %v2450_v45  ;;  %v1110_v50 = vmul.f32 %v1094_v51, %v2689_v5  ;;  %v906_v39 = vadd.f32 %v2600_v11, %v905_v54  ;;  %v3079_v59 = vld [vmem:[#allocation7_spill] sm:$0xff] }
 0x20f   : > { %v987_v0 = vmul.f32 1.0614054, %v2766_v16  ;;  %v1017_v58 = vmul.f32 %v1001_v24, %v2740_v35  ;;  %v1255_v15 = vmul.f32 %v1239_v60, %v2440_v34  ;;  %v1080_v56 = vmul.f32 %v1064_v28, %v2715_v14  ;;  %v3080_v60 = vld [vmem:[#allocation10_spill] sm:$0xff] }
 0x210   : > { %v880_v5 = vsel %vm2774_vm2, %v2524_v43, %v876_v29  ;;  %v883_v23 = vand.u32 2147483648, %v2450_v45  ;;  %v1190_v42 = vmul.f32 %v2500_v48, %v1110_v50  ;;  %vm908_vm3 = vweird.f32 %v2600_v11  ;;  %v3069_v43 = vld [vmem:[#allocation20_spill] sm:$0xff] }
 0x211   : > { %v1003_v20 = vadd.f32 -1.4531521, %v987_v0  ;;  %v1033_v22 = vadd.f32 1.4214138, %v1017_v58  ;;  %v1267_v3 = vpack.c.bf16 %v1255_v15, %v1253_v17  ;;  %v1096_v40 = vadd.f32 0.2548296, %v1080_v56  ;;  %vm2796_vm5 = vmor %vm907_vm13, %vm908_vm3 }
 0x212   : > { %vm882_vm4 = vcmp.eq.f32.partialorder %v881_v10, 8.507059e+37  ;;  %v884_v7 = vor.u32 1.1754944e-38, %v883_v23  ;;  %v1206_v18 = vsub.f32 1.0, %v1190_v42  ;;  %v911_v12 = vand.u32 2147483647, %v2535_v19  ;;  %v3081_v15 = vld [vmem:[#allocation9_spill] sm:$0xff] }
 0x213   : > { %v1019_v34 = vmul.f32 %v1003_v20, %v2766_v16  ;;  %v1049_v31 = vmul.f32 %v1033_v22, %v2740_v35  ;;  %1802 = vpow2.f32 %v3069_v43  ;;  %1418 = vmatmul.bf16.gmra.mxu2 %v1267_v3  ;;  %v1112_v45 = vmul.f32 %v1096_v40, %v2715_v14  ;;  %v3082_v40 = vld [vmem:[#allocation16_spill] sm:$0xff] }
 0x214   : > { %v2792_v48 = vsel %vm882_vm4, %v884_v7, %v880_v5  ;;  %v913_v62 = vand.u32 2147483648, %v2535_v19  ;;  %v910_v37 = vsel %vm2796_vm5, %v2600_v11, %v906_v39  ;;  %v1173_v14 = vmul.f32 1.442695, %v3072_v13  ;;  %v3076_v11 = vld [vmem:[#allocation19_spill] sm:$0xff] }
 0x215   : > { %v1035_v9 = vadd.f32 1.4214138, %v1019_v34  ;;  %v1065_v30 = vadd.f32 -0.28449672, %v1049_v31  ;;  %v986_v27 = vmul.f32 1.0614054, %v2792_v48  ;;  %v1192_v38 = vmul.f32 %v3073_v53, %v1112_v45 }
 0x216   : > { %v1222_v32 = vmul.f32 %v1206_v18, %v3074_v33  ;;  %v914_v2 = vor.u32 1.1754944e-38, %v913_v62  ;;  %vm912_vm6 = vcmp.eq.f32.partialorder %v911_v12, 8.507059e+37  ;;  %v3075_v41 = vmov -1.0  }
 0x217   : > { %v1051_v52 = vmul.f32 %v1035_v9, %v2766_v16  ;;  %v1081_v4 = vmul.f32 %v1065_v30, %v2740_v35  ;;  %v1002_v19 = vadd.f32 -1.4531521, %v986_v27  ;;  %v680_v21 = vsel %vm664_vm15, 1.0, %v3075_v41  ;;  %v3083_v30 = vld [vmem:[#allocation5_spill] sm:$0xff] }
 0x218   : > { %v1132_v63 = vsub.f32 0.0, %v3076_v11  ;;  %v1208_v25 = vsub.f32 1.0, %v1192_v38  ;;  %v2814_v54 = vsel %vm912_vm6, %v914_v2, %v910_v37  ;;  %v3078_v55 = vsub.f32 0.0, %v3077_v57  ;;  %v3085_v2 = vld [vmem:[#allocation8_spill] sm:$0xff] }
 0x219   : > { %v1067_v8 = vadd.f32 -0.28449672, %v1051_v52  ;;  %v1097_v61 = vadd.f32 0.2548296, %v1081_v4  ;;  %v988_v1 = vmul.f32 1.0614054, %v2814_v54  ;;  %v1803_v36 = vpop.eup %1802  ;;  %1804 = vpow2.f32 %v1173_v14 }
 0x21a   : > { %v1146_v26 = vmul.f32 %v3078_v55, %v3077_v57  ;;  %v1224_v29 = vmul.f32 %v1208_v25, %v680_v21  ;;  %v1238_v6 = vadd.f32 1.0, %v1222_v32  ;;  %v1018_v46 = vmul.f32 %v1002_v19, %v2792_v48  ;;  %v3084_v14 = vld [vmem:[#allocation6_spill] sm:$0xff]  ;;  %v3087_v25 = vld [vmem:[#allocation15_spill] sm:$0xff] }
 0x21b   : > { %v632_v44 = vmul.f32 0.5, %v3079_v59  ;;  %v1083_v17 = vmul.f32 %v1067_v8, %v2766_v16  ;;  %v1113_v51 = vmul.f32 %v1097_v61, %v2740_v35  ;;  %v1004_v24 = vadd.f32 -1.4531521, %v988_v1 }
 0x21c   : > { %vm665_vm7 = vcmp.ge.f32.partialorder %v3080_v60, 0.0  ;;  %v1148_v28 = vmul.f32 %v1132_v63, %v3076_v11  ;;  %v1240_v10 = vadd.f32 1.0, %v1224_v29  ;;  %v1034_v50 = vadd.f32 1.4214138, %v1018_v46  ;;  %v3086_v63 = vld [vmem:[#allocation12_spill] sm:$0xff] }
 0x21d   : > { %v1171_v0 = vmul.f32 1.442695, %v1146_v26  ;;  %v1099_v58 = vadd.f32 0.2548296, %v1083_v17  ;;  %v1193_v47 = vmul.f32 %v1803_v36, %v1113_v51  ;;  %v1020_v39 = vmul.f32 %v1004_v24, %v2814_v54  ;;  %v3088_v51 = vld [vmem:[#allocation18_spill] sm:$0xff] }
 0x21e   : > { %v1254_v56 = vmul.f32 %v1238_v6, %v3081_v15  ;;  %v1256_v5 = vmul.f32 %v1240_v10, %v632_v44  ;;  %v1050_v23 = vmul.f32 %v1034_v50, %v2792_v48  ;;  %v681_v42 = vsel %vm665_vm7, 1.0, %v3075_v41 }
 0x21f   : > { %v1115_v35 = vmul.f32 %v1099_v58, %v2766_v16  ;;  %v1209_v20 = vsub.f32 1.0, %v1193_v47  ;;  %v1036_v22 = vadd.f32 1.4214138, %v1020_v39  ;;  %v1805_v3 = vpop.eup %1804  ;;  %vm667_vm8 = vcmp.ge.f32.partialorder %v3082_v40, 0.0 }
 0x220   : > { %v1175_v7 = vmul.f32 1.442695, %v1148_v28  ;;  %v1268_v18 = vpack.c.bf16 %v1256_v5, %v1254_v56  ;;  %v1066_v34 = vadd.f32 -0.28449672, %v1050_v23  ;;  %1806 = vpow2.f32 %v1171_v0 }
 0x221   : > { %v1195_v31 = vmul.f32 %v1805_v3, %v1115_v35  ;;  %v1225_v12 = vmul.f32 %v1209_v20, %v681_v42  ;;  %v1052_v43 = vmul.f32 %v1036_v22, %v2814_v54  ;;  %v683_v27 = vsel %vm667_vm8, 1.0, %v3075_v41  ;;  %v3089_v35 = vld [vmem:[#allocation11_spill] sm:$0xff]  ;;  %v3090_v22 = vld [vmem:[#allocation17_spill] sm:$0xff] }
 0x222   : > { %1447 = vmatmul.bf16.gmra.mxu3 %v1268_v18  ;;  %v1082_v45 = vmul.f32 %v1066_v34, %v2792_v48  ;;  %1808 = vpow2.f32 %v1175_v7  ;;  %v633_v52 = vmul.f32 0.5, %v3085_v2  ;;  %vm666_vm9 = vcmp.ge.f32.partialorder %v3086_v63, 0.0 }
 0x223   : > { %v1211_v9 = vsub.f32 1.0, %v1195_v31  ;;  %v1068_v16 = vadd.f32 -0.28449672, %v1052_v43  ;;  %v1241_v33 = vadd.f32 1.0, %v1225_v12  ;;  %v635_v57 = vmul.f32 0.5, %v3087_v25 }
 0x224   : > { %v1098_v13 = vadd.f32 0.2548296, %v1082_v45  ;;  %v682_v6 = vsel %vm666_vm9, 1.0, %v3075_v41  ;;  %vm668_vm10 = vcmp.ge.f32.partialorder %v3088_v51, 0.0  ;;  %v634_v20 = vmul.f32 0.5, %v3089_v35 }
 0x225   : > { %v1227_v38 = vmul.f32 %v1211_v9, %v683_v27  ;;  %v1084_v32 = vmul.f32 %v1068_v16, %v2814_v54  ;;  %v1257_v1 = vmul.f32 %v1241_v33, %v633_v52  ;;  %v684_v39 = vsel %vm668_vm10, 1.0, %v3075_v41 }
 0x226   : > { %v1114_v4 = vmul.f32 %v1098_v13, %v2792_v48  ;;  %v1807_v11 = vpop.eup %1806  ;;  %v636_v3 = vmul.f32 0.5, %v3090_v22 }
 0x227   : > { %v1243_v55 = vadd.f32 1.0, %v1227_v38  ;;  %v1100_v26 = vadd.f32 0.2548296, %v1084_v32 }
 0x228   : > { %v1194_v8 = vmul.f32 %v1807_v11, %v1114_v4  ;;  %v1809_v29 = vpop.eup %1808 }
 0x229   : > { %v591_v49 = vpop.f32.mrf.mxu0  ;;  %v620_v62 = vpop.f32.mrf.mxu1  ;;  %v1259_v36 = vmul.f32 %v1243_v55, %v635_v57  ;;  %v1116_v48 = vmul.f32 %v1100_v26, %v2814_v54 }
 0x22a   : > { %v2835_v37 = vadd.f32 %v591_v49, %v3083_v30  ;;  %v2839_v53 = vadd.f32 %v620_v62, %v3084_v14  ;;  %v1210_v46 = vsub.f32 1.0, %v1194_v8 }
 0x22b   : > { %v1269_v24 = vpack.c.bf16 %v1259_v36, %v1257_v1  ;;  %v1196_v60 = vmul.f32 %v1809_v29, %v1116_v48 }
 0x22c   : > { %v2845_v19 = vmul.f32 0.70710677, %v2835_v37  ;;  %v2848_v21 = vmul.f32 0.70710677, %v2839_v53  ;;  %v1226_v50 = vmul.f32 %v1210_v46, %v682_v6 }
 0x22d   : > { %1423 = vmatmul.bf16.gmra.mxu2 %v1269_v24  ;;  %v1212_v58 = vsub.f32 1.0, %v1196_v60 }
 0x22e   : > { %v2853_v61 = vand.u32 2147483647, %v2845_v19  ;;  %v2859_v44 = vand.u32 2147483647, %v2848_v21  ;;  %v1242_v5 = vadd.f32 1.0, %v1226_v50 }
 0x22f   : > { %v1228_v56 = vmul.f32 %v1212_v58, %v684_v39 }
 0x230   : > { %v717_v59 = vmul.f32 0.3275911, %v2853_v61  ;;  %v718_v0 = vmul.f32 0.3275911, %v2859_v44  ;;  %v1258_v34 = vmul.f32 %v1242_v5, %v634_v20  ;;  %v1133_v32 = vsub.f32 0.0, %v2853_v61 }
 0x231   : > { %v593_v17 = vpop.f32.mrf.mxu0  ;;  %v622_v10 = vpop.f32.mrf.mxu1  ;;  %v1244_v40 = vadd.f32 1.0, %v1228_v56  ;;  %v1134_v51 = vsub.f32 0.0, %v2859_v44 }
 0x232   : > { %v2863_v28 = vadd.f32 %v593_v17, %v3083_v30  ;;  %v733_v54 = vadd.f32 1.0, %v717_v59  ;;  %v2871_v15 = vadd.f32 %v622_v10, %v3084_v14  ;;  %v2873_v23 = vadd.f32 1.0, %v718_v0 }
 0x233   : > { %v1260_v31 = vmul.f32 %v1244_v40, %v636_v3  ;;  %v1149_v57 = vmul.f32 %v1133_v32, %v2853_v61 }
 0x234   : > { %v2867_v47 = vmul.f32 0.70710677, %v2863_v28  ;;  %1810 = vrcp.f32 %v733_v54  ;;  %v2883_v18 = vmul.f32 0.70710677, %v2871_v15  ;;  %v928_v14 = vand.u32 2147483648, %v733_v54 }
 0x235   : > { %1812 = vrcp.f32 %v2873_v23  ;;  %v1270_v49 = vpack.c.bf16 %v1260_v31, %v1258_v34  ;;  %v926_v33 = vand.u32 2147483647, %v733_v54  ;;  %vm922_vm12 = vweird.f32 %v733_v54 }
 0x236   : > { %v2876_v42 = vand.u32 2147483647, %v2867_v47  ;;  %v2886_v45 = vand.u32 2147483647, %v2883_v18  ;;  %v929_v11 = vor.u32 1.1754944e-38, %v928_v14  ;;  %vm937_vm2 = vweird.f32 %v2873_v23 }
 0x237   : > { %1452 = vmatmul.bf16.gmra.mxu3 %v1270_v49  ;;  %vm927_vm14 = vcmp.eq.f32.partialorder %v926_v33, 8.507059e+37  ;;  %v1177_v17 = vmul.f32 1.442695, %v1149_v57  ;;  %v941_v5 = vand.u32 2147483647, %v2873_v23  ;;  %v943_v35 = vand.u32 2147483648, %v2873_v23 }
 0x238   : > { %v719_v7 = vmul.f32 0.3275911, %v2876_v42  ;;  %v720_v9 = vmul.f32 0.3275911, %v2886_v45  ;;  %v1135_v10 = vsub.f32 0.0, %v2876_v42 }
 0x239   : > { %vm942_vm9 = vcmp.eq.f32.partialorder %v941_v5, 8.507059e+37 }
 0x23a   : > { %v1811_v12 = vpop.eup %1810  ;;  %v735_v43 = vadd.f32 1.0, %v719_v7  ;;  %v2893_v13 = vadd.f32 1.0, %v720_v9  ;;  %v944_v7 = vor.u32 1.1754944e-38, %v943_v35  ;;  %v1151_v49 = vmul.f32 %v1135_v10, %v2876_v42 }
 0x23b   : > { %v918_v62 = vmul.f32 %v1811_v12, %v733_v54  ;;  %v2889_v16 = vpop.eup %1812  ;;  %vm923_vm11 = vweird.f32 %v1811_v12 }
 0x23c   : > { %1814 = vrcp.f32 %v735_v43  ;;  %v933_v27 = vmul.f32 %v2889_v16, %v2873_v23  ;;  %vm924_vm13 = vmor %vm922_vm12, %vm923_vm11  ;;  %v956_v48 = vand.u32 2147483647, %v735_v43  ;;  %v958_v29 = vand.u32 2147483648, %v735_v43 }
 0x23d   : > { %v919_v30 = vsub.f32 1.0, %v918_v62  ;;  %1816 = vrcp.f32 %v2893_v13  ;;  %vm952_vm1 = vweird.f32 %v735_v43  ;;  %vm938_vm5 = vweird.f32 %v2889_v16 }
 0x23e   : > { %v934_v4 = vsub.f32 1.0, %v933_v27  ;;  %vm957_vm4 = vcmp.eq.f32.partialorder %v956_v48, 8.507059e+37  ;;  %v959_v50 = vor.u32 1.1754944e-38, %v958_v29  ;;  %vm939_vm6 = vmor %vm937_vm2, %vm938_vm5  ;;  %vm967_vm8 = vweird.f32 %v2893_v13 }
 0x23f   : > { %v920_v38 = vmul.f32 %v1811_v12, %v919_v30  ;;  %v971_v34 = vand.u32 2147483647, %v2893_v13  ;;  %1818 = vpow2.f32 %v1177_v17  ;;  %vm669_vm12 = vcmp.ge.f32.partialorder %v2845_v19, 0.0 }
 0x240   : > { %v935_v36 = vmul.f32 %v2889_v16, %v934_v4  ;;  %v1181_v4 = vmul.f32 1.442695, %v1151_v49  ;;  %v685_v10 = vsel %vm669_vm12, 1.0, %v3075_v41 }
 0x241   : > { %v921_v2 = vadd.f32 %v1811_v12, %v920_v38  ;;  %vm972_vm11 = vcmp.eq.f32.partialorder %v971_v34, 8.507059e+37 }
 0x242   : > { %v1815_v52 = vpop.eup %1814  ;;  %v936_v39 = vadd.f32 %v2889_v16, %v935_v36  ;;  %1820 = vpow2.f32 %v1181_v4 }
 0x243   : > { %v948_v63 = vmul.f32 %v1815_v52, %v735_v43  ;;  %v925_v25 = vsel %vm924_vm13, %v1811_v12, %v921_v2  ;;  %v1817_v1 = vpop.eup %1816  ;;  %vm953_vm15 = vweird.f32 %v1815_v52  ;;  %v973_v43 = vand.u32 2147483648, %v2893_v13 }
 0x244   : > { %v930_v55 = vsel %vm927_vm14, %v929_v11, %v925_v25  ;;  %v963_v46 = vmul.f32 %v1817_v1, %v2893_v13  ;;  %vm954_vm3 = vmor %vm952_vm1, %vm953_vm15  ;;  %vm968_vm7 = vweird.f32 %v1817_v1  ;;  %v940_v40 = vsel %vm939_vm6, %v2889_v16, %v936_v39 }
 0x245   : > { %v949_v26 = vsub.f32 1.0, %v948_v63  ;;  %v989_v8 = vmul.f32 1.0614054, %v930_v55  ;;  %vm969_vm10 = vmor %vm967_vm8, %vm968_vm7  ;;  %v945_v23 = vsel %vm942_vm9, %v944_v7, %v940_v40  ;;  %v974_v27 = vor.u32 1.1754944e-38, %v973_v43  ;;  %v1819_v25 = vpop.eup %1818 }
 0x246   : > { %v964_v24 = vsub.f32 1.0, %v963_v46  ;;  %v990_v14 = vmul.f32 1.0614054, %v945_v23  ;;  %v1136_v16 = vsub.f32 0.0, %v2886_v45  ;;  %vm671_vm13 = vcmp.ge.f32.partialorder %v2867_v47, 0.0 }
 0x247   : > { %v950_v6 = vmul.f32 %v1815_v52, %v949_v26  ;;  %v1005_v59 = vadd.f32 -1.4531521, %v989_v8  ;;  %vm670_vm14 = vcmp.ge.f32.partialorder %v2848_v21, 0.0  ;;  %v637_v47 = vmul.f32 0.5, %v2835_v37 }
 0x248   : > { %v965_v54 = vmul.f32 %v1817_v1, %v964_v24  ;;  %v1006_v2 = vadd.f32 -1.4531521, %v990_v14  ;;  %v1152_v57 = vmul.f32 %v1136_v16, %v2886_v45  ;;  %v686_v49 = vsel %vm670_vm14, 1.0, %v3075_v41 }
 0x249   : > { %v951_v60 = vadd.f32 %v1815_v52, %v950_v6  ;;  %v1021_v61 = vmul.f32 %v1005_v59, %v930_v55  ;;  %vm672_vm15 = vcmp.ge.f32.partialorder %v2883_v18, 0.0 }
 0x24a   : > { %v966_v3 = vadd.f32 %v1817_v1, %v965_v54  ;;  %v1022_v42 = vmul.f32 %v1006_v2, %v945_v23  ;;  %v1183_v59 = vmul.f32 1.442695, %v1152_v57 }
 0x24b   : > { %v955_v0 = vsel %vm954_vm3, %v1815_v52, %v951_v60  ;;  %v1037_v58 = vadd.f32 1.4214138, %v1021_v61  ;;  %v1150_v52 = vmul.f32 %v1134_v51, %v2859_v44  ;;  %v1821_v61 = vpop.eup %1820 }
 0x24c   : > { %v960_v56 = vsel %vm957_vm4, %v959_v50, %v955_v0  ;;  %v970_v62 = vsel %vm969_vm10, %v1817_v1, %v966_v3  ;;  %v1038_v36 = vadd.f32 1.4214138, %v1022_v42 }
 0x24d   : > { %v991_v20 = vmul.f32 1.0614054, %v960_v56  ;;  %v1053_v22 = vmul.f32 %v1037_v58, %v930_v55  ;;  %v975_v32 = vsel %vm972_vm11, %v974_v27, %v970_v62  ;;  %v1179_v48 = vmul.f32 1.442695, %v1150_v52 }
 0x24e   : > { %v992_v13 = vmul.f32 1.0614054, %v975_v32  ;;  %v1054_v46 = vmul.f32 %v1038_v36, %v945_v23  ;;  %v688_v27 = vsel %vm672_vm15, 1.0, %v3075_v41 }
 0x24f   : > { %v1007_v31 = vadd.f32 -1.4531521, %v991_v20  ;;  %v1069_v12 = vadd.f32 -0.28449672, %v1053_v22  ;;  %1822 = vpow2.f32 %v1179_v48  ;;  %v687_v20 = vsel %vm671_vm13, 1.0, %v3075_v41 }
 0x250   : > { %v1008_v26 = vadd.f32 -1.4531521, %v992_v13  ;;  %1824 = vpow2.f32 %v1183_v59  ;;  %v1743_v41 = vld [vmem:[%s3001_s6] ss:$0 sm:$0xff] }
 0x251   : > { %v1023_v9 = vmul.f32 %v1007_v31, %v960_v56  ;;  %v1085_v30 = vmul.f32 %v1069_v12, %v930_v55  ;;  %v639_v31 = vmul.f32 0.5, %v2863_v28  ;;  %v638_v28 = vmul.f32 0.5, %v2839_v53 }
 0x252   : > { %v1024_v29 = vmul.f32 %v1008_v26, %v975_v32  ;;  %v1827_v26 = vld [vmem:[%s1994_s17 + $0x8] sm:$0xff] }
 0x253   : > { %v1039_v38 = vadd.f32 1.4214138, %v1023_v9  ;;  %v1101_v33 = vadd.f32 0.2548296, %v1085_v30 }
 0x254   : > { %v1040_v17 = vadd.f32 1.4214138, %v1024_v29 }
 0x255   : > { %v1055_v11 = vmul.f32 %v1039_v38, %v960_v56  ;;  %v1117_v63 = vmul.f32 %v1101_v33, %v930_v55  ;;  %v1070_v55 = vadd.f32 -0.28449672, %v1054_v46  ;;  %v1823_v35 = vpop.eup %1822  ;;  %v640_v38 = vmul.f32 0.5, %v2871_v15  ;;  %v1826_v15 = vld [vmem:[%s1994_s17] sm:$0xff]  ;;  %v1828_v46 = vld [vmem:[%s1994_s17 + $0x10] sm:$0xff] }
 0x256   : > { %v1056_v24 = vmul.f32 %v1040_v17, %v975_v32  ;;  %v1825_v34 = vpop.eup %1824 }
 0x257   : > { %v1071_v8 = vadd.f32 -0.28449672, %v1055_v11  ;;  %v1197_v1 = vmul.f32 %v1819_v25, %v1117_v63  ;;  %v1086_v45 = vmul.f32 %v1070_v55, %v945_v23  ;;  %v1829_v55 = vld [vmem:[%s1994_s17 + $0x18] sm:$0xff] }
 0x258   : > { %v1072_v50 = vadd.f32 -0.28449672, %v1056_v24 }
 0x259   : > { %v1087_v6 = vmul.f32 %v1071_v8, %v960_v56  ;;  %v1213_v51 = vsub.f32 1.0, %v1197_v1  ;;  %v1102_v58 = vadd.f32 0.2548296, %v1086_v45 }
 0x25a   : > { %v1088_v39 = vmul.f32 %v1072_v50, %v975_v32 }
 0x25b   : > { %v1103_v44 = vadd.f32 0.2548296, %v1087_v6  ;;  %v1229_v0 = vmul.f32 %v1213_v51, %v685_v10  ;;  %v1118_v19 = vmul.f32 %v1102_v58, %v945_v23 }
 0x25c   : > { %v1104_v22 = vadd.f32 0.2548296, %v1088_v39 }
 0x25d   : > { %v1119_v60 = vmul.f32 %v1103_v44, %v960_v56  ;;  %v1245_v3 = vadd.f32 1.0, %v1229_v0  ;;  %v1198_v40 = vmul.f32 %v1823_v35, %v1118_v19  ;;  %v1831_v19 = vld [vmem:[%s1994_s17 + $0x28] sm:$0xff] }
 0x25e   : > { %v1120_v7 = vmul.f32 %v1104_v22, %v975_v32 }
 0x25f   : > { %v1199_v54 = vmul.f32 %v1821_v61, %v1119_v60  ;;  %v1214_v43 = vsub.f32 1.0, %v1198_v40  ;;  %v1261_v62 = vmul.f32 %v1245_v3, %v637_v47 }
 0x260   : > { %v1200_v23 = vmul.f32 %v1825_v34, %v1120_v7  ;;  %v1832_v7 = vld [vmem:[%s1994_s17 + $0x30] sm:$0xff] }
 0x261   : > { %v1215_v5 = vsub.f32 1.0, %v1199_v54  ;;  %v1230_v30 = vmul.f32 %v1214_v43, %v686_v49  ;;  %v1830_v54 = vld [vmem:[%s1994_s17 + $0x20] sm:$0xff]  ;;  %v1833_v43 = vld [vmem:[%s1994_s17 + $0x38] sm:$0xff] }
 0x262   : > { %v1216_v21 = vsub.f32 1.0, %v1200_v23 }
 0x263   : > { %v1231_v56 = vmul.f32 %v1215_v5, %v687_v20  ;;  %v1246_v37 = vadd.f32 1.0, %v1230_v30 }
 0x264   : > { %v1232_v16 = vmul.f32 %v1216_v21, %v688_v27 }
 0x265   : > { %v1247_v12 = vadd.f32 1.0, %v1231_v56  ;;  %v1262_v18 = vmul.f32 %v1246_v37, %v638_v28 }
 0x266   : > { %v1248_v33 = vadd.f32 1.0, %v1232_v16 }
 0x267   : > { %v1263_v9 = vmul.f32 %v1247_v12, %v639_v31 }
 0x268   : > { %v1264_v32 = vmul.f32 %v1248_v33, %v640_v38 }
 0x269   : > { %v1271_v14 = vpack.c.bf16 %v1263_v9, %v1261_v62 }
 0x26a   : > { %v1272_v2 = vpack.c.bf16 %v1264_v32, %v1262_v18 }
 0x26b   : > { %1428 = vmatmul.bf16.gmra.mxu2 %v1271_v14 }
 0x26c   : > { %1457 = vmatmul.bf16.gmra.mxu3 %v1272_v2 }
 0x283   : > { %v1414_v52 = vpop.f32.mrf.mxu2 }
 0x284   : > { %v1415_v4 = vadd.f32 %v1743_v41, %v1414_v52 }
 0x28b   : > { %v1416_v53 = vpop.f32.mrf.mxu2 }
 0x28c   : > { %v1443_v13 = vpop.f32.mrf.mxu3  ;;  %v1417_v42 = vadd.f32 %v1743_v41, %v1416_v53 }
 0x28d   : > { %v1444_v11 = vadd.f32 %v1443_v13, %v1415_v4 }
 0x28f   : > { %v1463_v63 = vadd.f32 %v1826_v15, %v1444_v11 }
 0x291   : > { %1471 = vst.msk [vmem:[%s2936_s13] sm:$0xff] %vm291_vm0, %v1463_v63 }
 0x294   : > { %v1445_v25 = vpop.f32.mrf.mxu3 }
 0x295   : > { %v1446_v57 = vadd.f32 %v1445_v25, %v1417_v42 }
 0x296   : > { %v1419_v1 = vpop.f32.mrf.mxu2 }
 0x297   : > { %v1464_v8 = vadd.f32 %v1827_v26, %v1446_v57  ;;  %v1420_v36 = vadd.f32 %v1743_v41, %v1419_v1 }
 0x299   : > { %1472 = vst.msk [vmem:[%s2936_s13 + $0x8] sm:$0xff] %vm291_vm0, %v1464_v8 }
 0x29e   : > { %v1421_v6 = vpop.f32.mrf.mxu2 }
 0x29f   : > { %v1422_v17 = vadd.f32 %v1743_v41, %v1421_v6 }
 0x2a5   : > { %v1448_v48 = vpop.f32.mrf.mxu3 }
 0x2a6   : > { %v1449_v29 = vadd.f32 %v1448_v48, %v1420_v36 }
 0x2a8   : > { %v1465_v59 = vadd.f32 %v1828_v46, %v1449_v29 }
 0x2aa   : > { %1473 = vst.msk [vmem:[%s2936_s13 + $0x10] sm:$0xff] %vm291_vm0, %v1465_v59 }
 0x2ad   : > { %v1450_v44 = vpop.f32.mrf.mxu3 }
 0x2ae   : > { %v1451_v51 = vadd.f32 %v1450_v44, %v1422_v17 }
 0x2b0   : > { %v1466_v24 = vadd.f32 %v1829_v55, %v1451_v51  ;;  %v1424_v60 = vpop.f32.mrf.mxu2 }
 0x2b1   : > { %v1425_v45 = vadd.f32 %v1743_v41, %v1424_v60 }
 0x2b2   : > { %1474 = vst.msk [vmem:[%s2936_s13 + $0x18] sm:$0xff] %vm291_vm0, %v1466_v24 }
 0x2b8   : > { %v1426_v50 = vpop.f32.mrf.mxu2 }
 0x2b9   : > { %v1427_v58 = vadd.f32 %v1743_v41, %v1426_v50 }
 0x2ba   : > { %v1453_v61 = vpop.f32.mrf.mxu3 }
 0x2bb   : > { %v1454_v10 = vadd.f32 %v1453_v61, %v1425_v45 }
 0x2bd   : > { %v1467_v0 = vadd.f32 %v1830_v54, %v1454_v10 }
 0x2bf   : > { %1475 = vst.msk [vmem:[%s2936_s13 + $0x20] sm:$0xff] %vm291_vm0, %v1467_v0 }
 0x2c2   : > { %v1455_v39 = vpop.f32.mrf.mxu3 }
 0x2c3   : > { %v1456_v5 = vadd.f32 %v1455_v39, %v1427_v58 }
 0x2c5   : > { %v1468_v35 = vadd.f32 %v1831_v19, %v1456_v5 }
 0x2c7   : > { %1476 = vst.msk [vmem:[%s2936_s13 + $0x28] sm:$0xff] %vm291_vm0, %v1468_v35 }
 0x2ee   : > { %v1429_v20 = vpop.f32.mrf.mxu2 }
 0x2ef   : > { %v1430_v22 = vadd.f32 %v1743_v41, %v1429_v20  ;;  %v1458_v56 = vpop.f32.mrf.mxu3 }
 0x2f1   : > { %v1459_v3 = vadd.f32 %v1458_v56, %v1430_v22 }
 0x2f3   : > { %v1469_v34 = vadd.f32 %v1832_v7, %v1459_v3 }
 0x2f5   : > { %1477 = vst.msk [vmem:[%s2936_s13 + $0x30] sm:$0xff] %vm291_vm0, %v1469_v34 }
 0x2f6   : > { %v1431_v40 = vpop.f32.mrf.mxu2 }
 0x2f7   : > { %v1432_v47 = vadd.f32 %v1743_v41, %v1431_v40  ;;  %v1460_v31 = vpop.f32.mrf.mxu3 }
 0x2f9   : > { %v1461_v12 = vadd.f32 %v1460_v31, %v1432_v47 }
 0x2fb   : > { %v1470_v49 = vadd.f32 %v1833_v43, %v1461_v12 }
 0x2fd   : > { %1478 = vst.msk [vmem:[%s2936_s13 + $0x38] sm:$0xff] %vm291_vm0, %v1470_v49 }
 0x2fe   : > { %1861 = shalt.err (!%p1858_p3)
}
 0x2ff   : > { %s1900_s17 = smov 128   ;;  %s1901_s8 = smov 8  }
 0x300   : > { %1698 = dma.vmem_to_hbm [thread:$0]  (%p1980_p5), %s1493_s19, 1024, %s1495_s20, %s1480_s28, %s1900_s17, %s1900_s17, %s1901_s8  }
 0x301 PF: > { %p1704_p4 = scmp.ge.s32.totalorder %s1896_s27, 2  ;;  %s1509_s13 = sand.u32 1, %s1884_s24  }
 0x302   : > { %s1510_s16 = scalar_lea.sflag [#allocation3], %s1509_s13 }
 0x303   : > { %p1701_p7 = pnand %p1704_p4, %p1984_p6 }
 0x305   : > { %p1702_p8 = pneg %p1701_p7 }
 0x307   : > { %1879 = dma.done.wait (%p1702_p8), %s1510_s16, 1024  }
 0x308   : > { %1881 = vsyncadd (%p1702_p8), %s1510_s16, 4294966272  ;;  %p17_p9 = scmp.ge.s32.totalorder %s1967_s30, 4   ;;  %s3091_s24 = smov %s1888_s25 }
 0x309   : > { %s3092_s25 = smov %s1892_s26  ;;  %s3093_s26 = smov %s1978_s10 }
 0x30a   : > { %s3094_s27 = smov %s1967_s30  ;;  %19 = sbr.rel (!%p17_p9) target bundleno = 3 (0x3), region = 83 }
 0x30f   :  { %1516 = vsyncpa [#allocation3], 1 }
 0x310   :  { %1518 = vsyncpa [#allocation3 + $0x1], 1 }

</bundles_post_ra>
